<compile_context>
chip_gen: v7x
topology: tpu7x:2x2x1
jax: 0.10.0
libtpu: 0.0.40
codegen_flags: <defaults>
</compile_context>

<pallas_src>
import functools

import jax
import jax.numpy as jnp
from jax.experimental import pallas as pl
from jax.experimental.pallas import tpu as pltpu


# --------------------------------------------------------------------------- #
# Kernels
# --------------------------------------------------------------------------- #
def point_feat_kernel(x_ref,
                      w1_ref, t1_ref,
                      w2_ref, t2_ref,
                      w3_ref, t3_ref,
                      g_ref, *, epi_dtype):
    """conv1-3 + (folded) BN + relu + running max-pool over point chunks."""
    c = pl.program_id(1)

    @pl.when(c == 0)
    def _init():
        # relu output is >= 0, so 0 is a valid identity for the running max.
        g_ref[...] = jnp.zeros_like(g_ref)

    tb, chunk, _ = x_ref.shape
    x = x_ref[...].reshape(tb * chunk, 3)                      # bf16 (rows, 3)

    # conv1 + bn1 + relu  (BN scale folded into w1; shift-only epilogue)
    h = jnp.dot(x, w1_ref[...], preferred_element_type=jnp.float32)
    h = jnp.maximum(h.astype(epi_dtype) + t1_ref[...], 0).astype(jnp.bfloat16)
    # conv2 + bn2 + relu
    h = jnp.dot(h, w2_ref[...], preferred_element_type=jnp.float32)
    h = jnp.maximum(h.astype(epi_dtype) + t2_ref[...], 0).astype(jnp.bfloat16)
    # conv3 + bn3 + relu
    h = jnp.dot(h, w3_ref[...], preferred_element_type=jnp.float32)
    h = jnp.maximum(h.astype(epi_dtype) + t3_ref[...], 0)

    # Running global max-pool over points: (rows, 1024) -> (tb, 1024).
    gmax = jnp.max(h.reshape(tb, chunk, h.shape[-1]), axis=1)
    g_ref[...] = jnp.maximum(g_ref[...], gmax.astype(g_ref.dtype))


def fc_kernel(g_ref,
              wf1_ref, tf1_ref,
              wf2_ref, tf2_ref,
              wf3_ref, bf3_ref,
              out_ref, *, epi_dtype):
    """fc1-3 + (folded) BN + relu over the pooled features, whole batch at once."""
    g = g_ref[...]                                             # bf16 (Bp, 1024)
    f = jnp.dot(g, wf1_ref[...], preferred_element_type=jnp.float32)
    f = jnp.maximum(f.astype(epi_dtype) + tf1_ref[...], 0).astype(jnp.bfloat16)
    f = jnp.dot(f, wf2_ref[...], preferred_element_type=jnp.float32)
    f = jnp.maximum(f.astype(epi_dtype) + tf2_ref[...], 0).astype(jnp.bfloat16)
    f = jnp.dot(f, wf3_ref[...], preferred_element_type=jnp.float32)
    out_ref[...] = f + bf3_ref[...]                            # f32 (Bp, 128)


# --------------------------------------------------------------------------- #
# Generation-aware knobs
# --------------------------------------------------------------------------- #
def _default_epilogue_dtype():
    """bf16 epilogues on v6e/v7x (packed-bf16 VALU); f32 on v5x / older."""
    try:
        kind = jax.devices()[0].device_kind.lower()
    except Exception:
        return jnp.bfloat16
    if any(tag in kind for tag in ("v2", "v3", "v4", "v5")):
        return jnp.float32
    return jnp.bfloat16


def _vmem_limit_bytes():
    """~3/4 of physical VMEM (48 MiB on v7x, 96 MiB on v5e/v6e)."""
    try:
        cap = int(pltpu.get_tpu_info().vmem_capacity_bytes)
    except Exception:
        cap = 64 * 1024 * 1024                 # conservative (v7x-sized) fallback
    return min((cap * 3) // 4, 100 * 1024 * 1024)


# --------------------------------------------------------------------------- #
# Wrapper
# --------------------------------------------------------------------------- #
def stn3d_forward(x_ncw, params, *, tb=8, chunk=256, epi_dtype=None):
    """x_ncw: (B, 3, N) float32; params: fused params from init_params."""
    B, C, N = x_ncw.shape
    assert C == 3
    assert tb % 8 == 0 and chunk % 8 == 0
    if epi_dtype is None:
        epi_dtype = _default_epilogue_dtype()

    (w1, t1, w2, t2, w3, t3, wf1, tf1, wf2, tf2, wf3, bf3) = params

    bf16 = lambda a: a.astype(jnp.bfloat16)
    ep = lambda a: a.astype(epi_dtype)
    vmem_limit = _vmem_limit_bytes()

    # --- pad batch to a multiple of tb, points to a multiple of chunk --------
    nblk = pl.cdiv(B, tb)
    Bp = nblk * tb
    chunk = min(chunk, ((N + 7) // 8) * 8)
    nchunk = pl.cdiv(N, chunk)
    Np = nchunk * chunk

    # NCW -> (B, N, 3) bf16 activations.
    x = jnp.transpose(x_ncw, (0, 2, 1)).astype(jnp.bfloat16)
    if Np != N:
        # Edge-replicate points: duplicates cannot change the max-pool result.
        x = jnp.pad(x, ((0, 0), (0, Np - N), (0, 0)), mode="edge")
    if Bp != B:
        x = jnp.pad(x, ((0, Bp - B), (0, 0), (0, 0)))

    # --- kernel 1: point features + global max-pool --------------------------
    kconv = (bf16(w1), ep(t1), bf16(w2), ep(t2), bf16(w3), ep(t3))

    def wspec(a):
        nd = a.ndim
        # Constant-index resident weights; single-buffer to save VMEM.
        return pl.BlockSpec(a.shape, lambda b, c, _nd=nd: (0,) * _nd,
                            pipeline_mode=pl.Buffered(1))

    g = pl.pallas_call(
        functools.partial(point_feat_kernel, epi_dtype=epi_dtype),
        out_shape=jax.ShapeDtypeStruct((Bp, 1024), jnp.bfloat16),
        grid=(nblk, nchunk),
        in_specs=[pl.BlockSpec((tb, chunk, 3), lambda b, c: (b, c, 0))]
                 + [wspec(a) for a in kconv],
        out_specs=pl.BlockSpec((tb, 1024), lambda b, c: (b, 0)),
        compiler_params=pltpu.CompilerParams(
            dimension_semantics=("parallel", "arbitrary"),
            vmem_limit_bytes=vmem_limit),
    )(x, *kconv)

    # --- kernel 2: fc stack over the whole (padded) batch at once ------------
    # fc3 zero-padded to 128 output lanes -> unmasked full-lane store.
    wf3p = jnp.pad(wf3, ((0, 0), (0, 128 - wf3.shape[1])))
    bf3p = jnp.pad(bf3, ((0, 0), (0, 128 - bf3.shape[1]))).astype(jnp.float32)
    kfc = (bf16(wf1), ep(tf1), bf16(wf2), ep(tf2), bf16(wf3p), bf3p)

    out = pl.pallas_call(
        functools.partial(fc_kernel, epi_dtype=epi_dtype),
        out_shape=jax.ShapeDtypeStruct((Bp, 128), jnp.float32),
        grid=(1,),
        in_specs=[pl.BlockSpec(g.shape, lambda i: (0, 0))]
                 + [pl.BlockSpec(a.shape, lambda i: (0, 0)) for a in kfc],
        out_specs=pl.BlockSpec((Bp, 128), lambda i: (0, 0)),
        compiler_params=pltpu.CompilerParams(vmem_limit_bytes=vmem_limit),
    )(g, *kfc)

    out = out[:B, :9].reshape(B, 3, 3)
    return out + jnp.eye(3, dtype=out.dtype)[None]


# --------------------------------------------------------------------------- #
# Parameters (BN scale folded into weights, bias+BN folded into shifts)
# --------------------------------------------------------------------------- #
def _fuse(w, bias, gamma, beta, mean, var, eps=1e-5):
    """Fold conv/fc bias + BatchNorm (eval mode) into (scaled weight, shift)."""
    scale = gamma / jnp.sqrt(var + eps)          # (1, C)
    w_fused = w * scale                          # scale folded into the matmul
    shift = (bias - mean) * scale + beta         # (1, C)
    return w_fused, shift


def init_params(key):
    keys = jax.random.split(key, 16)

    def linear(k, cin, cout):
        kw, kb = jax.random.split(k)
        bound = 1.0 / jnp.sqrt(cin)
        w = jax.random.uniform(kw, (cin, cout), jnp.float32, -bound, bound)
        b = jax.random.uniform(kb, (1, cout), jnp.float32, -bound, bound)
        return w, b

    def bn(k, c):
        kg, kb, km, kv = jax.random.split(k, 4)
        gamma = 1.0 + 0.1 * jax.random.normal(kg, (1, c), jnp.float32)
        beta = 0.1 * jax.random.normal(kb, (1, c), jnp.float32)
        mean = 0.1 * jax.random.normal(km, (1, c), jnp.float32)
        var = jnp.abs(jax.random.normal(kv, (1, c), jnp.float32)) + 0.5
        return gamma, beta, mean, var

    # conv1/2/3 (kernel size 1) stored as (Cin, Cout)
    w1, b1 = linear(keys[0], 3, 64)
    w2, b2 = linear(keys[1], 64, 128)
    w3, b3 = linear(keys[2], 128, 1024)
    wf1, bf1 = linear(keys[3], 1024, 512)
    wf2, bf2 = linear(keys[4], 512, 256)
    wf3, bf3 = linear(keys[5], 256, 9)

    w1, t1 = _fuse(w1, b1, *bn(keys[6], 64))
    w2, t2 = _fuse(w2, b2, *bn(keys[7], 128))
    w3, t3 = _fuse(w3, b3, *bn(keys[8], 1024))
    wf1, tf1 = _fuse(wf1, bf1, *bn(keys[9], 512))
    wf2, tf2 = _fuse(wf2, bf2, *bn(keys[10], 256))

    return (w1, t1, w2, t2, w3, t3, wf1, tf1, wf2, tf2, wf3, bf3)


# --------------------------------------------------------------------------- #
# Pure-JAX reference mirroring the kernel's bf16-weight / f32-accum math
# --------------------------------------------------------------------------- #
def reference_forward(x_ncw, params, epi_dtype=jnp.bfloat16):
    (w1, t1, w2, t2, w3, t3, wf1, tf1, wf2, tf2, wf3, bf3) = params

    def mm(a, w):
        return jnp.dot(a.astype(jnp.bfloat16), w.astype(jnp.bfloat16),
                       preferred_element_type=jnp.float32)

    def epi(h, t):
        return jnp.maximum(h.astype(epi_dtype) + t.astype(epi_dtype), 0)

    x = jnp.transpose(x_ncw, (0, 2, 1))                  # (B, N, 3)
    h = epi(mm(x, w1), t1)
    h = epi(mm(h, w2), t2)
    h = epi(mm(h, w3), t3)
    g = jnp.max(h, axis=1).astype(jnp.bfloat16)          # (B, 1024)
    f = epi(mm(g, wf1), tf1)
    f = epi(mm(f, wf2), tf2)
    f = mm(f, wf3) + bf3
    f = f.reshape(-1, 3, 3)
    return f + jnp.eye(3, dtype=f.dtype)[None]


if __name__ == "__main__":
    key = jax.random.PRNGKey(0)
    kx, kp = jax.random.split(key)

    # tb=8 -> 2 batch blocks (work for both v7x TCs); chunk=128 -> 2 point
    # chunks (exercises the running-max path and edge point padding, N=192).
    B, N = 16, 192
    x = jax.random.normal(kx, (B, 3, N), jnp.float32)    # PyTorch NCW input
    params = init_params(kp)

    out = stn3d_forward(x, params, tb=8, chunk=128)
    out = jax.block_until_ready(out)
    assert out.shape == (B, 3, 3)

    epi = _default_epilogue_dtype()
    ref = reference_forward(x, params, epi_dtype=epi)
    max_err = float(jnp.max(jnp.abs(out - ref)))
    assert jnp.allclose(out, ref, rtol=2e-2, atol=2e-2), (
        f"mismatch vs reference, max_err={max_err}")

    print("KERNEL_OK")
</pallas_src>

<mosaic_0001>
module attributes {stable_mosaic.version = 11 : i64} {
  func.func @point_feat_kernel(%arg0: i32, %arg1: i32, %arg2: memref<8x128x3xbf16, #tpu.memory_space<vmem>>, %arg3: memref<3x64xbf16, #tpu.memory_space<vmem>>, %arg4: memref<1x64xbf16, #tpu.memory_space<vmem>>, %arg5: memref<64x128xbf16, #tpu.memory_space<vmem>>, %arg6: memref<1x128xbf16, #tpu.memory_space<vmem>>, %arg7: memref<128x1024xbf16, #tpu.memory_space<vmem>>, %arg8: memref<1x1024xbf16, #tpu.memory_space<vmem>>, %arg9: memref<8x1024xbf16, #tpu.memory_space<vmem>>) attributes {dimension_semantics = [#tpu.dimension_semantics<parallel>, #tpu.dimension_semantics<arbitrary>], iteration_bounds = array<i64: 2, 2>, scalar_prefetch = 0 : i64, scratch_operands = 0 : i64, tpu.core_type = #tpu.core_type<tc>, window_params = [{transform_indices = @transform_0, window_bounds = array<i64: 8, 128, 3>}, {pipeline_mode = #tpu.pipeline_mode<synchronous>, transform_indices = @transform_1, window_bounds = array<i64: 3, 64>}, {pipeline_mode = #tpu.pipeline_mode<synchronous>, transform_indices = @transform_2, window_bounds = array<i64: 1, 64>}, {pipeline_mode = #tpu.pipeline_mode<synchronous>, transform_indices = @transform_3, window_bounds = array<i64: 64, 128>}, {pipeline_mode = #tpu.pipeline_mode<synchronous>, transform_indices = @transform_4, window_bounds = array<i64: 1, 128>}, {pipeline_mode = #tpu.pipeline_mode<synchronous>, transform_indices = @transform_5, window_bounds = array<i64: 128, 1024>}, {pipeline_mode = #tpu.pipeline_mode<synchronous>, transform_indices = @transform_6, window_bounds = array<i64: 1, 1024>}, {transform_indices = @transform_7, window_bounds = array<i64: 8, 1024>}]} {
    %c0_i32 = arith.constant 0 : i32
    %0 = arith.cmpi eq, %arg1, %c0_i32 : i32
    %1 = arith.extui %0 : i1 to i32
    %c0_i32_0 = arith.constant 0 : i32
    %2 = arith.cmpi ne, %1, %c0_i32_0 : i32
    scf.if %2 {
      %cst_25 = arith.constant 0.000000e+00 : bf16
      %34 = vector.broadcast %cst_25 : bf16 to vector<8x1024xbf16>
      %c0_26 = arith.constant 0 : index
      %c0_27 = arith.constant 0 : index
      %35 = vector.load %arg9[%c0_26, %c0_27] : memref<8x1024xbf16, #tpu.memory_space<vmem>>, vector<8x1024xbf16>
      tpu.vector_store %arg9[%c0_26, %c0_27], %34 {strides = array<i32>} : memref<8x1024xbf16, #tpu.memory_space<vmem>>, vector<8x1024xbf16>,
    } else {
    }
    %c0 = arith.constant 0 : index
    %c0_1 = arith.constant 0 : index
    %c0_2 = arith.constant 0 : index
    %3 = vector.load %arg2[%c0, %c0_1, %c0_2] : memref<8x128x3xbf16, #tpu.memory_space<vmem>>, vector<8x128x3xbf16>
    %4 = vector.shape_cast %3 : vector<8x128x3xbf16> to vector<1024x3xbf16>
    %c0_3 = arith.constant 0 : index
    %c0_4 = arith.constant 0 : index
    %5 = vector.load %arg3[%c0_3, %c0_4] : memref<3x64xbf16, #tpu.memory_space<vmem>>, vector<3x64xbf16>
    %cst = arith.constant dense<0.000000e+00> : vector<1024x64xf32>
    %6 = tpu.matmul %4, %5, %cst {dimension_numbers = #tpu.dot_dimension_numbers<[1], [0], [0], [1], [0, 0, 1, 1], [], []>} : vector<1024x3xbf16>, vector<3x64xbf16>, vector<1024x64xf32> -> vector<1024x64xf32>
    %7 = arith.truncf %6 : vector<1024x64xf32> to vector<1024x64xbf16>
    %c0_5 = arith.constant 0 : index
    %c0_6 = arith.constant 0 : index
    %8 = vector.load %arg4[%c0_5, %c0_6] : memref<1x64xbf16, #tpu.memory_space<vmem>>, vector<1x64xbf16>
    %9 = vector.broadcast %8 : vector<1x64xbf16> to vector<1024x64xbf16>
    %10 = arith.addf %7, %9 : vector<1024x64xbf16>
    %cst_7 = arith.constant 0.000000e+00 : bf16
    %11 = vector.broadcast %cst_7 : bf16 to vector<1024x64xbf16>
    %12 = arith.maximumf %10, %11 : vector<1024x64xbf16>
    %c0_8 = arith.constant 0 : index
    %c0_9 = arith.constant 0 : index
    %13 = vector.load %arg5[%c0_8, %c0_9] : memref<64x128xbf16, #tpu.memory_space<vmem>>, vector<64x128xbf16>
    %cst_10 = arith.constant dense<0.000000e+00> : vector<1024x128xf32>
    %14 = tpu.matmul %12, %13, %cst_10 {dimension_numbers = #tpu.dot_dimension_numbers<[1], [0], [0], [1], [0, 0, 1, 1], [], []>} : vector<1024x64xbf16>, vector<64x128xbf16>, vector<1024x128xf32> -> vector<1024x128xf32>
    %15 = arith.truncf %14 : vector<1024x128xf32> to vector<1024x128xbf16>
    %c0_11 = arith.constant 0 : index
    %c0_12 = arith.constant 0 : index
    %16 = vector.load %arg6[%c0_11, %c0_12] : memref<1x128xbf16, #tpu.memory_space<vmem>>, vector<1x128xbf16>
    %17 = vector.broadcast %16 : vector<1x128xbf16> to vector<1024x128xbf16>
    %18 = arith.addf %15, %17 : vector<1024x128xbf16>
    %cst_13 = arith.constant 0.000000e+00 : bf16
    %19 = vector.broadcast %cst_13 : bf16 to vector<1024x128xbf16>
    %20 = arith.maximumf %18, %19 : vector<1024x128xbf16>
    %c0_14 = arith.constant 0 : index
    %c0_15 = arith.constant 0 : index
    %21 = vector.load %arg7[%c0_14, %c0_15] : memref<128x1024xbf16, #tpu.memory_space<vmem>>, vector<128x1024xbf16>
    %cst_16 = arith.constant dense<0.000000e+00> : vector<1024x1024xf32>
    %22 = tpu.matmul %20, %21, %cst_16 {dimension_numbers = #tpu.dot_dimension_numbers<[1], [0], [0], [1], [0, 0, 1, 1], [], []>} : vector<1024x128xbf16>, vector<128x1024xbf16>, vector<1024x1024xf32> -> vector<1024x1024xf32>
    %23 = arith.truncf %22 : vector<1024x1024xf32> to vector<1024x1024xbf16>
    %c0_17 = arith.constant 0 : index
    %c0_18 = arith.constant 0 : index
    %24 = vector.load %arg8[%c0_17, %c0_18] : memref<1x1024xbf16, #tpu.memory_space<vmem>>, vector<1x1024xbf16>
    %25 = vector.broadcast %24 : vector<1x1024xbf16> to vector<1024x1024xbf16>
    %26 = arith.addf %23, %25 : vector<1024x1024xbf16>
    %cst_19 = arith.constant 0.000000e+00 : bf16
    %27 = vector.broadcast %cst_19 : bf16 to vector<1024x1024xbf16>
    %28 = arith.maximumf %26, %27 : vector<1024x1024xbf16>
    %29 = vector.shape_cast %28 : vector<1024x1024xbf16> to vector<8x128x1024xbf16>
    %cst_20 = arith.constant dense<0xFF80> : vector<8x1024xbf16>
    %30 = vector.multi_reduction <maximumf>, %29, %cst_20 [1] : vector<8x128x1024xbf16> to vector<8x1024xbf16>
    %c0_21 = arith.constant 0 : index
    %c0_22 = arith.constant 0 : index
    %31 = vector.load %arg9[%c0_21, %c0_22] : memref<8x1024xbf16, #tpu.memory_space<vmem>>, vector<8x1024xbf16>
    %32 = arith.maximumf %31, %30 : vector<8x1024xbf16>
    %c0_23 = arith.constant 0 : index
    %c0_24 = arith.constant 0 : index
    %33 = vector.load %arg9[%c0_23, %c0_24] : memref<8x1024xbf16, #tpu.memory_space<vmem>>, vector<8x1024xbf16>
    tpu.vector_store %arg9[%c0_23, %c0_24], %32 {strides = array<i32>} : memref<8x1024xbf16, #tpu.memory_space<vmem>>, vector<8x1024xbf16>,
    return
  }
  func.func @transform_0(%arg0: i32, %arg1: i32) -> (i32, i32, i32) {
    %c0_i32 = arith.constant 0 : i32
    %c0_i32_0 = arith.constant 0 : i32
    return %arg0, %arg1, %c0_i32 : i32, i32, i32
  }
  func.func @transform_1(%arg0: i32, %arg1: i32) -> (i32, i32) {
    %c0_i32 = arith.constant 0 : i32
    %c0_i32_0 = arith.constant 0 : i32
    %c0_i32_1 = arith.constant 0 : i32
    return %c0_i32, %c0_i32_0 : i32, i32
  }
  func.func @transform_2(%arg0: i32, %arg1: i32) -> (i32, i32) {
    %c0_i32 = arith.constant 0 : i32
    %c0_i32_0 = arith.constant 0 : i32
    %c0_i32_1 = arith.constant 0 : i32
    return %c0_i32, %c0_i32_0 : i32, i32
  }
  func.func @transform_3(%arg0: i32, %arg1: i32) -> (i32, i32) {
    %c0_i32 = arith.constant 0 : i32
    %c0_i32_0 = arith.constant 0 : i32
    %c0_i32_1 = arith.constant 0 : i32
    return %c0_i32, %c0_i32_0 : i32, i32
  }
  func.func @transform_4(%arg0: i32, %arg1: i32) -> (i32, i32) {
    %c0_i32 = arith.constant 0 : i32
    %c0_i32_0 = arith.constant 0 : i32
    %c0_i32_1 = arith.constant 0 : i32
    return %c0_i32, %c0_i32_0 : i32, i32
  }
  func.func @transform_5(%arg0: i32, %arg1: i32) -> (i32, i32) {
    %c0_i32 = arith.constant 0 : i32
    %c0_i32_0 = arith.constant 0 : i32
    %c0_i32_1 = arith.constant 0 : i32
    return %c0_i32, %c0_i32_0 : i32, i32
  }
  func.func @transform_6(%arg0: i32, %arg1: i32) -> (i32, i32) {
    %c0_i32 = arith.constant 0 : i32
    %c0_i32_0 = arith.constant 0 : i32
    %c0_i32_1 = arith.constant 0 : i32
    return %c0_i32, %c0_i32_0 : i32, i32
  }
  func.func @transform_7(%arg0: i32, %arg1: i32) -> (i32, i32) {
    %c0_i32 = arith.constant 0 : i32
    %c0_i32_0 = arith.constant 0 : i32
    return %arg0, %c0_i32 : i32, i32
  }
}

</mosaic_0001>

<bundles_post_ra>
// kernel: tpu_custom_call.1
= control target key start
LH: loop header
LB: loop body
LE: loop exit
PB: predicated region body
PF: predicated region fallthrough
CT: control target
= control target key end

     0   :  { %12 = vsyncpa [#allocation4], 0  ;;  %s14270_s0 = inlined_call_operand.vmem [shape: bf16[16,256,3], index: 0, kind: input, shape index: {}]   ;;  %s14271_s1 = inlined_call_operand.vmem [shape: bf16[3,64], index: 1, kind: input, shape index: {}]   ;;  %s14272_s2 = inlined_call_operand.vmem [shape: bf16[1,64], index: 2, kind: input, shape index: {}]   ;;  %s14273_s3 = inlined_call_operand.vmem [shape: bf16[64,128], index: 3, kind: input, shape index: {}]   ;;  %s14274_s4 = inlined_call_operand.vmem [shape: bf16[1,128], index: 4, kind: input, shape index: {}]   ;;  %s14275_s5 = inlined_call_operand.vmem [shape: bf16[128,1024], index: 5, kind: input, shape index: {}]   ;;  %s14276_s6 = inlined_call_operand.vmem [shape: bf16[1,1024], index: 6, kind: input, shape index: {}]   ;;  %s14277_s7 = inlined_call_operand.hbm [shape: bf16[16,1024], index: 7, kind: output, shape index: {}]  }
   0x1   :  { %14 = vsyncpa [#allocation4 + $0x1], 0  ;;  %s10457_s24 = smov 0   ;;  %s10459_s25 = smov 0  }
   0x2   :  { %s10461_s26 = smov 0   ;;  %s10463_s27 = smov 0  }
   0x3   :  { %s10465_s28 = smov 0   ;;  %s10467_s29 = smov 0  }
   0x4   :  { %s10469_s30 = smov 0   ;;  %s10471_s8 = smov 0  }
   0x5   :  { %s10473_s9 = smov 0   ;;  %s10475_s10 = smov 0  }
   0x6 LB: > { %s9427_s11 = sadd.s32 4294967295, %s10410_s10   ;;  %s9428_s12 = sadd.s32 4294967294, %s10410_s10   ;;  %s10410_s10 = sphi %s10475_s10, %s20_s10   ;;  %s10406_s9 = sphi %s10473_s9, %s14621_s9   ;;  %s10402_s8 = sphi %s10471_s8, %s14620_s8   ;;  %s10398_s30 = sphi %s10469_s30, %s14619_s30   ;;  %s10394_s29 = sphi %s10467_s29, %s14618_s29   ;;  %s10390_s28 = sphi %s10465_s28, %s14617_s28   ;;  %s10386_s27 = sphi %s10463_s27, %s14616_s27   ;;  %s10382_s26 = sphi %s10461_s26, %s14615_s26   ;;  %s10378_s25 = sphi %s10459_s25, %s14614_s25   ;;  %s10374_s24 = sphi %s10457_s24, %s14613_s24  }
   0x7   : > { %s29_s13 = sadd.s32 1, %s10402_s8  ;;  %s32_s14 = sadd.s32 1, %s10406_s9 }
   0x8   : > { %p30_p0 = scmp.ge.s32.totalorder %s29_s13, 2  ;;  %s41_s15 = sadd.s32 1, %s10390_s28 }
   0x9   : > { %p48_p1 = scmp.ne.s32.totalorder %s10390_s28, %s10386_s27  ;;  %p49_p2 = scmp.eq.s32.totalorder %s10410_s10, 0 }
   0xa   : > { %s14623_s13 = smov (%p30_p0, %s29_s13), 0  ;;  %s14625_s14 = smov (!%p30_p0, %s32_s14), %s10406_s9 }
   0xb   : > { %14405 = sst [smem:[#allocation6_spill]] %s14623_s13  ;;  %s37_s16 = ssub.s32 %s10402_s8, %s14623_s13 }
   0xc   : > { %p10520_p3 = por %p49_p2, %p48_p1  ;;  %p34_p4 = scmp.ge.s32.totalorder %s14625_s14, 2 }
   0xd   : > { %s193_s18 = sadd.s32 1, %s10382_s26  ;;  %p203_p5 = scmp.ne.s32.totalorder %s10382_s26, %s10378_s25 }
   0xe   : > { %p204_p6 = scmp.eq.s32.totalorder %s9427_s11, 3  ;;  %s14627_s14 = smov (%p34_p4, %s14625_s14), 0 }
   0xf   : > { %14407 = sst [smem:[#allocation7_spill]] %s14627_s14  ;;  %p209_p8 = scmp.ne.s32.totalorder %s10378_s25, %s10374_s24 }
  0x10   : > { %p10529_p7 = por %p204_p6, %p203_p5  ;;  %s36_s20 = ssub.s32 %s10406_s9, %s14627_s14 }
  0x11   : > { %p210_p9 = scmp.eq.s32.totalorder %s9428_s12, 3  ;;  %s38_s21 = sor.u32 %s37_s16, %s36_s20 }
  0x12   : > { %p191_p10 = scmp.eq.s32.totalorder %s36_s20, 0  ;;  %p39_p11 = scmp.eq.s32.totalorder %s38_s21, 0 }
  0x13   : > { %p10537_p12 = por %p210_p9, %p209_p8  ;;  %p9430_p13 = scmp.ge.s32.totalorder %s10410_s10, 4 }
  0x14   : > { %s10542_s23 = scalar_select %p191_p10, %s10382_s26, %s193_s18  }
  0x15   : > { %s14409_s22 = scalar_select %p10537_p12, 1, 0 }
  0x16   : > { %s10545_s11 = scalar_select %p39_p11, %s10390_s28, %s41_s15  }
  0x17   : > { %14410 = sst [smem:[#allocation8_spill]] %s14409_s22  ;;  %244 = sbr.rel (%p9430_p13) target bundleno = 69 (0x45), region = 40 }
  0x1e   : > { %247 = sbr.rel (!%p10520_p3) target bundleno = 69 (0x45), region = 44  ;;  %s249_s12 = sand.u32 (%p10520_p3), 1, %s10390_s28  }
  0x1f   : > { %s9433_s16 = sshll.u32 (%p10520_p3), %s10402_s8, 4  ;;  %s9431_s20 = sshll.u32 (%p10520_p3), %s249_s12, 9 }
  0x20   : > { %s9737_s21 = sshll.u32 (%p10520_p3), %s10406_s9, 8  ;;  %s10561_s17 = scalar_lea.vmem (%p10520_p3), [#allocation2], %s9431_s20 }
  0x21   : > { %s255_s14 = sadd.s32 (%p10520_p3), %s9737_s21, %s9433_s16 }
  0x22   : > { %s9435_s13 = sshll.u32 (%p10520_p3), %s255_s14, 2 }
  0x23   : > { %s10556_s15 = scalar_lea.vmem (%p10520_p3), %s14270_s0, %s9435_s13 }
  0x24   : > { %v273_v0 = vld [vmem:[%s10556_s15] sm:$0xff] (%p10520_p3)   ;;  %v277_v1 = vld [vmem:[%s10556_s15 + $0x8] sm:$0xff] (%p10520_p3)   ;;  %v281_v2 = vld [vmem:[%s10556_s15 + $0x10] sm:$0xff] (%p10520_p3)  }
  0x25   : > { %274 = vst [vmem:[%s10561_s17] sm:$0xff] %v273_v0   ;;  %278 = vst [vmem:[%s10561_s17 + $0x8] sm:$0xff] %v277_v1   ;;  %v285_v3 = vld [vmem:[%s10556_s15 + $0x18] sm:$0xff]   ;;  %v289_v4 = vld [vmem:[%s10556_s15 + $0x20] sm:$0xff]  }
  0x26   : > { %282 = vst [vmem:[%s10561_s17 + $0x10] sm:$0xff] %v281_v2   ;;  %v293_v5 = vld [vmem:[%s10556_s15 + $0x28] sm:$0xff]   ;;  %286 = vst [vmem:[%s10561_s17 + $0x18] sm:$0xff] %v285_v3   ;;  %v297_v6 = vld [vmem:[%s10556_s15 + $0x30] sm:$0xff]  }
  0x27   : > { %290 = vst [vmem:[%s10561_s17 + $0x20] sm:$0xff] %v289_v4   ;;  %294 = vst [vmem:[%s10561_s17 + $0x28] sm:$0xff] %v293_v5   ;;  %v301_v7 = vld [vmem:[%s10556_s15 + $0x38] sm:$0xff]   ;;  %v305_v8 = vld [vmem:[%s10556_s15 + $0x80] sm:$0xff]  }
  0x28   : > { %298 = vst [vmem:[%s10561_s17 + $0x30] sm:$0xff] %v297_v6   ;;  %302 = vst [vmem:[%s10561_s17 + $0x38] sm:$0xff] %v301_v7   ;;  %v309_v9 = vld [vmem:[%s10556_s15 + $0x88] sm:$0xff]   ;;  %v313_v10 = vld [vmem:[%s10556_s15 + $0x90] sm:$0xff]  }
  0x29   : > { %306 = vst [vmem:[%s10561_s17 + $0x40] sm:$0xff] %v305_v8   ;;  %v317_v11 = vld [vmem:[%s10556_s15 + $0x98] sm:$0xff]   ;;  %310 = vst [vmem:[%s10561_s17 + $0x48] sm:$0xff] %v309_v9   ;;  %v321_v12 = vld [vmem:[%s10556_s15 + $0xa0] sm:$0xff]  }
  0x2a   : > { %314 = vst [vmem:[%s10561_s17 + $0x50] sm:$0xff] %v313_v10   ;;  %318 = vst [vmem:[%s10561_s17 + $0x58] sm:$0xff] %v317_v11   ;;  %v325_v13 = vld [vmem:[%s10556_s15 + $0xa8] sm:$0xff]   ;;  %v329_v14 = vld [vmem:[%s10556_s15 + $0xb0] sm:$0xff]  }
  0x2b   : > { %322 = vst [vmem:[%s10561_s17 + $0x60] sm:$0xff] %v321_v12   ;;  %326 = vst [vmem:[%s10561_s17 + $0x68] sm:$0xff] %v325_v13   ;;  %v333_v15 = vld [vmem:[%s10556_s15 + $0xb8] sm:$0xff]   ;;  %v337_v16 = vld [vmem:[%s10556_s15 + $0x100] sm:$0xff]  }
  0x2c   : > { %330 = vst [vmem:[%s10561_s17 + $0x70] sm:$0xff] %v329_v14   ;;  %v341_v17 = vld [vmem:[%s10556_s15 + $0x108] sm:$0xff]   ;;  %334 = vst [vmem:[%s10561_s17 + $0x78] sm:$0xff] %v333_v15   ;;  %v345_v18 = vld [vmem:[%s10556_s15 + $0x110] sm:$0xff]  }
  0x2d   : > { %338 = vst [vmem:[%s10561_s17 + $0x80] sm:$0xff] %v337_v16   ;;  %342 = vst [vmem:[%s10561_s17 + $0x88] sm:$0xff] %v341_v17   ;;  %v349_v19 = vld [vmem:[%s10556_s15 + $0x118] sm:$0xff]   ;;  %v353_v20 = vld [vmem:[%s10556_s15 + $0x120] sm:$0xff]  }
  0x2e   : > { %346 = vst [vmem:[%s10561_s17 + $0x90] sm:$0xff] %v345_v18   ;;  %350 = vst [vmem:[%s10561_s17 + $0x98] sm:$0xff] %v349_v19   ;;  %v357_v21 = vld [vmem:[%s10556_s15 + $0x128] sm:$0xff]   ;;  %v361_v22 = vld [vmem:[%s10556_s15 + $0x130] sm:$0xff]  }
  0x2f   : > { %354 = vst [vmem:[%s10561_s17 + $0xa0] sm:$0xff] %v353_v20   ;;  %v365_v23 = vld [vmem:[%s10556_s15 + $0x138] sm:$0xff]   ;;  %358 = vst [vmem:[%s10561_s17 + $0xa8] sm:$0xff] %v357_v21   ;;  %v369_v24 = vld [vmem:[%s10556_s15 + $0x180] sm:$0xff]  }
  0x30   : > { %362 = vst [vmem:[%s10561_s17 + $0xb0] sm:$0xff] %v361_v22   ;;  %366 = vst [vmem:[%s10561_s17 + $0xb8] sm:$0xff] %v365_v23   ;;  %v373_v25 = vld [vmem:[%s10556_s15 + $0x188] sm:$0xff]   ;;  %v377_v26 = vld [vmem:[%s10556_s15 + $0x190] sm:$0xff]  }
  0x31   : > { %370 = vst [vmem:[%s10561_s17 + $0xc0] sm:$0xff] %v369_v24   ;;  %374 = vst [vmem:[%s10561_s17 + $0xc8] sm:$0xff] %v373_v25   ;;  %v381_v27 = vld [vmem:[%s10556_s15 + $0x198] sm:$0xff]   ;;  %v385_v28 = vld [vmem:[%s10556_s15 + $0x1a0] sm:$0xff]  }
  0x32   : > { %378 = vst [vmem:[%s10561_s17 + $0xd0] sm:$0xff] %v377_v26   ;;  %v389_v29 = vld [vmem:[%s10556_s15 + $0x1a8] sm:$0xff]   ;;  %382 = vst [vmem:[%s10561_s17 + $0xd8] sm:$0xff] %v381_v27   ;;  %v393_v30 = vld [vmem:[%s10556_s15 + $0x1b0] sm:$0xff]  }
  0x33   : > { %386 = vst [vmem:[%s10561_s17 + $0xe0] sm:$0xff] %v385_v28   ;;  %390 = vst [vmem:[%s10561_s17 + $0xe8] sm:$0xff] %v389_v29   ;;  %v397_v31 = vld [vmem:[%s10556_s15 + $0x1b8] sm:$0xff]   ;;  %v401_v32 = vld [vmem:[%s10556_s15 + $0x200] sm:$0xff]  }
  0x34   : > { %394 = vst [vmem:[%s10561_s17 + $0xf0] sm:$0xff] %v393_v30   ;;  %398 = vst [vmem:[%s10561_s17 + $0xf8] sm:$0xff] %v397_v31   ;;  %v405_v33 = vld [vmem:[%s10556_s15 + $0x208] sm:$0xff]   ;;  %v409_v34 = vld [vmem:[%s10556_s15 + $0x210] sm:$0xff]  }
  0x35   : > { %402 = vst [vmem:[%s10561_s17 + $0x100] sm:$0xff] %v401_v32   ;;  %v413_v35 = vld [vmem:[%s10556_s15 + $0x218] sm:$0xff]   ;;  %406 = vst [vmem:[%s10561_s17 + $0x108] sm:$0xff] %v405_v33   ;;  %v417_v36 = vld [vmem:[%s10556_s15 + $0x220] sm:$0xff]  }
  0x36   : > { %410 = vst [vmem:[%s10561_s17 + $0x110] sm:$0xff] %v409_v34   ;;  %414 = vst [vmem:[%s10561_s17 + $0x118] sm:$0xff] %v413_v35   ;;  %v421_v37 = vld [vmem:[%s10556_s15 + $0x228] sm:$0xff]   ;;  %v425_v38 = vld [vmem:[%s10556_s15 + $0x230] sm:$0xff]  }
  0x37   : > { %418 = vst [vmem:[%s10561_s17 + $0x120] sm:$0xff] %v417_v36   ;;  %422 = vst [vmem:[%s10561_s17 + $0x128] sm:$0xff] %v421_v37   ;;  %v429_v39 = vld [vmem:[%s10556_s15 + $0x238] sm:$0xff]   ;;  %v433_v40 = vld [vmem:[%s10556_s15 + $0x280] sm:$0xff]  }
  0x38   : > { %426 = vst [vmem:[%s10561_s17 + $0x130] sm:$0xff] %v425_v38   ;;  %v437_v41 = vld [vmem:[%s10556_s15 + $0x288] sm:$0xff]   ;;  %430 = vst [vmem:[%s10561_s17 + $0x138] sm:$0xff] %v429_v39   ;;  %v441_v42 = vld [vmem:[%s10556_s15 + $0x290] sm:$0xff]  }
  0x39   : > { %434 = vst [vmem:[%s10561_s17 + $0x140] sm:$0xff] %v433_v40   ;;  %438 = vst [vmem:[%s10561_s17 + $0x148] sm:$0xff] %v437_v41   ;;  %v445_v43 = vld [vmem:[%s10556_s15 + $0x298] sm:$0xff]   ;;  %v449_v44 = vld [vmem:[%s10556_s15 + $0x2a0] sm:$0xff]  }
  0x3a   : > { %442 = vst [vmem:[%s10561_s17 + $0x150] sm:$0xff] %v441_v42   ;;  %446 = vst [vmem:[%s10561_s17 + $0x158] sm:$0xff] %v445_v43   ;;  %v453_v45 = vld [vmem:[%s10556_s15 + $0x2a8] sm:$0xff]   ;;  %v457_v46 = vld [vmem:[%s10556_s15 + $0x2b0] sm:$0xff]  }
  0x3b   : > { %450 = vst [vmem:[%s10561_s17 + $0x160] sm:$0xff] %v449_v44   ;;  %v461_v47 = vld [vmem:[%s10556_s15 + $0x2b8] sm:$0xff]   ;;  %454 = vst [vmem:[%s10561_s17 + $0x168] sm:$0xff] %v453_v45   ;;  %v465_v48 = vld [vmem:[%s10556_s15 + $0x300] sm:$0xff]  }
  0x3c   : > { %458 = vst [vmem:[%s10561_s17 + $0x170] sm:$0xff] %v457_v46   ;;  %462 = vst [vmem:[%s10561_s17 + $0x178] sm:$0xff] %v461_v47   ;;  %v469_v49 = vld [vmem:[%s10556_s15 + $0x308] sm:$0xff]   ;;  %v473_v50 = vld [vmem:[%s10556_s15 + $0x310] sm:$0xff]  }
  0x3d   : > { %466 = vst [vmem:[%s10561_s17 + $0x180] sm:$0xff] %v465_v48   ;;  %470 = vst [vmem:[%s10561_s17 + $0x188] sm:$0xff] %v469_v49   ;;  %v477_v51 = vld [vmem:[%s10556_s15 + $0x318] sm:$0xff]   ;;  %v481_v52 = vld [vmem:[%s10556_s15 + $0x320] sm:$0xff]  }
  0x3e   : > { %474 = vst [vmem:[%s10561_s17 + $0x190] sm:$0xff] %v473_v50   ;;  %v485_v53 = vld [vmem:[%s10556_s15 + $0x328] sm:$0xff]   ;;  %478 = vst [vmem:[%s10561_s17 + $0x198] sm:$0xff] %v477_v51   ;;  %v489_v54 = vld [vmem:[%s10556_s15 + $0x330] sm:$0xff]  }
  0x3f   : > { %482 = vst [vmem:[%s10561_s17 + $0x1a0] sm:$0xff] %v481_v52   ;;  %486 = vst [vmem:[%s10561_s17 + $0x1a8] sm:$0xff] %v485_v53   ;;  %v493_v55 = vld [vmem:[%s10556_s15 + $0x338] sm:$0xff]   ;;  %v497_v56 = vld [vmem:[%s10556_s15 + $0x380] sm:$0xff]  }
  0x40   : > { %490 = vst [vmem:[%s10561_s17 + $0x1b0] sm:$0xff] %v489_v54   ;;  %494 = vst [vmem:[%s10561_s17 + $0x1b8] sm:$0xff] %v493_v55   ;;  %v501_v57 = vld [vmem:[%s10556_s15 + $0x388] sm:$0xff]   ;;  %v505_v58 = vld [vmem:[%s10556_s15 + $0x390] sm:$0xff]  }
  0x41   : > { %498 = vst [vmem:[%s10561_s17 + $0x1c0] sm:$0xff] %v497_v56   ;;  %v509_v59 = vld [vmem:[%s10556_s15 + $0x398] sm:$0xff]   ;;  %502 = vst [vmem:[%s10561_s17 + $0x1c8] sm:$0xff] %v501_v57   ;;  %v513_v60 = vld [vmem:[%s10556_s15 + $0x3a0] sm:$0xff]  }
  0x42   : > { %506 = vst [vmem:[%s10561_s17 + $0x1d0] sm:$0xff] %v505_v58   ;;  %510 = vst [vmem:[%s10561_s17 + $0x1d8] sm:$0xff] %v509_v59   ;;  %v517_v61 = vld [vmem:[%s10556_s15 + $0x3a8] sm:$0xff]   ;;  %v521_v62 = vld [vmem:[%s10556_s15 + $0x3b0] sm:$0xff]  }
  0x43   : > { %514 = vst [vmem:[%s10561_s17 + $0x1e0] sm:$0xff] %v513_v60   ;;  %518 = vst [vmem:[%s10561_s17 + $0x1e8] sm:$0xff] %v517_v61   ;;  %v525_v63 = vld [vmem:[%s10556_s15 + $0x3b8] sm:$0xff]  }
  0x44   : > { %522 = vst [vmem:[%s10561_s17 + $0x1f0] sm:$0xff] %v521_v62   ;;  %526 = vst [vmem:[%s10561_s17 + $0x1f8] sm:$0xff] %v525_v63  }
  0x45 PF: > { %p9436_p0 = scmp.ge.s32.totalorder %s10410_s10, 1  ;;  %p806_p1 = scmp.lt.s32.totalorder %s10410_s10, 5 }
  0x47   : > { %p807_p2 = pnand %p9436_p0, %p806_p1 }
  0x49   : > { %810 = sbr.rel (%p807_p2) target bundleno = 1859 (0x743), region = 85 }
  0x50   : > { %s813_s13 = sand.u32 1, %s10386_s27   ;;  %s841_s14 = sand.u32 1, %s10378_s25  }
  0x51   : > { %s9437_s22 = sshll.u32 %s813_s13, 9  ;;  %s9438_s12 = sshll.u32 %s841_s14, 5 }
  0x52   : > { %s10694_s16 = scalar_lea.vmem [#allocation2], %s9437_s22  ;;  %s10696_s20 = scalar_lea.vmem [#allocation3], %s9438_s12 }
  0x53   : > { %p9439_p3 = scmp.ne.s32.totalorder %s10394_s29, 0 }
  0x54   : > { %v10412_v0 = vmov (!%p9439_p3), 0  }
  0x55   : > { %850 = sbr.rel (%p9439_p3) target bundleno = 92 (0x5c), region = 93  ;;  %851 = vst [vmem:[%s10696_s20] sm:$0xff] (!%p9439_p3), %v10412_v0  ;;  %852 = vst [vmem:[%s10696_s20 + $0x8] sm:$0xff] (!%p9439_p3), %v10412_v0 }
  0x56   : > { %853 = vst [vmem:[%s10696_s20 + $0x10] sm:$0xff] (!%p9439_p3), %v10412_v0  ;;  %854 = vst [vmem:[%s10696_s20 + $0x18] sm:$0xff] (!%p9439_p3), %v10412_v0 }
  0x5c PF: > { %v983_v1 = vld [vmem:[%s14271_s1] sm:$0x3]  ;;  %vm1497_vm0 = vcmask 1040384   ;;  %vm1498_vm1 = vcmask 1041408   ;;  %v10413_v3 = vmov 65535   ;;  %vm1304_vm2 = vcmask 23552  }
  0x5d   : > { %v10229_v2 = vld [vmem:[%s10694_s16] sm:$0xff]   ;;  %v1499_v4 = vsel %vm1497_vm0, 4294967295, %v10413_v3  ;;  %v10230_v7 = vld [vmem:[%s10694_s16 + $0x8] sm:$0xff]   ;;  %v10231_v8 = vld [vmem:[%s10694_s16 + $0x10] sm:$0xff]   ;;  %vm2281_vm3 = vcmask 523264   ;;  %vm9254_vm4 = vcmask 1041409  }
  0x5e   : > { %v1500_v5 = vsel %vm1498_vm1, %v1499_v4, 0  ;;  %9874 = vmatprep.mubr.msk.bf16.mxu0 %vm1304_vm2, %v10229_v2  ;;  %v10232_v9 = vld [vmem:[%s10694_s16 + $0x18] sm:$0xff]   ;;  %v10233_v10 = vld [vmem:[%s10694_s16 + $0x20] sm:$0xff]   ;;  %v10234_v11 = vld [vmem:[%s10694_s16 + $0x28] sm:$0xff]   ;;  %vm9256_vm5 = vcmask 1042434   ;;  %vm9258_vm6 = vcmask 1043459  }
  0x5f   : > { %v1502_v6 = vand.u32 %v1500_v5, %v983_v1  ;;  %v10235_v12 = vld [vmem:[%s10694_s16 + $0x30] sm:$0xff]   ;;  %v10236_v13 = vld [vmem:[%s10694_s16 + $0x38] sm:$0xff]   ;;  %v10237_v14 = vld [vmem:[%s10694_s16 + $0x40] sm:$0xff]   ;;  %vm9260_vm7 = vcmask 1044484   ;;  %vm9262_vm8 = vcmask 1045509   ;;  %vm9264_vm9 = vcmask 1046534  }
  0x60   : > { %v10238_v15 = vld [vmem:[%s10694_s16 + $0x48] sm:$0xff]   ;;  %v10239_v16 = vld [vmem:[%s10694_s16 + $0x50] sm:$0xff]   ;;  %v10240_v17 = vld [vmem:[%s10694_s16 + $0x58] sm:$0xff]   ;;  %vm9266_vm10 = vcmask 1047559   ;;  %s9738_s21 = sshll.u32 %s10398_s30, 9  ;;  %s9348_s29 = sshll.u32 %s10696_s20, 4  ;;  %s14210_s29 = int_to_ptr.vmem [resolvable:$true] %s9348_s29 }
  0x61   : > { %9872 = vmatprep.subr.bf16.mxu0 %v1502_v6  ;;  %v10241_v18 = vld [vmem:[%s10694_s16 + $0x60] sm:$0xff]   ;;  %v10242_v19 = vld [vmem:[%s10694_s16 + $0x68] sm:$0xff]   ;;  %v10243_v20 = vld [vmem:[%s10694_s16 + $0x70] sm:$0xff]   ;;  %s14208_s17 = scalar_lea.hbm %s14277_s7, %s9738_s21  ;;  %s9334_s13 = scalar_lea.sflag [#allocation4], %s841_s14 }
  0x62   : > { %9873 = vmatpush3.bf16.msra.mxu0 %v1502_v6  ;;  %v10244_v21 = vld [vmem:[%s10694_s16 + $0x78] sm:$0xff]   ;;  %v10245_v22 = vld [vmem:[%s10694_s16 + $0x80] sm:$0xff]   ;;  %v10246_v23 = vld [vmem:[%s10694_s16 + $0x88] sm:$0xff]   ;;  %s10416_s30 = smov [#allocation3]  }
  0x63   : > { %v10247_v24 = vld [vmem:[%s10694_s16 + $0x90] sm:$0xff]   ;;  %v10248_v25 = vld [vmem:[%s10694_s16 + $0x98] sm:$0xff]   ;;  %v10249_v26 = vld [vmem:[%s10694_s16 + $0xa0] sm:$0xff]   ;;  %s10304_s22 = sshll.u32 %s10416_s30, 4  ;;  %s10305_s22 = int_to_ptr.vmem [resolvable:$false] %s10304_s22 }
  0x64   : > { %v10281_v27 = vld [vmem:[%s14273_s3] sm:$0xff]   ;;  %v10250_v28 = vld [vmem:[%s10694_s16 + $0xa8] sm:$0xff]   ;;  %v10251_v29 = vld [vmem:[%s10694_s16 + $0xb0] sm:$0xff]   ;;  %s10306_s12 = scalar_lea.vmem %s10305_s22, 1024  ;;  %p10307_p8 = scmp.lt.s32.totalorder %s14210_s29, %s10305_s22 }
  0x65   : > { %9875 = vmatmul.mubr.msk.bf16.vlgmr.msra.gmra.mrb[0].mxu0 %vm1304_vm2, %v10230_v7  ;;  %10002 = vmatprep.subr.bf16.mxu1 %v10281_v27  ;;  %v10284_v30 = vld [vmem:[%s14273_s3 + $0x8] sm:$0xff]   ;;  %v10252_v31 = vld [vmem:[%s10694_s16 + $0xb8] sm:$0xff]   ;;  %v10285_v32 = vld [vmem:[%s14273_s3 + $0x10] sm:$0xff]  }
  0x66   : > { %9878 = vmatprep.mubr.msk.bf16.mxu0 %vm1304_vm2, %v10231_v8  ;;  %10003 = vmatpush3.bf16.msra.mxu1 %v10281_v27  ;;  %v10253_v33 = vld [vmem:[%s10694_s16 + $0xc0] sm:$0xff]   ;;  %v10288_v34 = vld [vmem:[%s14273_s3 + $0x18] sm:$0xff]   ;;  %v10254_v35 = vld [vmem:[%s10694_s16 + $0xc8] sm:$0xff]  }
  0x67   : > { %10004 = vmatprep.subr.bf16.mxu1 %v10284_v30  ;;  %v10255_v36 = vld [vmem:[%s10694_s16 + $0xd0] sm:$0xff]   ;;  %v3219_v37 = vld [vmem:[%s14275_s5] sm:$0xff]  ;;  %v10780_v39 = vld [vmem:[%s14275_s5 + $0x8] sm:$0xff] }
  0x68   : > { %v3223_v38 = vld [vmem:[%s14275_s5 + $0x20] sm:$0xff]  ;;  %v10786_v42 = vld [vmem:[%s14275_s5 + $0x28] sm:$0xff]  ;;  %v10256_v45 = vld [vmem:[%s10694_s16 + $0xd8] sm:$0xff]  }
  0x69   : > { %v9636_v40 = vcombine.low %v3219_v37, %v3223_v38  ;;  %v9637_v41 = vcombine.high %v3219_v37, %v3223_v38  ;;  %v9638_v43 = vcombine.low %v10780_v39, %v10786_v42  ;;  %v9639_v44 = vcombine.high %v10780_v39, %v10786_v42  ;;  %v10257_v46 = vld [vmem:[%s10694_s16 + $0xe0] sm:$0xff]   ;;  %v10258_v47 = vld [vmem:[%s10694_s16 + $0xe8] sm:$0xff]   ;;  %v10259_v48 = vld [vmem:[%s10694_s16 + $0xf0] sm:$0xff]  }
  0x6a   : > { %10005 = vmatpush3.bf16.msra.mxu1 %v10284_v30  ;;  %v10260_v49 = vld [vmem:[%s10694_s16 + $0xf8] sm:$0xff]   ;;  %v10261_v50 = vld [vmem:[%s10694_s16 + $0x100] sm:$0xff]   ;;  %v10262_v51 = vld [vmem:[%s10694_s16 + $0x108] sm:$0xff]  }
  0x6b   : > { %10006 = vmatprep.subr.bf16.mxu1 %v10285_v32  ;;  %3603 = vmatprep.subr.bf16.mxu0 %v9637_v41  ;;  %v10263_v52 = vld [vmem:[%s10694_s16 + $0x110] sm:$0xff]   ;;  %v3227_v53 = vld [vmem:[%s14275_s5 + $0x40] sm:$0xff]  ;;  %v10264_v57 = vld [vmem:[%s10694_s16 + $0x118] sm:$0xff]   ;;  %v14311_v41 = vmov 0  }
  0x6c   : > { %3604 = vmatpush1.bf16.msra.mxu0 %v9636_v40  ;;  %v3231_v54 = vld [vmem:[%s14275_s5 + $0x60] sm:$0xff]  ;;  %v10266_v59 = vld [vmem:[%s10694_s16 + $0x128] sm:$0xff]   ;;  %v10267_v60 = vld [vmem:[%s10694_s16 + $0x130] sm:$0xff]  }
  0x6d   : > { %9879 = vmatmul.mubr.msk.bf16.gmra.mrb[4].mxu0 %vm1304_vm2, %v10232_v9  ;;  %v9644_v55 = vcombine.low %v3227_v53, %v3231_v54  ;;  %v9645_v56 = vcombine.high %v3227_v53, %v3231_v54  ;;  %v10265_v58 = vld [vmem:[%s10694_s16 + $0x120] sm:$0xff]   ;;  %v10268_v61 = vld [vmem:[%s10694_s16 + $0x138] sm:$0xff]   ;;  %v10270_v63 = vld [vmem:[%s10694_s16 + $0x148] sm:$0xff]  }
  0x6e   : > { %9882 = vmatprep.mubr.msk.bf16.mxu0 %vm1304_vm2, %v10233_v10  ;;  %10007 = vmatpush3.bf16.msra.mxu1 %v10285_v32  ;;  %v10269_v62 = vld [vmem:[%s10694_s16 + $0x140] sm:$0xff]   ;;  %v10271_v0 = vld [vmem:[%s10694_s16 + $0x150] sm:$0xff]   ;;  %v10272_v5 = vld [vmem:[%s10694_s16 + $0x158] sm:$0xff]  }
  0x6f   : > { %10008 = vmatprep.subr.bf16.mxu1 %v10288_v34  ;;  %3605 = vmatprep.subr.bf16.mxu0 %v9645_v56  ;;  %v3235_v1 = vld [vmem:[%s14275_s5 + $0x80] sm:$0xff]  ;;  %v10274_v7 = vld [vmem:[%s10694_s16 + $0x168] sm:$0xff]   ;;  %v10275_v8 = vld [vmem:[%s10694_s16 + $0x170] sm:$0xff]  }
  0x70   : > { %3606 = vmatpush1.bf16.msra.mxu0 %v9644_v55  ;;  %v3239_v2 = vld [vmem:[%s14275_s5 + $0xa0] sm:$0xff]  ;;  %v10276_v9 = vld [vmem:[%s10694_s16 + $0x178] sm:$0xff]   ;;  %v3228_v37 = vld [vmem:[%s14275_s5 + $0x48] sm:$0xff] }
  0x71   : > { %v9652_v3 = vcombine.low %v3235_v1, %v3239_v2  ;;  %v9653_v4 = vcombine.high %v3235_v1, %v3239_v2  ;;  %v10273_v6 = vld [vmem:[%s10694_s16 + $0x160] sm:$0xff]   ;;  %v3232_v38 = vld [vmem:[%s14275_s5 + $0x68] sm:$0xff] }
  0x72   : > { %10009 = vmatpush3.bf16.msra.mxu1 %v10288_v34  ;;  %v10277_v10 = vld [vmem:[%s10694_s16 + $0x180] sm:$0xff]   ;;  %v9646_v56 = vcombine.low %v3228_v37, %v3232_v38  ;;  %v3244_v39 = vld [vmem:[%s14275_s5 + $0xc8] sm:$0xff] }
  0x73   : > { %4276 = vmatprep.subr.bf16.mxu1 %v9639_v44  ;;  %3607 = vmatprep.subr.bf16.mxu0 %v9653_v4  ;;  %v3248_v42 = vld [vmem:[%s14275_s5 + $0xe8] sm:$0xff]  ;;  %v10292_v4 = vld [vmem:[%s10694_s16 + $0x1d8] sm:$0xff]  }
  0x74   : > { %3608 = vmatpush1.bf16.msra.mxu0 %v9652_v3 }
  0x75   : > { %9883 = vmatmul.mubr.msk.bf16.gmra.mrb[8].mxu0 %vm1304_vm2, %v10234_v11  ;;  %v10278_v11 = vld [vmem:[%s10694_s16 + $0x188] sm:$0xff]  }
  0x76   : > { %9886 = vmatprep.mubr.msk.bf16.mxu0 %vm1304_vm2, %v10235_v12  ;;  %v10279_v12 = vld [vmem:[%s10694_s16 + $0x190] sm:$0xff]  }
  0x7d   : > { %9887 = vmatmul.mubr.msk.bf16.gmra.mrb[12].mxu0 %vm1304_vm2, %v10236_v13  ;;  %v3243_v13 = vld [vmem:[%s14275_s5 + $0xc0] sm:$0xff] }
  0x7e   : > { %9890 = vmatprep.mubr.msk.bf16.mxu0 %vm1304_vm2, %v10237_v14  ;;  %v3247_v14 = vld [vmem:[%s14275_s5 + $0xe0] sm:$0xff] }
  0x85   : > { %9891 = vmatmul.mubr.msk.bf16.gmra.mrb[16].mxu0 %vm1304_vm2, %v10238_v15  ;;  %v9660_v15 = vcombine.low %v3243_v13, %v3247_v14 }
  0x86   : > { %9894 = vmatprep.mubr.msk.bf16.mxu0 %vm1304_vm2, %v10239_v16  ;;  %v9661_v16 = vcombine.high %v3243_v13, %v3247_v14  ;;  %v9662_v13 = vcombine.low %v3244_v39, %v3248_v42 }
  0x88   : > { %3609 = vmatprep.subr.bf16.mxu0 %v9661_v16 }
  0x89   : > { %3610 = vmatpush1.bf16.msra.mxu0 %v9660_v15 }
  0x8d   : > { %9895 = vmatmul.mubr.msk.bf16.gmra.mrb[20].mxu0 %vm1304_vm2, %v10240_v17  ;;  %v10280_v17 = vld [vmem:[%s10694_s16 + $0x198] sm:$0xff]  }
  0x8e   : > { %9898 = vmatprep.mubr.msk.bf16.mxu0 %vm1304_vm2, %v10241_v18  ;;  %v10282_v18 = vld [vmem:[%s10694_s16 + $0x1a0] sm:$0xff]  }
  0x95   : > { %9899 = vmatmul.mubr.msk.bf16.gmra.mrb[24].mxu0 %vm1304_vm2, %v10242_v19  ;;  %v2117_v19 = vlaneseq }
  0x96   : > { %9902 = vmatprep.mubr.msk.bf16.mxu0 %vm1304_vm2, %v10243_v20  ;;  %v10283_v20 = vld [vmem:[%s10694_s16 + $0x1a8] sm:$0xff]  }
  0x9d   : > { %9903 = vmatmul.mubr.msk.bf16.gmra.mrb[28].mxu0 %vm1304_vm2, %v10244_v21  ;;  %v10863_v21 = vshrl.u32 %v2117_v19, 7 }
  0x9e   : > { %9906 = vmatprep.mubr.msk.bf16.mxu0 %vm1304_vm2, %v10245_v22  ;;  %v2113_v22 = vld [vmem:[%s14272_s2] sm:$0x1] }
  0xa5   : > { %9907 = vmatmul.mubr.msk.bf16.gmra.mrb[32].mxu0 %vm1304_vm2, %v10246_v23  ;;  %v10286_v23 = vld [vmem:[%s10694_s16 + $0x1b0] sm:$0xff]  }
  0xa6   : > { %9910 = vmatprep.mubr.msk.bf16.mxu0 %vm1304_vm2, %v10247_v24  ;;  %v2115_v24 = vpack.i.b16 %v2113_v22, %v2113_v22 }
  0xad   : > { %9911 = vmatmul.mubr.msk.bf16.gmra.mrb[36].mxu0 %vm1304_vm2, %v10248_v25  ;;  %v10871_v25 = vsub.s32 0, %v10863_v21 }
  0xae   : > { %9914 = vmatprep.mubr.msk.bf16.mxu0 %vm1304_vm2, %v10249_v26 }
  0xaf   : > { %14411 = vst [vmem:[#allocation9_spill] sm:$0xff] %v10871_v25 }
  0xb5   : > { %9915 = vmatmul.mubr.msk.bf16.gmra.mrb[40].mxu0 %vm1304_vm2, %v10250_v28  ;;  %v10875_v28 = vrot.slane %v2115_v24, %v10871_v25 }
  0xb6   : > { %9918 = vmatprep.mubr.msk.bf16.mxu0 %vm1304_vm2, %v10251_v29  ;;  %v10287_v29 = vld [vmem:[%s10694_s16 + $0x1b8] sm:$0xff]  }
  0xbd   : > { %9919 = vmatmul.mubr.msk.bf16.gmra.mrb[44].mxu0 %vm1304_vm2, %v10252_v31  ;;  %v10289_v31 = vld [vmem:[%s10694_s16 + $0x1c0] sm:$0xff]  }
  0xbe   : > { %9922 = vmatprep.mubr.msk.bf16.mxu0 %vm1304_vm2, %v10253_v33 }
  0xc5   : > { %9923 = vmatmul.mubr.msk.bf16.gmra.mrb[48].mxu0 %vm1304_vm2, %v10254_v35 }
  0xc6   : > { %9926 = vmatprep.mubr.msk.bf16.mxu0 %vm1304_vm2, %v10255_v36 }
  0xcd   : > { %9927 = vmatmul.mubr.msk.bf16.gmra.mrb[52].mxu0 %vm1304_vm2, %v10256_v45 }
  0xce   : > { %9930 = vmatprep.mubr.msk.bf16.mxu0 %vm1304_vm2, %v10257_v46 }
  0xd5   : > { %9931 = vmatmul.mubr.msk.bf16.gmra.mrb[56].mxu0 %vm1304_vm2, %v10258_v47  ;;  %v10290_v47 = vld [vmem:[%s10694_s16 + $0x1c8] sm:$0xff]  }
  0xd6   : > { %9934 = vmatprep.mubr.msk.bf16.mxu0 %vm1304_vm2, %v10259_v48  ;;  %v9647_v48 = vcombine.high %v3228_v37, %v3232_v38  ;;  %v10296_v37 = vld [vmem:[%s10694_s16 + $0x1f8] sm:$0xff]  }
  0xdd   : > { %9935 = vmatmul.mubr.msk.bf16.gmra.mrb[60].mxu0 %vm1304_vm2, %v10260_v49 }
  0xde   : > { %9938 = vmatprep.mubr.msk.bf16.mxu0 %vm1304_vm2, %v10261_v50  ;;  %v10291_v50 = vld [vmem:[%s10694_s16 + $0x1d0] sm:$0xff]  }
  0xe5   : > { %9939 = vmatmul.mubr.msk.bf16.gmra.mrb[64].mxu0 %vm1304_vm2, %v10262_v51  ;;  %v3236_v51 = vld [vmem:[%s14275_s5 + $0x88] sm:$0xff] }
  0xe6   : > { %9942 = vmatprep.mubr.msk.bf16.mxu0 %vm1304_vm2, %v10263_v52  ;;  %v3240_v52 = vld [vmem:[%s14275_s5 + $0xa8] sm:$0xff] }
  0xe7   : > { %v9654_v1 = vcombine.low %v3236_v51, %v3240_v52 }
  0xed   : > { %9943 = vmatmul.mubr.msk.bf16.gmra.mrb[68].mxu0 %vm1304_vm2, %v10264_v57 }
  0xee   : > { %9946 = vmatprep.mubr.msk.bf16.mxu0 %vm1304_vm2, %v10265_v58  ;;  %v9655_v58 = vcombine.high %v3236_v51, %v3240_v52 }
  0xf5   : > { %9947 = vmatmul.mubr.msk.bf16.gmra.mrb[72].mxu0 %vm1304_vm2, %v10266_v59  ;;  %v3251_v59 = vld [vmem:[%s14275_s5 + $0x100] sm:$0xff] }
  0xf6   : > { %9950 = vmatprep.mubr.msk.bf16.mxu0 %vm1304_vm2, %v10267_v60  ;;  %v3255_v60 = vld [vmem:[%s14275_s5 + $0x120] sm:$0xff] }
  0xfd   : > { %9951 = vmatmul.mubr.msk.bf16.gmra.mrb[76].mxu0 %vm1304_vm2, %v10268_v61 }
  0xfe   : > { %9954 = vmatprep.mubr.msk.bf16.mxu0 %vm1304_vm2, %v10269_v62  ;;  %v9669_v62 = vcombine.high %v3251_v59, %v3255_v60 }
 0x100   : > { %3611 = vmatprep.subr.bf16.mxu0 %v9669_v62 }
 0x105   : > { %9955 = vmatmul.mubr.msk.bf16.gmra.mrb[80].mxu0 %vm1304_vm2, %v10270_v63 }
 0x106   : > { %9958 = vmatprep.mubr.msk.bf16.mxu0 %vm1304_vm2, %v10271_v0 }
 0x10d   : > { %9959 = vmatmul.mubr.msk.bf16.gmra.mrb[84].mxu0 %vm1304_vm2, %v10272_v5  ;;  %v9663_v5 = vcombine.high %v3244_v39, %v3248_v42  ;;  %v3264_v42 = vld [vmem:[%s14275_s5 + $0x168] sm:$0xff] }
 0x10e   : > { %9962 = vmatprep.mubr.msk.bf16.mxu0 %vm1304_vm2, %v10273_v6 }
 0x115   : > { %9963 = vmatmul.mubr.msk.bf16.gmra.mrb[88].mxu0 %vm1304_vm2, %v10274_v7  ;;  %v10293_v7 = vld [vmem:[%s10694_s16 + $0x1e0] sm:$0xff]  }
 0x116   : > { %9966 = vmatprep.mubr.msk.bf16.mxu0 %vm1304_vm2, %v10275_v8  ;;  %v3252_v8 = vld [vmem:[%s14275_s5 + $0x108] sm:$0xff] }
 0x11d   : > { %9967 = vmatmul.mubr.msk.bf16.gmra.mrb[92].mxu0 %vm1304_vm2, %v10276_v9  ;;  %v3256_v9 = vld [vmem:[%s14275_s5 + $0x128] sm:$0xff] }
 0x11e   : > { %9970 = vmatprep.mubr.msk.bf16.mxu0 %vm1304_vm2, %v10277_v10  ;;  %v9671_v15 = vcombine.high %v3252_v8, %v3256_v9  ;;  %v9670_v19 = vcombine.low %v3252_v8, %v3256_v9 }
 0x125   : > { %9971 = vmatmul.mubr.msk.bf16.gmra.mrb[96].mxu0 %vm1304_vm2, %v10278_v11 }
 0x126   : > { %9974 = vmatprep.mubr.msk.bf16.mxu0 %vm1304_vm2, %v10279_v12 }
 0x12d   : > { %9975 = vmatmul.mubr.msk.bf16.gmra.mrb[100].mxu0 %vm1304_vm2, %v10280_v17 }
 0x12e   : > { %9978 = vmatprep.mubr.msk.bf16.mxu0 %vm1304_vm2, %v10282_v18 }
 0x135   : > { %9979 = vmatmul.mubr.msk.bf16.gmra.mrb[104].mxu0 %vm1304_vm2, %v10283_v20 }
 0x136   : > { %9982 = vmatprep.mubr.msk.bf16.mxu0 %vm1304_vm2, %v10286_v23  ;;  %v10294_v23 = vld [vmem:[%s10694_s16 + $0x1e8] sm:$0xff]  }
 0x138   : > { %v9876_v26 = vpop.f32.mrb[0].mxu0 }
 0x139   : > { %v1538_v27 = vpop.f32.mrb[1].mxu0 }
 0x13a   : > { %v9877_v30 = vpop.f32.mrb[2].mxu0 }
 0x13b   : > { %v2050_v32 = vpack.c.bf16 %v9877_v30, %v9876_v26  ;;  %v1541_v33 = vpop.f32.mrb[3].mxu0  ;;  %v10295_v26 = vld [vmem:[%s10694_s16 + $0x1f0] sm:$0xff]   ;;  %s10300_s16 = scalar_lea.vmem %s14210_s29, 512 }
 0x13c   : > { %v2049_v34 = vpack.c.bf16 %v1541_v33, %v1538_v27  ;;  %p10301_p4 = scmp.ne.s32.totalorder %s14210_s29, %s10300_s16  ;;  %p10308_p9 = scmp.lt.s32.totalorder %s10306_s12, %s10300_s16 }
 0x13d   : > { %v2122_v35 = vadd.bf16 %v10875_v28, %v2050_v32  ;;  %9983 = vmatmul.mubr.msk.bf16.gmra.mrb[108].mxu0 %vm1304_vm2, %v10287_v29 }
 0x13e   : > { %v2121_v36 = vadd.bf16 %v10875_v28, %v2049_v34  ;;  %9986 = vmatprep.mubr.msk.bf16.mxu0 %vm1304_vm2, %v10289_v31  ;;  %p10302_p5 = pnand %p10301_p4, %p10529_p7  ;;  %p10309_p10 = por %p10308_p9, %p10307_p8 }
 0x13f   : > { %v2186_v46 = vmax.bf16 %v14311_v41, %v2122_v35 }
 0x140   : > { %v9880_v40 = vpop.f32.mrb[4].mxu0  ;;  %v2185_v44 = vmax.bf16 %v14311_v41, %v2121_v36  ;;  %p10303_p6 = pneg %p10302_p5 }
 0x141   : > { %v1554_v45 = vpop.f32.mrb[5].mxu0 }
 0x142   : > { %v9881_v49 = vpop.f32.mrb[6].mxu0  ;;  %10010 = vmatprep.mubr.msk.bf16.mxu1 %vm2281_vm3, %v2185_v44  ;;  %p10310_p11 = pnand %p10309_p10, %p10303_p6 }
 0x143   : > { %v2052_v53 = vpack.c.bf16 %v9881_v49, %v9880_v40  ;;  %v1557_v54 = vpop.f32.mrb[7].mxu0  ;;  %10011 = vmatmul.mubr.msk.bf16.vlgmr.msra.gmra.mrb[0].mxu1 %vm2281_vm3, %v2186_v46 }
 0x144   : > { %v2051_v55 = vpack.c.bf16 %v1557_v54, %v1554_v45  ;;  %4277 = vmatpush1.bf16.msra.mxu1 %v9638_v43  ;;  %v9668_v43 = vcombine.low %v3251_v59, %v3255_v60  ;;  %v3260_v59 = vld [vmem:[%s14275_s5 + $0x148] sm:$0xff] }
 0x145   : > { %v2124_v57 = vadd.bf16 %v10875_v28, %v2052_v53  ;;  %9987 = vmatmul.mubr.msk.bf16.gmra.mrb[112].mxu0 %vm1304_vm2, %v10290_v47  ;;  %4278 = vmatprep.subr.bf16.mxu1 %v9647_v48  ;;  %v9679_v62 = vcombine.high %v3260_v59, %v3264_v42 }
 0x146   : > { %v2123_v61 = vadd.bf16 %v10875_v28, %v2051_v55  ;;  %9990 = vmatprep.mubr.msk.bf16.mxu0 %vm1304_vm2, %v10291_v50  ;;  %3612 = vmatpush1.bf16.msra.mxu0 %v9668_v43  ;;  %v9678_v43 = vcombine.low %v3260_v59, %v3264_v42 }
 0x147   : > { %v2188_v3 = vmax.bf16 %v14311_v41, %v2124_v57  ;;  %v3259_v57 = vld [vmem:[%s14275_s5 + $0x140] sm:$0xff] }
 0x148   : > { %v9884_v63 = vpop.f32.mrb[8].mxu0  ;;  %v2187_v0 = vmax.bf16 %v14311_v41, %v2123_v61  ;;  %4279 = vmatpush1.bf16.msra.mxu1 %v9646_v56 }
 0x149   : > { %v1570_v2 = vpop.f32.mrb[9].mxu0  ;;  %4280 = vmatprep.subr.bf16.mxu1 %v9655_v58  ;;  %v3263_v58 = vld [vmem:[%s14275_s5 + $0x160] sm:$0xff] }
 0x14a   : > { %v9885_v6 = vpop.f32.mrb[10].mxu0  ;;  %10014 = vmatprep.mubr.msk.bf16.mxu1 %vm2281_vm3, %v2187_v0  ;;  %v9676_v61 = vcombine.low %v3259_v57, %v3263_v58  ;;  %v9677_v39 = vcombine.high %v3259_v57, %v3263_v58 }
 0x14b   : > { %v2054_v10 = vpack.c.bf16 %v9885_v6, %v9884_v63  ;;  %v1573_v11 = vpop.f32.mrb[11].mxu0  ;;  %10015 = vmatmul.mubr.msk.bf16.gmra.mrb[4].mxu1 %vm2281_vm3, %v2188_v3 }
 0x14c   : > { %v2053_v12 = vpack.c.bf16 %v1573_v11, %v1570_v2  ;;  %4281 = vmatpush1.bf16.msra.mxu1 %v9654_v1  ;;  %3613 = vmatprep.subr.bf16.mxu0 %v9677_v39 }
 0x14d   : > { %v2126_v14 = vadd.bf16 %v10875_v28, %v2054_v10  ;;  %9991 = vmatmul.mubr.msk.bf16.gmra.mrb[116].mxu0 %vm1304_vm2, %v10292_v4  ;;  %4282 = vmatprep.subr.bf16.mxu1 %v9663_v5 }
 0x14e   : > { %v2125_v16 = vadd.bf16 %v10875_v28, %v2053_v12  ;;  %9994 = vmatprep.mubr.msk.bf16.mxu0 %vm1304_vm2, %v10293_v7  ;;  %3614 = vmatpush1.bf16.msra.mxu0 %v9676_v61 }
 0x14f   : > { %v2190_v22 = vmax.bf16 %v14311_v41, %v2126_v14 }
 0x150   : > { %v9888_v17 = vpop.f32.mrb[12].mxu0  ;;  %v2189_v18 = vmax.bf16 %v14311_v41, %v2125_v16  ;;  %4283 = vmatpush1.bf16.msra.mxu1 %v9662_v13 }
 0x151   : > { %v1586_v20 = vpop.f32.mrb[13].mxu0  ;;  %4284 = vmatprep.subr.bf16.mxu1 %v9671_v15 }
 0x152   : > { %v9889_v24 = vpop.f32.mrb[14].mxu0  ;;  %10018 = vmatprep.mubr.msk.bf16.mxu1 %vm2281_vm3, %v2189_v18 }
 0x153   : > { %v2056_v27 = vpack.c.bf16 %v9889_v24, %v9888_v17  ;;  %v1589_v29 = vpop.f32.mrb[15].mxu0  ;;  %10019 = vmatmul.mubr.msk.bf16.gmra.mrb[8].mxu1 %vm2281_vm3, %v2190_v22 }
 0x154   : > { %v2055_v30 = vpack.c.bf16 %v1589_v29, %v1586_v20  ;;  %4285 = vmatpush1.bf16.msra.mxu1 %v9670_v19 }
 0x155   : > { %v2128_v31 = vadd.bf16 %v10875_v28, %v2056_v27  ;;  %9995 = vmatmul.mubr.msk.bf16.gmra.mrb[120].mxu0 %vm1304_vm2, %v10294_v23  ;;  %4286 = vmatprep.subr.bf16.mxu1 %v9679_v62 }
 0x156   : > { %v2127_v32 = vadd.bf16 %v10875_v28, %v2055_v30  ;;  %9998 = vmatprep.mubr.msk.bf16.mxu0 %vm1304_vm2, %v10295_v26 }
 0x157   : > { %v2192_v36 = vmax.bf16 %v14311_v41, %v2128_v31 }
 0x158   : > { %v9892_v33 = vpop.f32.mrb[16].mxu0  ;;  %v2191_v34 = vmax.bf16 %v14311_v41, %v2127_v32  ;;  %4287 = vmatpush1.bf16.msra.mxu1 %v9678_v43 }
 0x159   : > { %v1602_v35 = vpop.f32.mrb[17].mxu0 }
 0x15a   : > { %v9893_v38 = vpop.f32.mrb[18].mxu0  ;;  %10022 = vmatprep.mubr.msk.bf16.mxu1 %vm2281_vm3, %v2191_v34 }
 0x15b   : > { %v2058_v40 = vpack.c.bf16 %v9893_v38, %v9892_v33  ;;  %v1605_v44 = vpop.f32.mrb[19].mxu0  ;;  %10023 = vmatmul.mubr.msk.bf16.gmra.mrb[12].mxu1 %vm2281_vm3, %v2192_v36 }
 0x15c   : > { %v2057_v45 = vpack.c.bf16 %v1605_v44, %v1602_v35 }
 0x15d   : > { %v2130_v46 = vadd.bf16 %v10875_v28, %v2058_v40  ;;  %9999 = vmatmul.mubr.msk.bf16.gmra.mrb[124].mxu0 %vm1304_vm2, %v10296_v37 }
 0x15e   : > { %v2129_v47 = vadd.bf16 %v10875_v28, %v2057_v45  ;;  %3635 = vmatprep.mubr.bf16.mxu0 %v14311_v41  ;;  %v3267_v45 = vld [vmem:[%s14275_s5 + $0x180] sm:$0xff] }
 0x15f   : > { %v2194_v51 = vmax.bf16 %v14311_v41, %v2130_v46  ;;  %v3271_v46 = vld [vmem:[%s14275_s5 + $0x1a0] sm:$0xff] }
 0x160   : > { %v9896_v48 = vpop.f32.mrb[20].mxu0  ;;  %v2193_v49 = vmax.bf16 %v14311_v41, %v2129_v47  ;;  %v3268_v47 = vld [vmem:[%s14275_s5 + $0x188] sm:$0xff] }
 0x161   : > { %v1618_v50 = vpop.f32.mrb[21].mxu0 }
 0x162   : > { %v9897_v52 = vpop.f32.mrb[22].mxu0  ;;  %10026 = vmatprep.mubr.msk.bf16.mxu1 %vm2281_vm3, %v2193_v49  ;;  %v9684_v49 = vcombine.low %v3267_v45, %v3271_v46 }
 0x163   : > { %v2060_v53 = vpack.c.bf16 %v9897_v52, %v9896_v48  ;;  %v1621_v54 = vpop.f32.mrb[23].mxu0  ;;  %10027 = vmatmul.mubr.msk.bf16.gmra.mrb[16].mxu1 %vm2281_vm3, %v2194_v51  ;;  %v3272_v51 = vld [vmem:[%s14275_s5 + $0x1a8] sm:$0xff] }
 0x164   : > { %v2059_v55 = vpack.c.bf16 %v1621_v54, %v1618_v50  ;;  %v9685_v50 = vcombine.high %v3267_v45, %v3271_v46  ;;  %v9686_v52 = vcombine.low %v3268_v47, %v3272_v51 }
 0x165   : > { %v2132_v56 = vadd.bf16 %v10875_v28, %v2060_v53  ;;  %v9687_v53 = vcombine.high %v3268_v47, %v3272_v51 }
 0x166   : > { %v2131_v60 = vadd.bf16 %v10875_v28, %v2059_v55  ;;  %3615 = vmatprep.subr.bf16.mxu0 %v9685_v50 }
 0x167   : > { %v2196_v2 = vmax.bf16 %v14311_v41, %v2132_v56  ;;  %4288 = vmatprep.subr.bf16.mxu1 %v9687_v53  ;;  %3616 = vmatpush1.bf16.msra.mxu0 %v9684_v49 }
 0x168   : > { %v9900_v63 = vpop.f32.mrb[24].mxu0  ;;  %v2195_v0 = vmax.bf16 %v14311_v41, %v2131_v60  ;;  %4289 = vmatpush1.bf16.msra.mxu1 %v9686_v52 }
 0x169   : > { %v1634_v1 = vpop.f32.mrb[25].mxu0 }
 0x16a   : > { %v9901_v3 = vpop.f32.mrb[26].mxu0  ;;  %10030 = vmatprep.mubr.msk.bf16.mxu1 %vm2281_vm3, %v2195_v0 }
 0x16b   : > { %v2062_v4 = vpack.c.bf16 %v9901_v3, %v9900_v63  ;;  %v1637_v5 = vpop.f32.mrb[27].mxu0  ;;  %10031 = vmatmul.mubr.msk.bf16.gmra.mrb[20].mxu1 %vm2281_vm3, %v2196_v2 }
 0x16c   : > { %v2061_v6 = vpack.c.bf16 %v1637_v5, %v1634_v1 }
 0x16d   : > { %v2134_v7 = vadd.bf16 %v10875_v28, %v2062_v4 }
 0x16e   : > { %v2133_v8 = vadd.bf16 %v10875_v28, %v2061_v6 }
 0x16f   : > { %v2198_v12 = vmax.bf16 %v14311_v41, %v2134_v7 }
 0x170   : > { %v9904_v9 = vpop.f32.mrb[28].mxu0  ;;  %v2197_v10 = vmax.bf16 %v14311_v41, %v2133_v8 }
 0x171   : > { %v1650_v11 = vpop.f32.mrb[29].mxu0 }
 0x172   : > { %v9905_v13 = vpop.f32.mrb[30].mxu0  ;;  %10034 = vmatprep.mubr.msk.bf16.mxu1 %vm2281_vm3, %v2197_v10 }
 0x173   : > { %v2064_v14 = vpack.c.bf16 %v9905_v13, %v9904_v9  ;;  %v1653_v15 = vpop.f32.mrb[31].mxu0  ;;  %10035 = vmatmul.mubr.msk.bf16.gmra.mrb[24].mxu1 %vm2281_vm3, %v2198_v12  ;;  %v3279_v12 = vld [vmem:[%s14275_s5 + $0x1e0] sm:$0xff] }
 0x174   : > { %v2063_v16 = vpack.c.bf16 %v1653_v15, %v1650_v11  ;;  %v3275_v11 = vld [vmem:[%s14275_s5 + $0x1c0] sm:$0xff] }
 0x175   : > { %v2136_v17 = vadd.bf16 %v10875_v28, %v2064_v14  ;;  %v9693_v14 = vcombine.high %v3275_v11, %v3279_v12 }
 0x176   : > { %v2135_v18 = vadd.bf16 %v10875_v28, %v2063_v16 }
 0x177   : > { %v2200_v23 = vmax.bf16 %v14311_v41, %v2136_v17  ;;  %v9692_v17 = vcombine.low %v3275_v11, %v3279_v12  ;;  %3617 = vmatprep.subr.bf16.mxu0 %v9693_v14  ;;  %v11075_v14 = vld [vmem:[%s14275_s5 + $0x30] sm:$0xff] }
 0x178   : > { %v9908_v19 = vpop.f32.mrb[32].mxu0  ;;  %v2199_v20 = vmax.bf16 %v14311_v41, %v2135_v18 }
 0x179   : > { %v1666_v22 = vpop.f32.mrb[33].mxu0  ;;  %3618 = vmatpush1.bf16.msra.mxu0 %v9692_v17 }
 0x17a   : > { %v9909_v24 = vpop.f32.mrb[34].mxu0  ;;  %10038 = vmatprep.mubr.msk.bf16.mxu1 %vm2281_vm3, %v2199_v20 }
 0x17b   : > { %v2066_v26 = vpack.c.bf16 %v9909_v24, %v9908_v19  ;;  %v1669_v27 = vpop.f32.mrb[35].mxu0  ;;  %10039 = vmatmul.mubr.msk.bf16.gmra.mrb[28].mxu1 %vm2281_vm3, %v2200_v23 }
 0x17c   : > { %v2065_v29 = vpack.c.bf16 %v1669_v27, %v1666_v22 }
 0x17d   : > { %v2138_v30 = vadd.bf16 %v10875_v28, %v2066_v26 }
 0x17e   : > { %v2137_v31 = vadd.bf16 %v10875_v28, %v2065_v29 }
 0x17f   : > { %v2202_v35 = vmax.bf16 %v14311_v41, %v2138_v30 }
 0x180   : > { %v9912_v32 = vpop.f32.mrb[36].mxu0  ;;  %v2201_v33 = vmax.bf16 %v14311_v41, %v2137_v31 }
 0x181   : > { %v1682_v34 = vpop.f32.mrb[37].mxu0 }
 0x182   : > { %v9913_v36 = vpop.f32.mrb[38].mxu0  ;;  %10042 = vmatprep.mubr.msk.bf16.mxu1 %vm2281_vm3, %v2201_v33  ;;  %v3276_v33 = vld [vmem:[%s14275_s5 + $0x1c8] sm:$0xff] }
 0x183   : > { %v2068_v37 = vpack.c.bf16 %v9913_v36, %v9912_v32  ;;  %v1685_v38 = vpop.f32.mrb[39].mxu0  ;;  %10043 = vmatmul.mubr.msk.bf16.gmra.mrb[32].mxu1 %vm2281_vm3, %v2202_v35 }
 0x184   : > { %v2067_v40 = vpack.c.bf16 %v1685_v38, %v1682_v34  ;;  %v3280_v34 = vld [vmem:[%s14275_s5 + $0x1e8] sm:$0xff] }
 0x185   : > { %v2140_v44 = vadd.bf16 %v10875_v28, %v2068_v37  ;;  %v9694_v36 = vcombine.low %v3276_v33, %v3280_v34  ;;  %v9695_v37 = vcombine.high %v3276_v33, %v3280_v34 }
 0x186   : > { %v2139_v48 = vadd.bf16 %v10875_v28, %v2067_v40 }
 0x187   : > { %v2204_v57 = vmax.bf16 %v14311_v41, %v2140_v44  ;;  %4290 = vmatprep.subr.bf16.mxu1 %v9695_v37 }
 0x188   : > { %v9916_v54 = vpop.f32.mrb[40].mxu0  ;;  %v2203_v55 = vmax.bf16 %v14311_v41, %v2139_v48  ;;  %4291 = vmatpush1.bf16.msra.mxu1 %v9694_v36 }
 0x189   : > { %v1698_v56 = vpop.f32.mrb[41].mxu0 }
 0x18a   : > { %v9917_v58 = vpop.f32.mrb[42].mxu0  ;;  %10046 = vmatprep.mubr.msk.bf16.mxu1 %vm2281_vm3, %v2203_v55 }
 0x18b   : > { %v2070_v59 = vpack.c.bf16 %v9917_v58, %v9916_v54  ;;  %v1701_v60 = vpop.f32.mrb[43].mxu0  ;;  %10047 = vmatmul.mubr.msk.bf16.gmra.mrb[36].mxu1 %vm2281_vm3, %v2204_v57 }
 0x18c   : > { %v2069_v61 = vpack.c.bf16 %v1701_v60, %v1698_v56 }
 0x18d   : > { %v2142_v39 = vadd.bf16 %v10875_v28, %v2070_v59 }
 0x18e   : > { %v2141_v42 = vadd.bf16 %v10875_v28, %v2069_v61 }
 0x18f   : > { %v2206_v0 = vmax.bf16 %v14311_v41, %v2142_v39 }
 0x190   : > { %v9920_v43 = vpop.f32.mrb[44].mxu0  ;;  %v2205_v62 = vmax.bf16 %v14311_v41, %v2141_v42 }
 0x191   : > { %v1714_v63 = vpop.f32.mrb[45].mxu0 }
 0x192   : > { %v9921_v1 = vpop.f32.mrb[46].mxu0  ;;  %10050 = vmatprep.mubr.msk.bf16.mxu1 %vm2281_vm3, %v2205_v62 }
 0x193   : > { %v2072_v2 = vpack.c.bf16 %v9921_v1, %v9920_v43  ;;  %v1717_v3 = vpop.f32.mrb[47].mxu0  ;;  %10051 = vmatmul.mubr.msk.bf16.gmra.mrb[40].mxu1 %vm2281_vm3, %v2206_v0 }
 0x194   : > { %v2071_v4 = vpack.c.bf16 %v1717_v3, %v1714_v63 }
 0x195   : > { %v2144_v5 = vadd.bf16 %v10875_v28, %v2072_v2 }
 0x196   : > { %v2143_v6 = vadd.bf16 %v10875_v28, %v2071_v4 }
 0x197   : > { %v2208_v10 = vmax.bf16 %v14311_v41, %v2144_v5 }
 0x198   : > { %v9924_v7 = vpop.f32.mrb[48].mxu0  ;;  %v2207_v8 = vmax.bf16 %v14311_v41, %v2143_v6 }
 0x199   : > { %v1730_v9 = vpop.f32.mrb[49].mxu0 }
 0x19a   : > { %v9925_v13 = vpop.f32.mrb[50].mxu0  ;;  %10054 = vmatprep.mubr.msk.bf16.mxu1 %vm2281_vm3, %v2207_v8 }
 0x19b   : > { %v2074_v15 = vpack.c.bf16 %v9925_v13, %v9924_v7  ;;  %v1733_v16 = vpop.f32.mrb[51].mxu0  ;;  %10055 = vmatmul.mubr.msk.bf16.gmra.mrb[44].mxu1 %vm2281_vm3, %v2208_v10  ;;  %v11070_v13 = vld [vmem:[%s14275_s5 + $0x10] sm:$0xff] }
 0x19c   : > { %v2073_v18 = vpack.c.bf16 %v1733_v16, %v1730_v9  ;;  %v9640_v17 = vcombine.low %v11070_v13, %v11075_v14 }
 0x19d   : > { %v2146_v19 = vadd.bf16 %v10875_v28, %v2074_v15  ;;  %v11080_v15 = vld [vmem:[%s14275_s5 + $0x18] sm:$0xff] }
 0x19e   : > { %v2145_v20 = vadd.bf16 %v10875_v28, %v2073_v18  ;;  %v9641_v18 = vcombine.high %v11070_v13, %v11075_v14 }
 0x19f   : > { %v2210_v26 = vmax.bf16 %v14311_v41, %v2146_v19  ;;  %v11090_v19 = vld [vmem:[%s14275_s5 + $0x38] sm:$0xff] }
 0x1a0   : > { %v9928_v22 = vpop.f32.mrb[52].mxu0  ;;  %v2209_v23 = vmax.bf16 %v14311_v41, %v2145_v20  ;;  %4949 = vmatprep.subr.bf16.mxu0 %v9641_v18 }
 0x1a1   : > { %v1746_v24 = vpop.f32.mrb[53].mxu0 }
 0x1a2   : > { %v9929_v27 = vpop.f32.mrb[54].mxu0  ;;  %10058 = vmatprep.mubr.msk.bf16.mxu1 %vm2281_vm3, %v2209_v23  ;;  %v9643_v23 = vcombine.high %v11080_v15, %v11090_v19 }
 0x1a3   : > { %v2076_v29 = vpack.c.bf16 %v9929_v27, %v9928_v22  ;;  %v1749_v30 = vpop.f32.mrb[55].mxu0  ;;  %10059 = vmatmul.mubr.msk.bf16.gmra.mrb[48].mxu1 %vm2281_vm3, %v2210_v26  ;;  %v9642_v22 = vcombine.low %v11080_v15, %v11090_v19  ;;  %v3238_v15 = vld [vmem:[%s14275_s5 + $0x98] sm:$0xff] }
 0x1a4   : > { %v2075_v31 = vpack.c.bf16 %v1749_v30, %v1746_v24  ;;  %5622 = vmatprep.subr.bf16.mxu1 %v9643_v23 }
 0x1a5   : > { %v2148_v32 = vadd.bf16 %v10875_v28, %v2076_v29 }
 0x1a6   : > { %v2147_v35 = vadd.bf16 %v10875_v28, %v2075_v31 }
 0x1a7   : > { %v2212_v45 = vmax.bf16 %v14311_v41, %v2148_v32 }
 0x1a8   : > { %v9932_v38 = vpop.f32.mrb[56].mxu0  ;;  %v2211_v40 = vmax.bf16 %v14311_v41, %v2147_v35 }
 0x1a9   : > { %v1762_v44 = vpop.f32.mrb[57].mxu0 }
 0x1aa   : > { %v9933_v46 = vpop.f32.mrb[58].mxu0  ;;  %10062 = vmatprep.mubr.msk.bf16.mxu1 %vm2281_vm3, %v2211_v40 }
 0x1ab   : > { %v2078_v47 = vpack.c.bf16 %v9933_v46, %v9932_v38  ;;  %v1765_v48 = vpop.f32.mrb[59].mxu0  ;;  %10063 = vmatmul.mubr.msk.bf16.gmra.mrb[52].mxu1 %vm2281_vm3, %v2212_v45 }
 0x1ac   : > { %v2077_v49 = vpack.c.bf16 %v1765_v48, %v1762_v44 }
 0x1ad   : > { %v2150_v50 = vadd.bf16 %v10875_v28, %v2078_v47 }
 0x1ae   : > { %v2149_v51 = vadd.bf16 %v10875_v28, %v2077_v49 }
 0x1af   : > { %v2214_v55 = vmax.bf16 %v14311_v41, %v2150_v50 }
 0x1b0   : > { %v9936_v52 = vpop.f32.mrb[60].mxu0  ;;  %v2213_v53 = vmax.bf16 %v14311_v41, %v2149_v51 }
 0x1b1   : > { %v1778_v54 = vpop.f32.mrb[61].mxu0 }
 0x1b2   : > { %v9937_v56 = vpop.f32.mrb[62].mxu0  ;;  %10066 = vmatprep.mubr.msk.bf16.mxu1 %vm2281_vm3, %v2213_v53 }
 0x1b3   : > { %v2080_v57 = vpack.c.bf16 %v9937_v56, %v9936_v52  ;;  %v1781_v58 = vpop.f32.mrb[63].mxu0  ;;  %10067 = vmatmul.mubr.msk.bf16.gmra.mrb[56].mxu1 %vm2281_vm3, %v2214_v55 }
 0x1b4   : > { %v2079_v59 = vpack.c.bf16 %v1781_v58, %v1778_v54 }
 0x1b5   : > { %v2152_v60 = vadd.bf16 %v10875_v28, %v2080_v57 }
 0x1b6   : > { %v2151_v61 = vadd.bf16 %v10875_v28, %v2079_v59 }
 0x1b7   : > { %v2216_v62 = vmax.bf16 %v14311_v41, %v2152_v60 }
 0x1b8   : > { %v9940_v39 = vpop.f32.mrb[64].mxu0  ;;  %v2215_v42 = vmax.bf16 %v14311_v41, %v2151_v61 }
 0x1b9   : > { %v1794_v43 = vpop.f32.mrb[65].mxu0 }
 0x1ba   : > { %v9941_v63 = vpop.f32.mrb[66].mxu0  ;;  %10070 = vmatprep.mubr.msk.bf16.mxu1 %vm2281_vm3, %v2215_v42 }
 0x1bb   : > { %v2082_v0 = vpack.c.bf16 %v9941_v63, %v9940_v39  ;;  %v1797_v1 = vpop.f32.mrb[67].mxu0  ;;  %10071 = vmatmul.mubr.msk.bf16.gmra.mrb[60].mxu1 %vm2281_vm3, %v2216_v62 }
 0x1bc   : > { %v2081_v2 = vpack.c.bf16 %v1797_v1, %v1794_v43 }
 0x1bd   : > { %v2154_v3 = vadd.bf16 %v10875_v28, %v2082_v0 }
 0x1be   : > { %v2153_v4 = vadd.bf16 %v10875_v28, %v2081_v2 }
 0x1bf   : > { %v2218_v8 = vmax.bf16 %v14311_v41, %v2154_v3 }
 0x1c0   : > { %v9944_v5 = vpop.f32.mrb[68].mxu0  ;;  %v2217_v6 = vmax.bf16 %v14311_v41, %v2153_v4 }
 0x1c1   : > { %v1810_v7 = vpop.f32.mrb[69].mxu0 }
 0x1c2   : > { %v9945_v9 = vpop.f32.mrb[70].mxu0  ;;  %10074 = vmatprep.mubr.msk.bf16.mxu1 %vm2281_vm3, %v2217_v6 }
 0x1c3   : > { %v2084_v10 = vpack.c.bf16 %v9945_v9, %v9944_v5  ;;  %v1813_v11 = vpop.f32.mrb[71].mxu0  ;;  %10075 = vmatmul.mubr.msk.bf16.gmra.mrb[64].mxu1 %vm2281_vm3, %v2218_v8 }
 0x1c4   : > { %v2083_v12 = vpack.c.bf16 %v1813_v11, %v1810_v7 }
 0x1c5   : > { %v2156_v16 = vadd.bf16 %v10875_v28, %v2084_v10 }
 0x1c6   : > { %v2155_v20 = vadd.bf16 %v10875_v28, %v2083_v12 }
 0x1c7   : > { %v2220_v29 = vmax.bf16 %v14311_v41, %v2156_v16 }
 0x1c8   : > { %v9948_v24 = vpop.f32.mrb[72].mxu0  ;;  %v2219_v26 = vmax.bf16 %v14311_v41, %v2155_v20 }
 0x1c9   : > { %v1826_v27 = vpop.f32.mrb[73].mxu0 }
 0x1ca   : > { %v9949_v30 = vpop.f32.mrb[74].mxu0  ;;  %10078 = vmatprep.mubr.msk.bf16.mxu1 %vm2281_vm3, %v2219_v26 }
 0x1cb   : > { %v2086_v31 = vpack.c.bf16 %v9949_v30, %v9948_v24  ;;  %v1829_v32 = vpop.f32.mrb[75].mxu0  ;;  %10079 = vmatmul.mubr.msk.bf16.gmra.mrb[68].mxu1 %vm2281_vm3, %v2220_v29 }
 0x1cc   : > { %v2085_v33 = vpack.c.bf16 %v1829_v32, %v1826_v27 }
 0x1cd   : > { %v2158_v34 = vadd.bf16 %v10875_v28, %v2086_v31 }
 0x1ce   : > { %v2157_v35 = vadd.bf16 %v10875_v28, %v2085_v33 }
 0x1cf   : > { %v2222_v40 = vmax.bf16 %v14311_v41, %v2158_v34 }
 0x1d0   : > { %v9952_v36 = vpop.f32.mrb[76].mxu0  ;;  %v2221_v37 = vmax.bf16 %v14311_v41, %v2157_v35 }
 0x1d1   : > { %v1842_v38 = vpop.f32.mrb[77].mxu0 }
 0x1d2   : > { %v9953_v44 = vpop.f32.mrb[78].mxu0  ;;  %10082 = vmatprep.mubr.msk.bf16.mxu1 %vm2281_vm3, %v2221_v37 }
 0x1d3   : > { %v2088_v45 = vpack.c.bf16 %v9953_v44, %v9952_v36  ;;  %v1845_v46 = vpop.f32.mrb[79].mxu0  ;;  %10083 = vmatmul.mubr.msk.bf16.gmra.mrb[72].mxu1 %vm2281_vm3, %v2222_v40 }
 0x1d4   : > { %v2087_v47 = vpack.c.bf16 %v1845_v46, %v1842_v38 }
 0x1d5   : > { %v2160_v48 = vadd.bf16 %v10875_v28, %v2088_v45 }
 0x1d6   : > { %v2159_v49 = vadd.bf16 %v10875_v28, %v2087_v47 }
 0x1d7   : > { %v2224_v53 = vmax.bf16 %v14311_v41, %v2160_v48 }
 0x1d8   : > { %v9956_v50 = vpop.f32.mrb[80].mxu0  ;;  %v2223_v51 = vmax.bf16 %v14311_v41, %v2159_v49 }
 0x1d9   : > { %v1858_v52 = vpop.f32.mrb[81].mxu0 }
 0x1da   : > { %v9957_v54 = vpop.f32.mrb[82].mxu0  ;;  %10086 = vmatprep.mubr.msk.bf16.mxu1 %vm2281_vm3, %v2223_v51 }
 0x1db   : > { %v2090_v55 = vpack.c.bf16 %v9957_v54, %v9956_v50  ;;  %v1861_v56 = vpop.f32.mrb[83].mxu0  ;;  %10087 = vmatmul.mubr.msk.bf16.gmra.mrb[76].mxu1 %vm2281_vm3, %v2224_v53 }
 0x1dc   : > { %v2089_v57 = vpack.c.bf16 %v1861_v56, %v1858_v52 }
 0x1dd   : > { %v2162_v58 = vadd.bf16 %v10875_v28, %v2090_v55 }
 0x1de   : > { %v2161_v59 = vadd.bf16 %v10875_v28, %v2089_v57 }
 0x1df   : > { %v2226_v42 = vmax.bf16 %v14311_v41, %v2162_v58 }
 0x1e0   : > { %v9960_v60 = vpop.f32.mrb[84].mxu0  ;;  %v2225_v61 = vmax.bf16 %v14311_v41, %v2161_v59 }
 0x1e1   : > { %v1874_v39 = vpop.f32.mrb[85].mxu0 }
 0x1e2   : > { %v9961_v43 = vpop.f32.mrb[86].mxu0  ;;  %10090 = vmatprep.mubr.msk.bf16.mxu1 %vm2281_vm3, %v2225_v61 }
 0x1e3   : > { %v2092_v62 = vpack.c.bf16 %v9961_v43, %v9960_v60  ;;  %v1877_v63 = vpop.f32.mrb[87].mxu0  ;;  %10091 = vmatmul.mubr.msk.bf16.gmra.mrb[80].mxu1 %vm2281_vm3, %v2226_v42 }
 0x1e4   : > { %v2091_v0 = vpack.c.bf16 %v1877_v63, %v1874_v39 }
 0x1e5   : > { %v2164_v1 = vadd.bf16 %v10875_v28, %v2092_v62 }
 0x1e6   : > { %v2163_v2 = vadd.bf16 %v10875_v28, %v2091_v0 }
 0x1e7   : > { %v2228_v6 = vmax.bf16 %v14311_v41, %v2164_v1 }
 0x1e8   : > { %v9964_v3 = vpop.f32.mrb[88].mxu0  ;;  %v2227_v4 = vmax.bf16 %v14311_v41, %v2163_v2 }
 0x1e9   : > { %v1890_v5 = vpop.f32.mrb[89].mxu0 }
 0x1ea   : > { %v9965_v7 = vpop.f32.mrb[90].mxu0  ;;  %10094 = vmatprep.mubr.msk.bf16.mxu1 %vm2281_vm3, %v2227_v4 }
 0x1eb   : > { %v2094_v8 = vpack.c.bf16 %v9965_v7, %v9964_v3  ;;  %v1893_v9 = vpop.f32.mrb[91].mxu0  ;;  %10095 = vmatmul.mubr.msk.bf16.gmra.mrb[84].mxu1 %vm2281_vm3, %v2228_v6  ;;  %v3083_v3 = vld [vmem:[%s14274_s4] sm:$0x1] }
 0x1ec   : > { %v2093_v10 = vpack.c.bf16 %v1893_v9, %v1890_v5 }
 0x1ed   : > { %v2166_v11 = vadd.bf16 %v10875_v28, %v2094_v8  ;;  %v3085_v8 = vpack.i.b16 %v3083_v3, %v3083_v3 }
 0x1ee   : > { %v2165_v12 = vadd.bf16 %v10875_v28, %v2093_v10 }
 0x1ef   : > { %v2230_v23 = vmax.bf16 %v14311_v41, %v2166_v11 }
 0x1f0   : > { %v9968_v16 = vpop.f32.mrb[92].mxu0  ;;  %v2229_v18 = vmax.bf16 %v14311_v41, %v2165_v12 }
 0x1f1   : > { %v1906_v20 = vpop.f32.mrb[93].mxu0 }
 0x1f2   : > { %v9969_v24 = vpop.f32.mrb[94].mxu0  ;;  %10098 = vmatprep.mubr.msk.bf16.mxu1 %vm2281_vm3, %v2229_v18 }
 0x1f3   : > { %v2096_v26 = vpack.c.bf16 %v9969_v24, %v9968_v16  ;;  %v1909_v27 = vpop.f32.mrb[95].mxu0  ;;  %10099 = vmatmul.mubr.msk.bf16.gmra.mrb[88].mxu1 %vm2281_vm3, %v2230_v23 }
 0x1f4   : > { %v2095_v29 = vpack.c.bf16 %v1909_v27, %v1906_v20  ;;  %v11161_v20 = vrot.slane %v3085_v8, %v10871_v25 }
 0x1f5   : > { %v2168_v30 = vadd.bf16 %v10875_v28, %v2096_v26 }
 0x1f6   : > { %v2167_v31 = vadd.bf16 %v10875_v28, %v2095_v29 }
 0x1f7   : > { %v2232_v35 = vmax.bf16 %v14311_v41, %v2168_v30 }
 0x1f8   : > { %v9972_v32 = vpop.f32.mrb[96].mxu0  ;;  %v2231_v33 = vmax.bf16 %v14311_v41, %v2167_v31 }
 0x1f9   : > { %v1922_v34 = vpop.f32.mrb[97].mxu0 }
 0x1fa   : > { %v9973_v36 = vpop.f32.mrb[98].mxu0  ;;  %10102 = vmatprep.mubr.msk.bf16.mxu1 %vm2281_vm3, %v2231_v33 }
 0x1fb   : > { %v2098_v37 = vpack.c.bf16 %v9973_v36, %v9972_v32  ;;  %v1925_v38 = vpop.f32.mrb[99].mxu0  ;;  %10103 = vmatmul.mubr.msk.bf16.gmra.mrb[92].mxu1 %vm2281_vm3, %v2232_v35  ;;  %v3233_v35 = vld [vmem:[%s14275_s5 + $0x70] sm:$0xff] }
 0x1fc   : > { %v2097_v40 = vpack.c.bf16 %v1925_v38, %v1922_v34  ;;  %v3229_v34 = vld [vmem:[%s14275_s5 + $0x50] sm:$0xff] }
 0x1fd   : > { %v2170_v44 = vadd.bf16 %v10875_v28, %v2098_v37 }
 0x1fe   : > { %v2169_v45 = vadd.bf16 %v10875_v28, %v2097_v40 }
 0x1ff   : > { %v2234_v49 = vmax.bf16 %v14311_v41, %v2170_v44 }
 0x200   : > { %v9976_v46 = vpop.f32.mrb[100].mxu0  ;;  %v2233_v47 = vmax.bf16 %v14311_v41, %v2169_v45 }
 0x201   : > { %v1938_v48 = vpop.f32.mrb[101].mxu0 }
 0x202   : > { %v9977_v50 = vpop.f32.mrb[102].mxu0  ;;  %10106 = vmatprep.mubr.msk.bf16.mxu1 %vm2281_vm3, %v2233_v47 }
 0x203   : > { %v2100_v51 = vpack.c.bf16 %v9977_v50, %v9976_v46  ;;  %v1941_v52 = vpop.f32.mrb[103].mxu0  ;;  %10107 = vmatmul.mubr.msk.bf16.gmra.mrb[96].mxu1 %vm2281_vm3, %v2234_v49  ;;  %v9649_v46 = vcombine.high %v3229_v34, %v3233_v35 }
 0x204   : > { %v2099_v53 = vpack.c.bf16 %v1941_v52, %v1938_v48 }
 0x205   : > { %v2172_v54 = vadd.bf16 %v10875_v28, %v2100_v51 }
 0x206   : > { %v2171_v55 = vadd.bf16 %v10875_v28, %v2099_v53 }
 0x207   : > { %v2236_v59 = vmax.bf16 %v14311_v41, %v2172_v54 }
 0x208   : > { %v9980_v56 = vpop.f32.mrb[104].mxu0  ;;  %v2235_v57 = vmax.bf16 %v14311_v41, %v2171_v55  ;;  %v9648_v55 = vcombine.low %v3229_v34, %v3233_v35 }
 0x209   : > { %v1954_v58 = vpop.f32.mrb[105].mxu0 }
 0x20a   : > { %v9981_v60 = vpop.f32.mrb[106].mxu0  ;;  %10110 = vmatprep.mubr.msk.bf16.mxu1 %vm2281_vm3, %v2235_v57 }
 0x20b   : > { %v2102_v61 = vpack.c.bf16 %v9981_v60, %v9980_v56  ;;  %v1957_v39 = vpop.f32.mrb[107].mxu0  ;;  %10111 = vmatmul.mubr.msk.bf16.gmra.mrb[100].mxu1 %vm2281_vm3, %v2236_v59 }
 0x20c   : > { %v2101_v42 = vpack.c.bf16 %v1957_v39, %v1954_v58 }
 0x20d   : > { %v2174_v43 = vadd.bf16 %v10875_v28, %v2102_v61 }
 0x20e   : > { %v2173_v62 = vadd.bf16 %v10875_v28, %v2101_v42 }
 0x20f   : > { %v2238_v2 = vmax.bf16 %v14311_v41, %v2174_v43 }
 0x210   : > { %v9984_v63 = vpop.f32.mrb[108].mxu0  ;;  %v2237_v0 = vmax.bf16 %v14311_v41, %v2173_v62 }
 0x211   : > { %v1970_v1 = vpop.f32.mrb[109].mxu0 }
 0x212   : > { %v9985_v4 = vpop.f32.mrb[110].mxu0  ;;  %10114 = vmatprep.mubr.msk.bf16.mxu1 %vm2281_vm3, %v2237_v0 }
 0x213   : > { %v2104_v5 = vpack.c.bf16 %v9985_v4, %v9984_v63  ;;  %v1973_v6 = vpop.f32.mrb[111].mxu0  ;;  %10115 = vmatmul.mubr.msk.bf16.gmra.mrb[104].mxu1 %vm2281_vm3, %v2238_v2 }
 0x214   : > { %v2103_v7 = vpack.c.bf16 %v1973_v6, %v1970_v1 }
 0x215   : > { %v2176_v9 = vadd.bf16 %v10875_v28, %v2104_v5 }
 0x216   : > { %v2175_v10 = vadd.bf16 %v10875_v28, %v2103_v7  ;;  %v10012_v11 = vpop.f32.mrb[0].mxu1 }
 0x217   : > { %v2508_v12 = vpop.f32.mrb[1].mxu1  ;;  %v2240_v29 = vmax.bf16 %v14311_v41, %v2176_v9 }
 0x218   : > { %v9988_v16 = vpop.f32.mrb[112].mxu0  ;;  %v10013_v18 = vpop.f32.mrb[2].mxu1  ;;  %v2239_v23 = vmax.bf16 %v14311_v41, %v2175_v10 }
 0x219   : > { %v3020_v24 = vpack.c.bf16 %v10013_v18, %v10012_v11  ;;  %v1986_v26 = vpop.f32.mrb[113].mxu0  ;;  %v2511_v27 = vpop.f32.mrb[3].mxu1 }
 0x21a   : > { %v3019_v30 = vpack.c.bf16 %v2511_v27, %v2508_v12  ;;  %v9989_v31 = vpop.f32.mrb[114].mxu0  ;;  %10118 = vmatprep.mubr.msk.bf16.mxu1 %vm2281_vm3, %v2239_v23 }
 0x21b   : > { %v2106_v32 = vpack.c.bf16 %v9989_v31, %v9988_v16  ;;  %v1989_v33 = vpop.f32.mrb[115].mxu0  ;;  %10119 = vmatmul.mubr.msk.bf16.gmra.mrb[108].mxu1 %vm2281_vm3, %v2240_v29  ;;  %v3092_v56 = vadd.bf16 %v11161_v20, %v3020_v24 }
 0x21c   : > { %v3091_v36 = vadd.bf16 %v11161_v20, %v3019_v30  ;;  %v2105_v37 = vpack.c.bf16 %v1989_v33, %v1986_v26 }
 0x21d   : > { %v2178_v38 = vadd.bf16 %v10875_v28, %v2106_v32  ;;  %v11194_v14 = vmax.bf16 %v14311_v41, %v3092_v56  ;;  %v3230_v56 = vld [vmem:[%s14275_s5 + $0x58] sm:$0xff] }
 0x21e   : > { %v11176_v40 = vmax.bf16 %v14311_v41, %v3091_v36  ;;  %v2177_v44 = vadd.bf16 %v10875_v28, %v2105_v37  ;;  %v10016_v45 = vpop.f32.mrb[4].mxu1 }
 0x21f   : > { %v2524_v47 = vpop.f32.mrb[5].mxu1  ;;  %v2242_v54 = vmax.bf16 %v14311_v41, %v2178_v38  ;;  %14413 = vst [vmem:[#allocation11_spill] sm:$0xff] %v11194_v14 }
 0x220   : > { %14412 = vst [vmem:[#allocation10_spill] sm:$0xff] %v11176_v40  ;;  %v9992_v48 = vpop.f32.mrb[116].mxu0  ;;  %v10017_v49 = vpop.f32.mrb[6].mxu1  ;;  %3636 = vmatmul.mubr.bf16.vlgmr.msra.gmra.mrb[128].mxu0 %v11176_v40  ;;  %v2241_v50 = vmax.bf16 %v14311_v41, %v2177_v44 }
 0x221   : > { %v3022_v51 = vpack.c.bf16 %v10017_v49, %v10016_v45  ;;  %v2002_v52 = vpop.f32.mrb[117].mxu0  ;;  %v2527_v53 = vpop.f32.mrb[7].mxu1  ;;  %3645 = vmatprep.mubr.bf16.mxu0 %v14311_v41  ;;  %4950 = vmatpush1.bf16.msra.mxu0 %v9640_v17 }
 0x222   : > { %v3021_v57 = vpack.c.bf16 %v2527_v53, %v2524_v47  ;;  %v9993_v58 = vpop.f32.mrb[118].mxu0  ;;  %10122 = vmatprep.mubr.msk.bf16.mxu1 %vm2281_vm3, %v2241_v50  ;;  %4951 = vmatprep.subr.bf16.mxu0 %v9649_v46 }
 0x223   : > { %v2108_v59 = vpack.c.bf16 %v9993_v58, %v9992_v48  ;;  %v2005_v60 = vpop.f32.mrb[119].mxu0  ;;  %10123 = vmatmul.mubr.msk.bf16.gmra.mrb[112].mxu1 %vm2281_vm3, %v2242_v54  ;;  %v3094_v32 = vadd.bf16 %v11161_v20, %v3022_v51 }
 0x224   : > { %v2107_v61 = vpack.c.bf16 %v2005_v60, %v2002_v52  ;;  %v3093_v4 = vadd.bf16 %v11161_v20, %v3021_v57  ;;  %v3234_v57 = vld [vmem:[%s14275_s5 + $0x78] sm:$0xff] }
 0x225   : > { %v2180_v39 = vadd.bf16 %v10875_v28, %v2108_v59  ;;  %4952 = vmatpush1.bf16.msra.mxu0 %v9648_v55  ;;  %v11236_v46 = vmax.bf16 %v14311_v41, %v3094_v32 }
 0x226   : > { %v2179_v42 = vadd.bf16 %v10875_v28, %v2107_v61  ;;  %v11191_v13 = vpop.f32.mrb[8].mxu1  ;;  %v11212_v16 = vmax.bf16 %v14311_v41, %v3093_v4 }
 0x227   : > { %v2540_v17 = vpop.f32.mrb[9].mxu1  ;;  %v2244_v3 = vmax.bf16 %v14311_v41, %v2180_v39  ;;  %14415 = vst [vmem:[#allocation13_spill] sm:$0xff] %v11236_v46  ;;  %v9651_v39 = vcombine.high %v3230_v56, %v3234_v57 }
 0x228   : > { %v9996_v43 = vpop.f32.mrb[120].mxu0  ;;  %v11196_v62 = vpop.f32.mrb[10].mxu1  ;;  %3646 = vmatmul.mubr.bf16.gmra.mrb[132].mxu0 %v11194_v14  ;;  %v2243_v63 = vmax.bf16 %v14311_v41, %v2179_v42  ;;  %14414 = vst [vmem:[#allocation12_spill] sm:$0xff] %v11212_v16 }
 0x229   : > { %v3024_v0 = vpack.c.bf16 %v11196_v62, %v11191_v13  ;;  %v2018_v1 = vpop.f32.mrb[121].mxu0  ;;  %v2543_v2 = vpop.f32.mrb[11].mxu1  ;;  %3655 = vmatprep.mubr.bf16.mxu0 %v14311_v41  ;;  %v3237_v13 = vld [vmem:[%s14275_s5 + $0x90] sm:$0xff] }
 0x22a   : > { %v3023_v5 = vpack.c.bf16 %v2543_v2, %v2540_v17  ;;  %v9997_v6 = vpop.f32.mrb[122].mxu0  ;;  %10126 = vmatprep.mubr.msk.bf16.mxu1 %vm2281_vm3, %v2243_v63  ;;  %v3241_v62 = vld [vmem:[%s14275_s5 + $0xb0] sm:$0xff]  ;;  %v3242_v2 = vld [vmem:[%s14275_s5 + $0xb8] sm:$0xff] }
 0x22b   : > { %v2110_v7 = vpack.c.bf16 %v9997_v6, %v9996_v43  ;;  %v2021_v8 = vpop.f32.mrb[123].mxu0  ;;  %10127 = vmatmul.mubr.msk.bf16.gmra.mrb[116].mxu1 %vm2281_vm3, %v2244_v3  ;;  %v3096_v42 = vadd.bf16 %v11161_v20, %v3024_v0  ;;  %v9650_v43 = vcombine.low %v3230_v56, %v3234_v57  ;;  %v9657_v0 = vcombine.high %v3237_v13, %v3241_v62 }
 0x22c   : > { %v2109_v9 = vpack.c.bf16 %v2021_v8, %v2018_v1  ;;  %v3095_v52 = vadd.bf16 %v11161_v20, %v3023_v5  ;;  %v9658_v4 = vcombine.low %v3238_v15, %v3242_v2  ;;  %v9659_v5 = vcombine.high %v3238_v15, %v3242_v2 }
 0x22d   : > { %v2182_v10 = vadd.bf16 %v10875_v28, %v2110_v7  ;;  %v11291_v1 = vmax.bf16 %v14311_v41, %v3096_v42  ;;  %4953 = vmatprep.subr.bf16.mxu0 %v9657_v0 }
 0x22e   : > { %v2181_v11 = vadd.bf16 %v10875_v28, %v2109_v9  ;;  %v11209_v12 = vpop.f32.mrb[12].mxu1  ;;  %v11259_v55 = vmax.bf16 %v14311_v41, %v3095_v52 }
 0x22f   : > { %v11214_v18 = vpop.f32.mrb[13].mxu1  ;;  %v2246_v31 = vmax.bf16 %v14311_v41, %v2182_v10  ;;  %14417 = vst [vmem:[#allocation15_spill] sm:$0xff] %v11291_v1 }
 0x230   : > { %v10000_v23 = vpop.f32.mrb[124].mxu0  ;;  %v11216_v24 = vpop.f32.mrb[14].mxu1  ;;  %3656 = vmatmul.mubr.bf16.gmra.mrb[136].mxu0 %v11212_v16  ;;  %v2245_v26 = vmax.bf16 %v14311_v41, %v2181_v11  ;;  %14416 = vst [vmem:[#allocation14_spill] sm:$0xff] %v11259_v55 }
 0x231   : > { %v3026_v27 = vpack.c.bf16 %v11216_v24, %v11209_v12  ;;  %v2034_v29 = vpop.f32.mrb[125].mxu0  ;;  %v11222_v30 = vpop.f32.mrb[15].mxu1  ;;  %3665 = vmatprep.mubr.bf16.mxu0 %v14311_v41 }
 0x232   : > { %v3025_v33 = vpack.c.bf16 %v11222_v30, %v11214_v18  ;;  %v10001_v34 = vpop.f32.mrb[126].mxu0  ;;  %10130 = vmatprep.mubr.msk.bf16.mxu1 %vm2281_vm3, %v2245_v26 }
 0x233   : > { %v2112_v35 = vpack.c.bf16 %v10001_v34, %v10000_v23  ;;  %v2037_v36 = vpop.f32.mrb[127].mxu0  ;;  %10131 = vmatmul.mubr.msk.bf16.gmra.mrb[120].mxu1 %vm2281_vm3, %v2246_v31  ;;  %v3098_v30 = vadd.bf16 %v11161_v20, %v3026_v27 }
 0x234   : > { %v2111_v37 = vpack.c.bf16 %v2037_v36, %v2034_v29  ;;  %v3097_v8 = vadd.bf16 %v11161_v20, %v3025_v33 }
 0x235   : > { %v2184_v38 = vadd.bf16 %v10875_v28, %v2112_v35  ;;  %v11346_v33 = vmax.bf16 %v14311_v41, %v3098_v30 }
 0x236   : > { %v2183_v44 = vadd.bf16 %v10875_v28, %v2111_v37  ;;  %v11233_v45 = vpop.f32.mrb[16].mxu1  ;;  %v11323_v11 = vmax.bf16 %v14311_v41, %v3097_v8 }
 0x237   : > { %v11238_v47 = vpop.f32.mrb[17].mxu1  ;;  %v2248_v28 = vmax.bf16 %v14311_v41, %v2184_v38  ;;  %14419 = vst [vmem:[#allocation17_spill] sm:$0xff] %v11346_v33 }
 0x238   : > { %v11240_v48 = vpop.f32.mrb[18].mxu1  ;;  %3666 = vmatmul.mubr.bf16.gmra.mrb[140].mxu0 %v11236_v46  ;;  %v2247_v49 = vmax.bf16 %v14311_v41, %v2183_v44  ;;  %14418 = vst [vmem:[#allocation16_spill] sm:$0xff] %v11323_v11 }
 0x239   : > { %v3028_v50 = vpack.c.bf16 %v11240_v48, %v11233_v45  ;;  %v11246_v51 = vpop.f32.mrb[19].mxu1  ;;  %3675 = vmatprep.mubr.bf16.mxu0 %v14311_v41 }
 0x23a   : > { %v3027_v53 = vpack.c.bf16 %v11246_v51, %v11238_v47  ;;  %10134 = vmatprep.mubr.msk.bf16.mxu1 %vm2281_vm3, %v2247_v49 }
 0x23b   : > { %10135 = vmatmul.mubr.msk.bf16.gmra.mrb[124].mxu1 %vm2281_vm3, %v2248_v28  ;;  %v3100_v28 = vadd.bf16 %v11161_v20, %v3028_v50 }
 0x23c   : > { %4308 = vmatprep.mubr.bf16.mxu1 %v14311_v41  ;;  %v3099_v27 = vadd.bf16 %v11161_v20, %v3027_v53 }
 0x23d   : > { %v11392_v56 = vmax.bf16 %v14311_v41, %v3100_v28 }
 0x23e   : > { %v11256_v54 = vpop.f32.mrb[20].mxu1  ;;  %v11369_v38 = vmax.bf16 %v14311_v41, %v3099_v27 }
 0x23f   : > { %v11267_v58 = vpop.f32.mrb[21].mxu1  ;;  %14421 = vst [vmem:[#allocation19_spill] sm:$0xff] %v11392_v56 }
 0x240   : > { %v11269_v59 = vpop.f32.mrb[22].mxu1  ;;  %3676 = vmatmul.mubr.bf16.gmra.mrb[144].mxu0 %v11259_v55  ;;  %14420 = vst [vmem:[#allocation18_spill] sm:$0xff] %v11369_v38 }
 0x241   : > { %v3030_v60 = vpack.c.bf16 %v11269_v59, %v11256_v54  ;;  %v11274_v61 = vpop.f32.mrb[23].mxu1  ;;  %3685 = vmatprep.mubr.bf16.mxu0 %v14311_v41  ;;  %v3245_v54 = vld [vmem:[%s14275_s5 + $0xd0] sm:$0xff] }
 0x242   : > { %v3029_v17 = vpack.c.bf16 %v11274_v61, %v11267_v58 }
 0x243   : > { %4309 = vmatmul.mubr.bf16.vlgmr.msra.gmra.mrb[128].mxu1 %v11176_v40 }
 0x244   : > { %5623 = vmatpush1.bf16.msra.mxu1 %v9642_v22  ;;  %4318 = vmatprep.mubr.bf16.mxu1 %v14311_v41  ;;  %v9656_v22 = vcombine.low %v3237_v13, %v3241_v62  ;;  %v3101_v50 = vadd.bf16 %v11161_v20, %v3029_v17  ;;  %v3102_v17 = vadd.bf16 %v11161_v20, %v3030_v60 }
 0x245   : > { %5624 = vmatprep.subr.bf16.mxu1 %v9651_v39 }
 0x246   : > { %v11288_v63 = vpop.f32.mrb[24].mxu1  ;;  %4954 = vmatpush1.bf16.msra.mxu0 %v9656_v22  ;;  %v11415_v13 = vmax.bf16 %v14311_v41, %v3101_v50  ;;  %v11438_v2 = vmax.bf16 %v14311_v41, %v3102_v17 }
 0x247   : > { %v11302_v19 = vpop.f32.mrb[25].mxu1 }
 0x248   : > { %v11307_v3 = vpop.f32.mrb[26].mxu1  ;;  %3686 = vmatmul.mubr.bf16.gmra.mrb[148].mxu0 %v11291_v1  ;;  %5625 = vmatpush1.bf16.msra.mxu1 %v9650_v43  ;;  %14422 = vst [vmem:[#allocation20_spill] sm:$0xff] %v11415_v13  ;;  %14423 = vst [vmem:[#allocation21_spill] sm:$0xff] %v11438_v2 }
 0x249   : > { %v3032_v6 = vpack.c.bf16 %v11307_v3, %v11288_v63  ;;  %v11312_v7 = vpop.f32.mrb[27].mxu1  ;;  %3695 = vmatprep.mubr.bf16.mxu0 %v14311_v41  ;;  %5626 = vmatprep.subr.bf16.mxu1 %v9659_v5  ;;  %v3249_v63 = vld [vmem:[%s14275_s5 + $0xf0] sm:$0xff]  ;;  %v3246_v3 = vld [vmem:[%s14275_s5 + $0xd8] sm:$0xff] }
 0x24a   : > { %v3031_v9 = vpack.c.bf16 %v11312_v7, %v11302_v19  ;;  %v9664_v17 = vcombine.low %v3245_v54, %v3249_v63  ;;  %v9665_v8 = vcombine.high %v3245_v54, %v3249_v63 }
 0x24b   : > { %4319 = vmatmul.mubr.bf16.gmra.mrb[132].mxu1 %v11194_v14 }
 0x24c   : > { %4328 = vmatprep.mubr.bf16.mxu1 %v14311_v41  ;;  %5627 = vmatpush1.bf16.msra.mxu1 %v9658_v4  ;;  %v3103_v60 = vadd.bf16 %v11161_v20, %v3031_v9  ;;  %v3104_v9 = vadd.bf16 %v11161_v20, %v3032_v6 }
 0x24d   : > { %4955 = vmatprep.subr.bf16.mxu0 %v9665_v8 }
 0x24e   : > { %v11320_v10 = vpop.f32.mrb[28].mxu1  ;;  %v11461_v27 = vmax.bf16 %v14311_v41, %v3103_v60  ;;  %v11484_v19 = vmax.bf16 %v14311_v41, %v3104_v9  ;;  %v3250_v9 = vld [vmem:[%s14275_s5 + $0xf8] sm:$0xff]  ;;  %4956 = vmatpush1.bf16.msra.mxu0 %v9664_v17 }
 0x24f   : > { %v11325_v18 = vpop.f32.mrb[29].mxu1  ;;  %v9666_v22 = vcombine.low %v3246_v3, %v3250_v9  ;;  %v9667_v45 = vcombine.high %v3246_v3, %v3250_v9 }
 0x250   : > { %v11327_v23 = vpop.f32.mrb[30].mxu1  ;;  %3696 = vmatmul.mubr.bf16.gmra.mrb[152].mxu0 %v11323_v11  ;;  %14424 = vst [vmem:[#allocation22_spill] sm:$0xff] %v11461_v27  ;;  %14425 = vst [vmem:[#allocation23_spill] sm:$0xff] %v11484_v19 }
 0x251   : > { %v3034_v26 = vpack.c.bf16 %v11327_v23, %v11320_v10  ;;  %v11332_v29 = vpop.f32.mrb[31].mxu1  ;;  %3705 = vmatprep.mubr.bf16.mxu0 %v14311_v41  ;;  %5628 = vmatprep.subr.bf16.mxu1 %v9667_v45 }
 0x252   : > { %v3033_v31 = vpack.c.bf16 %v11332_v29, %v11325_v18  ;;  %5629 = vmatpush1.bf16.msra.mxu1 %v9666_v22 }
 0x253   : > { %4329 = vmatmul.mubr.bf16.gmra.mrb[136].mxu1 %v11212_v16  ;;  %v3106_v45 = vadd.bf16 %v11161_v20, %v3034_v26 }
 0x254   : > { %4338 = vmatprep.mubr.bf16.mxu1 %v14311_v41  ;;  %v3105_v54 = vadd.bf16 %v11161_v20, %v3033_v31 }
 0x256   : > { %v11343_v32 = vpop.f32.mrb[32].mxu1  ;;  %v11519_v9 = vmax.bf16 %v14311_v41, %v3105_v54  ;;  %v11542_v54 = vmax.bf16 %v14311_v41, %v3106_v45 }
 0x257   : > { %v11348_v34 = vpop.f32.mrb[33].mxu1 }
 0x258   : > { %v11350_v35 = vpop.f32.mrb[34].mxu1  ;;  %3706 = vmatmul.mubr.bf16.gmra.mrb[156].mxu0 %v11346_v33  ;;  %14426 = vst [vmem:[#allocation24_spill] sm:$0xff] %v11519_v9  ;;  %14427 = vst [vmem:[#allocation25_spill] sm:$0xff] %v11542_v54 }
 0x259   : > { %v3036_v12 = vpack.c.bf16 %v11350_v35, %v11343_v32  ;;  %v11355_v24 = vpop.f32.mrb[35].mxu1  ;;  %3715 = vmatprep.mubr.bf16.mxu0 %v14311_v41 }
 0x25a   : > { %v3035_v36 = vpack.c.bf16 %v11355_v24, %v11348_v34 }
 0x25b   : > { %4339 = vmatmul.mubr.bf16.gmra.mrb[140].mxu1 %v11236_v46 }
 0x25c   : > { %4348 = vmatprep.mubr.bf16.mxu1 %v14311_v41  ;;  %v3107_v26 = vadd.bf16 %v11161_v20, %v3035_v36  ;;  %v3108_v36 = vadd.bf16 %v11161_v20, %v3036_v12 }
 0x25e   : > { %v11366_v37 = vpop.f32.mrb[36].mxu1  ;;  %v11565_v10 = vmax.bf16 %v14311_v41, %v3107_v26  ;;  %v11588_v34 = vmax.bf16 %v14311_v41, %v3108_v36 }
 0x25f   : > { %v11371_v44 = vpop.f32.mrb[37].mxu1 }
 0x260   : > { %v11373_v49 = vpop.f32.mrb[38].mxu1  ;;  %3716 = vmatmul.mubr.bf16.gmra.mrb[160].mxu0 %v11369_v38  ;;  %14428 = vst [vmem:[#allocation26_spill] sm:$0xff] %v11565_v10  ;;  %14429 = vst [vmem:[#allocation27_spill] sm:$0xff] %v11588_v34 }
 0x261   : > { %v11378_v51 = vpop.f32.mrb[39].mxu1  ;;  %3725 = vmatprep.mubr.bf16.mxu0 %v14311_v41 }
 0x262   : > { %v14430_v12 = vpack.c.bf16 %v11378_v51, %v11371_v44 }
 0x263   : > { %4349 = vmatmul.mubr.bf16.gmra.mrb[144].mxu1 %v11259_v55 }
 0x264   : > { %4358 = vmatprep.mubr.bf16.mxu1 %v14311_v41  ;;  %v3109_v26 = vadd.bf16 %v11161_v20, %v14430_v12  ;;  %v14432_v12 = vpack.c.bf16 %v11373_v49, %v11366_v37 }
 0x266   : > { %v11389_v53 = vpop.f32.mrb[40].mxu1  ;;  %v11611_v32 = vmax.bf16 %v14311_v41, %v3109_v26  ;;  %v3110_v36 = vadd.bf16 %v11161_v20, %v14432_v12 }
 0x267   : > { %v11394_v57 = vpop.f32.mrb[41].mxu1 }
 0x268   : > { %v11396_v39 = vpop.f32.mrb[42].mxu1  ;;  %3726 = vmatmul.mubr.bf16.gmra.mrb[164].mxu0 %v11392_v56  ;;  %14431 = vst [vmem:[#allocation28_spill] sm:$0xff] %v11611_v32  ;;  %v11634_v44 = vmax.bf16 %v14311_v41, %v3110_v36 }
 0x269   : > { %v11401_v48 = vpop.f32.mrb[43].mxu1  ;;  %3735 = vmatprep.mubr.bf16.mxu0 %v14311_v41 }
 0x26a   : > { %14433 = vst [vmem:[#allocation29_spill] sm:$0xff] %v11634_v44  ;;  %v14434_v12 = vpack.c.bf16 %v11401_v48, %v11394_v57 }
 0x26b   : > { %4359 = vmatmul.mubr.bf16.gmra.mrb[148].mxu1 %v11291_v1 }
 0x26c   : > { %4368 = vmatprep.mubr.bf16.mxu1 %v14311_v41  ;;  %v3111_v26 = vadd.bf16 %v11161_v20, %v14434_v12  ;;  %v14436_v12 = vpack.c.bf16 %v11396_v39, %v11389_v53  ;;  %v3257_v53 = vld [vmem:[%s14275_s5 + $0x130] sm:$0xff] }
 0x26e   : > { %v11412_v43 = vpop.f32.mrb[44].mxu1  ;;  %v11657_v37 = vmax.bf16 %v14311_v41, %v3111_v26  ;;  %v3112_v36 = vadd.bf16 %v11161_v20, %v14436_v12 }
 0x26f   : > { %v11417_v62 = vpop.f32.mrb[45].mxu1 }
 0x270   : > { %v11419_v15 = vpop.f32.mrb[46].mxu1  ;;  %3736 = vmatmul.mubr.bf16.gmra.mrb[168].mxu0 %v11415_v13  ;;  %14435 = vst [vmem:[#allocation30_spill] sm:$0xff] %v11657_v37  ;;  %v11680_v57 = vmax.bf16 %v14311_v41, %v3112_v36  ;;  %v3258_v36 = vld [vmem:[%s14275_s5 + $0x138] sm:$0xff] }
 0x271   : > { %v11424_v61 = vpop.f32.mrb[47].mxu1  ;;  %3745 = vmatprep.mubr.bf16.mxu0 %v14311_v41 }
 0x272   : > { %14438 = vst [vmem:[#allocation32_spill] sm:$0xff] %v11680_v57  ;;  %v14441_v12 = vpack.c.bf16 %v11424_v61, %v11417_v62  ;;  %v14442_v62 = vmov 0  }
 0x273   : > { %4369 = vmatmul.mubr.bf16.gmra.mrb[152].mxu1 %v11323_v11 }
 0x274   : > { %4378 = vmatprep.mubr.bf16.mxu1 %v14311_v41  ;;  %v3113_v26 = vadd.bf16 %v11161_v20, %v14441_v12 }
 0x276   : > { %v11435_v0 = vpop.f32.mrb[48].mxu1 }
 0x277   : > { %v11440_v4 = vpop.f32.mrb[49].mxu1 }
 0x278   : > { %v11442_v5 = vpop.f32.mrb[50].mxu1  ;;  %3746 = vmatmul.mubr.bf16.gmra.mrb[172].mxu0 %v11438_v2 }
 0x279   : > { %v11447_v59 = vpop.f32.mrb[51].mxu1  ;;  %3755 = vmatprep.mubr.bf16.mxu0 %v14311_v41 }
 0x27b   : > { %4379 = vmatmul.mubr.bf16.gmra.mrb[156].mxu1 %v11346_v33 }
 0x27c   : > { %4388 = vmatprep.mubr.bf16.mxu1 %v14311_v41 }
 0x27e   : > { %v11458_v30 = vpop.f32.mrb[52].mxu1 }
 0x27f   : > { %v11463_v28 = vpop.f32.mrb[53].mxu1 }
 0x280   : > { %v11465_v50 = vpop.f32.mrb[54].mxu1  ;;  %3756 = vmatmul.mubr.bf16.gmra.mrb[176].mxu0 %v11461_v27 }
 0x281   : > { %v11470_v7 = vpop.f32.mrb[55].mxu1  ;;  %3765 = vmatprep.mubr.bf16.mxu0 %v14311_v41 }
 0x283   : > { %4389 = vmatmul.mubr.bf16.gmra.mrb[160].mxu1 %v11369_v38 }
 0x284   : > { %4398 = vmatprep.mubr.bf16.mxu1 %v14311_v41 }
 0x286   : > { %v11481_v60 = vpop.f32.mrb[56].mxu1 }
 0x287   : > { %v11495_v6 = vpop.f32.mrb[57].mxu1 }
 0x288   : > { %v11500_v58 = vpop.f32.mrb[58].mxu1  ;;  %3766 = vmatmul.mubr.bf16.gmra.mrb[180].mxu0 %v11484_v19 }
 0x289   : > { %v11505_v47 = vpop.f32.mrb[59].mxu1  ;;  %3775 = vmatprep.mubr.bf16.mxu0 %v14311_v41 }
 0x28b   : > { %4399 = vmatmul.mubr.bf16.gmra.mrb[164].mxu1 %v11392_v56 }
 0x28c   : > { %4408 = vmatprep.mubr.bf16.mxu1 %v14311_v41 }
 0x28e   : > { %v11516_v3 = vpop.f32.mrb[60].mxu1 }
 0x28f   : > { %v11521_v8 = vpop.f32.mrb[61].mxu1 }
 0x290   : > { %v11523_v18 = vpop.f32.mrb[62].mxu1  ;;  %3776 = vmatmul.mubr.bf16.gmra.mrb[184].mxu0 %v11519_v9 }
 0x291   : > { %v11528_v31 = vpop.f32.mrb[63].mxu1  ;;  %3785 = vmatprep.mubr.bf16.mxu0 %v14311_v41 }
 0x293   : > { %4409 = vmatmul.mubr.bf16.gmra.mrb[168].mxu1 %v11415_v13 }
 0x294   : > { %4418 = vmatprep.mubr.bf16.mxu1 %v14311_v41 }
 0x296   : > { %v11539_v17 = vpop.f32.mrb[64].mxu1 }
 0x297   : > { %v11544_v29 = vpop.f32.mrb[65].mxu1 }
 0x298   : > { %v11546_v42 = vpop.f32.mrb[66].mxu1  ;;  %3786 = vmatmul.mubr.bf16.gmra.mrb[188].mxu0 %v11542_v54 }
 0x299   : > { %v11551_v23 = vpop.f32.mrb[67].mxu1  ;;  %3795 = vmatprep.mubr.bf16.mxu0 %v14311_v41 }
 0x29b   : > { %4419 = vmatmul.mubr.bf16.gmra.mrb[172].mxu1 %v11438_v2 }
 0x29c   : > { %4428 = vmatprep.mubr.bf16.mxu1 %v14311_v41 }
 0x29e   : > { %v11562_v22 = vpop.f32.mrb[68].mxu1 }
 0x29f   : > { %v11567_v63 = vpop.f32.mrb[69].mxu1 }
 0x2a0   : > { %v11569_v52 = vpop.f32.mrb[70].mxu1  ;;  %3796 = vmatmul.mubr.bf16.gmra.mrb[192].mxu0 %v11565_v10 }
 0x2a1   : > { %v11574_v24 = vpop.f32.mrb[71].mxu1  ;;  %3805 = vmatprep.mubr.bf16.mxu0 %v14311_v41 }
 0x2a3   : > { %4429 = vmatmul.mubr.bf16.gmra.mrb[176].mxu1 %v11461_v27 }
 0x2a4   : > { %4438 = vmatprep.mubr.bf16.mxu1 %v14311_v41 }
 0x2a6   : > { %v11585_v45 = vpop.f32.mrb[72].mxu1 }
 0x2a7   : > { %v11590_v2 = vpop.f32.mrb[73].mxu1 }
 0x2a8   : > { %v11592_v13 = vpop.f32.mrb[74].mxu1  ;;  %3806 = vmatmul.mubr.bf16.gmra.mrb[196].mxu0 %v11588_v34 }
 0x2a9   : > { %v11597_v35 = vpop.f32.mrb[75].mxu1  ;;  %3815 = vmatprep.mubr.bf16.mxu0 %v14311_v41 }
 0x2ab   : > { %4439 = vmatmul.mubr.bf16.gmra.mrb[180].mxu1 %v11484_v19 }
 0x2ac   : > { %4448 = vmatprep.mubr.bf16.mxu1 %v14311_v41 }
 0x2ae   : > { %v11608_v27 = vpop.f32.mrb[76].mxu1 }
 0x2af   : > { %v11613_v56 = vpop.f32.mrb[77].mxu1 }
 0x2b0   : > { %v11615_v38 = vpop.f32.mrb[78].mxu1  ;;  %3816 = vmatmul.mubr.bf16.gmra.mrb[200].mxu0 %v11611_v32 }
 0x2b1   : > { %v11620_v51 = vpop.f32.mrb[79].mxu1  ;;  %3825 = vmatprep.mubr.bf16.mxu0 %v14311_v41 }
 0x2b3   : > { %4449 = vmatmul.mubr.bf16.gmra.mrb[184].mxu1 %v11519_v9 }
 0x2b4   : > { %4458 = vmatprep.mubr.bf16.mxu1 %v14311_v41 }
 0x2b6   : > { %v11631_v19 = vpop.f32.mrb[80].mxu1 }
 0x2b7   : > { %v11636_v33 = vpop.f32.mrb[81].mxu1 }
 0x2b8   : > { %v11638_v11 = vpop.f32.mrb[82].mxu1  ;;  %3826 = vmatmul.mubr.bf16.gmra.mrb[204].mxu0 %v11634_v44 }
 0x2b9   : > { %v11643_v49 = vpop.f32.mrb[83].mxu1  ;;  %3835 = vmatprep.mubr.bf16.mxu0 %v14311_v41 }
 0x2bb   : > { %4459 = vmatmul.mubr.bf16.gmra.mrb[188].mxu1 %v11542_v54 }
 0x2bc   : > { %4468 = vmatprep.mubr.bf16.mxu1 %v14311_v41 }
 0x2be   : > { %v11654_v9 = vpop.f32.mrb[84].mxu1 }
 0x2bf   : > { %v11659_v1 = vpop.f32.mrb[85].mxu1 }
 0x2c0   : > { %v11661_v55 = vpop.f32.mrb[86].mxu1  ;;  %3836 = vmatmul.mubr.bf16.gmra.mrb[208].mxu0 %v11657_v37 }
 0x2c1   : > { %v11666_v48 = vpop.f32.mrb[87].mxu1  ;;  %3845 = vmatprep.mubr.bf16.mxu0 %v14311_v41 }
 0x2c3   : > { %4469 = vmatmul.mubr.bf16.gmra.mrb[192].mxu1 %v11565_v10  ;;  %v3253_v10 = vld [vmem:[%s14275_s5 + $0x110] sm:$0xff] }
 0x2c4   : > { %4478 = vmatprep.mubr.bf16.mxu1 %v14311_v41  ;;  %v9672_v61 = vcombine.low %v3253_v10, %v3257_v53  ;;  %v9673_v12 = vcombine.high %v3253_v10, %v3257_v53 }
 0x2c6   : > { %v11677_v54 = vpop.f32.mrb[88].mxu1  ;;  %4957 = vmatprep.subr.bf16.mxu0 %v9673_v12 }
 0x2c7   : > { %14437 = vst [vmem:[#allocation31_spill] sm:$0xff] %v11677_v54  ;;  %v11682_v46 = vpop.f32.mrb[89].mxu1  ;;  %v11715_v54 = vmax.bf16 %v14442_v62, %v3113_v26  ;;  %4958 = vmatpush1.bf16.msra.mxu0 %v9672_v61 }
 0x2c8   : > { %14439 = vst [vmem:[#allocation33_spill] sm:$0xff] %v11682_v46  ;;  %v11684_v16 = vpop.f32.mrb[90].mxu1  ;;  %3846 = vmatmul.mubr.bf16.gmra.mrb[212].mxu0 %v11680_v57 }
 0x2c9   : > { %14440 = vst [vmem:[#allocation34_spill] sm:$0xff] %v11684_v16  ;;  %v11689_v39 = vpop.f32.mrb[91].mxu1  ;;  %3855 = vmatprep.mubr.bf16.mxu0 %v14311_v41  ;;  %v3254_v41 = vld [vmem:[%s14275_s5 + $0x118] sm:$0xff]  ;;  %14444 = vst [vmem:[#allocation36_spill] sm:$0xff] %v11715_v54 }
 0x2ca   : > { %v9675_v14 = vcombine.high %v3254_v41, %v3258_v36 }
 0x2cb   : > { %4479 = vmatmul.mubr.bf16.gmra.mrb[196].mxu1 %v11588_v34  ;;  %v9674_v34 = vcombine.low %v3254_v41, %v3258_v36  ;;  %v14445_v41 = vpack.c.bf16 %v11419_v15, %v11412_v43 }
 0x2cc   : > { %4488 = vmatprep.mubr.bf16.mxu1 %v14442_v62  ;;  %5630 = vmatprep.subr.bf16.mxu1 %v9675_v14 }
 0x2cd   : > { %5631 = vmatpush1.bf16.msra.mxu1 %v9674_v34  ;;  %v3114_v26 = vadd.bf16 %v11161_v20, %v14445_v41  ;;  %v14450_v41 = vpack.c.bf16 %v11447_v59, %v11440_v4 }
 0x2ce   : > { %v11712_v40 = vpop.f32.mrb[92].mxu1 }
 0x2cf   : > { %14443 = vst [vmem:[#allocation35_spill] sm:$0xff] %v11712_v40  ;;  %v11717_v16 = vpop.f32.mrb[93].mxu1  ;;  %v11738_v36 = vmax.bf16 %v14442_v62, %v3114_v26  ;;  %v3115_v10 = vadd.bf16 %v11161_v20, %v14450_v41  ;;  %v14456_v41 = vpack.c.bf16 %v11442_v5, %v11435_v0  ;;  %v10299_v5 = vld.sshfl [vmem:[%s14276_s6] sm:$0xff pattern:$0x75316420] }
 0x2d0   : > { %v11719_v46 = vpop.f32.mrb[94].mxu1  ;;  %3856 = vmatmul.mubr.bf16.gmra.mrb[216].mxu0 %v11715_v54 }
 0x2d1   : > { %v11724_v53 = vpop.f32.mrb[95].mxu1  ;;  %3865 = vmatprep.mubr.bf16.mxu0 %v14442_v62  ;;  %14447 = vst [vmem:[#allocation38_spill] sm:$0xff] %v11738_v36  ;;  %v11761_v43 = vmax.bf16 %v14442_v62, %v3115_v10  ;;  %v3116_v10 = vadd.bf16 %v11161_v20, %v14456_v41 }
 0x2d3   : > { %4489 = vmatmul.mubr.bf16.gmra.mrb[200].mxu1 %v11611_v32  ;;  %14452 = vst [vmem:[#allocation42_spill] sm:$0xff] %v11761_v43  ;;  %v10415_v32 = vmov 1966171168   ;;  %v11784_v4 = vmax.bf16 %v14442_v62, %v3116_v10 }
 0x2d4   : > { %4498 = vmatprep.mubr.bf16.mxu1 %v14442_v62 }
 0x2d5   : > { %14458 = vst [vmem:[#allocation47_spill] sm:$0xff] %v11784_v4 }
 0x2d6   : > { %v11735_v34 = vpop.f32.mrb[96].mxu1 }
 0x2d7   : > { %14446 = vst [vmem:[#allocation37_spill] sm:$0xff] %v11735_v34  ;;  %v11740_v61 = vpop.f32.mrb[97].mxu1  ;;  %v6811_v34 = vunpack.c.l.s4 %v10415_v32 }
 0x2d8   : > { %14448 = vst [vmem:[#allocation39_spill] sm:$0xff] %v11740_v61  ;;  %v11742_v12 = vpop.f32.mrb[98].mxu1  ;;  %3866 = vmatmul.mubr.bf16.gmra.mrb[220].mxu0 %v11738_v36 }
 0x2d9   : > { %14449 = vst [vmem:[#allocation40_spill] sm:$0xff] %v11742_v12  ;;  %v11747_v15 = vpop.f32.mrb[99].mxu1  ;;  %3875 = vmatprep.mubr.bf16.mxu0 %v14442_v62  ;;  %v6812_v26 = vunpack.c.0.s8 %v6811_v34 }
 0x2db   : > { %4499 = vmatmul.mubr.bf16.gmra.mrb[204].mxu1 %v11634_v44 }
 0x2dc   : > { %4508 = vmatprep.mubr.bf16.mxu1 %v14442_v62 }
 0x2de   : > { %v11758_v14 = vpop.f32.mrb[100].mxu1 }
 0x2df   : > { %14451 = vst [vmem:[#allocation41_spill] sm:$0xff] %v11758_v14  ;;  %v11763_v12 = vpop.f32.mrb[101].mxu1  ;;  %v11787_v14 = vsub.s32 %v6812_v26, %v10863_v21  ;;  %v14463_v21 = vpack.c.bf16 %v11470_v7, %v11463_v28 }
 0x2e0   : > { %14453 = vst [vmem:[#allocation43_spill] sm:$0xff] %v11763_v12  ;;  %v11765_v40 = vpop.f32.mrb[102].mxu1  ;;  %3876 = vmatmul.mubr.bf16.gmra.mrb[224].mxu0 %v11761_v43 }
 0x2e1   : > { %14454 = vst [vmem:[#allocation44_spill] sm:$0xff] %v11765_v40  ;;  %v11770_v59 = vpop.f32.mrb[103].mxu1  ;;  %3885 = vmatprep.mubr.bf16.mxu0 %v14442_v62  ;;  %14459 = vst [vmem:[#allocation48_spill] sm:$0xff] %v11787_v14  ;;  %v3117_v26 = vadd.bf16 %v11161_v20, %v14463_v21  ;;  %v14469_v21 = vpack.c.bf16 %v11465_v50, %v11458_v30 }
 0x2e2   : > { %14455 = vst [vmem:[#allocation45_spill] sm:$0xff] %v11770_v59 }
 0x2e3   : > { %4509 = vmatmul.mubr.bf16.gmra.mrb[208].mxu1 %v11657_v37  ;;  %v11813_v34 = vmax.bf16 %v14442_v62, %v3117_v26  ;;  %v3118_v26 = vadd.bf16 %v11161_v20, %v14469_v21 }
 0x2e4   : > { %4518 = vmatprep.mubr.bf16.mxu1 %v14442_v62 }
 0x2e5   : > { %14465 = vst [vmem:[#allocation53_spill] sm:$0xff] %v11813_v34 }
 0x2e6   : > { %v11781_v44 = vpop.f32.mrb[104].mxu1 }
 0x2e7   : > { %14457 = vst [vmem:[#allocation46_spill] sm:$0xff] %v11781_v44  ;;  %v11789_v40 = vpop.f32.mrb[105].mxu1  ;;  %v6824_v44 = vcombine.high %v10299_v5, %v10299_v5 }
 0x2e8   : > { %14460 = vst [vmem:[#allocation49_spill] sm:$0xff] %v11789_v40  ;;  %v11791_v0 = vpop.f32.mrb[106].mxu1  ;;  %3886 = vmatmul.mubr.bf16.gmra.mrb[228].mxu0 %v11784_v4 }
 0x2e9   : > { %14461 = vst [vmem:[#allocation50_spill] sm:$0xff] %v11791_v0  ;;  %v11799_v41 = vpop.f32.mrb[107].mxu1  ;;  %3895 = vmatprep.mubr.bf16.mxu0 %v14442_v62  ;;  %v11836_v28 = vrot.slane %v6824_v44, %v11787_v14 }
 0x2ea   : > { %14462 = vst [vmem:[#allocation51_spill] sm:$0xff] %v11799_v41 }
 0x2eb   : > { %4519 = vmatmul.mubr.bf16.gmra.mrb[212].mxu1 %v11680_v57  ;;  %v11832_v57 = vrot.slane %v10299_v5, %v11787_v14  ;;  %v11844_v5 = vmax.bf16 %v14442_v62, %v3118_v26  ;;  %v14475_v26 = vpack.c.bf16 %v11505_v47, %v11495_v6 }
 0x2ec   : > { %4528 = vmatprep.mubr.bf16.mxu1 %v14442_v62 }
 0x2ed   : > { %v6859_v30 = vpack.i.b16 %v11832_v57, %v11832_v57  ;;  %14471 = vst [vmem:[#allocation58_spill] sm:$0xff] %v11844_v5 }
 0x2ee   : > { %v11810_v32 = vpop.f32.mrb[108].mxu1 }
 0x2ef   : > { %14464 = vst [vmem:[#allocation52_spill] sm:$0xff] %v11810_v32  ;;  %v11815_v37 = vpop.f32.mrb[109].mxu1 }
 0x2f0   : > { %14466 = vst [vmem:[#allocation54_spill] sm:$0xff] %v11815_v37  ;;  %v11817_v0 = vpop.f32.mrb[110].mxu1  ;;  %3896 = vmatmul.mubr.bf16.gmra.mrb[232].mxu0 %v11813_v34 }
 0x2f1   : > { %14467 = vst [vmem:[#allocation55_spill] sm:$0xff] %v11817_v0  ;;  %v11822_v7 = vpop.f32.mrb[111].mxu1  ;;  %3905 = vmatprep.mubr.bf16.mxu0 %v14442_v62 }
 0x2f2   : > { %14468 = vst [vmem:[#allocation56_spill] sm:$0xff] %v11822_v7 }
 0x2f3   : > { %v3637_v40 = vpop.f32.mrb[128].mxu0  ;;  %4529 = vmatmul.mubr.bf16.gmra.mrb[216].mxu1 %v11715_v54  ;;  %v6866_v54 = vpack.i.b16 %v11836_v28, %v11836_v28 }
 0x2f4   : > { %v3639_v32 = vpop.f32.mrb[129].mxu0  ;;  %4538 = vmatprep.mubr.bf16.mxu1 %v14442_v62 }
 0x2f5   : > { %v3641_v0 = vpop.f32.mrb[130].mxu0  ;;  %v11868_v7 = vrot.slane %v6866_v54, %v10871_v25 }
 0x2f6   : > { %v6295_v41 = vpack.c.bf16 %v3641_v0, %v3637_v40  ;;  %v11841_v50 = vpop.f32.mrb[112].mxu1  ;;  %v3643_v21 = vpop.f32.mrb[131].mxu0 }
 0x2f7   : > { %14470 = vst [vmem:[#allocation57_spill] sm:$0xff] %v11841_v50  ;;  %v6296_v10 = vpack.c.bf16 %v3643_v21, %v3639_v32  ;;  %v11848_v44 = vpop.f32.mrb[113].mxu1  ;;  %v3119_v32 = vadd.bf16 %v11161_v20, %v14475_v26  ;;  %v11863_v21 = vrot.slane %v6859_v30, %v10871_v25 }
 0x2f8   : > { %14472 = vst [vmem:[#allocation59_spill] sm:$0xff] %v11848_v44  ;;  %v11850_v14 = vpop.f32.mrb[114].mxu1  ;;  %3906 = vmatmul.mubr.bf16.gmra.mrb[236].mxu0 %v11844_v5 }
 0x2f9   : > { %14473 = vst [vmem:[#allocation60_spill] sm:$0xff] %v11850_v14  ;;  %v11855_v0 = vpop.f32.mrb[115].mxu1  ;;  %3915 = vmatprep.mubr.bf16.mxu0 %v14442_v62  ;;  %v6914_v47 = vadd.bf16 %v11863_v21, %v6295_v41  ;;  %v11876_v14 = vmax.bf16 %v14442_v62, %v3119_v32  ;;  %v6915_v37 = vadd.bf16 %v11868_v7, %v6296_v10 }
 0x2fa   : > { %14474 = vst [vmem:[#allocation61_spill] sm:$0xff] %v11855_v0  ;;  %v14480_v10 = vpack.c.bf16 %v11500_v58, %v11481_v60 }
 0x2fb   : > { %v3647_v12 = vpop.f32.mrb[132].mxu0  ;;  %4539 = vmatmul.mubr.bf16.gmra.mrb[220].mxu1 %v11738_v36  ;;  %14477 = vst [vmem:[#allocation63_spill] sm:$0xff] %v11876_v14  ;;  %v7426_v32 = vmax.bf16 %v14442_v62, %v6914_v47 }
 0x2fc   : > { %v3649_v40 = vpop.f32.mrb[133].mxu0  ;;  %4548 = vmatprep.mubr.bf16.mxu1 %v14442_v62 }
 0x2fd   : > { %v3651_v50 = vpop.f32.mrb[134].mxu0 }
 0x2fe   : > { %v6303_v6 = vpack.c.bf16 %v3651_v50, %v3647_v12  ;;  %v11873_v26 = vpop.f32.mrb[116].mxu1  ;;  %v3653_v30 = vpop.f32.mrb[135].mxu0 }
 0x2ff   : > { %14476 = vst [vmem:[#allocation62_spill] sm:$0xff] %v11873_v26  ;;  %v6304_v54 = vpack.c.bf16 %v3653_v30, %v3649_v40  ;;  %v11879_v44 = vpop.f32.mrb[117].mxu1  ;;  %v3120_v40 = vadd.bf16 %v11161_v20, %v14480_v10 }
 0x300   : > { %14478 = vst [vmem:[#allocation64_spill] sm:$0xff] %v11879_v44  ;;  %v6922_v36 = vadd.bf16 %v11863_v21, %v6303_v6  ;;  %v11882_v0 = vpop.f32.mrb[118].mxu1  ;;  %3916 = vmatmul.mubr.bf16.gmra.mrb[240].mxu0 %v11876_v14 }
 0x301   : > { %14479 = vst [vmem:[#allocation65_spill] sm:$0xff] %v11882_v0  ;;  %v6923_v41 = vadd.bf16 %v11868_v7, %v6304_v54  ;;  %v11888_v50 = vpop.f32.mrb[119].mxu1  ;;  %3925 = vmatprep.mubr.bf16.mxu0 %v14442_v62  ;;  %v7427_v54 = vmax.bf16 %v14442_v62, %v6915_v37  ;;  %v11906_v61 = vmax.bf16 %v14442_v62, %v3120_v40 }
 0x302   : > { %v7434_v6 = vmax.bf16 %v14442_v62, %v6922_v36 }
 0x303   : > { %v7435_v12 = vmax.bf16 %v14442_v62, %v6923_v41  ;;  %v3657_v26 = vpop.f32.mrb[136].mxu0  ;;  %4549 = vmatmul.mubr.bf16.gmra.mrb[224].mxu1 %v11761_v43 }
 0x304   : > { %v7938_v0 = vmax.bf16 %v7434_v6, %v7426_v32  ;;  %v3659_v59 = vpop.f32.mrb[137].mxu0  ;;  %4558 = vmatprep.mubr.bf16.mxu1 %v14442_v62 }
 0x305   : > { %v7955_v58 = vmax.bf16 %v7435_v12, %v7427_v54  ;;  %v3661_v60 = vpop.f32.mrb[138].mxu0 }
 0x306   : > { %v6311_v10 = vpack.c.bf16 %v3661_v60, %v3657_v26  ;;  %v11903_v47 = vpop.f32.mrb[120].mxu1  ;;  %v3663_v36 = vpop.f32.mrb[139].mxu0 }
 0x307   : > { %14481 = vst [vmem:[#allocation66_spill] sm:$0xff] %v11903_v47  ;;  %v6312_v30 = vpack.c.bf16 %v3663_v36, %v3659_v59  ;;  %v11908_v37 = vpop.f32.mrb[121].mxu1  ;;  %v14485_v59 = vpack.c.bf16 %v11528_v31, %v11521_v8  ;;  %v3261_v31 = vld [vmem:[%s14275_s5 + $0x150] sm:$0xff] }
 0x308   : > { %14482 = vst [vmem:[#allocation67_spill] sm:$0xff] %v11908_v37  ;;  %v6930_v41 = vadd.bf16 %v11863_v21, %v6311_v10  ;;  %v11911_v44 = vpop.f32.mrb[122].mxu1  ;;  %3926 = vmatmul.mubr.bf16.gmra.mrb[244].mxu0 %v11906_v61 }
 0x309   : > { %14483 = vst [vmem:[#allocation68_spill] sm:$0xff] %v11911_v44  ;;  %v6931_v32 = vadd.bf16 %v11868_v7, %v6312_v30  ;;  %v11917_v12 = vpop.f32.mrb[123].mxu1  ;;  %3935 = vmatprep.mubr.bf16.mxu0 %v14442_v62  ;;  %v3121_v40 = vadd.bf16 %v11161_v20, %v14485_v59 }
 0x30a   : > { %14484 = vst [vmem:[#allocation69_spill] sm:$0xff] %v11917_v12  ;;  %v7442_v6 = vmax.bf16 %v14442_v62, %v6930_v41  ;;  %v3265_v41 = vld [vmem:[%s14275_s5 + $0x170] sm:$0xff] }
 0x30b   : > { %v7443_v60 = vmax.bf16 %v14442_v62, %v6931_v32  ;;  %v3667_v30 = vpop.f32.mrb[140].mxu0  ;;  %4559 = vmatmul.mubr.bf16.gmra.mrb[228].mxu1 %v11784_v4  ;;  %v3262_v32 = vld [vmem:[%s14275_s5 + $0x158] sm:$0xff]  ;;  %v9681_v54 = vcombine.high %v3261_v31, %v3265_v41 }
 0x30c   : > { %v11929_v10 = vmax.bf16 %v7938_v0, %v7442_v6  ;;  %v3669_v36 = vpop.f32.mrb[141].mxu0  ;;  %4568 = vmatprep.mubr.bf16.mxu1 %v14442_v62  ;;  %v3266_v4 = vld [vmem:[%s14275_s5 + $0x178] sm:$0xff] }
 0x30d   : > { %v11932_v26 = vmax.bf16 %v7955_v58, %v7443_v60  ;;  %v3671_v8 = vpop.f32.mrb[142].mxu0  ;;  %v11946_v58 = vmax.bf16 %v14442_v62, %v3121_v40  ;;  %v9680_v60 = vcombine.low %v3261_v31, %v3265_v41  ;;  %v9682_v44 = vcombine.low %v3262_v32, %v3266_v4  ;;  %4959 = vmatprep.subr.bf16.mxu0 %v9681_v54 }
 0x30e   : > { %v6319_v0 = vpack.c.bf16 %v3671_v8, %v3667_v30  ;;  %v11943_v59 = vpop.f32.mrb[124].mxu1  ;;  %v3673_v6 = vpop.f32.mrb[143].mxu0  ;;  %v9683_v37 = vcombine.high %v3262_v32, %v3266_v4  ;;  %v14486_v4 = vpack.c.bf16 %v11523_v18, %v11516_v3 }
 0x30f   : > { %v6320_v43 = vpack.c.bf16 %v3673_v6, %v3669_v36  ;;  %v11951_v47 = vpop.f32.mrb[125].mxu1  ;;  %4960 = vmatpush1.bf16.msra.mxu0 %v9680_v60 }
 0x310   : > { %v6938_v12 = vadd.bf16 %v11863_v21, %v6319_v0  ;;  %v11954_v30 = vpop.f32.mrb[126].mxu1  ;;  %3936 = vmatmul.mubr.bf16.gmra.mrb[248].mxu0 %v11946_v58  ;;  %5632 = vmatprep.subr.bf16.mxu1 %v9683_v37  ;;  %v3122_v36 = vadd.bf16 %v11161_v20, %v14486_v4 }
 0x311   : > { %v6939_v40 = vadd.bf16 %v11868_v7, %v6320_v43  ;;  %v11960_v31 = vpop.f32.mrb[127].mxu1  ;;  %3945 = vmatprep.mubr.bf16.mxu0 %v14442_v62  ;;  %5633 = vmatpush1.bf16.msra.mxu1 %v9682_v44 }
 0x312   : > { %v7450_v41 = vmax.bf16 %v14442_v62, %v6938_v12  ;;  %v6854_v12 = vcombine.high %v11832_v57, %v11832_v57  ;;  %v11978_v44 = vmax.bf16 %v14442_v62, %v3122_v36  ;;  %v14487_v36 = vpack.c.bf16 %v11551_v23, %v11544_v29 }
 0x313   : > { %v7451_v43 = vmax.bf16 %v14442_v62, %v6939_v40  ;;  %v3677_v32 = vpop.f32.mrb[144].mxu0  ;;  %4569 = vmatmul.mubr.bf16.gmra.mrb[232].mxu1 %v11813_v34  ;;  %v6856_v40 = vcombine.high %v11836_v28, %v11836_v28 }
 0x314   : > { %v7940_v0 = vmax.bf16 %v11929_v10, %v7450_v41  ;;  %v3679_v37 = vpop.f32.mrb[145].mxu0  ;;  %4578 = vmatprep.mubr.bf16.mxu1 %v14442_v62  ;;  %v6873_v57 = vpack.i.b16 %v6854_v12, %v6854_v12 }
 0x315   : > { %v7957_v3 = vmax.bf16 %v11932_v26, %v7451_v43  ;;  %v3681_v18 = vpop.f32.mrb[146].mxu0 }
 0x316   : > { %v6327_v6 = vpack.c.bf16 %v3681_v18, %v3677_v32  ;;  %v3683_v4 = vpop.f32.mrb[147].mxu0  ;;  %v4310_v60 = vpop.f32.mrb[128].mxu1  ;;  %v3123_v18 = vadd.bf16 %v11161_v20, %v14487_v36 }
 0x317   : > { %v6328_v8 = vpack.c.bf16 %v3683_v4, %v3679_v37  ;;  %v4312_v10 = vpop.f32.mrb[129].mxu1  ;;  %v6880_v4 = vpack.i.b16 %v6856_v40, %v6856_v40 }
 0x318   : > { %v6946_v41 = vadd.bf16 %v11863_v21, %v6327_v6  ;;  %3946 = vmatmul.mubr.bf16.gmra.mrb[252].mxu0 %v11978_v44  ;;  %v4314_v26 = vpop.f32.mrb[130].mxu1  ;;  %v12000_v23 = vmax.bf16 %v14442_v62, %v3123_v18 }
 0x319   : > { %v6947_v43 = vadd.bf16 %v11868_v7, %v6328_v8  ;;  %v6297_v54 = vpack.c.bf16 %v4314_v26, %v4310_v60  ;;  %v4316_v32 = vpop.f32.mrb[131].mxu1  ;;  %3955 = vmatprep.mubr.bf16.mxu0 %v14442_v62  ;;  %v11997_v26 = vrot.slane %v6873_v57, %v10871_v25  ;;  %v12003_v40 = vrot.slane %v6880_v4, %v10871_v25 }
 0x31a   : > { %v7458_v28 = vmax.bf16 %v14442_v62, %v6946_v41  ;;  %v6298_v37 = vpack.c.bf16 %v4316_v32, %v4312_v10 }
 0x31b   : > { %v7459_v6 = vmax.bf16 %v14442_v62, %v6947_v43  ;;  %v3687_v34 = vpop.f32.mrb[148].mxu0  ;;  %4579 = vmatmul.mubr.bf16.gmra.mrb[236].mxu1 %v11844_v5  ;;  %v6916_v57 = vadd.bf16 %v11997_v26, %v6297_v54 }
 0x31c   : > { %v7941_v8 = vmax.bf16 %v7940_v0, %v7458_v28  ;;  %v3689_v60 = vpop.f32.mrb[149].mxu0  ;;  %4588 = vmatprep.mubr.bf16.mxu1 %v14442_v62 }
 0x31d   : > { %v11994_v12 = vmax.bf16 %v7957_v3, %v7459_v6  ;;  %v3691_v29 = vpop.f32.mrb[150].mxu0 }
 0x31e   : > { %v6335_v10 = vpack.c.bf16 %v3691_v29, %v3687_v34  ;;  %v3693_v41 = vpop.f32.mrb[151].mxu0  ;;  %v4320_v43 = vpop.f32.mrb[132].mxu1  ;;  %v14488_v34 = vpack.c.bf16 %v11546_v42, %v11539_v17  ;;  %v7428_v42 = vmax.bf16 %v14442_v62, %v6916_v57 }
 0x31f   : > { %v6336_v32 = vpack.c.bf16 %v3693_v41, %v3689_v60  ;;  %v4322_v0 = vpop.f32.mrb[133].mxu1  ;;  %v6917_v60 = vadd.bf16 %v12003_v40, %v6298_v37 }
 0x320   : > { %v6954_v36 = vadd.bf16 %v11863_v21, %v6335_v10  ;;  %3956 = vmatmul.mubr.bf16.gmra.mrb[0].mxu0 %v12000_v23  ;;  %v4324_v3 = vpop.f32.mrb[134].mxu1  ;;  %v3124_v4 = vadd.bf16 %v11161_v20, %v14488_v34 }
 0x321   : > { %v6955_v28 = vadd.bf16 %v11868_v7, %v6336_v32  ;;  %v6305_v6 = vpack.c.bf16 %v4324_v3, %v4320_v43  ;;  %v4326_v18 = vpop.f32.mrb[135].mxu1  ;;  %3965 = vmatprep.mubr.bf16.mxu0 %v14442_v62 }
 0x322   : > { %v7466_v29 = vmax.bf16 %v14442_v62, %v6954_v36  ;;  %v6306_v10 = vpack.c.bf16 %v4326_v18, %v4322_v0  ;;  %v12025_v36 = vmax.bf16 %v14442_v62, %v3124_v4 }
 0x323   : > { %v7467_v41 = vmax.bf16 %v14442_v62, %v6955_v28  ;;  %v6924_v54 = vadd.bf16 %v11997_v26, %v6305_v6  ;;  %v3697_v25 = vpop.f32.mrb[152].mxu0  ;;  %4589 = vmatmul.mubr.bf16.gmra.mrb[240].mxu1 %v11876_v14  ;;  %v7429_v28 = vmax.bf16 %v14442_v62, %v6917_v60 }
 0x324   : > { %v7942_v43 = vmax.bf16 %v7941_v8, %v7466_v29  ;;  %v6925_v32 = vadd.bf16 %v12003_v40, %v6306_v10  ;;  %v3699_v3 = vpop.f32.mrb[153].mxu0  ;;  %4598 = vmatprep.mubr.bf16.mxu1 %v14442_v62 }
 0x325   : > { %v7959_v17 = vmax.bf16 %v11994_v12, %v7467_v41  ;;  %v7436_v37 = vmax.bf16 %v14442_v62, %v6924_v54  ;;  %v3701_v0 = vpop.f32.mrb[154].mxu0 }
 0x326   : > { %v7437_v6 = vmax.bf16 %v14442_v62, %v6925_v32  ;;  %v6343_v8 = vpack.c.bf16 %v3701_v0, %v3697_v25  ;;  %v3703_v18 = vpop.f32.mrb[155].mxu0  ;;  %v4330_v34 = vpop.f32.mrb[136].mxu1  ;;  %v14489_v25 = vpack.c.bf16 %v11574_v24, %v11567_v63 }
 0x327   : > { %v7972_v29 = vmax.bf16 %v7436_v37, %v7428_v42  ;;  %v6344_v10 = vpack.c.bf16 %v3703_v18, %v3699_v3  ;;  %v4332_v14 = vpop.f32.mrb[137].mxu1 }
 0x328   : > { %v7989_v5 = vmax.bf16 %v7437_v6, %v7429_v28  ;;  %v6962_v57 = vadd.bf16 %v11863_v21, %v6343_v8  ;;  %3966 = vmatmul.mubr.bf16.gmra.mrb[4].mxu0 %v12025_v36  ;;  %v4334_v12 = vpop.f32.mrb[138].mxu1  ;;  %v3125_v60 = vadd.bf16 %v11161_v20, %v14489_v25 }
 0x329   : > { %v6963_v41 = vadd.bf16 %v11868_v7, %v6344_v10  ;;  %v6313_v4 = vpack.c.bf16 %v4334_v12, %v4330_v34  ;;  %v4336_v54 = vpop.f32.mrb[139].mxu1  ;;  %3975 = vmatprep.mubr.bf16.mxu0 %v14442_v62 }
 0x32a   : > { %v7474_v32 = vmax.bf16 %v14442_v62, %v6962_v57  ;;  %v6314_v3 = vpack.c.bf16 %v4336_v54, %v4332_v14  ;;  %v12045_v34 = vmax.bf16 %v14442_v62, %v3125_v60  ;;  %v14490_v60 = vpack.c.bf16 %v11569_v52, %v11562_v22 }
 0x32b   : > { %v7475_v42 = vmax.bf16 %v14442_v62, %v6963_v41  ;;  %v6932_v37 = vadd.bf16 %v11997_v26, %v6313_v4  ;;  %v3707_v0 = vpop.f32.mrb[156].mxu0  ;;  %4599 = vmatmul.mubr.bf16.gmra.mrb[244].mxu1 %v11906_v61 }
 0x32c   : > { %v7943_v28 = vmax.bf16 %v7942_v43, %v7474_v32  ;;  %v6933_v6 = vadd.bf16 %v12003_v40, %v6314_v3  ;;  %v3709_v8 = vpop.f32.mrb[157].mxu0  ;;  %4608 = vmatprep.mubr.bf16.mxu1 %v14442_v62  ;;  %v3126_v32 = vadd.bf16 %v11161_v20, %v14490_v60 }
 0x32d   : > { %v7960_v18 = vmax.bf16 %v7959_v17, %v7475_v42  ;;  %v7444_v63 = vmax.bf16 %v14442_v62, %v6932_v37  ;;  %v3711_v24 = vpop.f32.mrb[158].mxu0 }
 0x32e   : > { %v7445_v14 = vmax.bf16 %v14442_v62, %v6933_v6  ;;  %v6351_v10 = vpack.c.bf16 %v3711_v24, %v3707_v0  ;;  %v3713_v57 = vpop.f32.mrb[159].mxu0  ;;  %v4340_v12 = vpop.f32.mrb[140].mxu1  ;;  %v12067_v24 = vmax.bf16 %v14442_v62, %v3126_v32 }
 0x32f   : > { %v12048_v41 = vmax.bf16 %v7972_v29, %v7444_v63  ;;  %v6352_v43 = vpack.c.bf16 %v3713_v57, %v3709_v8  ;;  %v4342_v4 = vpop.f32.mrb[141].mxu1 }
 0x330   : > { %v12050_v54 = vmax.bf16 %v7989_v5, %v7445_v14  ;;  %v6970_v25 = vadd.bf16 %v11863_v21, %v6351_v10  ;;  %3976 = vmatmul.mubr.bf16.gmra.mrb[8].mxu0 %v12045_v34  ;;  %v4344_v17 = vpop.f32.mrb[142].mxu1 }
 0x331   : > { %v6971_v3 = vadd.bf16 %v11868_v7, %v6352_v43  ;;  %v6321_v42 = vpack.c.bf16 %v4344_v17, %v4340_v12  ;;  %v4346_v37 = vpop.f32.mrb[143].mxu1  ;;  %3985 = vmatprep.mubr.bf16.mxu0 %v14442_v62 }
 0x332   : > { %v7482_v29 = vmax.bf16 %v14442_v62, %v6970_v25  ;;  %v6322_v5 = vpack.c.bf16 %v4346_v37, %v4342_v4 }
 0x333   : > { %v7483_v0 = vmax.bf16 %v14442_v62, %v6971_v3  ;;  %v6940_v6 = vadd.bf16 %v11997_v26, %v6321_v42  ;;  %v3717_v8 = vpop.f32.mrb[160].mxu0  ;;  %4609 = vmatmul.mubr.bf16.gmra.mrb[248].mxu1 %v11946_v58 }
 0x334   : > { %v7944_v63 = vmax.bf16 %v7943_v28, %v7482_v29  ;;  %v6941_v52 = vadd.bf16 %v12003_v40, %v6322_v5  ;;  %v3719_v22 = vpop.f32.mrb[161].mxu0  ;;  %4618 = vmatprep.mubr.bf16.mxu1 %v14442_v62 }
 0x335   : > { %v7961_v14 = vmax.bf16 %v7960_v18, %v7483_v0  ;;  %v7452_v10 = vmax.bf16 %v14442_v62, %v6940_v6  ;;  %v3721_v57 = vpop.f32.mrb[162].mxu0  ;;  %v14491_v0 = vpack.c.bf16 %v11597_v35, %v11590_v2 }
 0x336   : > { %v7945_v12 = vunpack.i.l.bf16 %v7944_v63  ;;  %v7946_v43 = vunpack.i.h.bf16 %v7944_v63  ;;  %v7453_v4 = vmax.bf16 %v14442_v62, %v6941_v52  ;;  %v6359_v25 = vpack.c.bf16 %v3721_v57, %v3717_v8  ;;  %v3723_v17 = vpop.f32.mrb[163].mxu0  ;;  %v4350_v60 = vpop.f32.mrb[144].mxu1 }
 0x337   : > { %v7962_v28 = vunpack.i.l.bf16 %v7961_v14  ;;  %v7963_v3 = vunpack.i.h.bf16 %v7961_v14  ;;  %v7974_v42 = vmax.bf16 %v12048_v41, %v7452_v10  ;;  %v6360_v37 = vpack.c.bf16 %v3723_v17, %v3719_v22  ;;  %v4352_v29 = vpop.f32.mrb[145].mxu1 }
 0x338   : > { %v7947_v5 = vmax.f32 %v7945_v12, %v7946_v43  ;;  %v7991_v32 = vmax.bf16 %v12050_v54, %v7453_v4  ;;  %3986 = vmatmul.mubr.bf16.gmra.mrb[12].mxu0 %v12067_v24  ;;  %v4354_v18 = vpop.f32.mrb[146].mxu1  ;;  %v3127_v6 = vadd.bf16 %v11161_v20, %v14491_v0 }
 0x339   : > { %v7964_v8 = vmax.f32 %v7962_v28, %v7963_v3  ;;  %v6329_v63 = vpack.c.bf16 %v4354_v18, %v4350_v60  ;;  %v4356_v52 = vpop.f32.mrb[147].mxu1  ;;  %3995 = vmatprep.mubr.bf16.mxu0 %v14442_v62  ;;  %v6978_v28 = vadd.bf16 %v11863_v21, %v6359_v25 }
 0x33a   : > { %v7948_v14 = vrot.slane %v7947_v5, 4  ;;  %v6330_v41 = vpack.c.bf16 %v4356_v52, %v4352_v29  ;;  %v12084_v2 = vmax.bf16 %v14442_v62, %v3127_v6 }
 0x33b   : > { %v7965_v22 = vrot.slane %v7964_v8, 4  ;;  %v6948_v10 = vadd.bf16 %v11997_v26, %v6329_v63  ;;  %v3727_v57 = vpop.f32.mrb[164].mxu0  ;;  %4619 = vmatmul.mubr.bf16.gmra.mrb[252].mxu1 %v11978_v44  ;;  %v6979_v63 = vadd.bf16 %v11868_v7, %v6360_v37 }
 0x33c   : > { %v7949_v54 = vmax.f32 %v7947_v5, %v7948_v14  ;;  %v6949_v12 = vadd.bf16 %v12003_v40, %v6330_v41  ;;  %v3729_v43 = vpop.f32.mrb[165].mxu0  ;;  %4628 = vmatprep.mubr.bf16.mxu1 %v14442_v62 }
 0x33d   : > { %v7966_v35 = vmax.f32 %v7964_v8, %v7965_v22  ;;  %v7460_v4 = vmax.bf16 %v14442_v62, %v6948_v10  ;;  %v3731_v17 = vpop.f32.mrb[166].mxu0  ;;  %v14492_v10 = vpack.c.bf16 %v11592_v13, %v11585_v45 }
 0x33e   : > { %v7950_v60 = vrot.slane %v7949_v54, 2  ;;  %v7461_v3 = vmax.bf16 %v14442_v62, %v6949_v12  ;;  %v6367_v29 = vpack.c.bf16 %v3731_v17, %v3727_v57  ;;  %v3733_v18 = vpop.f32.mrb[167].mxu0  ;;  %v4360_v5 = vpop.f32.mrb[148].mxu1 }
 0x33f   : > { %v7967_v0 = vrot.slane %v7966_v35, 2  ;;  %v12090_v52 = vmax.bf16 %v7974_v42, %v7460_v4  ;;  %v6368_v14 = vpack.c.bf16 %v3733_v18, %v3729_v43  ;;  %v4362_v6 = vpop.f32.mrb[149].mxu1  ;;  %v3128_v57 = vadd.bf16 %v11161_v20, %v14492_v10 }
 0x340   : > { %v7951_v41 = vmax.f32 %v7949_v54, %v7950_v60  ;;  %v12092_v8 = vmax.bf16 %v7991_v32, %v7461_v3  ;;  %v6986_v22 = vadd.bf16 %v11863_v21, %v6367_v29  ;;  %3996 = vmatmul.mubr.bf16.gmra.mrb[16].mxu0 %v12084_v2  ;;  %v4364_v25 = vpop.f32.mrb[150].mxu1  ;;  %v7490_v32 = vmax.bf16 %v14442_v62, %v6978_v28 }
 0x341   : > { %v7968_v12 = vmax.f32 %v7966_v35, %v7967_v0  ;;  %v6987_v37 = vadd.bf16 %v11868_v7, %v6368_v14  ;;  %v6337_v42 = vpack.c.bf16 %v4364_v25, %v4360_v5  ;;  %v4366_v4 = vpop.f32.mrb[151].mxu1  ;;  %4005 = vmatprep.mubr.bf16.mxu0 %v14442_v62  ;;  %v7491_v3 = vmax.bf16 %v14442_v62, %v6979_v63 }
 0x342   : > { %v7952_v54 = vrot.slane %v7951_v41, 1  ;;  %v7498_v43 = vmax.bf16 %v14442_v62, %v6986_v22  ;;  %v6338_v17 = vpack.c.bf16 %v4366_v4, %v4362_v6  ;;  %v12112_v63 = vmax.bf16 %v14442_v62, %v3128_v57 }
 0x343   : > { %v7969_v60 = vrot.slane %v7968_v12, 1  ;;  %v7499_v13 = vmax.bf16 %v14442_v62, %v6987_v37  ;;  %v6956_v45 = vadd.bf16 %v11997_v26, %v6337_v42  ;;  %v3737_v35 = vpop.f32.mrb[168].mxu0  ;;  %4629 = vmatmul.mubr.bf16.gmra.mrb[0].mxu1 %v12000_v23 }
 0x344   : > { %v7953_v29 = vmax.f32 %v7951_v41, %v7952_v54  ;;  %v8074_v18 = vmax.bf16 %v7498_v43, %v7490_v32  ;;  %v6957_v5 = vadd.bf16 %v12003_v40, %v6338_v17  ;;  %v3739_v0 = vpop.f32.mrb[169].mxu0  ;;  %4638 = vmatprep.mubr.bf16.mxu1 %v14442_v62 }
 0x345   : > { %v7970_v28 = vmax.f32 %v7968_v12, %v7969_v60  ;;  %v8091_v14 = vmax.bf16 %v7499_v13, %v7491_v3  ;;  %v7468_v6 = vmax.bf16 %v14442_v62, %v6956_v45  ;;  %v3741_v22 = vpop.f32.mrb[170].mxu0 }
 0x346   : > { %v7954_v25 = vpack.i.bf16 %v7953_v29, %v7953_v29  ;;  %v7469_v10 = vmax.bf16 %v14442_v62, %v6957_v5  ;;  %v6375_v37 = vpack.c.bf16 %v3741_v22, %v3737_v35  ;;  %v3743_v42 = vpop.f32.mrb[171].mxu0  ;;  %v4370_v41 = vpop.f32.mrb[152].mxu1 }
 0x347   : > { %v7971_v4 = vpack.i.bf16 %v7970_v28, %v7970_v28  ;;  %v7976_v54 = vmax.bf16 %v12090_v52, %v7468_v6  ;;  %v6376_v32 = vpack.c.bf16 %v3743_v42, %v3739_v0  ;;  %v4372_v43 = vpop.f32.mrb[153].mxu1  ;;  %v14493_v52 = vpack.c.bf16 %v11620_v51, %v11613_v56  ;;  %v3269_v6 = vld [vmem:[%s14275_s5 + $0x190] sm:$0xff]  ;;  %v3270_v51 = vld [vmem:[%s14275_s5 + $0x198] sm:$0xff] }
 0x348   : > { %v7993_v12 = vmax.bf16 %v12092_v8, %v7469_v10  ;;  %v6994_v17 = vadd.bf16 %v11863_v21, %v6375_v37  ;;  %4006 = vmatmul.mubr.bf16.gmra.mrb[20].mxu0 %v12112_v63  ;;  %v4374_v60 = vpop.f32.mrb[154].mxu1  ;;  %v3273_v56 = vld [vmem:[%s14275_s5 + $0x1b0] sm:$0xff] }
 0x349   : > { %v12119_v57 = vcombine.low %v7954_v25, %v7971_v4  ;;  %v6995_v3 = vadd.bf16 %v11868_v7, %v6376_v32  ;;  %v6345_v13 = vpack.c.bf16 %v4374_v60, %v4370_v41  ;;  %v4376_v45 = vpop.f32.mrb[155].mxu1  ;;  %4015 = vmatprep.mubr.bf16.mxu0 %v14442_v62  ;;  %v3129_v35 = vadd.bf16 %v11161_v20, %v14493_v52  ;;  %v3274_v41 = vld [vmem:[%s14275_s5 + $0x1b8] sm:$0xff] }
 0x34a   : > { %v7506_v8 = vmax.bf16 %v14442_v62, %v6994_v17  ;;  %v6346_v29 = vpack.c.bf16 %v4376_v45, %v4372_v43  ;;  %v9688_v37 = vcombine.low %v3269_v6, %v3273_v56  ;;  %v9689_v42 = vcombine.high %v3269_v6, %v3273_v56 }
 0x34b   : > { %v7507_v5 = vmax.bf16 %v14442_v62, %v6995_v3  ;;  %v6964_v0 = vadd.bf16 %v11997_v26, %v6345_v13  ;;  %v3747_v28 = vpop.f32.mrb[172].mxu0  ;;  %4639 = vmatmul.mubr.bf16.gmra.mrb[4].mxu1 %v12025_v36  ;;  %v9690_v17 = vcombine.low %v3270_v51, %v3274_v41  ;;  %v9691_v60 = vcombine.high %v3270_v51, %v3274_v41 }
 0x34c   : > { %v12140_v22 = vmax.bf16 %v8074_v18, %v7506_v8  ;;  %v6965_v25 = vadd.bf16 %v12003_v40, %v6346_v29  ;;  %v3749_v10 = vpop.f32.mrb[173].mxu0  ;;  %4648 = vmatprep.mubr.bf16.mxu1 %v14442_v62  ;;  %v12151_v18 = vmax.bf16 %v14442_v62, %v3129_v35  ;;  %4961 = vmatprep.subr.bf16.mxu0 %v9689_v42 }
 0x34d   : > { %v12147_v4 = vmax.bf16 %v8091_v14, %v7507_v5  ;;  %v7476_v32 = vmax.bf16 %v14442_v62, %v6964_v0  ;;  %v3751_v43 = vpop.f32.mrb[174].mxu0  ;;  %5634 = vmatprep.subr.bf16.mxu1 %v9691_v60  ;;  %4962 = vmatpush1.bf16.msra.mxu0 %v9688_v37 }
 0x34e   : > { %v7477_v3 = vmax.bf16 %v14442_v62, %v6965_v25  ;;  %v6383_v13 = vpack.c.bf16 %v3751_v43, %v3747_v28  ;;  %v3753_v45 = vpop.f32.mrb[175].mxu0  ;;  %v4380_v52 = vpop.f32.mrb[156].mxu1  ;;  %5635 = vmatpush1.bf16.msra.mxu1 %v9690_v17 }
 0x34f   : > { %v7977_v8 = vmax.bf16 %v7976_v54, %v7476_v32  ;;  %v6384_v29 = vpack.c.bf16 %v3753_v45, %v3749_v10  ;;  %v4382_v6 = vpop.f32.mrb[157].mxu1  ;;  %v14494_v54 = vpack.c.bf16 %v11615_v38, %v11608_v27 }
 0x350   : > { %v7994_v14 = vmax.bf16 %v7993_v12, %v7477_v3  ;;  %v7002_v5 = vadd.bf16 %v11863_v21, %v6383_v13  ;;  %4016 = vmatmul.mubr.bf16.gmra.mrb[24].mxu0 %v12151_v18  ;;  %v4384_v0 = vpop.f32.mrb[158].mxu1 }
 0x351   : > { %v7003_v35 = vadd.bf16 %v11868_v7, %v6384_v29  ;;  %v6353_v56 = vpack.c.bf16 %v4384_v0, %v4380_v52  ;;  %v4386_v51 = vpop.f32.mrb[159].mxu1  ;;  %4025 = vmatprep.mubr.bf16.mxu0 %v14442_v62  ;;  %v3130_v28 = vadd.bf16 %v11161_v20, %v14494_v54 }
 0x352   : > { %v7514_v25 = vmax.bf16 %v14442_v62, %v7002_v5  ;;  %v6354_v12 = vpack.c.bf16 %v4386_v51, %v4382_v6  ;;  %v14495_v5 = vpack.c.bf16 %v11643_v49, %v11636_v33 }
 0x353   : > { %v7515_v10 = vmax.bf16 %v14442_v62, %v7003_v35  ;;  %v6972_v37 = vadd.bf16 %v11997_v26, %v6353_v56  ;;  %v3757_v42 = vpop.f32.mrb[176].mxu0  ;;  %4649 = vmatmul.mubr.bf16.gmra.mrb[8].mxu1 %v12045_v34  ;;  %v12172_v60 = vmax.bf16 %v14442_v62, %v3130_v28 }
 0x354   : > { %v8076_v41 = vmax.bf16 %v12140_v22, %v7514_v25  ;;  %v6973_v32 = vadd.bf16 %v12003_v40, %v6354_v12  ;;  %v3759_v43 = vpop.f32.mrb[177].mxu0  ;;  %4658 = vmatprep.mubr.bf16.mxu1 %v14442_v62  ;;  %v3131_v0 = vadd.bf16 %v11161_v20, %v14495_v5 }
 0x355   : > { %v8093_v38 = vmax.bf16 %v12147_v4, %v7515_v10  ;;  %v7484_v27 = vmax.bf16 %v14442_v62, %v6972_v37  ;;  %v3761_v17 = vpop.f32.mrb[178].mxu0 }
 0x356   : > { %v7485_v3 = vmax.bf16 %v14442_v62, %v6973_v32  ;;  %v6391_v13 = vpack.c.bf16 %v3761_v17, %v3757_v42  ;;  %v3763_v45 = vpop.f32.mrb[179].mxu0  ;;  %v4390_v52 = vpop.f32.mrb[160].mxu1 }
 0x357   : > { %v7978_v29 = vmax.bf16 %v7977_v8, %v7484_v27  ;;  %v6392_v22 = vpack.c.bf16 %v3763_v45, %v3759_v43  ;;  %v4392_v6 = vpop.f32.mrb[161].mxu1  ;;  %v12192_v45 = vmax.bf16 %v14442_v62, %v3131_v0 }
 0x358   : > { %v7995_v4 = vmax.bf16 %v7994_v14, %v7485_v3  ;;  %v7010_v35 = vadd.bf16 %v11863_v21, %v6391_v13  ;;  %4026 = vmatmul.mubr.bf16.gmra.mrb[28].mxu0 %v12172_v60  ;;  %v4394_v56 = vpop.f32.mrb[162].mxu1 }
 0x359   : > { %v7979_v51 = vunpack.i.l.bf16 %v7978_v29  ;;  %v7980_v54 = vunpack.i.h.bf16 %v7978_v29  ;;  %v7011_v28 = vadd.bf16 %v11868_v7, %v6392_v22  ;;  %v6361_v25 = vpack.c.bf16 %v4394_v56, %v4390_v52  ;;  %v4396_v12 = vpop.f32.mrb[163].mxu1  ;;  %4035 = vmatprep.mubr.bf16.mxu0 %v14442_v62 }
 0x35a   : > { %v7996_v8 = vunpack.i.l.bf16 %v7995_v4  ;;  %v7997_v10 = vunpack.i.h.bf16 %v7995_v4  ;;  %v7522_v33 = vmax.bf16 %v14442_v62, %v7010_v35  ;;  %v6362_v49 = vpack.c.bf16 %v4396_v12, %v4392_v6 }
 0x35b   : > { %v7981_v37 = vmax.f32 %v7979_v51, %v7980_v54  ;;  %v7523_v14 = vmax.bf16 %v14442_v62, %v7011_v28  ;;  %v3767_v42 = vpop.f32.mrb[180].mxu0  ;;  %4659 = vmatmul.mubr.bf16.gmra.mrb[12].mxu1 %v12067_v24  ;;  %v6980_v28 = vadd.bf16 %v11997_v26, %v6361_v25 }
 0x35c   : > { %v7998_v32 = vmax.f32 %v7996_v8, %v7997_v10  ;;  %v12186_v43 = vmax.bf16 %v8076_v41, %v7522_v33  ;;  %v3769_v27 = vpop.f32.mrb[181].mxu0  ;;  %4668 = vmatprep.mubr.bf16.mxu1 %v14442_v62  ;;  %v14496_v41 = vpack.c.bf16 %v11638_v11, %v11631_v19  ;;  %v6981_v11 = vadd.bf16 %v12003_v40, %v6362_v49 }
 0x35d   : > { %v7982_v17 = vrot.slane %v7981_v37, 4  ;;  %v12189_v3 = vmax.bf16 %v8093_v38, %v7523_v14  ;;  %v3771_v13 = vpop.f32.mrb[182].mxu0 }
 0x35e   : > { %v7999_v52 = vrot.slane %v7998_v32, 4  ;;  %v6399_v29 = vpack.c.bf16 %v3771_v13, %v3767_v42  ;;  %v3773_v22 = vpop.f32.mrb[183].mxu0  ;;  %v4400_v6 = vpop.f32.mrb[164].mxu1  ;;  %v3132_v56 = vadd.bf16 %v11161_v20, %v14496_v41  ;;  %v7493_v41 = vmax.bf16 %v14442_v62, %v6981_v11 }
 0x35f   : > { %v7983_v5 = vmax.f32 %v7981_v37, %v7982_v17  ;;  %v6400_v4 = vpack.c.bf16 %v3773_v22, %v3769_v27  ;;  %v4402_v35 = vpop.f32.mrb[165].mxu1  ;;  %v7492_v22 = vmax.bf16 %v14442_v62, %v6980_v28 }
 0x360   : > { %v8000_v51 = vmax.f32 %v7998_v32, %v7999_v52  ;;  %v7018_v38 = vadd.bf16 %v11863_v21, %v6399_v29  ;;  %4036 = vmatmul.mubr.bf16.gmra.mrb[32].mxu0 %v12192_v45  ;;  %v4404_v54 = vpop.f32.mrb[166].mxu1  ;;  %v12209_v25 = vmax.bf16 %v14442_v62, %v3132_v56 }
 0x361   : > { %v7984_v0 = vrot.slane %v7983_v5, 2  ;;  %v7019_v12 = vadd.bf16 %v11868_v7, %v6400_v4  ;;  %v6369_v8 = vpack.c.bf16 %v4404_v54, %v4400_v6  ;;  %v4406_v10 = vpop.f32.mrb[167].mxu1  ;;  %4045 = vmatprep.mubr.bf16.mxu0 %v14442_v62 }
 0x362   : > { %v8001_v33 = vrot.slane %v8000_v51, 2  ;;  %v7530_v19 = vmax.bf16 %v14442_v62, %v7018_v38  ;;  %v6370_v37 = vpack.c.bf16 %v4406_v10, %v4402_v35 }
 0x363   : > { %v7985_v14 = vmax.f32 %v7983_v5, %v7984_v0  ;;  %v7531_v42 = vmax.bf16 %v14442_v62, %v7019_v12  ;;  %v6988_v32 = vadd.bf16 %v11997_v26, %v6369_v8  ;;  %v3777_v27 = vpop.f32.mrb[184].mxu0  ;;  %4669 = vmatmul.mubr.bf16.gmra.mrb[16].mxu1 %v12084_v2 }
 0x364   : > { %v8002_v17 = vmax.f32 %v8000_v51, %v8001_v33  ;;  %v8078_v13 = vmax.bf16 %v12186_v43, %v7530_v19  ;;  %v6989_v52 = vadd.bf16 %v12003_v40, %v6370_v37  ;;  %v3779_v49 = vpop.f32.mrb[185].mxu0  ;;  %4678 = vmatprep.mubr.bf16.mxu1 %v14442_v62 }
 0x365   : > { %v7986_v29 = vrot.slane %v7985_v14, 1  ;;  %v8095_v6 = vmax.bf16 %v12189_v3, %v7531_v42  ;;  %v7500_v5 = vmax.bf16 %v14442_v62, %v6988_v32  ;;  %v3781_v4 = vpop.f32.mrb[186].mxu0 }
 0x366   : > { %v8003_v35 = vrot.slane %v8002_v17, 1  ;;  %v7501_v56 = vmax.bf16 %v14442_v62, %v6989_v52  ;;  %v6407_v51 = vpack.c.bf16 %v3781_v4, %v3777_v27  ;;  %v3783_v43 = vpop.f32.mrb[187].mxu0  ;;  %v4410_v38 = vpop.f32.mrb[168].mxu1 }
 0x367   : > { %v7987_v54 = vmax.f32 %v7985_v14, %v7986_v29  ;;  %v8108_v0 = vmax.bf16 %v7500_v5, %v7492_v22  ;;  %v6408_v12 = vpack.c.bf16 %v3783_v43, %v3779_v49  ;;  %v4412_v8 = vpop.f32.mrb[169].mxu1  ;;  %v14497_v14 = vpack.c.bf16 %v11666_v48, %v11659_v1 }
 0x368   : > { %v8004_v10 = vmax.f32 %v8002_v17, %v8003_v35  ;;  %v8125_v33 = vmax.bf16 %v7501_v56, %v7493_v41  ;;  %v7026_v28 = vadd.bf16 %v11863_v21, %v6407_v51  ;;  %4046 = vmatmul.mubr.bf16.gmra.mrb[36].mxu0 %v12209_v25  ;;  %v4414_v3 = vpop.f32.mrb[170].mxu1 }
 0x369   : > { %v7988_v19 = vpack.i.bf16 %v7987_v54, %v7987_v54  ;;  %v7027_v37 = vadd.bf16 %v11868_v7, %v6408_v12  ;;  %v6377_v11 = vpack.c.bf16 %v4414_v3, %v4410_v38  ;;  %v4416_v42 = vpop.f32.mrb[171].mxu1  ;;  %4055 = vmatprep.mubr.bf16.mxu0 %v14442_v62  ;;  %v3133_v32 = vadd.bf16 %v11161_v20, %v14497_v14 }
 0x36a   : > { %v8005_v27 = vpack.i.bf16 %v8004_v10, %v8004_v10  ;;  %v7538_v17 = vmax.bf16 %v14442_v62, %v7026_v28  ;;  %v6378_v52 = vpack.c.bf16 %v4416_v42, %v4412_v8 }
 0x36b   : > { %v7539_v49 = vmax.bf16 %v14442_v62, %v7027_v37  ;;  %v6996_v29 = vadd.bf16 %v11997_v26, %v6377_v11  ;;  %v3787_v22 = vpop.f32.mrb[188].mxu0  ;;  %4679 = vmatmul.mubr.bf16.gmra.mrb[20].mxu1 %v12112_v63  ;;  %v12237_v51 = vmax.bf16 %v14442_v62, %v3133_v32 }
 0x36c   : > { %v12231_v5 = vcombine.low %v7988_v19, %v8005_v27  ;;  %v8079_v4 = vmax.bf16 %v8078_v13, %v7538_v17  ;;  %v6997_v35 = vadd.bf16 %v12003_v40, %v6378_v52  ;;  %v3789_v41 = vpop.f32.mrb[189].mxu0  ;;  %4688 = vmatprep.mubr.bf16.mxu1 %v14442_v62  ;;  %v14498_v19 = vpack.c.bf16 %v11661_v55, %v11654_v9 }
 0x36d   : > { %v8096_v1 = vmax.bf16 %v8095_v6, %v7539_v49  ;;  %v7508_v48 = vmax.bf16 %v14442_v62, %v6996_v29  ;;  %v3791_v56 = vpop.f32.mrb[190].mxu0 }
 0x36e   : > { %v7509_v43 = vmax.bf16 %v14442_v62, %v6997_v35  ;;  %v6415_v38 = vpack.c.bf16 %v3791_v56, %v3787_v22  ;;  %v3793_v54 = vpop.f32.mrb[191].mxu0  ;;  %v4420_v12 = vpop.f32.mrb[172].mxu1  ;;  %v3134_v37 = vadd.bf16 %v11161_v20, %v14498_v19 }
 0x36f   : > { %v12240_v8 = vmax.bf16 %v8108_v0, %v7508_v48  ;;  %v6416_v13 = vpack.c.bf16 %v3793_v54, %v3789_v41  ;;  %v4422_v10 = vpop.f32.mrb[173].mxu1 }
 0x370   : > { %v12242_v28 = vmax.bf16 %v8125_v33, %v7509_v43  ;;  %v7034_v3 = vadd.bf16 %v11863_v21, %v6415_v38  ;;  %4056 = vmatmul.mubr.bf16.gmra.mrb[40].mxu0 %v12237_v51  ;;  %v4424_v6 = vpop.f32.mrb[174].mxu1  ;;  %v12259_v49 = vmax.bf16 %v14442_v62, %v3134_v37  ;;  %v14499_v37 = vld [vmem:[#allocation33_spill] sm:$0xff] }
 0x371   : > { %v7035_v11 = vadd.bf16 %v11868_v7, %v6416_v13  ;;  %v6385_v42 = vpack.c.bf16 %v4424_v6, %v4420_v12  ;;  %v4426_v14 = vpop.f32.mrb[175].mxu1  ;;  %4065 = vmatprep.mubr.bf16.mxu0 %v14442_v62 }
 0x372   : > { %v7546_v0 = vmax.bf16 %v14442_v62, %v7034_v3  ;;  %v6386_v33 = vpack.c.bf16 %v4426_v14, %v4422_v10 }
 0x373   : > { %v7547_v32 = vmax.bf16 %v14442_v62, %v7035_v11  ;;  %v7004_v27 = vadd.bf16 %v11997_v26, %v6385_v42  ;;  %v3797_v17 = vpop.f32.mrb[192].mxu0  ;;  %4689 = vmatmul.mubr.bf16.gmra.mrb[24].mxu1 %v12151_v18  ;;  %v14500_v11 = vpack.c.bf16 %v11689_v39, %v14499_v37 }
 0x374   : > { %v8080_v52 = vmax.bf16 %v8079_v4, %v7546_v0  ;;  %v7005_v55 = vadd.bf16 %v12003_v40, %v6386_v33  ;;  %v3799_v9 = vpop.f32.mrb[193].mxu0  ;;  %4698 = vmatprep.mubr.bf16.mxu1 %v14442_v62 }
 0x375   : > { %v8097_v29 = vmax.bf16 %v8096_v1, %v7547_v32  ;;  %v7516_v22 = vmax.bf16 %v14442_v62, %v7004_v27  ;;  %v3801_v35 = vpop.f32.mrb[194].mxu0  ;;  %v3135_v42 = vadd.bf16 %v11161_v20, %v14500_v11 }
 0x376   : > { %v8081_v41 = vunpack.i.l.bf16 %v8080_v52  ;;  %v8082_v48 = vunpack.i.h.bf16 %v8080_v52  ;;  %v7517_v56 = vmax.bf16 %v14442_v62, %v7005_v55  ;;  %v6423_v43 = vpack.c.bf16 %v3801_v35, %v3797_v17  ;;  %v3803_v38 = vpop.f32.mrb[195].mxu0  ;;  %v4430_v54 = vpop.f32.mrb[176].mxu1 }
 0x377   : > { %v8098_v4 = vunpack.i.l.bf16 %v8097_v29  ;;  %v8099_v12 = vunpack.i.h.bf16 %v8097_v29  ;;  %v8110_v13 = vmax.bf16 %v12240_v8, %v7516_v22  ;;  %v6424_v10 = vpack.c.bf16 %v3803_v38, %v3799_v9  ;;  %v4432_v3 = vpop.f32.mrb[177].mxu1 }
 0x378   : > { %v8083_v6 = vmax.f32 %v8081_v41, %v8082_v48  ;;  %v8127_v19 = vmax.bf16 %v12242_v28, %v7517_v56  ;;  %4066 = vmatmul.mubr.bf16.gmra.mrb[44].mxu0 %v12259_v49  ;;  %v4434_v1 = vpop.f32.mrb[178].mxu1  ;;  %v12276_v39 = vmax.bf16 %v14442_v62, %v3135_v42  ;;  %v7042_v48 = vadd.bf16 %v11863_v21, %v6423_v43 }
 0x379   : > { %v8100_v14 = vmax.f32 %v8098_v4, %v8099_v12  ;;  %v6393_v0 = vpack.c.bf16 %v4434_v1, %v4430_v54  ;;  %v4436_v33 = vpop.f32.mrb[179].mxu1  ;;  %4075 = vmatprep.mubr.bf16.mxu0 %v14442_v62 }
 0x37a   : > { %v8084_v32 = vrot.slane %v8083_v6, 4  ;;  %v6394_v8 = vpack.c.bf16 %v4436_v33, %v4432_v3  ;;  %v7043_v3 = vadd.bf16 %v11868_v7, %v6424_v10  ;;  %v14502_v33 = vld [vmem:[#allocation31_spill] sm:$0xff] }
 0x37b   : > { %v8101_v27 = vrot.slane %v8100_v14, 4  ;;  %v7012_v17 = vadd.bf16 %v11997_v26, %v6393_v0  ;;  %v3807_v52 = vpop.f32.mrb[196].mxu0  ;;  %4699 = vmatmul.mubr.bf16.gmra.mrb[28].mxu1 %v12172_v60  ;;  %v14501_v0 = vld [vmem:[#allocation34_spill] sm:$0xff] }
 0x37c   : > { %v8085_v28 = vmax.f32 %v8083_v6, %v8084_v32  ;;  %v7013_v55 = vadd.bf16 %v12003_v40, %v6394_v8  ;;  %v3809_v9 = vpop.f32.mrb[197].mxu0  ;;  %4708 = vmatprep.mubr.bf16.mxu1 %v14442_v62  ;;  %v14503_v32 = vpack.c.bf16 %v14501_v0, %v14502_v33 }
 0x37d   : > { %v8102_v29 = vmax.f32 %v8100_v14, %v8101_v27  ;;  %v7524_v22 = vmax.bf16 %v14442_v62, %v7012_v17  ;;  %v3811_v35 = vpop.f32.mrb[198].mxu0 }
 0x37e   : > { %v8086_v41 = vrot.slane %v8085_v28, 2  ;;  %v7525_v56 = vmax.bf16 %v14442_v62, %v7013_v55  ;;  %v6431_v38 = vpack.c.bf16 %v3811_v35, %v3807_v52  ;;  %v3813_v54 = vpop.f32.mrb[199].mxu0  ;;  %v4440_v4 = vpop.f32.mrb[180].mxu1  ;;  %v3136_v8 = vadd.bf16 %v11161_v20, %v14503_v32 }
 0x37f   : > { %v8103_v12 = vrot.slane %v8102_v29, 2  ;;  %v12282_v6 = vmax.bf16 %v8110_v13, %v7524_v22  ;;  %v6432_v1 = vpack.c.bf16 %v3813_v54, %v3809_v9  ;;  %v4442_v37 = vpop.f32.mrb[181].mxu1  ;;  %v7555_v22 = vmax.bf16 %v14442_v62, %v7043_v3 }
 0x380   : > { %v8087_v11 = vmax.f32 %v8085_v28, %v8086_v41  ;;  %v12284_v42 = vmax.bf16 %v8127_v19, %v7525_v56  ;;  %v7050_v14 = vadd.bf16 %v11863_v21, %v6431_v38  ;;  %4076 = vmatmul.mubr.bf16.gmra.mrb[48].mxu0 %v12276_v39  ;;  %v4444_v43 = vpop.f32.mrb[182].mxu1  ;;  %v7554_v19 = vmax.bf16 %v14442_v62, %v7042_v48 }
 0x381   : > { %v8104_v27 = vmax.f32 %v8102_v29, %v8103_v12  ;;  %v7051_v10 = vadd.bf16 %v11868_v7, %v6432_v1  ;;  %v6401_v13 = vpack.c.bf16 %v4444_v43, %v4440_v4  ;;  %v4446_v17 = vpop.f32.mrb[183].mxu1  ;;  %4085 = vmatprep.mubr.bf16.mxu0 %v14442_v62  ;;  %v14504_v56 = vpack.c.bf16 %v11724_v53, %v11717_v16 }
 0x382   : > { %v8088_v52 = vrot.slane %v8087_v11, 1  ;;  %v7562_v28 = vmax.bf16 %v14442_v62, %v7050_v14  ;;  %v6402_v55 = vpack.c.bf16 %v4446_v17, %v4442_v37  ;;  %v12308_v43 = vmax.bf16 %v14442_v62, %v3136_v8 }
 0x383   : > { %v8105_v9 = vrot.slane %v8104_v27, 1  ;;  %v7563_v35 = vmax.bf16 %v14442_v62, %v7051_v10  ;;  %v7020_v41 = vadd.bf16 %v11997_v26, %v6401_v13  ;;  %v3817_v29 = vpop.f32.mrb[200].mxu0  ;;  %4709 = vmatmul.mubr.bf16.gmra.mrb[32].mxu1 %v12192_v45  ;;  %v3137_v38 = vadd.bf16 %v11161_v20, %v14504_v56 }
 0x384   : > { %v8089_v54 = vmax.f32 %v8087_v11, %v8088_v52  ;;  %v8210_v48 = vmax.bf16 %v7562_v28, %v7554_v19  ;;  %v7021_v4 = vadd.bf16 %v12003_v40, %v6402_v55  ;;  %v3819_v12 = vpop.f32.mrb[201].mxu0  ;;  %4718 = vmatprep.mubr.bf16.mxu1 %v14442_v62  ;;  %14505 = vst [vmem:[#allocation33_spill] sm:$0xff] %v12308_v43 }
 0x385   : > { %v8106_v3 = vmax.f32 %v8104_v27, %v8105_v9  ;;  %v8227_v1 = vmax.bf16 %v7563_v35, %v7555_v22  ;;  %v7532_v37 = vmax.bf16 %v14442_v62, %v7020_v41  ;;  %v3821_v14 = vpop.f32.mrb[202].mxu0  ;;  %v12313_v27 = vmax.bf16 %v14442_v62, %v3137_v38 }
 0x386   : > { %v8090_v0 = vpack.i.bf16 %v8089_v54, %v8089_v54  ;;  %v7533_v16 = vmax.bf16 %v14442_v62, %v7021_v4  ;;  %v6439_v53 = vpack.c.bf16 %v3821_v14, %v3817_v29  ;;  %v3823_v33 = vpop.f32.mrb[203].mxu0  ;;  %v4450_v11 = vpop.f32.mrb[184].mxu1  ;;  %v9191_v35 = vunpack.c.h.b16 %v12119_v57 }
 0x387   : > { %v8107_v32 = vpack.i.bf16 %v8106_v3, %v8106_v3  ;;  %v8112_v10 = vmax.bf16 %v12282_v6, %v7532_v37  ;;  %v6440_v13 = vpack.c.bf16 %v3823_v33, %v3819_v12  ;;  %v4452_v17 = vpop.f32.mrb[185].mxu1  ;;  %14506 = vst [vmem:[#allocation34_spill] sm:$0xff] %v12313_v27  ;;  %v9190_v6 = vunpack.c.l.b16 %v12119_v57  ;;  %v3277_v12 = vld [vmem:[%s14275_s5 + $0x1d0] sm:$0xff]  ;;  %v3278_v3 = vld [vmem:[%s14275_s5 + $0x1d8] sm:$0xff] }
 0x388   : > { %v8129_v52 = vmax.bf16 %v12284_v42, %v7533_v16  ;;  %v7058_v19 = vadd.bf16 %v11863_v21, %v6439_v53  ;;  %4086 = vmatmul.mubr.bf16.gmra.mrb[52].mxu0 %v12308_v43  ;;  %v4454_v8 = vpop.f32.mrb[186].mxu1  ;;  %v3281_v57 = vld [vmem:[%s14275_s5 + $0x1f0] sm:$0xff]  ;;  %v3282_v33 = vld [vmem:[%s14275_s5 + $0x1f8] sm:$0xff] }
 0x389   : > { %v9704_v28 = vcombine.low %v8090_v0, %v8107_v32  ;;  %v7059_v55 = vadd.bf16 %v11868_v7, %v6440_v13  ;;  %v6409_v9 = vpack.c.bf16 %v4454_v8, %v4450_v11  ;;  %v4456_v22 = vpop.f32.mrb[187].mxu1  ;;  %4095 = vmatprep.mubr.bf16.mxu0 %v14442_v62  ;;  %v9696_v16 = vcombine.low %v3277_v12, %v3281_v57 }
 0x38a   : > { %v7570_v41 = vmax.bf16 %v14442_v62, %v7058_v19  ;;  %v6410_v42 = vpack.c.bf16 %v4456_v22, %v4452_v17  ;;  %v9697_v53 = vcombine.high %v3277_v12, %v3281_v57  ;;  %v9699_v22 = vcombine.high %v3278_v3, %v3282_v33 }
 0x38b   : > { %v9198_v29 = vunpack.c.l.b16 %v9704_v28  ;;  %v9199_v56 = vunpack.c.h.b16 %v9704_v28  ;;  %v7571_v38 = vmax.bf16 %v14442_v62, %v7059_v55  ;;  %v7028_v54 = vadd.bf16 %v11997_v26, %v6409_v9  ;;  %v3827_v4 = vpop.f32.mrb[204].mxu0  ;;  %4719 = vmatmul.mubr.bf16.gmra.mrb[36].mxu1 %v12209_v25 }
 0x38c   : > { %v12335_v37 = vmax.bf16 %v8210_v48, %v7570_v41  ;;  %v7029_v14 = vadd.bf16 %v12003_v40, %v6410_v42  ;;  %v3829_v0 = vpop.f32.mrb[205].mxu0  ;;  %4728 = vmatprep.mubr.bf16.mxu1 %v14442_v62  ;;  %4963 = vmatprep.subr.bf16.mxu0 %v9697_v53  ;;  %v9698_v9 = vcombine.low %v3278_v3, %v3282_v33 }
 0x38d   : > { %v12343_v11 = vsel %vm9254_vm4, %v9198_v29, %v9190_v6  ;;  %v12346_v32 = vsel %vm9254_vm4, %v9199_v56, %v9191_v35  ;;  %v12348_v13 = vmax.bf16 %v8227_v1, %v7571_v38  ;;  %v7540_v48 = vmax.bf16 %v14442_v62, %v7028_v54  ;;  %v3831_v17 = vpop.f32.mrb[206].mxu0  ;;  %4964 = vmatpush1.bf16.msra.mxu0 %v9696_v16 }
 0x38e   : > { %v7541_v19 = vmax.bf16 %v14442_v62, %v7029_v14  ;;  %v6447_v8 = vpack.c.bf16 %v3831_v17, %v3827_v4  ;;  %v3833_v28 = vpop.f32.mrb[207].mxu0  ;;  %v4460_v55 = vpop.f32.mrb[188].mxu1  ;;  %5636 = vmatprep.subr.bf16.mxu1 %v9699_v22  ;;  %v14507_v4 = vld [vmem:[#allocation35_spill] sm:$0xff] }
 0x38f   : > { %v8113_v41 = vmax.bf16 %v8112_v10, %v7540_v48  ;;  %v6448_v42 = vpack.c.bf16 %v3833_v28, %v3829_v0  ;;  %v4462_v6 = vpop.f32.mrb[189].mxu1  ;;  %5637 = vmatpush1.bf16.msra.mxu1 %v9698_v9  ;;  %v14508_v10 = vpack.c.bf16 %v11719_v46, %v14507_v4 }
 0x390   : > { %v8130_v29 = vmax.bf16 %v8129_v52, %v7541_v19  ;;  %v7066_v35 = vadd.bf16 %v11863_v21, %v6447_v8  ;;  %4096 = vmatmul.mubr.bf16.gmra.mrb[56].mxu0 %v12313_v27  ;;  %v4464_v1 = vpop.f32.mrb[190].mxu1 }
 0x391   : > { %v7067_v56 = vadd.bf16 %v11868_v7, %v6448_v42  ;;  %v6417_v38 = vpack.c.bf16 %v4464_v1, %v4460_v55  ;;  %v4466_v54 = vpop.f32.mrb[191].mxu1  ;;  %4105 = vmatprep.mubr.bf16.mxu0 %v14442_v62  ;;  %v3138_v12 = vadd.bf16 %v11161_v20, %v14508_v10 }
 0x392   : > { %v7578_v52 = vmax.bf16 %v14442_v62, %v7066_v35  ;;  %v6418_v57 = vpack.c.bf16 %v4466_v54, %v4462_v6  ;;  %v14510_v6 = vld [vmem:[#allocation39_spill] sm:$0xff] }
 0x393   : > { %v7579_v3 = vmax.bf16 %v14442_v62, %v7067_v56  ;;  %v7036_v14 = vadd.bf16 %v11997_v26, %v6417_v38  ;;  %v3837_v0 = vpop.f32.mrb[208].mxu0  ;;  %4729 = vmatmul.mubr.bf16.gmra.mrb[40].mxu1 %v12237_v51  ;;  %v12370_v19 = vmax.bf16 %v14442_v62, %v3138_v12  ;;  %v14511_v35 = vpack.c.bf16 %v11747_v15, %v14510_v6 }
 0x394   : > { %v8212_v16 = vmax.bf16 %v12335_v37, %v7578_v52  ;;  %v7037_v53 = vadd.bf16 %v12003_v40, %v6418_v57  ;;  %v3839_v33 = vpop.f32.mrb[209].mxu0  ;;  %4738 = vmatprep.mubr.bf16.mxu1 %v14442_v62 }
 0x395   : > { %v8229_v46 = vmax.bf16 %v12348_v13, %v7579_v3  ;;  %v7548_v48 = vmax.bf16 %v14442_v62, %v7036_v14  ;;  %v3841_v17 = vpop.f32.mrb[210].mxu0  ;;  %14509 = vst [vmem:[#allocation31_spill] sm:$0xff] %v12370_v19  ;;  %v3139_v1 = vadd.bf16 %v11161_v20, %v14511_v35 }
 0x396   : > { %v7549_v8 = vmax.bf16 %v14442_v62, %v7037_v53  ;;  %v6455_v28 = vpack.c.bf16 %v3841_v17, %v3837_v0  ;;  %v3843_v55 = vpop.f32.mrb[211].mxu0  ;;  %v4470_v9 = vpop.f32.mrb[192].mxu1 }
 0x397   : > { %v8114_v22 = vmax.bf16 %v8113_v41, %v7548_v48  ;;  %v6456_v37 = vpack.c.bf16 %v3843_v55, %v3839_v33  ;;  %v4472_v42 = vpop.f32.mrb[193].mxu1  ;;  %v12390_v55 = vmax.bf16 %v14442_v62, %v3139_v1 }
 0x398   : > { %v8131_v13 = vmax.bf16 %v8130_v29, %v7549_v8  ;;  %v7074_v56 = vadd.bf16 %v11863_v21, %v6455_v28  ;;  %4106 = vmatmul.mubr.bf16.gmra.mrb[60].mxu0 %v12370_v19  ;;  %v4474_v38 = vpop.f32.mrb[194].mxu1 }
 0x399   : > { %v8115_v54 = vunpack.i.l.bf16 %v8114_v22  ;;  %v8116_v4 = vunpack.i.h.bf16 %v8114_v22  ;;  %v7075_v10 = vadd.bf16 %v11868_v7, %v6456_v37  ;;  %v6425_v12 = vpack.c.bf16 %v4474_v38, %v4470_v9  ;;  %v4476_v52 = vpop.f32.mrb[195].mxu1  ;;  %4115 = vmatprep.mubr.bf16.mxu0 %v14442_v62  ;;  %14512 = vst [vmem:[#allocation35_spill] sm:$0xff] %v12390_v55 }
 0x39a   : > { %v8132_v41 = vunpack.i.l.bf16 %v8131_v13  ;;  %v8133_v57 = vunpack.i.h.bf16 %v8131_v13  ;;  %v7586_v15 = vmax.bf16 %v14442_v62, %v7074_v56  ;;  %v6426_v3 = vpack.c.bf16 %v4476_v52, %v4472_v42  ;;  %v14513_v56 = vld [vmem:[#allocation40_spill] sm:$0xff] }
 0x39b   : > { %v8117_v14 = vmax.f32 %v8115_v54, %v8116_v4  ;;  %v7587_v29 = vmax.bf16 %v14442_v62, %v7075_v10  ;;  %v3847_v0 = vpop.f32.mrb[212].mxu0  ;;  %4739 = vmatmul.mubr.bf16.gmra.mrb[44].mxu1 %v12259_v49  ;;  %v7044_v52 = vadd.bf16 %v11997_v26, %v6425_v12 }
 0x39c   : > { %v8134_v53 = vmax.f32 %v8132_v41, %v8133_v57  ;;  %v12384_v33 = vmax.bf16 %v8212_v16, %v7586_v15  ;;  %v3849_v48 = vpop.f32.mrb[213].mxu0  ;;  %4748 = vmatprep.mubr.bf16.mxu1 %v14442_v62  ;;  %v14514_v16 = vld [vmem:[#allocation37_spill] sm:$0xff] }
 0x39d   : > { %v8118_v17 = vrot.slane %v8117_v14, 4  ;;  %v12387_v8 = vmax.bf16 %v8229_v46, %v7587_v29  ;;  %v3851_v28 = vpop.f32.mrb[214].mxu0  ;;  %v14515_v38 = vpack.c.bf16 %v14513_v56, %v14514_v16  ;;  %v7045_v29 = vadd.bf16 %v12003_v40, %v6426_v3 }
 0x39e   : > { %v8135_v9 = vrot.slane %v8134_v53, 4  ;;  %v6463_v22 = vpack.c.bf16 %v3851_v28, %v3847_v0  ;;  %v3853_v37 = vpop.f32.mrb[215].mxu0  ;;  %v4480_v42 = vpop.f32.mrb[196].mxu1 }
 0x39f   : > { %v8119_v6 = vmax.f32 %v8117_v14, %v8118_v17  ;;  %v6464_v35 = vpack.c.bf16 %v3853_v37, %v3849_v48  ;;  %v4482_v13 = vpop.f32.mrb[197].mxu1  ;;  %v3140_v54 = vadd.bf16 %v11161_v20, %v14515_v38 }
 0x3a0   : > { %v8136_v4 = vmax.f32 %v8134_v53, %v8135_v9  ;;  %v7082_v46 = vadd.bf16 %v11863_v21, %v6463_v22  ;;  %4116 = vmatmul.mubr.bf16.gmra.mrb[64].mxu0 %v12390_v55  ;;  %v4484_v10 = vpop.f32.mrb[198].mxu1 }
 0x3a1   : > { %v8120_v1 = vrot.slane %v8119_v6, 2  ;;  %v7083_v41 = vadd.bf16 %v11868_v7, %v6464_v35  ;;  %v6433_v57 = vpack.c.bf16 %v4484_v10, %v4480_v42  ;;  %v4486_v15 = vpop.f32.mrb[199].mxu1  ;;  %4125 = vmatprep.mubr.bf16.mxu0 %v14442_v62  ;;  %v12407_v12 = vmax.bf16 %v14442_v62, %v3140_v54 }
 0x3a2   : > { %v8137_v14 = vrot.slane %v8136_v4, 2  ;;  %v7594_v0 = vmax.bf16 %v14442_v62, %v7082_v46  ;;  %v6434_v53 = vpack.c.bf16 %v4486_v15, %v4482_v13  ;;  %v7557_v54 = vmax.bf16 %v14442_v62, %v7045_v29 }
 0x3a3   : > { %v8121_v48 = vmax.f32 %v8119_v6, %v8120_v1  ;;  %v7595_v17 = vmax.bf16 %v14442_v62, %v7083_v41  ;;  %v7052_v28 = vadd.bf16 %v11997_v26, %v6433_v57  ;;  %v3857_v9 = vpop.f32.mrb[216].mxu0  ;;  %4749 = vmatmul.mubr.bf16.gmra.mrb[48].mxu1 %v12276_v39  ;;  %14516 = vst [vmem:[#allocation39_spill] sm:$0xff] %v12407_v12 }
 0x3a4   : > { %v8138_v22 = vmax.f32 %v8136_v4, %v8137_v14  ;;  %v8214_v37 = vmax.bf16 %v12384_v33, %v7594_v0  ;;  %v7053_v42 = vadd.bf16 %v12003_v40, %v6434_v53  ;;  %v3859_v3 = vpop.f32.mrb[217].mxu0  ;;  %4758 = vmatprep.mubr.bf16.mxu1 %v14442_v62  ;;  %v7556_v6 = vmax.bf16 %v14442_v62, %v7044_v52  ;;  %v14517_v14 = vld [vmem:[#allocation45_spill] sm:$0xff]  ;;  %v14518_v0 = vld [vmem:[#allocation43_spill] sm:$0xff] }
 0x3a5   : > { %v8122_v35 = vrot.slane %v8121_v48, 1  ;;  %v8231_v13 = vmax.bf16 %v12387_v8, %v7595_v17  ;;  %v7564_v56 = vmax.bf16 %v14442_v62, %v7052_v28  ;;  %v3861_v16 = vpop.f32.mrb[218].mxu0  ;;  %v14519_v52 = vpack.c.bf16 %v14517_v14, %v14518_v0 }
 0x3a6   : > { %v8139_v38 = vrot.slane %v8138_v22, 1  ;;  %v7565_v4 = vmax.bf16 %v14442_v62, %v7053_v42  ;;  %v6471_v46 = vpack.c.bf16 %v3861_v16, %v3857_v9  ;;  %v3863_v33 = vpop.f32.mrb[219].mxu0  ;;  %v4490_v10 = vpop.f32.mrb[200].mxu1 }
 0x3a7   : > { %v8123_v1 = vmax.f32 %v8121_v48, %v8122_v35  ;;  %v8244_v41 = vmax.bf16 %v7564_v56, %v7556_v6  ;;  %v6472_v57 = vpack.c.bf16 %v3863_v33, %v3859_v3  ;;  %v4492_v15 = vpop.f32.mrb[201].mxu1  ;;  %v3141_v8 = vadd.bf16 %v11161_v20, %v14519_v52 }
 0x3a8   : > { %v8140_v53 = vmax.f32 %v8138_v22, %v8139_v38  ;;  %v8261_v17 = vmax.bf16 %v7565_v4, %v7557_v54  ;;  %v7090_v28 = vadd.bf16 %v11863_v21, %v6471_v46  ;;  %4126 = vmatmul.mubr.bf16.gmra.mrb[68].mxu0 %v12407_v12  ;;  %v4494_v29 = vpop.f32.mrb[202].mxu1 }
 0x3a9   : > { %v8124_v42 = vpack.i.bf16 %v8123_v1, %v8123_v1  ;;  %v7091_v9 = vadd.bf16 %v11868_v7, %v6472_v57  ;;  %v6441_v16 = vpack.c.bf16 %v4494_v29, %v4490_v10  ;;  %v4496_v48 = vpop.f32.mrb[203].mxu1  ;;  %4135 = vmatprep.mubr.bf16.mxu0 %v14442_v62  ;;  %v12430_v54 = vmax.bf16 %v14442_v62, %v3141_v8 }
 0x3aa   : > { %v8141_v3 = vpack.i.bf16 %v8140_v53, %v8140_v53  ;;  %v7602_v35 = vmax.bf16 %v14442_v62, %v7090_v28  ;;  %v6442_v6 = vpack.c.bf16 %v4496_v48, %v4492_v15  ;;  %v9192_v1 = vunpack.c.l.b16 %v12231_v5 }
 0x3ab   : > { %v7603_v56 = vmax.bf16 %v14442_v62, %v7091_v9  ;;  %v7060_v22 = vadd.bf16 %v11997_v26, %v6441_v16  ;;  %v3867_v38 = vpop.f32.mrb[220].mxu0  ;;  %4759 = vmatmul.mubr.bf16.gmra.mrb[52].mxu1 %v12308_v43  ;;  %14520 = vst [vmem:[#allocation40_spill] sm:$0xff] %v12430_v54  ;;  %v9193_v57 = vunpack.c.h.b16 %v12231_v5 }
 0x3ac   : > { %v9705_v4 = vcombine.low %v8124_v42, %v8141_v3  ;;  %v8215_v46 = vmax.bf16 %v8214_v37, %v7602_v35  ;;  %v7061_v33 = vadd.bf16 %v12003_v40, %v6442_v6  ;;  %v3869_v10 = vpop.f32.mrb[221].mxu0  ;;  %4768 = vmatprep.mubr.bf16.mxu1 %v14442_v62  ;;  %v14521_v6 = vld [vmem:[#allocation44_spill] sm:$0xff] }
 0x3ad   : > { %v8232_v15 = vmax.bf16 %v8231_v13, %v7603_v56  ;;  %v7572_v14 = vmax.bf16 %v14442_v62, %v7060_v22  ;;  %v3871_v0 = vpop.f32.mrb[222].mxu0  ;;  %v14522_v56 = vld [vmem:[#allocation41_spill] sm:$0xff] }
 0x3ae   : > { %v9200_v52 = vunpack.c.l.b16 %v9705_v4  ;;  %v9201_v53 = vunpack.c.h.b16 %v9705_v4  ;;  %v7573_v8 = vmax.bf16 %v14442_v62, %v7061_v33  ;;  %v6479_v28 = vpack.c.bf16 %v3871_v0, %v3867_v38  ;;  %v3873_v29 = vpop.f32.mrb[223].mxu0  ;;  %v4500_v37 = vpop.f32.mrb[204].mxu1 }
 0x3af   : > { %v12438_v42 = vmax.bf16 %v8244_v41, %v7572_v14  ;;  %v6480_v9 = vpack.c.bf16 %v3873_v29, %v3869_v10  ;;  %v4502_v16 = vpop.f32.mrb[205].mxu1  ;;  %v14523_v22 = vpack.c.bf16 %v14521_v6, %v14522_v56 }
 0x3b0   : > { %v12441_v48 = vsel %vm9254_vm4, %v9200_v52, %v9192_v1  ;;  %v12444_v5 = vsel %vm9254_vm4, %v9201_v53, %v9193_v57  ;;  %v12446_v13 = vmax.bf16 %v8261_v17, %v7573_v8  ;;  %v7098_v3 = vadd.bf16 %v11863_v21, %v6479_v28  ;;  %4136 = vmatmul.mubr.bf16.gmra.mrb[72].mxu0 %v12430_v54  ;;  %v4504_v35 = vpop.f32.mrb[206].mxu1 }
 0x3b1   : > { %v3142_v41 = vadd.bf16 %v11161_v20, %v14523_v22  ;;  %v7099_v38 = vadd.bf16 %v11868_v7, %v6480_v9  ;;  %v6449_v4 = vpack.c.bf16 %v4504_v35, %v4500_v37  ;;  %v4506_v33 = vpop.f32.mrb[207].mxu1  ;;  %4145 = vmatprep.mubr.bf16.mxu0 %v14442_v62 }
 0x3b2   : > { %v7610_v10 = vmax.bf16 %v14442_v62, %v7098_v3  ;;  %v6450_v17 = vpack.c.bf16 %v4506_v33, %v4502_v16 }
 0x3b3   : > { %v7611_v1 = vmax.bf16 %v14442_v62, %v7099_v38  ;;  %v7068_v57 = vadd.bf16 %v11997_v26, %v6449_v4  ;;  %v3877_v14 = vpop.f32.mrb[224].mxu0  ;;  %4769 = vmatmul.mubr.bf16.gmra.mrb[56].mxu1 %v12313_v27  ;;  %v12463_v8 = vmax.bf16 %v14442_v62, %v3142_v41 }
 0x3b4   : > { %v8216_v0 = vmax.bf16 %v8215_v46, %v7610_v10  ;;  %v7069_v52 = vadd.bf16 %v12003_v40, %v6450_v17  ;;  %v3879_v53 = vpop.f32.mrb[225].mxu0  ;;  %4778 = vmatprep.mubr.bf16.mxu1 %v14442_v62  ;;  %v14525_v17 = vld [vmem:[#allocation51_spill] sm:$0xff] }
 0x3b5   : > { %14524 = vst [vmem:[#allocation37_spill] sm:$0xff] %v12463_v8  ;;  %v8233_v28 = vmax.bf16 %v8232_v15, %v7611_v1  ;;  %v7580_v29 = vmax.bf16 %v14442_v62, %v7068_v57  ;;  %v3881_v37 = vpop.f32.mrb[226].mxu0  ;;  %v14526_v1 = vld [vmem:[#allocation49_spill] sm:$0xff] }
 0x3b6   : > { %v8217_v9 = vunpack.i.l.bf16 %v8216_v0  ;;  %v8218_v16 = vunpack.i.h.bf16 %v8216_v0  ;;  %v7581_v3 = vmax.bf16 %v14442_v62, %v7069_v52  ;;  %v6487_v35 = vpack.c.bf16 %v3881_v37, %v3877_v14  ;;  %v3883_v6 = vpop.f32.mrb[227].mxu0  ;;  %v4510_v56 = vpop.f32.mrb[208].mxu1 }
 0x3b7   : > { %v8234_v46 = vunpack.i.l.bf16 %v8233_v28  ;;  %v8235_v22 = vunpack.i.h.bf16 %v8233_v28  ;;  %v8246_v38 = vmax.bf16 %v12438_v42, %v7580_v29  ;;  %v6488_v4 = vpack.c.bf16 %v3883_v6, %v3879_v53  ;;  %v4512_v33 = vpop.f32.mrb[209].mxu1 }
 0x3b8   : > { %v8219_v10 = vmax.f32 %v8217_v9, %v8218_v16  ;;  %v8263_v41 = vmax.bf16 %v12446_v13, %v7581_v3  ;;  %4146 = vmatmul.mubr.bf16.gmra.mrb[76].mxu0 %v12463_v8  ;;  %v4514_v15 = vpop.f32.mrb[210].mxu1  ;;  %v14527_v57 = vpack.c.bf16 %v14525_v17, %v14526_v1 }
 0x3b9   : > { %v8236_v14 = vmax.f32 %v8234_v46, %v8235_v22  ;;  %v6457_v52 = vpack.c.bf16 %v4514_v15, %v4510_v56  ;;  %v4516_v37 = vpop.f32.mrb[211].mxu1  ;;  %4155 = vmatprep.mubr.bf16.mxu0 %v14442_v62  ;;  %v7106_v15 = vadd.bf16 %v11863_v21, %v6487_v35 }
 0x3ba   : > { %v3143_v0 = vadd.bf16 %v11161_v20, %v14527_v57  ;;  %v8220_v28 = vrot.slane %v8219_v10, 4  ;;  %v6458_v42 = vpack.c.bf16 %v4516_v37, %v4512_v33  ;;  %v7107_v37 = vadd.bf16 %v11868_v7, %v6488_v4 }
 0x3bb   : > { %v8237_v53 = vrot.slane %v8236_v14, 4  ;;  %v7076_v29 = vadd.bf16 %v11997_v26, %v6457_v52  ;;  %v3887_v9 = vpop.f32.mrb[228].mxu0  ;;  %4779 = vmatmul.mubr.bf16.gmra.mrb[60].mxu1 %v12370_v19 }
 0x3bc   : > { %v8221_v13 = vmax.f32 %v8219_v10, %v8220_v28  ;;  %v7077_v16 = vadd.bf16 %v12003_v40, %v6458_v42  ;;  %v3889_v3 = vpop.f32.mrb[229].mxu0  ;;  %4788 = vmatprep.mubr.bf16.mxu1 %v14442_v62  ;;  %v12480_v6 = vmax.bf16 %v14442_v62, %v3143_v0 }
 0x3bd   : > { %v8238_v56 = vmax.f32 %v8236_v14, %v8237_v53  ;;  %v7588_v46 = vmax.bf16 %v14442_v62, %v7076_v29  ;;  %v3891_v22 = vpop.f32.mrb[230].mxu0  ;;  %v14529_v29 = vld [vmem:[#allocation50_spill] sm:$0xff] }
 0x3be   : > { %14528 = vst [vmem:[#allocation45_spill] sm:$0xff] %v12480_v6  ;;  %v8222_v33 = vrot.slane %v8221_v13, 2  ;;  %v7589_v17 = vmax.bf16 %v14442_v62, %v7077_v16  ;;  %v6495_v1 = vpack.c.bf16 %v3891_v22, %v3887_v9  ;;  %v3893_v57 = vpop.f32.mrb[231].mxu0  ;;  %v4520_v10 = vpop.f32.mrb[212].mxu1  ;;  %v14530_v16 = vld [vmem:[#allocation46_spill] sm:$0xff] }
 0x3bf   : > { %v8239_v52 = vrot.slane %v8238_v56, 2  ;;  %v12486_v28 = vmax.bf16 %v8246_v38, %v7588_v46  ;;  %v6496_v42 = vpack.c.bf16 %v3893_v57, %v3889_v3  ;;  %v4522_v0 = vpop.f32.mrb[213].mxu1  ;;  %v14531_v9 = vpack.c.bf16 %v14529_v29, %v14530_v16 }
 0x3c0   : > { %v8223_v19 = vmax.f32 %v8221_v13, %v8222_v33  ;;  %v12488_v14 = vmax.bf16 %v8263_v41, %v7589_v17  ;;  %v7114_v53 = vadd.bf16 %v11863_v21, %v6495_v1  ;;  %4156 = vmatmul.mubr.bf16.gmra.mrb[80].mxu0 %v12480_v6  ;;  %v4524_v35 = vpop.f32.mrb[214].mxu1  ;;  %v7618_v41 = vmax.bf16 %v14442_v62, %v7106_v15 }
 0x3c1   : > { %v3144_v22 = vadd.bf16 %v11161_v20, %v14531_v9  ;;  %v8240_v27 = vmax.f32 %v8238_v56, %v8239_v52  ;;  %v7115_v4 = vadd.bf16 %v11868_v7, %v6496_v42  ;;  %v6465_v38 = vpack.c.bf16 %v4524_v35, %v4520_v10  ;;  %v4526_v46 = vpop.f32.mrb[215].mxu1  ;;  %4165 = vmatprep.mubr.bf16.mxu0 %v14442_v62 }
 0x3c2   : > { %v8224_v13 = vrot.slane %v8223_v19, 1  ;;  %v7626_v3 = vmax.bf16 %v14442_v62, %v7114_v53  ;;  %v6466_v33 = vpack.c.bf16 %v4526_v46, %v4522_v0  ;;  %v7619_v1 = vmax.bf16 %v14442_v62, %v7107_v37 }
 0x3c3   : > { %v8241_v17 = vrot.slane %v8240_v27, 1  ;;  %v7627_v57 = vmax.bf16 %v14442_v62, %v7115_v4  ;;  %v7084_v29 = vadd.bf16 %v11997_v26, %v6465_v38  ;;  %v3897_v56 = vpop.f32.mrb[232].mxu0  ;;  %4789 = vmatmul.mubr.bf16.gmra.mrb[64].mxu1 %v12390_v55  ;;  %v12508_v37 = vmax.bf16 %v14442_v62, %v3144_v22 }
 0x3c4   : > { %v8225_v10 = vmax.f32 %v8223_v19, %v8224_v13  ;;  %v8346_v52 = vmax.bf16 %v7626_v3, %v7618_v41  ;;  %v7085_v42 = vadd.bf16 %v12003_v40, %v6466_v33  ;;  %v3899_v35 = vpop.f32.mrb[233].mxu0  ;;  %4798 = vmatprep.mubr.bf16.mxu1 %v14442_v62 }
 0x3c5   : > { %v8242_v15 = vmax.f32 %v8240_v27, %v8241_v17  ;;  %v8363_v53 = vmax.bf16 %v7627_v57, %v7619_v1  ;;  %v7596_v0 = vmax.bf16 %v14442_v62, %v7084_v29  ;;  %v3901_v16 = vpop.f32.mrb[234].mxu0 }
 0x3c6   : > { %v8226_v9 = vpack.i.bf16 %v8225_v10, %v8225_v10  ;;  %v7597_v4 = vmax.bf16 %v14442_v62, %v7085_v42  ;;  %v6503_v38 = vpack.c.bf16 %v3901_v16, %v3897_v56  ;;  %v3903_v46 = vpop.f32.mrb[235].mxu0  ;;  %v4530_v19 = vpop.f32.mrb[216].mxu1  ;;  %v14532_v56 = vld [vmem:[#allocation56_spill] sm:$0xff]  ;;  %v14533_v42 = vld [vmem:[#allocation54_spill] sm:$0xff] }
 0x3c7   : > { %v8243_v13 = vpack.i.bf16 %v8242_v15, %v8242_v15  ;;  %v8248_v41 = vmax.bf16 %v12486_v28, %v7596_v0  ;;  %v6504_v3 = vpack.c.bf16 %v3903_v46, %v3899_v35  ;;  %v4532_v33 = vpop.f32.mrb[217].mxu1  ;;  %v14534_v15 = vpack.c.bf16 %v14532_v56, %v14533_v42 }
 0x3c8   : > { %v8265_v27 = vmax.bf16 %v12488_v14, %v7597_v4  ;;  %v7122_v17 = vadd.bf16 %v11863_v21, %v6503_v38  ;;  %4166 = vmatmul.mubr.bf16.gmra.mrb[84].mxu0 %v12508_v37  ;;  %v4534_v1 = vpop.f32.mrb[218].mxu1 }
 0x3c9   : > { %v9708_v22 = vcombine.low %v8226_v9, %v8243_v13  ;;  %v7123_v57 = vadd.bf16 %v11868_v7, %v6504_v3  ;;  %v6473_v29 = vpack.c.bf16 %v4534_v1, %v4530_v19  ;;  %v4536_v10 = vpop.f32.mrb[219].mxu1  ;;  %4175 = vmatprep.mubr.bf16.mxu0 %v14442_v62  ;;  %v3145_v28 = vadd.bf16 %v11161_v20, %v14534_v15 }
 0x3ca   : > { %v7634_v35 = vmax.bf16 %v14442_v62, %v7122_v17  ;;  %v6474_v14 = vpack.c.bf16 %v4536_v10, %v4532_v33 }
 0x3cb   : > { %v9206_v0 = vunpack.c.l.b16 %v9708_v22  ;;  %v9207_v16 = vunpack.c.h.b16 %v9708_v22  ;;  %v7635_v4 = vmax.bf16 %v14442_v62, %v7123_v57  ;;  %v7092_v9 = vadd.bf16 %v11997_v26, %v6473_v29  ;;  %v3907_v38 = vpop.f32.mrb[236].mxu0  ;;  %4799 = vmatmul.mubr.bf16.gmra.mrb[68].mxu1 %v12407_v12 }
 0x3cc   : > { %v12525_v46 = vmax.bf16 %v8346_v52, %v7634_v35  ;;  %v7093_v19 = vadd.bf16 %v12003_v40, %v6474_v14  ;;  %v3909_v13 = vpop.f32.mrb[237].mxu0  ;;  %4808 = vmatprep.mubr.bf16.mxu1 %v14442_v62  ;;  %v12541_v52 = vmax.bf16 %v14442_v62, %v3145_v28  ;;  %v14535_v28 = vld [vmem:[#allocation55_spill] sm:$0xff] }
 0x3cd   : > { %v12529_v3 = vmax.bf16 %v8363_v53, %v7635_v4  ;;  %v7604_v33 = vmax.bf16 %v14442_v62, %v7092_v9  ;;  %v3911_v17 = vpop.f32.mrb[238].mxu0  ;;  %v12534_v1 = vsel %vm9256_vm5, %v9206_v0, %v12343_v11  ;;  %v12538_v22 = vsel %vm9256_vm5, %v9207_v16, %v12346_v32  ;;  %v14536_v4 = vld [vmem:[#allocation52_spill] sm:$0xff] }
 0x3ce   : > { %v7605_v57 = vmax.bf16 %v14442_v62, %v7093_v19  ;;  %v6511_v29 = vpack.c.bf16 %v3911_v17, %v3907_v38  ;;  %v3913_v10 = vpop.f32.mrb[239].mxu0  ;;  %v4540_v53 = vpop.f32.mrb[220].mxu1  ;;  %v14537_v9 = vpack.c.bf16 %v14535_v28, %v14536_v4  ;;  %v14539_v4 = vld [vmem:[#allocation61_spill] sm:$0xff] }
 0x3cf   : > { %v8249_v56 = vmax.bf16 %v8248_v41, %v7604_v33  ;;  %v6512_v42 = vpack.c.bf16 %v3913_v10, %v3909_v13  ;;  %v4542_v15 = vpop.f32.mrb[221].mxu1 }
 0x3d0   : > { %v8266_v35 = vmax.bf16 %v8265_v27, %v7605_v57  ;;  %v7130_v14 = vadd.bf16 %v11863_v21, %v6511_v29  ;;  %4176 = vmatmul.mubr.bf16.gmra.mrb[88].mxu0 %v12541_v52  ;;  %v4544_v11 = vpop.f32.mrb[222].mxu1  ;;  %v3146_v38 = vadd.bf16 %v11161_v20, %v14537_v9  ;;  %v14540_v9 = vld [vmem:[#allocation59_spill] sm:$0xff] }
 0x3d1   : > { %v7131_v32 = vadd.bf16 %v11868_v7, %v6512_v42  ;;  %v6481_v0 = vpack.c.bf16 %v4544_v11, %v4540_v53  ;;  %v4546_v16 = vpop.f32.mrb[223].mxu1  ;;  %4185 = vmatprep.mubr.bf16.mxu0 %v14442_v62 }
 0x3d2   : > { %v7642_v41 = vmax.bf16 %v14442_v62, %v7130_v14  ;;  %v6482_v19 = vpack.c.bf16 %v4546_v16, %v4542_v15  ;;  %v12562_v15 = vmax.bf16 %v14442_v62, %v3146_v38 }
 0x3d3   : > { %v7643_v27 = vmax.bf16 %v14442_v62, %v7131_v32  ;;  %v7100_v13 = vadd.bf16 %v11997_v26, %v6481_v0  ;;  %v3917_v33 = vpop.f32.mrb[240].mxu0  ;;  %4809 = vmatmul.mubr.bf16.gmra.mrb[72].mxu1 %v12430_v54 }
 0x3d4   : > { %v8348_v17 = vmax.bf16 %v12525_v46, %v7642_v41  ;;  %v7101_v57 = vadd.bf16 %v12003_v40, %v6482_v19  ;;  %v3919_v29 = vpop.f32.mrb[241].mxu0  ;;  %4818 = vmatprep.mubr.bf16.mxu1 %v14442_v62  ;;  %14538 = vst [vmem:[#allocation43_spill] sm:$0xff] %v12562_v15  ;;  %v14541_v41 = vpack.c.bf16 %v14539_v4, %v14540_v9 }
 0x3d5   : > { %v8365_v10 = vmax.bf16 %v12529_v3, %v7643_v27  ;;  %v7612_v53 = vmax.bf16 %v14442_v62, %v7100_v13  ;;  %v3921_v42 = vpop.f32.mrb[242].mxu0 }
 0x3d6   : > { %v7613_v14 = vmax.bf16 %v14442_v62, %v7101_v57  ;;  %v6519_v11 = vpack.c.bf16 %v3921_v42, %v3917_v33  ;;  %v3923_v32 = vpop.f32.mrb[243].mxu0  ;;  %v4550_v0 = vpop.f32.mrb[224].mxu1  ;;  %v3147_v19 = vadd.bf16 %v11161_v20, %v14541_v41 }
 0x3d7   : > { %v8250_v16 = vmax.bf16 %v8249_v56, %v7612_v53  ;;  %v6520_v46 = vpack.c.bf16 %v3923_v32, %v3919_v29  ;;  %v4552_v28 = vpop.f32.mrb[225].mxu1 }
 0x3d8   : > { %v8267_v3 = vmax.bf16 %v8266_v35, %v7613_v14  ;;  %v7138_v27 = vadd.bf16 %v11863_v21, %v6519_v11  ;;  %4186 = vmatmul.mubr.bf16.gmra.mrb[92].mxu0 %v12562_v15  ;;  %v4554_v38 = vpop.f32.mrb[226].mxu1 }
 0x3d9   : > { %v8251_v13 = vunpack.i.l.bf16 %v8250_v16  ;;  %v8252_v54 = vunpack.i.h.bf16 %v8250_v16  ;;  %v7139_v33 = vadd.bf16 %v11868_v7, %v6520_v46  ;;  %v6489_v57 = vpack.c.bf16 %v4554_v38, %v4550_v0  ;;  %v4556_v42 = vpop.f32.mrb[227].mxu1  ;;  %4195 = vmatprep.mubr.bf16.mxu0 %v14442_v62 }
 0x3da   : > { %v8268_v56 = vunpack.i.l.bf16 %v8267_v3  ;;  %v8269_v29 = vunpack.i.h.bf16 %v8267_v3  ;;  %v7650_v53 = vmax.bf16 %v14442_v62, %v7138_v27  ;;  %v6490_v32 = vpack.c.bf16 %v4556_v42, %v4552_v28 }
 0x3db   : > { %v8253_v4 = vmax.f32 %v8251_v13, %v8252_v54  ;;  %v7651_v35 = vmax.bf16 %v14442_v62, %v7139_v33  ;;  %v3927_v14 = vpop.f32.mrb[244].mxu0  ;;  %4819 = vmatmul.mubr.bf16.gmra.mrb[76].mxu1 %v12463_v8  ;;  %v12582_v3 = vmax.bf16 %v14442_v62, %v3147_v19  ;;  %v7108_v12 = vadd.bf16 %v11997_v26, %v6489_v57 }
 0x3dc   : > { %v8270_v11 = vmax.f32 %v8268_v56, %v8269_v29  ;;  %v12576_v9 = vmax.bf16 %v8348_v17, %v7650_v53  ;;  %v3929_v16 = vpop.f32.mrb[245].mxu0  ;;  %4828 = vmatprep.mubr.bf16.mxu1 %v14442_v62  ;;  %v14542_v56 = vld [vmem:[#allocation60_spill] sm:$0xff]  ;;  %v14543_v17 = vld [vmem:[#allocation57_spill] sm:$0xff] }
 0x3dd   : > { %v8254_v0 = vrot.slane %v8253_v4, 4  ;;  %v12579_v46 = vmax.bf16 %v8365_v10, %v7651_v35  ;;  %v3931_v41 = vpop.f32.mrb[246].mxu0  ;;  %v14544_v29 = vpack.c.bf16 %v14542_v56, %v14543_v17 }
 0x3de   : > { %v8271_v28 = vrot.slane %v8270_v11, 4  ;;  %v6527_v54 = vpack.c.bf16 %v3931_v41, %v3927_v14  ;;  %v3933_v27 = vpop.f32.mrb[247].mxu0  ;;  %v4560_v38 = vpop.f32.mrb[228].mxu1 }
 0x3df   : > { %v8255_v13 = vmax.f32 %v8253_v4, %v8254_v0  ;;  %v6528_v33 = vpack.c.bf16 %v3933_v27, %v3929_v16  ;;  %v4562_v42 = vpop.f32.mrb[229].mxu1  ;;  %v3148_v53 = vadd.bf16 %v11161_v20, %v14544_v29  ;;  %v7109_v0 = vadd.bf16 %v12003_v40, %v6490_v32 }
 0x3e0   : > { %v8272_v8 = vmax.f32 %v8270_v11, %v8271_v28  ;;  %v7146_v10 = vadd.bf16 %v11863_v21, %v6527_v54  ;;  %4196 = vmatmul.mubr.bf16.gmra.mrb[96].mxu0 %v12582_v3  ;;  %v4564_v35 = vpop.f32.mrb[230].mxu1 }
 0x3e1   : > { %v8256_v19 = vrot.slane %v8255_v13, 2  ;;  %v7147_v14 = vadd.bf16 %v11868_v7, %v6528_v33  ;;  %v6497_v41 = vpack.c.bf16 %v4564_v35, %v4560_v38  ;;  %v4566_v4 = vpop.f32.mrb[231].mxu1  ;;  %4205 = vmatprep.mubr.bf16.mxu0 %v14442_v62  ;;  %v12599_v57 = vmax.bf16 %v14442_v62, %v3148_v53 }
 0x3e2   : > { %v8273_v16 = vrot.slane %v8272_v8, 2  ;;  %v7658_v27 = vmax.bf16 %v14442_v62, %v7146_v10  ;;  %v6498_v11 = vpack.c.bf16 %v4566_v4, %v4562_v42  ;;  %v7621_v53 = vmax.bf16 %v14442_v62, %v7109_v0 }
 0x3e3   : > { %v8257_v28 = vmax.f32 %v8255_v13, %v8256_v19  ;;  %v7659_v54 = vmax.bf16 %v14442_v62, %v7147_v14  ;;  %v7116_v56 = vadd.bf16 %v11997_v26, %v6497_v41  ;;  %v3937_v17 = vpop.f32.mrb[248].mxu0  ;;  %4829 = vmatmul.mubr.bf16.gmra.mrb[80].mxu1 %v12480_v6  ;;  %v7620_v13 = vmax.bf16 %v14442_v62, %v7108_v12 }
 0x3e4   : > { %v8274_v38 = vmax.f32 %v8272_v8, %v8273_v16  ;;  %v8350_v33 = vmax.bf16 %v12576_v9, %v7658_v27  ;;  %v7117_v29 = vadd.bf16 %v12003_v40, %v6498_v11  ;;  %v3939_v32 = vpop.f32.mrb[249].mxu0  ;;  %4838 = vmatprep.mubr.bf16.mxu1 %v14442_v62 }
 0x3e5   : > { %v8258_v42 = vrot.slane %v8257_v28, 1  ;;  %v8367_v10 = vmax.bf16 %v12579_v46, %v7659_v54  ;;  %v7628_v35 = vmax.bf16 %v14442_v62, %v7116_v56  ;;  %v3941_v19 = vpop.f32.mrb[250].mxu0  ;;  %v14545_v54 = vld [vmem:[#allocation64_spill] sm:$0xff] }
 0x3e6   : > { %v8275_v14 = vrot.slane %v8274_v38, 1  ;;  %v7629_v8 = vmax.bf16 %v14442_v62, %v7117_v29  ;;  %v6535_v41 = vpack.c.bf16 %v3941_v19, %v3937_v17  ;;  %v3943_v9 = vpop.f32.mrb[251].mxu0  ;;  %v4570_v4 = vpop.f32.mrb[232].mxu1  ;;  %v14546_v56 = vpack.c.bf16 %v11888_v50, %v14545_v54 }
 0x3e7   : > { %v8259_v16 = vmax.f32 %v8257_v28, %v8258_v42  ;;  %v8380_v27 = vmax.bf16 %v7628_v35, %v7620_v13  ;;  %v6536_v11 = vpack.c.bf16 %v3943_v9, %v3939_v32  ;;  %v4572_v6 = vpop.f32.mrb[233].mxu1 }
 0x3e8   : > { %v8276_v55 = vmax.f32 %v8274_v38, %v8275_v14  ;;  %v8397_v43 = vmax.bf16 %v7629_v8, %v7621_v53  ;;  %v7154_v12 = vadd.bf16 %v11863_v21, %v6535_v41  ;;  %4206 = vmatmul.mubr.bf16.gmra.mrb[100].mxu0 %v12599_v57  ;;  %v4574_v46 = vpop.f32.mrb[234].mxu1  ;;  %v3149_v0 = vadd.bf16 %v11161_v20, %v14546_v56 }
 0x3e9   : > { %v8260_v29 = vpack.i.bf16 %v8259_v16, %v8259_v16  ;;  %v7155_v17 = vadd.bf16 %v11868_v7, %v6536_v11  ;;  %v6505_v19 = vpack.c.bf16 %v4574_v46, %v4570_v4  ;;  %v4576_v28 = vpop.f32.mrb[235].mxu1  ;;  %4215 = vmatprep.mubr.bf16.mxu0 %v14442_v62 }
 0x3ea   : > { %v8277_v32 = vpack.i.bf16 %v8276_v55, %v8276_v55  ;;  %v7666_v38 = vmax.bf16 %v14442_v62, %v7154_v12  ;;  %v6506_v42 = vpack.c.bf16 %v4576_v28, %v4572_v6  ;;  %v12624_v9 = vmax.bf16 %v14442_v62, %v3149_v0 }
 0x3eb   : > { %v7667_v13 = vmax.bf16 %v14442_v62, %v7155_v17  ;;  %v7124_v35 = vadd.bf16 %v11997_v26, %v6505_v19  ;;  %v3947_v14 = vpop.f32.mrb[252].mxu0  ;;  %4839 = vmatmul.mubr.bf16.gmra.mrb[84].mxu1 %v12508_v37 }
 0x3ec   : > { %v9709_v50 = vcombine.low %v8260_v29, %v8277_v32  ;;  %v8351_v53 = vmax.bf16 %v8350_v33, %v7666_v38  ;;  %v7125_v8 = vadd.bf16 %v12003_v40, %v6506_v42  ;;  %v3949_v41 = vpop.f32.mrb[253].mxu0  ;;  %4848 = vmatprep.mubr.bf16.mxu1 %v14442_v62  ;;  %14547 = vst [vmem:[#allocation44_spill] sm:$0xff] %v12624_v9  ;;  %v14548_v38 = vld [vmem:[#allocation65_spill] sm:$0xff] }
 0x3ed   : > { %v8368_v55 = vmax.bf16 %v8367_v10, %v7667_v13  ;;  %v7636_v6 = vmax.bf16 %v14442_v62, %v7124_v35  ;;  %v3951_v4 = vpop.f32.mrb[254].mxu0 }
 0x3ee   : > { %v9208_v16 = vunpack.c.l.b16 %v9709_v50  ;;  %v9209_v11 = vunpack.c.h.b16 %v9709_v50  ;;  %v7637_v12 = vmax.bf16 %v14442_v62, %v7125_v8  ;;  %v6543_v46 = vpack.c.bf16 %v3951_v4, %v3947_v14  ;;  %v3953_v54 = vpop.f32.mrb[255].mxu0  ;;  %v4580_v56 = vpop.f32.mrb[236].mxu1 }
 0x3ef   : > { %v12628_v33 = vmax.bf16 %v8380_v27, %v7636_v6  ;;  %v6544_v29 = vpack.c.bf16 %v3953_v54, %v3949_v41  ;;  %v4582_v17 = vpop.f32.mrb[237].mxu1  ;;  %v14549_v27 = vld [vmem:[#allocation62_spill] sm:$0xff] }
 0x3f0   : > { %v12630_v19 = vmax.bf16 %v8397_v43, %v7637_v12  ;;  %v7162_v0 = vadd.bf16 %v11863_v21, %v6543_v46  ;;  %4216 = vmatmul.mubr.bf16.gmra.mrb[104].mxu0 %v12624_v9  ;;  %v4584_v10 = vpop.f32.mrb[238].mxu1  ;;  %v12636_v28 = vsel %vm9256_vm5, %v9208_v16, %v12441_v48  ;;  %v12640_v32 = vsel %vm9256_vm5, %v9209_v11, %v12444_v5 }
 0x3f1   : > { %v14550_v42 = vpack.c.bf16 %v14548_v38, %v14549_v27  ;;  %v7163_v43 = vadd.bf16 %v11868_v7, %v6544_v29  ;;  %v6513_v35 = vpack.c.bf16 %v4584_v10, %v4580_v56  ;;  %v4586_v14 = vpop.f32.mrb[239].mxu1  ;;  %4225 = vmatprep.mubr.bf16.mxu0 %v14442_v62 }
 0x3f2   : > { %v7674_v50 = vmax.bf16 %v14442_v62, %v7162_v0  ;;  %v6514_v8 = vpack.c.bf16 %v4586_v14, %v4582_v17 }
 0x3f3   : > { %v3150_v13 = vadd.bf16 %v11161_v20, %v14550_v42  ;;  %v7675_v48 = vmax.bf16 %v14442_v62, %v7163_v43  ;;  %v7132_v41 = vadd.bf16 %v11997_v26, %v6513_v35  ;;  %v3957_v5 = vpop.f32.mrb[0].mxu0  ;;  %4849 = vmatmul.mubr.bf16.gmra.mrb[88].mxu1 %v12541_v52 }
 0x3f4   : > { %v8352_v6 = vmax.bf16 %v8351_v53, %v7674_v50  ;;  %v7133_v4 = vadd.bf16 %v12003_v40, %v6514_v8  ;;  %v3959_v16 = vpop.f32.mrb[1].mxu0  ;;  %4858 = vmatprep.mubr.bf16.mxu1 %v14442_v62  ;;  %v14552_v50 = vld [vmem:[#allocation69_spill] sm:$0xff]  ;;  %v14553_v8 = vld [vmem:[#allocation67_spill] sm:$0xff] }
 0x3f5   : > { %v12655_v11 = vmax.bf16 %v14442_v62, %v3150_v13  ;;  %v8369_v12 = vmax.bf16 %v8368_v55, %v7675_v48  ;;  %v7644_v46 = vmax.bf16 %v14442_v62, %v7132_v41  ;;  %v3961_v54 = vpop.f32.mrb[2].mxu0  ;;  %v14554_v48 = vpack.c.bf16 %v14552_v50, %v14553_v8 }
 0x3f6   : > { %v8353_v56 = vunpack.i.l.bf16 %v8352_v6  ;;  %v8354_v29 = vunpack.i.h.bf16 %v8352_v6  ;;  %v7645_v17 = vmax.bf16 %v14442_v62, %v7133_v4  ;;  %v6551_v0 = vpack.c.bf16 %v3961_v54, %v3957_v5  ;;  %v3963_v10 = vpop.f32.mrb[3].mxu0  ;;  %v4590_v38 = vpop.f32.mrb[240].mxu1 }
 0x3f7   : > { %14551 = vst [vmem:[#allocation41_spill] sm:$0xff] %v12655_v11  ;;  %v8370_v53 = vunpack.i.l.bf16 %v8369_v12  ;;  %v8371_v27 = vunpack.i.h.bf16 %v8369_v12  ;;  %v8382_v42 = vmax.bf16 %v12628_v33, %v7644_v46  ;;  %v6552_v43 = vpack.c.bf16 %v3963_v10, %v3959_v16  ;;  %v4592_v35 = vpop.f32.mrb[241].mxu1 }
 0x3f8   : > { %v8355_v14 = vmax.f32 %v8353_v56, %v8354_v29  ;;  %v8399_v13 = vmax.bf16 %v12630_v19, %v7645_v17  ;;  %4226 = vmatmul.mubr.bf16.gmra.mrb[108].mxu0 %v12655_v11  ;;  %v4594_v55 = vpop.f32.mrb[242].mxu1  ;;  %v3151_v41 = vadd.bf16 %v11161_v20, %v14554_v48 }
 0x3f9   : > { %v8372_v5 = vmax.f32 %v8370_v53, %v8371_v27  ;;  %v6521_v6 = vpack.c.bf16 %v4594_v55, %v4590_v38  ;;  %v4596_v4 = vpop.f32.mrb[243].mxu1  ;;  %4235 = vmatprep.mubr.bf16.mxu0 %v14442_v62 }
 0x3fa   : > { %v8356_v12 = vrot.slane %v8355_v14, 4  ;;  %v6522_v33 = vpack.c.bf16 %v4596_v4, %v4592_v35  ;;  %v12672_v17 = vmax.bf16 %v14442_v62, %v3151_v41  ;;  %v7170_v35 = vadd.bf16 %v11863_v21, %v6551_v0 }
 0x3fb   : > { %v8373_v16 = vrot.slane %v8372_v5, 4  ;;  %v7140_v46 = vadd.bf16 %v11997_v26, %v6521_v6  ;;  %v3967_v54 = vpop.f32.mrb[4].mxu0  ;;  %4859 = vmatmul.mubr.bf16.gmra.mrb[92].mxu1 %v12562_v15  ;;  %v7171_v6 = vadd.bf16 %v11868_v7, %v6552_v43 }
 0x3fc   : > { %v8357_v19 = vmax.f32 %v8355_v14, %v8356_v12  ;;  %v7141_v56 = vadd.bf16 %v12003_v40, %v6522_v33  ;;  %v3969_v29 = vpop.f32.mrb[5].mxu0  ;;  %4868 = vmatprep.mubr.bf16.mxu1 %v14442_v62  ;;  %14555 = vst [vmem:[#allocation51_spill] sm:$0xff] %v12672_v17 }
 0x3fd   : > { %v8374_v10 = vmax.f32 %v8372_v5, %v8373_v16  ;;  %v7652_v38 = vmax.bf16 %v14442_v62, %v7140_v46  ;;  %v3971_v53 = vpop.f32.mrb[6].mxu0  ;;  %v14556_v46 = vld [vmem:[#allocation68_spill] sm:$0xff] }
 0x3fe   : > { %v8358_v27 = vrot.slane %v8357_v19, 2  ;;  %v7653_v55 = vmax.bf16 %v14442_v62, %v7141_v56  ;;  %v6559_v50 = vpack.c.bf16 %v3971_v53, %v3967_v54  ;;  %v3973_v8 = vpop.f32.mrb[7].mxu0  ;;  %v4600_v14 = vpop.f32.mrb[244].mxu1  ;;  %v14557_v56 = vld [vmem:[#allocation66_spill] sm:$0xff] }
 0x3ff   : > { %v8375_v48 = vrot.slane %v8374_v10, 2  ;;  %v12678_v4 = vmax.bf16 %v8382_v42, %v7652_v38  ;;  %v6560_v12 = vpack.c.bf16 %v3973_v8, %v3969_v29  ;;  %v4602_v41 = vpop.f32.mrb[245].mxu1  ;;  %v14558_v54 = vpack.c.bf16 %v14556_v46, %v14557_v56 }
 0x400   : > { %v8359_v33 = vmax.f32 %v8357_v19, %v8358_v27  ;;  %v12680_v5 = vmax.bf16 %v8399_v13, %v7653_v55  ;;  %v7178_v16 = vadd.bf16 %v11863_v21, %v6559_v50  ;;  %4236 = vmatmul.mubr.bf16.gmra.mrb[112].mxu0 %v12672_v17  ;;  %v4604_v0 = vpop.f32.mrb[246].mxu1  ;;  %v7682_v13 = vmax.bf16 %v14442_v62, %v7170_v35 }
 0x401   : > { %v3152_v53 = vadd.bf16 %v11161_v20, %v14558_v54  ;;  %v8376_v15 = vmax.f32 %v8374_v10, %v8375_v48  ;;  %v7179_v43 = vadd.bf16 %v11868_v7, %v6560_v12  ;;  %v6529_v42 = vpack.c.bf16 %v4604_v0, %v4600_v14  ;;  %v4606_v38 = vpop.f32.mrb[247].mxu1  ;;  %4245 = vmatprep.mubr.bf16.mxu0 %v14442_v62 }
 0x402   : > { %v8360_v19 = vrot.slane %v8359_v33, 1  ;;  %v7690_v29 = vmax.bf16 %v14442_v62, %v7178_v16  ;;  %v6530_v27 = vpack.c.bf16 %v4606_v38, %v4602_v41  ;;  %v7683_v50 = vmax.bf16 %v14442_v62, %v7171_v6 }
 0x403   : > { %v8377_v55 = vrot.slane %v8376_v15, 1  ;;  %v7691_v8 = vmax.bf16 %v14442_v62, %v7179_v43  ;;  %v7148_v46 = vadd.bf16 %v11997_v26, %v6529_v42  ;;  %v3977_v10 = vpop.f32.mrb[8].mxu0  ;;  %4869 = vmatmul.mubr.bf16.gmra.mrb[96].mxu1 %v12582_v3  ;;  %v12700_v6 = vmax.bf16 %v14442_v62, %v3152_v53 }
 0x404   : > { %v8361_v14 = vmax.f32 %v8359_v33, %v8360_v19  ;;  %v8482_v48 = vmax.bf16 %v7690_v29, %v7682_v13  ;;  %v7149_v12 = vadd.bf16 %v12003_v40, %v6530_v27  ;;  %v3979_v0 = vpop.f32.mrb[9].mxu0  ;;  %4878 = vmatprep.mubr.bf16.mxu1 %v14442_v62 }
 0x405   : > { %v8378_v35 = vmax.f32 %v8376_v15, %v8377_v55  ;;  %v8499_v16 = vmax.bf16 %v7691_v8, %v7683_v50  ;;  %v7660_v41 = vmax.bf16 %v14442_v62, %v7148_v46  ;;  %v3981_v56 = vpop.f32.mrb[10].mxu0  ;;  %14559 = vst [vmem:[#allocation49_spill] sm:$0xff] %v12700_v6 }
 0x406   : > { %v8362_v54 = vpack.i.bf16 %v8361_v14, %v8361_v14  ;;  %v7661_v43 = vmax.bf16 %v14442_v62, %v7149_v12  ;;  %v6567_v42 = vpack.c.bf16 %v3981_v56, %v3977_v10  ;;  %v3983_v38 = vpop.f32.mrb[11].mxu0  ;;  %v4610_v33 = vpop.f32.mrb[248].mxu1  ;;  %v14560_v10 = vpack.c.bf16 %v11960_v31, %v11951_v47 }
 0x407   : > { %v8379_v19 = vpack.i.bf16 %v8378_v35, %v8378_v35  ;;  %v8384_v13 = vmax.bf16 %v12678_v4, %v7660_v41  ;;  %v6568_v29 = vpack.c.bf16 %v3983_v38, %v3979_v0  ;;  %v4612_v27 = vpop.f32.mrb[249].mxu1 }
 0x408   : > { %v8401_v15 = vmax.bf16 %v12680_v5, %v7661_v43  ;;  %v7186_v55 = vadd.bf16 %v11863_v21, %v6567_v42  ;;  %4246 = vmatmul.mubr.bf16.gmra.mrb[116].mxu0 %v12700_v6  ;;  %v4614_v50 = vpop.f32.mrb[250].mxu1  ;;  %v3153_v4 = vadd.bf16 %v11161_v20, %v14560_v10 }
 0x409   : > { %v9712_v53 = vcombine.low %v8362_v54, %v8379_v19  ;;  %v7187_v8 = vadd.bf16 %v11868_v7, %v6568_v29  ;;  %v6537_v46 = vpack.c.bf16 %v4614_v50, %v4610_v33  ;;  %v4616_v14 = vpop.f32.mrb[251].mxu1  ;;  %4255 = vmatprep.mubr.bf16.mxu0 %v14442_v62 }
 0x40a   : > { %v7698_v12 = vmax.bf16 %v14442_v62, %v7186_v55  ;;  %v6538_v5 = vpack.c.bf16 %v4616_v14, %v4612_v27 }
 0x40b   : > { %v9214_v0 = vunpack.c.l.b16 %v9712_v53  ;;  %v9215_v35 = vunpack.c.h.b16 %v9712_v53  ;;  %v7699_v41 = vmax.bf16 %v14442_v62, %v7187_v8  ;;  %v7156_v56 = vadd.bf16 %v11997_v26, %v6537_v46  ;;  %v3987_v54 = vpop.f32.mrb[12].mxu0  ;;  %4879 = vmatmul.mubr.bf16.gmra.mrb[100].mxu1 %v12599_v57 }
 0x40c   : > { %v12717_v43 = vmax.bf16 %v8482_v48, %v7698_v12  ;;  %v7157_v42 = vadd.bf16 %v12003_v40, %v6538_v5  ;;  %v3989_v47 = vpop.f32.mrb[13].mxu0  ;;  %4888 = vmatprep.mubr.bf16.mxu1 %v14442_v62  ;;  %v12733_v48 = vmax.bf16 %v14442_v62, %v3153_v4  ;;  %v14562_v4 = vpack.c.bf16 %v11954_v30, %v11943_v59 }
 0x40d   : > { %v12721_v31 = vmax.bf16 %v8499_v16, %v7699_v41  ;;  %v7668_v38 = vmax.bf16 %v14442_v62, %v7156_v56  ;;  %v3991_v33 = vpop.f32.mrb[14].mxu0  ;;  %v12726_v19 = vsel %vm9258_vm6, %v9214_v0, %v12534_v1  ;;  %v12730_v29 = vsel %vm9258_vm6, %v9215_v35, %v12538_v22 }
 0x40e   : > { %14561 = vst [vmem:[#allocation50_spill] sm:$0xff] %v12733_v48  ;;  %v7669_v27 = vmax.bf16 %v14442_v62, %v7157_v42  ;;  %v6575_v55 = vpack.c.bf16 %v3991_v33, %v3987_v54  ;;  %v3993_v50 = vpop.f32.mrb[15].mxu0  ;;  %v4620_v16 = vpop.f32.mrb[252].mxu1  ;;  %v3154_v0 = vadd.bf16 %v11161_v20, %v14562_v4 }
 0x40f   : > { %v8385_v53 = vmax.bf16 %v8384_v13, %v7668_v38  ;;  %v6576_v8 = vpack.c.bf16 %v3993_v50, %v3989_v47  ;;  %v4622_v46 = vpop.f32.mrb[253].mxu1 }
 0x410   : > { %v8402_v14 = vmax.bf16 %v8401_v15, %v7669_v27  ;;  %v7194_v10 = vadd.bf16 %v11863_v21, %v6575_v55  ;;  %4256 = vmatmul.mubr.bf16.gmra.mrb[120].mxu0 %v12733_v48  ;;  %v4624_v1 = vpop.f32.mrb[254].mxu1  ;;  %v12754_v38 = vmax.bf16 %v14442_v62, %v3154_v0 }
 0x411   : > { %v7195_v22 = vadd.bf16 %v11868_v7, %v6576_v8  ;;  %v6545_v12 = vpack.c.bf16 %v4624_v1, %v4620_v16  ;;  %v4626_v5 = vpop.f32.mrb[255].mxu1  ;;  %4265 = vmatprep.mubr.bf16.mxu0 %v14442_v62 }
 0x412   : > { %v7706_v13 = vmax.bf16 %v14442_v62, %v7194_v10  ;;  %v6546_v35 = vpack.c.bf16 %v4626_v5, %v4622_v46  ;;  %14563 = vst [vmem:[#allocation46_spill] sm:$0xff] %v12754_v38 }
 0x413   : > { %v7707_v15 = vmax.bf16 %v14442_v62, %v7195_v22  ;;  %v7164_v41 = vadd.bf16 %v11997_v26, %v6545_v12  ;;  %v3997_v56 = vpop.f32.mrb[16].mxu0  ;;  %4889 = vmatmul.mubr.bf16.gmra.mrb[104].mxu1 %v12624_v9 }
 0x414   : > { %v8484_v54 = vmax.bf16 %v12717_v43, %v7706_v13  ;;  %v7165_v42 = vadd.bf16 %v12003_v40, %v6546_v35  ;;  %v3999_v47 = vpop.f32.mrb[17].mxu0  ;;  %4898 = vmatprep.mubr.bf16.mxu1 %v14442_v62 }
 0x415   : > { %v8501_v59 = vmax.bf16 %v12721_v31, %v7707_v15  ;;  %v7676_v20 = vmax.bf16 %v14442_v62, %v7164_v41  ;;  %v4001_v30 = vpop.f32.mrb[18].mxu0 }
 0x416   : > { %v7677_v33 = vmax.bf16 %v14442_v62, %v7165_v42  ;;  %v6583_v27 = vpack.c.bf16 %v4001_v30, %v3997_v56  ;;  %v4003_v55 = vpop.f32.mrb[19].mxu0  ;;  %v4630_v50 = vpop.f32.mrb[0].mxu1 }
 0x417   : > { %v8386_v16 = vmax.bf16 %v8385_v53, %v7676_v20  ;;  %v6584_v43 = vpack.c.bf16 %v4003_v55, %v3999_v47  ;;  %v4632_v8 = vpop.f32.mrb[1].mxu1 }
 0x418   : > { %v8403_v46 = vmax.bf16 %v8402_v14, %v7677_v33  ;;  %v7202_v10 = vadd.bf16 %v11863_v21, %v6583_v27  ;;  %4266 = vmatmul.mubr.bf16.gmra.mrb[124].mxu0 %v12754_v38  ;;  %v4634_v31 = vpop.f32.mrb[2].mxu1 }
 0x419   : > { %v8387_v1 = vunpack.i.l.bf16 %v8386_v16  ;;  %v8388_v22 = vunpack.i.h.bf16 %v8386_v16  ;;  %v7203_v12 = vadd.bf16 %v11868_v7, %v6584_v43  ;;  %v6553_v5 = vpack.c.bf16 %v4634_v31, %v4630_v50  ;;  %v4636_v4 = vpop.f32.mrb[3].mxu1  ;;  %4981 = vmatprep.mubr.bf16.mxu0 %v14442_v62 }
 0x41a   : > { %v8404_v0 = vunpack.i.l.bf16 %v8403_v46  ;;  %v8405_v13 = vunpack.i.h.bf16 %v8403_v46  ;;  %v7714_v53 = vmax.bf16 %v14442_v62, %v7202_v10  ;;  %v6554_v35 = vpack.c.bf16 %v4636_v4, %v4632_v8 }
 0x41b   : > { %v8389_v15 = vmax.f32 %v8387_v1, %v8388_v22  ;;  %v7715_v14 = vmax.bf16 %v14442_v62, %v7203_v12  ;;  %v4007_v41 = vpop.f32.mrb[20].mxu0  ;;  %4899 = vmatmul.mubr.bf16.gmra.mrb[108].mxu1 %v12655_v11  ;;  %v7172_v12 = vadd.bf16 %v11997_v26, %v6553_v5 }
 0x41c   : > { %v8406_v56 = vmax.f32 %v8404_v0, %v8405_v13  ;;  %v12764_v42 = vmax.bf16 %v8484_v54, %v7714_v53  ;;  %v4009_v47 = vpop.f32.mrb[21].mxu0  ;;  %4908 = vmatprep.mubr.bf16.mxu1 %v14442_v62  ;;  %v14564_v54 = vld [vmem:[#allocation10_spill] sm:$0xff]  ;;  %v7173_v53 = vadd.bf16 %v12003_v40, %v6554_v35 }
 0x41d   : > { %v8390_v20 = vrot.slane %v8389_v15, 4  ;;  %v12767_v30 = vmax.bf16 %v8501_v59, %v7715_v14  ;;  %v4011_v33 = vpop.f32.mrb[22].mxu0 }
 0x41e   : > { %v8407_v27 = vrot.slane %v8406_v56, 4  ;;  %v6591_v55 = vpack.c.bf16 %v4011_v33, %v4007_v41  ;;  %v4013_v50 = vpop.f32.mrb[23].mxu0  ;;  %v4640_v16 = vpop.f32.mrb[4].mxu1 }
 0x41f   : > { %v8391_v43 = vmax.f32 %v8389_v15, %v8390_v20  ;;  %v6592_v8 = vpack.c.bf16 %v4013_v50, %v4009_v47  ;;  %v4642_v46 = vpop.f32.mrb[5].mxu1  ;;  %v7684_v50 = vmax.bf16 %v14442_v62, %v7172_v12 }
 0x420   : > { %v8408_v10 = vmax.f32 %v8406_v56, %v8407_v27  ;;  %v7210_v31 = vadd.bf16 %v11863_v21, %v6591_v55  ;;  %v4644_v1 = vpop.f32.mrb[6].mxu1  ;;  %4982 = vmatmul.mubr.bf16.vlgmr.msra.gmra.mrb[128].mxu0 %v14564_v54 }
 0x421   : > { %v8392_v22 = vrot.slane %v8391_v43, 2  ;;  %v7211_v59 = vadd.bf16 %v11868_v7, %v6592_v8  ;;  %v6561_v4 = vpack.c.bf16 %v4644_v1, %v4640_v16  ;;  %v4646_v0 = vpop.f32.mrb[7].mxu1  ;;  %4991 = vmatprep.mubr.bf16.mxu0 %v14442_v62 }
 0x422   : > { %v8409_v13 = vrot.slane %v8408_v10, 2  ;;  %v7722_v15 = vmax.bf16 %v14442_v62, %v7210_v31  ;;  %v6562_v14 = vpack.c.bf16 %v4646_v0, %v4642_v46  ;;  %v7685_v31 = vmax.bf16 %v14442_v62, %v7173_v53 }
 0x423   : > { %v8393_v41 = vmax.f32 %v8391_v43, %v8392_v22  ;;  %v7723_v56 = vmax.bf16 %v14442_v62, %v7211_v59  ;;  %v7180_v47 = vadd.bf16 %v11997_v26, %v6561_v4  ;;  %v4017_v20 = vpop.f32.mrb[24].mxu0  ;;  %4909 = vmatmul.mubr.bf16.gmra.mrb[112].mxu1 %v12672_v17 }
 0x424   : > { %v8410_v5 = vmax.f32 %v8408_v10, %v8409_v13  ;;  %v8486_v33 = vmax.bf16 %v12764_v42, %v7722_v15  ;;  %v7181_v27 = vadd.bf16 %v12003_v40, %v6562_v14  ;;  %v4019_v55 = vpop.f32.mrb[25].mxu0  ;;  %4918 = vmatprep.mubr.bf16.mxu1 %v14442_v62 }
 0x425   : > { %v8394_v35 = vrot.slane %v8393_v41, 1  ;;  %v8503_v16 = vmax.bf16 %v12767_v30, %v7723_v56  ;;  %v7692_v43 = vmax.bf16 %v14442_v62, %v7180_v47  ;;  %v4021_v8 = vpop.f32.mrb[26].mxu0  ;;  %v14565_v56 = vld [vmem:[#allocation11_spill] sm:$0xff] }
 0x426   : > { %v8411_v46 = vrot.slane %v8410_v5, 1  ;;  %v7693_v10 = vmax.bf16 %v14442_v62, %v7181_v27  ;;  %v6599_v1 = vpack.c.bf16 %v4021_v8, %v4017_v20  ;;  %v4023_v42 = vpop.f32.mrb[27].mxu0  ;;  %v4650_v22 = vpop.f32.mrb[8].mxu1 }
 0x427   : > { %v8395_v59 = vmax.f32 %v8393_v41, %v8394_v35  ;;  %v8516_v4 = vmax.bf16 %v7692_v43, %v7684_v50  ;;  %v6600_v0 = vpack.c.bf16 %v4023_v42, %v4019_v55  ;;  %v4652_v13 = vpop.f32.mrb[9].mxu1 }
 0x428   : > { %v8412_v15 = vmax.f32 %v8410_v5, %v8411_v46  ;;  %v8533_v14 = vmax.bf16 %v7693_v10, %v7685_v31  ;;  %v7218_v12 = vadd.bf16 %v11863_v21, %v6599_v1  ;;  %v4654_v30 = vpop.f32.mrb[10].mxu1  ;;  %4992 = vmatmul.mubr.bf16.gmra.mrb[132].mxu0 %v14565_v56 }
 0x429   : > { %v8396_v47 = vpack.i.bf16 %v8395_v59, %v8395_v59  ;;  %v7219_v17 = vadd.bf16 %v11868_v7, %v6600_v0  ;;  %v6569_v53 = vpack.c.bf16 %v4654_v30, %v4650_v22  ;;  %v4656_v11 = vpop.f32.mrb[11].mxu1  ;;  %5001 = vmatprep.mubr.bf16.mxu0 %v14442_v62 }
 0x42a   : > { %v8413_v20 = vpack.i.bf16 %v8412_v15, %v8412_v15  ;;  %v7730_v41 = vmax.bf16 %v14442_v62, %v7218_v12  ;;  %v6570_v27 = vpack.c.bf16 %v4656_v11, %v4652_v13 }
 0x42b   : > { %v7731_v55 = vmax.bf16 %v14442_v62, %v7219_v17  ;;  %v7188_v5 = vadd.bf16 %v11997_v26, %v6569_v53  ;;  %v4027_v35 = vpop.f32.mrb[28].mxu0  ;;  %4919 = vmatmul.mubr.bf16.gmra.mrb[116].mxu1 %v12700_v6 }
 0x42c   : > { %v9713_v50 = vcombine.low %v8396_v47, %v8413_v20  ;;  %v8487_v43 = vmax.bf16 %v8486_v33, %v7730_v41  ;;  %v7189_v8 = vadd.bf16 %v12003_v40, %v6570_v27  ;;  %v4029_v46 = vpop.f32.mrb[29].mxu0  ;;  %4928 = vmatprep.mubr.bf16.mxu1 %v14442_v62 }
 0x42d   : > { %v8504_v31 = vmax.bf16 %v8503_v16, %v7731_v55  ;;  %v7700_v10 = vmax.bf16 %v14442_v62, %v7188_v5  ;;  %v4031_v1 = vpop.f32.mrb[30].mxu0  ;;  %v14566_v16 = vld [vmem:[#allocation12_spill] sm:$0xff] }
 0x42e   : > { %v9216_v42 = vunpack.c.l.b16 %v9713_v50  ;;  %v9217_v11 = vunpack.c.h.b16 %v9713_v50  ;;  %v7701_v17 = vmax.bf16 %v14442_v62, %v7189_v8  ;;  %v6607_v22 = vpack.c.bf16 %v4031_v1, %v4027_v35  ;;  %v4033_v59 = vpop.f32.mrb[31].mxu0  ;;  %v4660_v0 = vpop.f32.mrb[12].mxu1 }
 0x42f   : > { %v12799_v13 = vmax.bf16 %v8516_v4, %v7700_v10  ;;  %v6608_v15 = vpack.c.bf16 %v4033_v59, %v4029_v46  ;;  %v4662_v33 = vpop.f32.mrb[13].mxu1 }
 0x430   : > { %v12801_v12 = vmax.bf16 %v8533_v14, %v7701_v17  ;;  %v7226_v30 = vadd.bf16 %v11863_v21, %v6607_v22  ;;  %v4664_v47 = vpop.f32.mrb[14].mxu1  ;;  %5002 = vmatmul.mubr.bf16.gmra.mrb[136].mxu0 %v14566_v16  ;;  %v12807_v53 = vsel %vm9258_vm6, %v9216_v42, %v12636_v28  ;;  %v12811_v20 = vsel %vm9258_vm6, %v9217_v11, %v12640_v32 }
 0x431   : > { %v7227_v4 = vadd.bf16 %v11868_v7, %v6608_v15  ;;  %v6577_v41 = vpack.c.bf16 %v4664_v47, %v4660_v0  ;;  %v4666_v27 = vpop.f32.mrb[15].mxu1  ;;  %5011 = vmatprep.mubr.bf16.mxu0 %v14442_v62 }
 0x432   : > { %v7738_v14 = vmax.bf16 %v14442_v62, %v7226_v30  ;;  %v6578_v55 = vpack.c.bf16 %v4666_v27, %v4662_v33  ;;  %v14567_v27 = vld [vmem:[#allocation13_spill] sm:$0xff] }
 0x433   : > { %v7739_v5 = vmax.bf16 %v14442_v62, %v7227_v4  ;;  %v7196_v35 = vadd.bf16 %v11997_v26, %v6577_v41  ;;  %v4037_v50 = vpop.f32.mrb[32].mxu0  ;;  %4929 = vmatmul.mubr.bf16.gmra.mrb[120].mxu1 %v12733_v48 }
 0x434   : > { %v8488_v28 = vmax.bf16 %v8487_v43, %v7738_v14  ;;  %v7197_v32 = vadd.bf16 %v12003_v40, %v6578_v55  ;;  %v4039_v8 = vpop.f32.mrb[33].mxu0  ;;  %4938 = vmatprep.mubr.bf16.mxu1 %v14442_v62 }
 0x435   : > { %v8505_v46 = vmax.bf16 %v8504_v31, %v7739_v5  ;;  %v7708_v10 = vmax.bf16 %v14442_v62, %v7196_v35  ;;  %v4041_v1 = vpop.f32.mrb[34].mxu0 }
 0x436   : > { %v8489_v42 = vunpack.i.l.bf16 %v8488_v28  ;;  %v8490_v11 = vunpack.i.h.bf16 %v8488_v28  ;;  %v7709_v17 = vmax.bf16 %v14442_v62, %v7197_v32  ;;  %v6615_v22 = vpack.c.bf16 %v4041_v1, %v4037_v50  ;;  %v4043_v59 = vpop.f32.mrb[35].mxu0  ;;  %v4670_v0 = vpop.f32.mrb[16].mxu1 }
 0x437   : > { %v8506_v15 = vunpack.i.l.bf16 %v8505_v46  ;;  %v8507_v33 = vunpack.i.h.bf16 %v8505_v46  ;;  %v8518_v43 = vmax.bf16 %v12799_v13, %v7708_v10  ;;  %v6616_v30 = vpack.c.bf16 %v4043_v59, %v4039_v8  ;;  %v4672_v47 = vpop.f32.mrb[17].mxu1 }
 0x438   : > { %v8491_v4 = vmax.f32 %v8489_v42, %v8490_v11  ;;  %v8535_v41 = vmax.bf16 %v12801_v12, %v7709_v17  ;;  %v4674_v31 = vpop.f32.mrb[18].mxu1  ;;  %5012 = vmatmul.mubr.bf16.gmra.mrb[140].mxu0 %v14567_v27  ;;  %v7234_v17 = vadd.bf16 %v11863_v21, %v6615_v22 }
 0x439   : > { %v8508_v14 = vmax.f32 %v8506_v15, %v8507_v33  ;;  %v6585_v55 = vpack.c.bf16 %v4674_v31, %v4670_v0  ;;  %v4676_v5 = vpop.f32.mrb[19].mxu1  ;;  %5021 = vmatprep.mubr.bf16.mxu0 %v14442_v62 }
 0x43a   : > { %v8492_v35 = vrot.slane %v8491_v4, 4  ;;  %v6586_v50 = vpack.c.bf16 %v4676_v5, %v4672_v47 }
 0x43b   : > { %v8509_v28 = vrot.slane %v8508_v14, 4  ;;  %v7204_v32 = vadd.bf16 %v11997_v26, %v6585_v55  ;;  %v4047_v46 = vpop.f32.mrb[36].mxu0  ;;  %4939 = vmatmul.mubr.bf16.gmra.mrb[124].mxu1 %v12754_v38 }
 0x43c   : > { %v8493_v13 = vmax.f32 %v8491_v4, %v8492_v35  ;;  %v7205_v8 = vadd.bf16 %v12003_v40, %v6586_v50  ;;  %v4049_v12 = vpop.f32.mrb[37].mxu0  ;;  %5654 = vmatprep.mubr.bf16.mxu1 %v14442_v62  ;;  %v7235_v4 = vadd.bf16 %v11868_v7, %v6616_v30 }
 0x43d   : > { %v8510_v10 = vmax.f32 %v8508_v14, %v8509_v28  ;;  %v7716_v1 = vmax.bf16 %v14442_v62, %v7204_v32  ;;  %v4051_v42 = vpop.f32.mrb[38].mxu0  ;;  %v14568_v32 = vld [vmem:[#allocation14_spill] sm:$0xff] }
 0x43e   : > { %v8494_v11 = vrot.slane %v8493_v13, 2  ;;  %v7717_v59 = vmax.bf16 %v14442_v62, %v7205_v8  ;;  %v6623_v0 = vpack.c.bf16 %v4051_v42, %v4047_v46  ;;  %v4053_v15 = vpop.f32.mrb[39].mxu0  ;;  %v4680_v33 = vpop.f32.mrb[20].mxu1 }
 0x43f   : > { %v8511_v47 = vrot.slane %v8510_v10, 2  ;;  %v12835_v31 = vmax.bf16 %v8518_v43, %v7716_v1  ;;  %v6624_v55 = vpack.c.bf16 %v4053_v15, %v4049_v12  ;;  %v4682_v5 = vpop.f32.mrb[21].mxu1  ;;  %v7746_v43 = vmax.bf16 %v14442_v62, %v7234_v17 }
 0x440   : > { %v8495_v35 = vmax.f32 %v8493_v13, %v8494_v11  ;;  %v12837_v14 = vmax.bf16 %v8535_v41, %v7717_v59  ;;  %v7242_v50 = vadd.bf16 %v11863_v21, %v6623_v0  ;;  %v4684_v28 = vpop.f32.mrb[22].mxu1  ;;  %5022 = vmatmul.mubr.bf16.gmra.mrb[144].mxu0 %v14568_v32  ;;  %v7747_v1 = vmax.bf16 %v14442_v62, %v7235_v4 }
 0x441   : > { %v8512_v22 = vmax.f32 %v8510_v10, %v8511_v47  ;;  %v7243_v46 = vadd.bf16 %v11868_v7, %v6624_v55  ;;  %v6593_v8 = vpack.c.bf16 %v4684_v28, %v4680_v33  ;;  %v4686_v42 = vpop.f32.mrb[23].mxu1  ;;  %5031 = vmatprep.mubr.bf16.mxu0 %v14442_v62 }
 0x442   : > { %v8496_v30 = vrot.slane %v8495_v35, 1  ;;  %v7754_v12 = vmax.bf16 %v14442_v62, %v7242_v50  ;;  %v6594_v13 = vpack.c.bf16 %v4686_v42, %v4682_v5 }
 0x443   : > { %v8513_v41 = vrot.slane %v8512_v22, 1  ;;  %v7755_v11 = vmax.bf16 %v14442_v62, %v7243_v46  ;;  %v7212_v59 = vadd.bf16 %v11997_v26, %v6593_v8  ;;  %v4057_v10 = vpop.f32.mrb[40].mxu0  ;;  %5655 = vmatmul.mubr.bf16.vlgmr.msra.gmra.mrb[128].mxu1 %v14564_v54 }
 0x444   : > { %v8497_v0 = vmax.f32 %v8495_v35, %v8496_v30  ;;  %v8618_v15 = vmax.bf16 %v7754_v12, %v7746_v43  ;;  %v7213_v33 = vadd.bf16 %v12003_v40, %v6594_v13  ;;  %v4059_v47 = vpop.f32.mrb[41].mxu0  ;;  %5664 = vmatprep.mubr.bf16.mxu1 %v14442_v62  ;;  %v14569_v13 = vld [vmem:[#allocation15_spill] sm:$0xff] }
 0x445   : > { %v8514_v17 = vmax.f32 %v8512_v22, %v8513_v41  ;;  %v8635_v55 = vmax.bf16 %v7755_v11, %v7747_v1  ;;  %v7724_v5 = vmax.bf16 %v14442_v62, %v7212_v59  ;;  %v4061_v50 = vpop.f32.mrb[42].mxu0 }
 0x446   : > { %v8498_v4 = vpack.i.bf16 %v8497_v0, %v8497_v0  ;;  %v7725_v28 = vmax.bf16 %v14442_v62, %v7213_v33  ;;  %v6631_v46 = vpack.c.bf16 %v4061_v50, %v4057_v10  ;;  %v4063_v8 = vpop.f32.mrb[43].mxu0  ;;  %v4690_v42 = vpop.f32.mrb[24].mxu1 }
 0x447   : > { %v8515_v38 = vpack.i.bf16 %v8514_v17, %v8514_v17  ;;  %v8520_v54 = vmax.bf16 %v12835_v31, %v7724_v5  ;;  %v6632_v35 = vpack.c.bf16 %v4063_v8, %v4059_v47  ;;  %v4692_v30 = vpop.f32.mrb[25].mxu1 }
 0x448   : > { %v8537_v43 = vmax.bf16 %v12837_v14, %v7725_v28  ;;  %v7250_v12 = vadd.bf16 %v11863_v21, %v6631_v46  ;;  %v4694_v22 = vpop.f32.mrb[26].mxu1  ;;  %5032 = vmatmul.mubr.bf16.gmra.mrb[148].mxu0 %v14569_v13 }
 0x449   : > { %v9716_v41 = vcombine.low %v8498_v4, %v8515_v38  ;;  %v7251_v1 = vadd.bf16 %v11868_v7, %v6632_v35  ;;  %v6601_v11 = vpack.c.bf16 %v4694_v22, %v4690_v42  ;;  %v4696_v59 = vpop.f32.mrb[27].mxu1  ;;  %5041 = vmatprep.mubr.bf16.mxu0 %v14442_v62 }
 0x44a   : > { %v7762_v10 = vmax.bf16 %v14442_v62, %v7250_v12  ;;  %v6602_v0 = vpack.c.bf16 %v4696_v59, %v4692_v30  ;;  %v14570_v59 = vld [vmem:[#allocation16_spill] sm:$0xff] }
 0x44b   : > { %v9222_v31 = vunpack.c.l.b16 %v9716_v41  ;;  %v9223_v33 = vunpack.c.h.b16 %v9716_v41  ;;  %v7763_v14 = vmax.bf16 %v14442_v62, %v7251_v1  ;;  %v7220_v47 = vadd.bf16 %v11997_v26, %v6601_v11  ;;  %v4067_v17 = vpop.f32.mrb[44].mxu0  ;;  %5665 = vmatmul.mubr.bf16.gmra.mrb[132].mxu1 %v14565_v56 }
 0x44c   : > { %v12863_v38 = vmax.bf16 %v8618_v15, %v7762_v10  ;;  %v7221_v5 = vadd.bf16 %v12003_v40, %v6602_v0  ;;  %v4069_v50 = vpop.f32.mrb[45].mxu0  ;;  %5674 = vmatprep.mubr.bf16.mxu1 %v14442_v62 }
 0x44d   : > { %v12867_v4 = vmax.bf16 %v8635_v55, %v7763_v14  ;;  %v7732_v28 = vmax.bf16 %v14442_v62, %v7220_v47  ;;  %v4071_v46 = vpop.f32.mrb[46].mxu0  ;;  %v12872_v8 = vsel %vm9260_vm7, %v9222_v31, %v12726_v19  ;;  %v12876_v42 = vsel %vm9260_vm7, %v9223_v33, %v12730_v29 }
 0x44e   : > { %v7733_v56 = vmax.bf16 %v14442_v62, %v7221_v5  ;;  %v6639_v15 = vpack.c.bf16 %v4071_v46, %v4067_v17  ;;  %v4073_v35 = vpop.f32.mrb[47].mxu0  ;;  %v4700_v30 = vpop.f32.mrb[28].mxu1 }
 0x44f   : > { %v8521_v12 = vmax.bf16 %v8520_v54, %v7732_v28  ;;  %v6640_v22 = vpack.c.bf16 %v4073_v35, %v4069_v50  ;;  %v4702_v55 = vpop.f32.mrb[29].mxu1 }
 0x450   : > { %v8538_v41 = vmax.bf16 %v8537_v43, %v7733_v56  ;;  %v7258_v1 = vadd.bf16 %v11863_v21, %v6639_v15  ;;  %v4704_v11 = vpop.f32.mrb[30].mxu1  ;;  %5042 = vmatmul.mubr.bf16.gmra.mrb[152].mxu0 %v14570_v59 }
 0x451   : > { %v7259_v19 = vadd.bf16 %v11868_v7, %v6640_v22  ;;  %v6609_v10 = vpack.c.bf16 %v4704_v11, %v4700_v30  ;;  %v4706_v0 = vpop.f32.mrb[31].mxu1  ;;  %5051 = vmatprep.mubr.bf16.mxu0 %v14442_v62  ;;  %v14571_v11 = vld [vmem:[#allocation17_spill] sm:$0xff] }
 0x452   : > { %v7770_v29 = vmax.bf16 %v14442_v62, %v7258_v1  ;;  %v6610_v31 = vpack.c.bf16 %v4706_v0, %v4702_v55 }
 0x453   : > { %v7771_v33 = vmax.bf16 %v14442_v62, %v7259_v19  ;;  %v7228_v54 = vadd.bf16 %v11997_v26, %v6609_v10  ;;  %v4077_v14 = vpop.f32.mrb[48].mxu0  ;;  %5675 = vmatmul.mubr.bf16.gmra.mrb[136].mxu1 %v14566_v16 }
 0x454   : > { %v8620_v43 = vmax.bf16 %v12863_v38, %v7770_v29  ;;  %v7229_v47 = vadd.bf16 %v12003_v40, %v6610_v31  ;;  %v4079_v17 = vpop.f32.mrb[49].mxu0  ;;  %5684 = vmatprep.mubr.bf16.mxu1 %v14442_v62 }
 0x455   : > { %v8637_v5 = vmax.bf16 %v12867_v4, %v7771_v33  ;;  %v7740_v50 = vmax.bf16 %v14442_v62, %v7228_v54  ;;  %v4081_v28 = vpop.f32.mrb[50].mxu0 }
 0x456   : > { %v7741_v46 = vmax.bf16 %v14442_v62, %v7229_v47  ;;  %v6647_v56 = vpack.c.bf16 %v4081_v28, %v4077_v14  ;;  %v4083_v15 = vpop.f32.mrb[51].mxu0  ;;  %v4710_v35 = vpop.f32.mrb[32].mxu1 }
 0x457   : > { %v8522_v30 = vmax.bf16 %v8521_v12, %v7740_v50  ;;  %v6648_v22 = vpack.c.bf16 %v4083_v15, %v4079_v17  ;;  %v4712_v16 = vpop.f32.mrb[33].mxu1 }
 0x458   : > { %v8539_v55 = vmax.bf16 %v8538_v41, %v7741_v46  ;;  %v7266_v38 = vadd.bf16 %v11863_v21, %v6647_v56  ;;  %v4714_v1 = vpop.f32.mrb[34].mxu1  ;;  %5052 = vmatmul.mubr.bf16.gmra.mrb[156].mxu0 %v14571_v11 }
 0x459   : > { %v8523_v19 = vunpack.i.l.bf16 %v8522_v30  ;;  %v8524_v10 = vunpack.i.h.bf16 %v8522_v30  ;;  %v7267_v4 = vadd.bf16 %v11868_v7, %v6648_v22  ;;  %v6617_v0 = vpack.c.bf16 %v4714_v1, %v4710_v35  ;;  %v4716_v29 = vpop.f32.mrb[35].mxu1  ;;  %5061 = vmatprep.mubr.bf16.mxu0 %v14442_v62 }
 0x45a   : > { %v8540_v31 = vunpack.i.l.bf16 %v8539_v55  ;;  %v8541_v33 = vunpack.i.h.bf16 %v8539_v55  ;;  %v7778_v12 = vmax.bf16 %v14442_v62, %v7266_v38  ;;  %v6618_v54 = vpack.c.bf16 %v4716_v29, %v4712_v16 }
 0x45b   : > { %v8525_v14 = vmax.f32 %v8523_v19, %v8524_v10  ;;  %v7779_v41 = vmax.bf16 %v14442_v62, %v7267_v4  ;;  %v4087_v47 = vpop.f32.mrb[52].mxu0  ;;  %5685 = vmatmul.mubr.bf16.gmra.mrb[140].mxu1 %v14567_v27  ;;  %v7236_v29 = vadd.bf16 %v11997_v26, %v6617_v0 }
 0x45c   : > { %v8542_v17 = vmax.f32 %v8540_v31, %v8541_v33  ;;  %v12900_v50 = vmax.bf16 %v8620_v43, %v7778_v12  ;;  %v4089_v28 = vpop.f32.mrb[53].mxu0  ;;  %5694 = vmatprep.mubr.bf16.mxu1 %v14442_v62  ;;  %v14572_v43 = vld [vmem:[#allocation18_spill] sm:$0xff] }
 0x45d   : > { %v8526_v46 = vrot.slane %v8525_v14, 4  ;;  %v12903_v56 = vmax.bf16 %v8637_v5, %v7779_v41  ;;  %v4091_v15 = vpop.f32.mrb[54].mxu0 }
 0x45e   : > { %v8543_v35 = vrot.slane %v8542_v17, 4  ;;  %v6655_v30 = vpack.c.bf16 %v4091_v15, %v4087_v47  ;;  %v4093_v22 = vpop.f32.mrb[55].mxu0  ;;  %v4720_v16 = vpop.f32.mrb[36].mxu1 }
 0x45f   : > { %v8527_v55 = vmax.f32 %v8525_v14, %v8526_v46  ;;  %v6656_v38 = vpack.c.bf16 %v4093_v22, %v4089_v28  ;;  %v4722_v1 = vpop.f32.mrb[37].mxu1  ;;  %v7237_v14 = vadd.bf16 %v12003_v40, %v6618_v54 }
 0x460   : > { %v8544_v19 = vmax.f32 %v8542_v17, %v8543_v35  ;;  %v7274_v27 = vadd.bf16 %v11863_v21, %v6655_v30  ;;  %v4724_v10 = vpop.f32.mrb[38].mxu1  ;;  %5062 = vmatmul.mubr.bf16.gmra.mrb[160].mxu0 %v14572_v43 }
 0x461   : > { %v8528_v4 = vrot.slane %v8527_v55, 2  ;;  %v7275_v5 = vadd.bf16 %v11868_v7, %v6656_v38  ;;  %v6625_v31 = vpack.c.bf16 %v4724_v10, %v4720_v16  ;;  %v4726_v33 = vpop.f32.mrb[39].mxu1  ;;  %5071 = vmatprep.mubr.bf16.mxu0 %v14442_v62  ;;  %v7748_v16 = vmax.bf16 %v14442_v62, %v7236_v29 }
 0x462   : > { %v8545_v12 = vrot.slane %v8544_v19, 2  ;;  %v7786_v41 = vmax.bf16 %v14442_v62, %v7274_v27  ;;  %v6626_v47 = vpack.c.bf16 %v4726_v33, %v4722_v1  ;;  %v7749_v10 = vmax.bf16 %v14442_v62, %v7237_v14 }
 0x463   : > { %v8529_v17 = vmax.f32 %v8527_v55, %v8528_v4  ;;  %v7787_v28 = vmax.bf16 %v14442_v62, %v7275_v5  ;;  %v7244_v46 = vadd.bf16 %v11997_v26, %v6625_v31  ;;  %v4097_v15 = vpop.f32.mrb[56].mxu0  ;;  %5695 = vmatmul.mubr.bf16.gmra.mrb[144].mxu1 %v14568_v32 }
 0x464   : > { %v8546_v0 = vmax.f32 %v8544_v19, %v8545_v12  ;;  %v8622_v35 = vmax.bf16 %v12900_v50, %v7786_v41  ;;  %v7245_v30 = vadd.bf16 %v12003_v40, %v6626_v47  ;;  %v4099_v22 = vpop.f32.mrb[57].mxu0  ;;  %5704 = vmatprep.mubr.bf16.mxu1 %v14442_v62 }
 0x465   : > { %v8530_v54 = vrot.slane %v8529_v17, 1  ;;  %v8639_v55 = vmax.bf16 %v12903_v56, %v7787_v28  ;;  %v7756_v38 = vmax.bf16 %v14442_v62, %v7244_v46  ;;  %v4101_v1 = vpop.f32.mrb[58].mxu0  ;;  %v14573_v28 = vld [vmem:[#allocation19_spill] sm:$0xff] }
 0x466   : > { %v8547_v27 = vrot.slane %v8546_v0, 1  ;;  %v7757_v32 = vmax.bf16 %v14442_v62, %v7245_v30  ;;  %v6663_v19 = vpack.c.bf16 %v4101_v1, %v4097_v15  ;;  %v4103_v50 = vpop.f32.mrb[59].mxu0  ;;  %v4730_v4 = vpop.f32.mrb[40].mxu1 }
 0x467   : > { %v8531_v5 = vmax.f32 %v8529_v17, %v8530_v54  ;;  %v8652_v31 = vmax.bf16 %v7756_v38, %v7748_v16  ;;  %v6664_v33 = vpack.c.bf16 %v4103_v50, %v4099_v22  ;;  %v4732_v12 = vpop.f32.mrb[41].mxu1 }
 0x468   : > { %v8548_v41 = vmax.f32 %v8546_v0, %v8547_v27  ;;  %v8669_v47 = vmax.bf16 %v7757_v32, %v7749_v10  ;;  %v7282_v29 = vadd.bf16 %v11863_v21, %v6663_v19  ;;  %v4734_v56 = vpop.f32.mrb[42].mxu1  ;;  %5072 = vmatmul.mubr.bf16.gmra.mrb[164].mxu0 %v14573_v28 }
 0x469   : > { %v8532_v46 = vpack.i.bf16 %v8531_v5, %v8531_v5  ;;  %v7283_v48 = vadd.bf16 %v11868_v7, %v6664_v33  ;;  %v6633_v14 = vpack.c.bf16 %v4734_v56, %v4730_v4  ;;  %v4736_v6 = vpop.f32.mrb[43].mxu1  ;;  %5081 = vmatprep.mubr.bf16.mxu0 %v14442_v62 }
 0x46a   : > { %v8549_v15 = vpack.i.bf16 %v8548_v41, %v8548_v41  ;;  %v7794_v17 = vmax.bf16 %v14442_v62, %v7282_v29  ;;  %v6634_v30 = vpack.c.bf16 %v4736_v6, %v4732_v12 }
 0x46b   : > { %v7795_v22 = vmax.bf16 %v14442_v62, %v7283_v48  ;;  %v7252_v0 = vadd.bf16 %v11997_v26, %v6633_v14  ;;  %v4107_v54 = vpop.f32.mrb[60].mxu0  ;;  %5705 = vmatmul.mubr.bf16.gmra.mrb[148].mxu1 %v14569_v13 }
 0x46c   : > { %v9717_v16 = vcombine.low %v8532_v46, %v8549_v15  ;;  %v8623_v38 = vmax.bf16 %v8622_v35, %v7794_v17  ;;  %v7253_v1 = vadd.bf16 %v12003_v40, %v6634_v30  ;;  %v4109_v27 = vpop.f32.mrb[61].mxu0  ;;  %5714 = vmatprep.mubr.bf16.mxu1 %v14442_v62 }
 0x46d   : > { %v8640_v10 = vmax.bf16 %v8639_v55, %v7795_v22  ;;  %v7764_v32 = vmax.bf16 %v14442_v62, %v7252_v0  ;;  %v4111_v19 = vpop.f32.mrb[62].mxu0  ;;  %v14574_v55 = vld [vmem:[#allocation20_spill] sm:$0xff] }
 0x46e   : > { %v9224_v50 = vunpack.c.l.b16 %v9717_v16  ;;  %v9225_v6 = vunpack.c.h.b16 %v9717_v16  ;;  %v7765_v48 = vmax.bf16 %v14442_v62, %v7253_v1  ;;  %v6671_v4 = vpack.c.bf16 %v4111_v19, %v4107_v54  ;;  %v4113_v5 = vpop.f32.mrb[63].mxu0  ;;  %v4740_v33 = vpop.f32.mrb[44].mxu1 }
 0x46f   : > { %v12935_v12 = vmax.bf16 %v8652_v31, %v7764_v32  ;;  %v6672_v13 = vpack.c.bf16 %v4113_v5, %v4109_v27  ;;  %v4742_v35 = vpop.f32.mrb[45].mxu1 }
 0x470   : > { %v12937_v41 = vmax.bf16 %v8669_v47, %v7765_v48  ;;  %v7290_v29 = vadd.bf16 %v11863_v21, %v6671_v4  ;;  %v4744_v56 = vpop.f32.mrb[46].mxu1  ;;  %5082 = vmatmul.mubr.bf16.gmra.mrb[168].mxu0 %v14574_v55  ;;  %v12943_v46 = vsel %vm9260_vm7, %v9224_v50, %v12807_v53  ;;  %v12947_v14 = vsel %vm9260_vm7, %v9225_v6, %v12811_v20 }
 0x471   : > { %v7291_v31 = vadd.bf16 %v11868_v7, %v6672_v13  ;;  %v6641_v15 = vpack.c.bf16 %v4744_v56, %v4740_v33  ;;  %v4746_v17 = vpop.f32.mrb[47].mxu1  ;;  %5091 = vmatprep.mubr.bf16.mxu0 %v14442_v62 }
 0x472   : > { %v7802_v47 = vmax.bf16 %v14442_v62, %v7290_v29  ;;  %v6642_v30 = vpack.c.bf16 %v4746_v17, %v4742_v35 }
 0x473   : > { %v7803_v22 = vmax.bf16 %v14442_v62, %v7291_v31  ;;  %v7260_v0 = vadd.bf16 %v11997_v26, %v6641_v15  ;;  %v4117_v54 = vpop.f32.mrb[64].mxu0  ;;  %5715 = vmatmul.mubr.bf16.gmra.mrb[152].mxu1 %v14570_v59  ;;  %v14575_v31 = vld [vmem:[#allocation21_spill] sm:$0xff] }
 0x474   : > { %v8624_v53 = vmax.bf16 %v8623_v38, %v7802_v47  ;;  %v7261_v20 = vadd.bf16 %v12003_v40, %v6642_v30  ;;  %v4119_v16 = vpop.f32.mrb[65].mxu0  ;;  %5724 = vmatprep.mubr.bf16.mxu1 %v14442_v62 }
 0x475   : > { %v8641_v1 = vmax.bf16 %v8640_v10, %v7803_v22  ;;  %v7772_v27 = vmax.bf16 %v14442_v62, %v7260_v0  ;;  %v4121_v32 = vpop.f32.mrb[66].mxu0 }
 0x476   : > { %v8625_v19 = vunpack.i.l.bf16 %v8624_v53  ;;  %v8626_v50 = vunpack.i.h.bf16 %v8624_v53  ;;  %v7773_v6 = vmax.bf16 %v14442_v62, %v7261_v20  ;;  %v6679_v48 = vpack.c.bf16 %v4121_v32, %v4117_v54  ;;  %v4123_v4 = vpop.f32.mrb[67].mxu0  ;;  %v4750_v5 = vpop.f32.mrb[48].mxu1 }
 0x477   : > { %v8642_v33 = vunpack.i.l.bf16 %v8641_v1  ;;  %v8643_v13 = vunpack.i.h.bf16 %v8641_v1  ;;  %v8654_v59 = vmax.bf16 %v12935_v12, %v7772_v27  ;;  %v6680_v38 = vpack.c.bf16 %v4123_v4, %v4119_v16  ;;  %v4752_v35 = vpop.f32.mrb[49].mxu1 }
 0x478   : > { %v8627_v29 = vmax.f32 %v8625_v19, %v8626_v50  ;;  %v8671_v56 = vmax.bf16 %v12937_v41, %v7773_v6  ;;  %v4754_v10 = vpop.f32.mrb[50].mxu1  ;;  %5092 = vmatmul.mubr.bf16.gmra.mrb[172].mxu0 %v14575_v31  ;;  %v7298_v19 = vadd.bf16 %v11863_v21, %v6679_v48 }
 0x479   : > { %v8644_v15 = vmax.f32 %v8642_v33, %v8643_v13  ;;  %v6649_v17 = vpack.c.bf16 %v4754_v10, %v4750_v5  ;;  %v4756_v47 = vpop.f32.mrb[51].mxu1  ;;  %5101 = vmatprep.mubr.bf16.mxu0 %v14442_v62 }
 0x47a   : > { %v8628_v30 = vrot.slane %v8627_v29, 4  ;;  %v6650_v22 = vpack.c.bf16 %v4756_v47, %v4752_v35 }
 0x47b   : > { %v8645_v0 = vrot.slane %v8644_v15, 4  ;;  %v7268_v54 = vadd.bf16 %v11997_v26, %v6649_v17  ;;  %v4127_v53 = vpop.f32.mrb[68].mxu0  ;;  %5725 = vmatmul.mubr.bf16.gmra.mrb[156].mxu1 %v14571_v11  ;;  %v7299_v11 = vadd.bf16 %v11868_v7, %v6680_v38 }
 0x47c   : > { %v8629_v12 = vmax.f32 %v8627_v29, %v8628_v30  ;;  %v7269_v20 = vadd.bf16 %v12003_v40, %v6650_v22  ;;  %v4129_v41 = vpop.f32.mrb[69].mxu0  ;;  %5734 = vmatprep.mubr.bf16.mxu1 %v14442_v62  ;;  %v14576_v30 = vld [vmem:[#allocation22_spill] sm:$0xff] }
 0x47d   : > { %v8646_v16 = vmax.f32 %v8644_v15, %v8645_v0  ;;  %v7780_v1 = vmax.bf16 %v14442_v62, %v7268_v54  ;;  %v4131_v27 = vpop.f32.mrb[70].mxu0 }
 0x47e   : > { %v8630_v32 = vrot.slane %v8629_v12, 2  ;;  %v7781_v50 = vmax.bf16 %v14442_v62, %v7269_v20  ;;  %v6687_v6 = vpack.c.bf16 %v4131_v27, %v4127_v53  ;;  %v4133_v4 = vpop.f32.mrb[71].mxu0  ;;  %v4760_v5 = vpop.f32.mrb[52].mxu1  ;;  %v7811_v20 = vmax.bf16 %v14442_v62, %v7299_v11 }
 0x47f   : > { %v8647_v33 = vrot.slane %v8646_v16, 2  ;;  %v12971_v13 = vmax.bf16 %v8654_v59, %v7780_v1  ;;  %v6688_v35 = vpack.c.bf16 %v4133_v4, %v4129_v41  ;;  %v4762_v29 = vpop.f32.mrb[53].mxu1  ;;  %v7810_v59 = vmax.bf16 %v14442_v62, %v7298_v19 }
 0x480   : > { %v8631_v10 = vmax.f32 %v8629_v12, %v8630_v32  ;;  %v12973_v15 = vmax.bf16 %v8671_v56, %v7781_v50  ;;  %v7306_v17 = vadd.bf16 %v11863_v21, %v6687_v6  ;;  %v4764_v47 = vpop.f32.mrb[54].mxu1  ;;  %5102 = vmatmul.mubr.bf16.gmra.mrb[176].mxu0 %v14576_v30 }
 0x481   : > { %v8648_v48 = vmax.f32 %v8646_v16, %v8647_v33  ;;  %v7307_v22 = vadd.bf16 %v11868_v7, %v6688_v35  ;;  %v6657_v0 = vpack.c.bf16 %v4764_v47, %v4760_v5  ;;  %v4766_v54 = vpop.f32.mrb[55].mxu1  ;;  %5111 = vmatprep.mubr.bf16.mxu0 %v14442_v62 }
 0x482   : > { %v8632_v38 = vrot.slane %v8631_v10, 1  ;;  %v7818_v53 = vmax.bf16 %v14442_v62, %v7306_v17  ;;  %v6658_v12 = vpack.c.bf16 %v4766_v54, %v4762_v29 }
 0x483   : > { %v8649_v56 = vrot.slane %v8648_v48, 1  ;;  %v7819_v41 = vmax.bf16 %v14442_v62, %v7307_v22  ;;  %v7276_v1 = vadd.bf16 %v11997_v26, %v6657_v0  ;;  %v4137_v16 = vpop.f32.mrb[72].mxu0  ;;  %5735 = vmatmul.mubr.bf16.gmra.mrb[160].mxu1 %v14572_v43 }
 0x484   : > { %v8633_v27 = vmax.f32 %v8631_v10, %v8632_v38  ;;  %v8754_v32 = vmax.bf16 %v7818_v53, %v7810_v59  ;;  %v7277_v50 = vadd.bf16 %v12003_v40, %v6658_v12  ;;  %v4139_v6 = vpop.f32.mrb[73].mxu0  ;;  %5744 = vmatprep.mubr.bf16.mxu1 %v14442_v62  ;;  %v14577_v59 = vld [vmem:[#allocation23_spill] sm:$0xff] }
 0x485   : > { %v8650_v19 = vmax.f32 %v8648_v48, %v8649_v56  ;;  %v8771_v4 = vmax.bf16 %v7819_v41, %v7811_v20  ;;  %v7788_v5 = vmax.bf16 %v14442_v62, %v7276_v1  ;;  %v4141_v33 = vpop.f32.mrb[74].mxu0 }
 0x486   : > { %v8634_v11 = vpack.i.bf16 %v8633_v27, %v8633_v27  ;;  %v7789_v35 = vmax.bf16 %v14442_v62, %v7277_v50  ;;  %v6695_v29 = vpack.c.bf16 %v4141_v33, %v4137_v16  ;;  %v4143_v17 = vpop.f32.mrb[75].mxu0  ;;  %v4770_v47 = vpop.f32.mrb[56].mxu1 }
 0x487   : > { %v8651_v22 = vpack.i.bf16 %v8650_v19, %v8650_v19  ;;  %v8656_v43 = vmax.bf16 %v12971_v13, %v7788_v5  ;;  %v6696_v10 = vpack.c.bf16 %v4143_v17, %v4139_v6  ;;  %v4772_v0 = vpop.f32.mrb[57].mxu1 }
 0x488   : > { %v8673_v54 = vmax.bf16 %v12973_v15, %v7789_v35  ;;  %v7314_v38 = vadd.bf16 %v11863_v21, %v6695_v29  ;;  %v4774_v48 = vpop.f32.mrb[58].mxu1  ;;  %5112 = vmatmul.mubr.bf16.gmra.mrb[180].mxu0 %v14577_v59 }
 0x489   : > { %v9720_v53 = vcombine.low %v8634_v11, %v8651_v22  ;;  %v7315_v12 = vadd.bf16 %v11868_v7, %v6696_v10  ;;  %v6665_v56 = vpack.c.bf16 %v4774_v48, %v4770_v47  ;;  %v4776_v20 = vpop.f32.mrb[59].mxu1  ;;  %5121 = vmatprep.mubr.bf16.mxu0 %v14442_v62 }
 0x48a   : > { %v7826_v41 = vmax.bf16 %v14442_v62, %v7314_v38  ;;  %v6666_v1 = vpack.c.bf16 %v4776_v20, %v4772_v0 }
 0x48b   : > { %v9230_v13 = vunpack.c.l.b16 %v9720_v53  ;;  %v9231_v16 = vunpack.c.h.b16 %v9720_v53  ;;  %v7827_v15 = vmax.bf16 %v14442_v62, %v7315_v12  ;;  %v7284_v27 = vadd.bf16 %v11997_v26, %v6665_v56  ;;  %v4147_v50 = vpop.f32.mrb[76].mxu0  ;;  %5745 = vmatmul.mubr.bf16.gmra.mrb[164].mxu1 %v14573_v28  ;;  %v14578_v12 = vld [vmem:[#allocation24_spill] sm:$0xff] }
 0x48c   : > { %v12999_v6 = vmax.bf16 %v8754_v32, %v7826_v41  ;;  %v7285_v19 = vadd.bf16 %v12003_v40, %v6666_v1  ;;  %v4149_v5 = vpop.f32.mrb[77].mxu0  ;;  %5754 = vmatprep.mubr.bf16.mxu1 %v14442_v62 }
 0x48d   : > { %v13003_v33 = vmax.bf16 %v8771_v4, %v7827_v15  ;;  %v7796_v11 = vmax.bf16 %v14442_v62, %v7284_v27  ;;  %v4151_v35 = vpop.f32.mrb[78].mxu0  ;;  %v13008_v29 = vsel %vm9262_vm8, %v9230_v13, %v12872_v8  ;;  %v13012_v17 = vsel %vm9262_vm8, %v9231_v16, %v12876_v42 }
 0x48e   : > { %v7797_v28 = vmax.bf16 %v14442_v62, %v7285_v19  ;;  %v6703_v32 = vpack.c.bf16 %v4151_v35, %v4147_v50  ;;  %v4153_v47 = vpop.f32.mrb[79].mxu0  ;;  %v4780_v22 = vpop.f32.mrb[60].mxu1 }
 0x48f   : > { %v8657_v10 = vmax.bf16 %v8656_v43, %v7796_v11  ;;  %v6704_v0 = vpack.c.bf16 %v4153_v47, %v4149_v5  ;;  %v4782_v4 = vpop.f32.mrb[61].mxu1 }
 0x490   : > { %v8674_v38 = vmax.bf16 %v8673_v54, %v7797_v28  ;;  %v7322_v48 = vadd.bf16 %v11863_v21, %v6703_v32  ;;  %v4784_v53 = vpop.f32.mrb[62].mxu1  ;;  %5122 = vmatmul.mubr.bf16.gmra.mrb[184].mxu0 %v14578_v12 }
 0x491   : > { %v7323_v8 = vadd.bf16 %v11868_v7, %v6704_v0  ;;  %v6673_v56 = vpack.c.bf16 %v4784_v53, %v4780_v22  ;;  %v4786_v20 = vpop.f32.mrb[63].mxu1  ;;  %5131 = vmatprep.mubr.bf16.mxu0 %v14442_v62 }
 0x492   : > { %v7834_v42 = vmax.bf16 %v14442_v62, %v7322_v48  ;;  %v6674_v41 = vpack.c.bf16 %v4786_v20, %v4782_v4  ;;  %v14579_v4 = vld [vmem:[#allocation25_spill] sm:$0xff] }
 0x493   : > { %v7835_v1 = vmax.bf16 %v14442_v62, %v7323_v8  ;;  %v7292_v43 = vadd.bf16 %v11997_v26, %v6673_v56  ;;  %v4157_v13 = vpop.f32.mrb[80].mxu0  ;;  %5755 = vmatmul.mubr.bf16.gmra.mrb[168].mxu1 %v14574_v55 }
 0x494   : > { %v8756_v54 = vmax.bf16 %v12999_v6, %v7834_v42  ;;  %v7293_v16 = vadd.bf16 %v12003_v40, %v6674_v41  ;;  %v4159_v15 = vpop.f32.mrb[81].mxu0  ;;  %5764 = vmatprep.mubr.bf16.mxu1 %v14442_v62 }
 0x495   : > { %v8773_v27 = vmax.bf16 %v13003_v33, %v7835_v1  ;;  %v7804_v50 = vmax.bf16 %v14442_v62, %v7292_v43  ;;  %v4161_v19 = vpop.f32.mrb[82].mxu0 }
 0x496   : > { %v7805_v5 = vmax.bf16 %v14442_v62, %v7293_v16  ;;  %v6711_v11 = vpack.c.bf16 %v4161_v19, %v4157_v13  ;;  %v4163_v35 = vpop.f32.mrb[83].mxu0  ;;  %v4790_v28 = vpop.f32.mrb[64].mxu1 }
 0x497   : > { %v8658_v32 = vmax.bf16 %v8657_v10, %v7804_v50  ;;  %v6712_v47 = vpack.c.bf16 %v4163_v35, %v4159_v15  ;;  %v4792_v55 = vpop.f32.mrb[65].mxu1 }
 0x498   : > { %v8675_v22 = vmax.bf16 %v8674_v38, %v7805_v5  ;;  %v7330_v6 = vadd.bf16 %v11863_v21, %v6711_v11  ;;  %v4794_v0 = vpop.f32.mrb[66].mxu1  ;;  %5132 = vmatmul.mubr.bf16.gmra.mrb[188].mxu0 %v14579_v4 }
 0x499   : > { %v8659_v48 = vunpack.i.l.bf16 %v8658_v32  ;;  %v8660_v53 = vunpack.i.h.bf16 %v8658_v32  ;;  %v7331_v33 = vadd.bf16 %v11868_v7, %v6712_v47  ;;  %v6681_v8 = vpack.c.bf16 %v4794_v0, %v4790_v28  ;;  %v4796_v56 = vpop.f32.mrb[67].mxu1  ;;  %5141 = vmatprep.mubr.bf16.mxu0 %v14442_v62 }
 0x49a   : > { %v8676_v20 = vunpack.i.l.bf16 %v8675_v22  ;;  %v8677_v42 = vunpack.i.h.bf16 %v8675_v22  ;;  %v7842_v10 = vmax.bf16 %v14442_v62, %v7330_v6  ;;  %v6682_v41 = vpack.c.bf16 %v4796_v56, %v4792_v55 }
 0x49b   : > { %v8661_v1 = vmax.f32 %v8659_v48, %v8660_v53  ;;  %v7843_v38 = vmax.bf16 %v14442_v62, %v7331_v33  ;;  %v4167_v43 = vpop.f32.mrb[84].mxu0  ;;  %5765 = vmatmul.mubr.bf16.gmra.mrb[172].mxu1 %v14575_v31  ;;  %v7300_v53 = vadd.bf16 %v11997_v26, %v6681_v8 }
 0x49c   : > { %v8678_v13 = vmax.f32 %v8676_v20, %v8677_v42  ;;  %v13036_v16 = vmax.bf16 %v8756_v54, %v7842_v10  ;;  %v4169_v15 = vpop.f32.mrb[85].mxu0  ;;  %5774 = vmatprep.mubr.bf16.mxu1 %v14442_v62  ;;  %v14580_v54 = vld [vmem:[#allocation26_spill] sm:$0xff]  ;;  %v7301_v42 = vadd.bf16 %v12003_v40, %v6682_v41 }
 0x49d   : > { %v8662_v50 = vrot.slane %v8661_v1, 4  ;;  %v13039_v19 = vmax.bf16 %v8773_v27, %v7843_v38  ;;  %v4171_v5 = vpop.f32.mrb[86].mxu0 }
 0x49e   : > { %v8679_v11 = vrot.slane %v8678_v13, 4  ;;  %v6719_v35 = vpack.c.bf16 %v4171_v5, %v4167_v43  ;;  %v4173_v28 = vpop.f32.mrb[87].mxu0  ;;  %v4800_v32 = vpop.f32.mrb[68].mxu1 }
 0x49f   : > { %v8663_v47 = vmax.f32 %v8661_v1, %v8662_v50  ;;  %v6720_v55 = vpack.c.bf16 %v4173_v28, %v4169_v15  ;;  %v4802_v22 = vpop.f32.mrb[69].mxu1 }
 0x4a0   : > { %v8680_v6 = vmax.f32 %v8678_v13, %v8679_v11  ;;  %v7338_v31 = vadd.bf16 %v11863_v21, %v6719_v35  ;;  %v4804_v0 = vpop.f32.mrb[70].mxu1  ;;  %5142 = vmatmul.mubr.bf16.gmra.mrb[192].mxu0 %v14580_v54  ;;  %v7812_v35 = vmax.bf16 %v14442_v62, %v7300_v53 }
 0x4a1   : > { %v8664_v48 = vrot.slane %v8663_v47, 2  ;;  %v7339_v27 = vadd.bf16 %v11868_v7, %v6720_v55  ;;  %v6689_v33 = vpack.c.bf16 %v4804_v0, %v4800_v32  ;;  %v4806_v56 = vpop.f32.mrb[71].mxu1  ;;  %5151 = vmatprep.mubr.bf16.mxu0 %v14442_v62 }
 0x4a2   : > { %v8681_v20 = vrot.slane %v8680_v6, 2  ;;  %v7850_v10 = vmax.bf16 %v14442_v62, %v7338_v31  ;;  %v6690_v1 = vpack.c.bf16 %v4806_v56, %v4802_v22  ;;  %v7813_v22 = vmax.bf16 %v14442_v62, %v7301_v42 }
 0x4a3   : > { %v8665_v38 = vmax.f32 %v8663_v47, %v8664_v48  ;;  %v7851_v43 = vmax.bf16 %v14442_v62, %v7339_v27  ;;  %v7308_v13 = vadd.bf16 %v11997_v26, %v6689_v33  ;;  %v4177_v15 = vpop.f32.mrb[88].mxu0  ;;  %5775 = vmatmul.mubr.bf16.gmra.mrb[176].mxu1 %v14576_v30 }
 0x4a4   : > { %v8682_v8 = vmax.f32 %v8680_v6, %v8681_v20  ;;  %v8758_v50 = vmax.bf16 %v13036_v16, %v7850_v10  ;;  %v7309_v5 = vadd.bf16 %v12003_v40, %v6690_v1  ;;  %v4179_v11 = vpop.f32.mrb[89].mxu0  ;;  %5784 = vmatprep.mubr.bf16.mxu1 %v14442_v62  ;;  %v14581_v10 = vld [vmem:[#allocation27_spill] sm:$0xff] }
 0x4a5   : > { %v8666_v41 = vrot.slane %v8665_v38, 1  ;;  %v8775_v28 = vmax.bf16 %v13039_v19, %v7851_v43  ;;  %v7820_v32 = vmax.bf16 %v14442_v62, %v7308_v13  ;;  %v4181_v47 = vpop.f32.mrb[90].mxu0 }
 0x4a6   : > { %v8683_v55 = vrot.slane %v8682_v8, 1  ;;  %v7821_v30 = vmax.bf16 %v14442_v62, %v7309_v5  ;;  %v6727_v6 = vpack.c.bf16 %v4181_v47, %v4177_v15  ;;  %v4183_v16 = vpop.f32.mrb[91].mxu0  ;;  %v4810_v31 = vpop.f32.mrb[72].mxu1 }
 0x4a7   : > { %v8667_v0 = vmax.f32 %v8665_v38, %v8666_v41  ;;  %v8788_v48 = vmax.bf16 %v7820_v32, %v7812_v35  ;;  %v6728_v27 = vpack.c.bf16 %v4183_v16, %v4179_v11  ;;  %v4812_v33 = vpop.f32.mrb[73].mxu1 }
 0x4a8   : > { %v8684_v56 = vmax.f32 %v8682_v8, %v8683_v55  ;;  %v8805_v20 = vmax.bf16 %v7821_v30, %v7813_v22  ;;  %v7346_v53 = vadd.bf16 %v11863_v21, %v6727_v6  ;;  %v4814_v19 = vpop.f32.mrb[74].mxu1  ;;  %5152 = vmatmul.mubr.bf16.gmra.mrb[196].mxu0 %v14581_v10 }
 0x4a9   : > { %v8668_v1 = vpack.i.bf16 %v8667_v0, %v8667_v0  ;;  %v7347_v43 = vadd.bf16 %v11868_v7, %v6728_v27  ;;  %v6697_v42 = vpack.c.bf16 %v4814_v19, %v4810_v31  ;;  %v4816_v13 = vpop.f32.mrb[75].mxu1  ;;  %5161 = vmatprep.mubr.bf16.mxu0 %v14442_v62 }
 0x4aa   : > { %v8685_v15 = vpack.i.bf16 %v8684_v56, %v8684_v56  ;;  %v7858_v38 = vmax.bf16 %v14442_v62, %v7346_v53  ;;  %v6698_v5 = vpack.c.bf16 %v4816_v13, %v4812_v33 }
 0x4ab   : > { %v7859_v11 = vmax.bf16 %v14442_v62, %v7347_v43  ;;  %v7316_v8 = vadd.bf16 %v11997_v26, %v6697_v42  ;;  %v4187_v41 = vpop.f32.mrb[92].mxu0  ;;  %5785 = vmatmul.mubr.bf16.gmra.mrb[180].mxu1 %v14577_v59 }
 0x4ac   : > { %v9721_v35 = vcombine.low %v8668_v1, %v8685_v15  ;;  %v8759_v32 = vmax.bf16 %v8758_v50, %v7858_v38  ;;  %v7317_v47 = vadd.bf16 %v12003_v40, %v6698_v5  ;;  %v4189_v55 = vpop.f32.mrb[93].mxu0  ;;  %5794 = vmatprep.mubr.bf16.mxu1 %v14442_v62 }
 0x4ad   : > { %v8776_v22 = vmax.bf16 %v8775_v28, %v7859_v11  ;;  %v7828_v30 = vmax.bf16 %v14442_v62, %v7316_v8  ;;  %v4191_v6 = vpop.f32.mrb[94].mxu0  ;;  %v14582_v28 = vld [vmem:[#allocation28_spill] sm:$0xff] }
 0x4ae   : > { %v9232_v16 = vunpack.c.l.b16 %v9721_v35  ;;  %v9233_v31 = vunpack.c.h.b16 %v9721_v35  ;;  %v7829_v0 = vmax.bf16 %v14442_v62, %v7317_v47  ;;  %v6735_v27 = vpack.c.bf16 %v4191_v6, %v4187_v41  ;;  %v4193_v33 = vpop.f32.mrb[95].mxu0  ;;  %v4820_v56 = vpop.f32.mrb[76].mxu1 }
 0x4af   : > { %v13071_v53 = vmax.bf16 %v8788_v48, %v7828_v30  ;;  %v6736_v59 = vpack.c.bf16 %v4193_v33, %v4189_v55  ;;  %v4822_v50 = vpop.f32.mrb[77].mxu1 }
 0x4b0   : > { %v13073_v19 = vmax.bf16 %v8805_v20, %v7829_v0  ;;  %v7354_v1 = vadd.bf16 %v11863_v21, %v6735_v27  ;;  %v4824_v43 = vpop.f32.mrb[78].mxu1  ;;  %5162 = vmatmul.mubr.bf16.gmra.mrb[200].mxu0 %v14582_v28  ;;  %v13079_v42 = vsel %vm9262_vm8, %v9232_v16, %v12943_v46  ;;  %v13083_v13 = vsel %vm9262_vm8, %v9233_v31, %v12947_v14 }
 0x4b1   : > { %v7355_v48 = vadd.bf16 %v11868_v7, %v6736_v59  ;;  %v6705_v15 = vpack.c.bf16 %v4824_v43, %v4820_v56  ;;  %v4826_v38 = vpop.f32.mrb[79].mxu1  ;;  %5171 = vmatprep.mubr.bf16.mxu0 %v14442_v62 }
 0x4b2   : > { %v7866_v20 = vmax.bf16 %v14442_v62, %v7354_v1  ;;  %v6706_v5 = vpack.c.bf16 %v4826_v38, %v4822_v50 }
 0x4b3   : > { %v7867_v11 = vmax.bf16 %v14442_v62, %v7355_v48  ;;  %v7324_v8 = vadd.bf16 %v11997_v26, %v6705_v15  ;;  %v4197_v41 = vpop.f32.mrb[96].mxu0  ;;  %5795 = vmatmul.mubr.bf16.gmra.mrb[184].mxu1 %v14578_v12  ;;  %v14583_v48 = vld [vmem:[#allocation29_spill] sm:$0xff] }
 0x4b4   : > { %v8760_v46 = vmax.bf16 %v8759_v32, %v7866_v20  ;;  %v7325_v14 = vadd.bf16 %v12003_v40, %v6706_v5  ;;  %v4199_v35 = vpop.f32.mrb[97].mxu0  ;;  %5804 = vmatprep.mubr.bf16.mxu1 %v14442_v62 }
 0x4b5   : > { %v8777_v47 = vmax.bf16 %v8776_v22, %v7867_v11  ;;  %v7836_v55 = vmax.bf16 %v14442_v62, %v7324_v8  ;;  %v4201_v30 = vpop.f32.mrb[98].mxu0 }
 0x4b6   : > { %v8761_v6 = vunpack.i.l.bf16 %v8760_v46  ;;  %v8762_v16 = vunpack.i.h.bf16 %v8760_v46  ;;  %v7837_v31 = vmax.bf16 %v14442_v62, %v7325_v14  ;;  %v6743_v0 = vpack.c.bf16 %v4201_v30, %v4197_v41  ;;  %v4203_v27 = vpop.f32.mrb[99].mxu0  ;;  %v4830_v33 = vpop.f32.mrb[80].mxu1 }
 0x4b7   : > { %v8778_v56 = vunpack.i.l.bf16 %v8777_v47  ;;  %v8779_v59 = vunpack.i.h.bf16 %v8777_v47  ;;  %v8790_v12 = vmax.bf16 %v13071_v53, %v7836_v55  ;;  %v6744_v32 = vpack.c.bf16 %v4203_v27, %v4199_v35  ;;  %v4832_v50 = vpop.f32.mrb[81].mxu1 }
 0x4b8   : > { %v8763_v1 = vmax.f32 %v8761_v6, %v8762_v16  ;;  %v8807_v43 = vmax.bf16 %v13073_v19, %v7837_v31  ;;  %v4834_v22 = vpop.f32.mrb[82].mxu1  ;;  %5172 = vmatmul.mubr.bf16.gmra.mrb[204].mxu0 %v14583_v48  ;;  %v7362_v6 = vadd.bf16 %v11863_v21, %v6743_v0 }
 0x4b9   : > { %v8780_v15 = vmax.f32 %v8778_v56, %v8779_v59  ;;  %v6713_v38 = vpack.c.bf16 %v4834_v22, %v4830_v33  ;;  %v4836_v20 = vpop.f32.mrb[83].mxu1  ;;  %5181 = vmatprep.mubr.bf16.mxu0 %v14442_v62 }
 0x4ba   : > { %v8764_v5 = vrot.slane %v8763_v1, 4  ;;  %v6714_v11 = vpack.c.bf16 %v4836_v20, %v4832_v50 }
 0x4bb   : > { %v8781_v8 = vrot.slane %v8780_v15, 4  ;;  %v7332_v41 = vadd.bf16 %v11997_v26, %v6713_v38  ;;  %v4207_v46 = vpop.f32.mrb[100].mxu0  ;;  %5805 = vmatmul.mubr.bf16.gmra.mrb[188].mxu1 %v14579_v4  ;;  %v7363_v4 = vadd.bf16 %v11868_v7, %v6744_v32 }
 0x4bc   : > { %v8765_v53 = vmax.f32 %v8763_v1, %v8764_v5  ;;  %v7333_v14 = vadd.bf16 %v12003_v40, %v6714_v11  ;;  %v4209_v19 = vpop.f32.mrb[101].mxu0  ;;  %5814 = vmatprep.mubr.bf16.mxu1 %v14442_v62  ;;  %v14584_v5 = vld [vmem:[#allocation30_spill] sm:$0xff] }
 0x4bd   : > { %v8782_v35 = vmax.f32 %v8780_v15, %v8781_v8  ;;  %v7844_v47 = vmax.bf16 %v14442_v62, %v7332_v41  ;;  %v4211_v55 = vpop.f32.mrb[102].mxu0 }
 0x4be   : > { %v8766_v30 = vrot.slane %v8765_v53, 2  ;;  %v7845_v16 = vmax.bf16 %v14442_v62, %v7333_v14  ;;  %v6751_v31 = vpack.c.bf16 %v4211_v55, %v4207_v46  ;;  %v4213_v27 = vpop.f32.mrb[103].mxu0  ;;  %v4840_v33 = vpop.f32.mrb[84].mxu1  ;;  %v7875_v14 = vmax.bf16 %v14442_v62, %v7363_v4 }
 0x4bf   : > { %v8783_v56 = vrot.slane %v8782_v35, 2  ;;  %v13107_v59 = vmax.bf16 %v8790_v12, %v7844_v47  ;;  %v6752_v50 = vpack.c.bf16 %v4213_v27, %v4209_v19  ;;  %v4842_v1 = vpop.f32.mrb[85].mxu1  ;;  %v7874_v12 = vmax.bf16 %v14442_v62, %v7362_v6 }
 0x4c0   : > { %v8767_v22 = vmax.f32 %v8765_v53, %v8766_v30  ;;  %v13109_v15 = vmax.bf16 %v8807_v43, %v7845_v16  ;;  %v7370_v38 = vadd.bf16 %v11863_v21, %v6751_v31  ;;  %v4844_v20 = vpop.f32.mrb[86].mxu1  ;;  %5182 = vmatmul.mubr.bf16.gmra.mrb[208].mxu0 %v14584_v5 }
 0x4c1   : > { %v8784_v0 = vmax.f32 %v8782_v35, %v8783_v56  ;;  %v7371_v11 = vadd.bf16 %v11868_v7, %v6752_v50  ;;  %v6721_v8 = vpack.c.bf16 %v4844_v20, %v4840_v33  ;;  %v4846_v41 = vpop.f32.mrb[87].mxu1  ;;  %5191 = vmatprep.mubr.bf16.mxu0 %v14442_v62 }
 0x4c2   : > { %v8768_v32 = vrot.slane %v8767_v22, 1  ;;  %v7882_v46 = vmax.bf16 %v14442_v62, %v7370_v38  ;;  %v6722_v53 = vpack.c.bf16 %v4846_v41, %v4842_v1 }
 0x4c3   : > { %v8785_v43 = vrot.slane %v8784_v0, 1  ;;  %v7883_v19 = vmax.bf16 %v14442_v62, %v7371_v11  ;;  %v7340_v47 = vadd.bf16 %v11997_v26, %v6721_v8  ;;  %v4217_v35 = vpop.f32.mrb[104].mxu0  ;;  %5815 = vmatmul.mubr.bf16.gmra.mrb[192].mxu1 %v14580_v54 }
 0x4c4   : > { %v8769_v55 = vmax.f32 %v8767_v22, %v8768_v32  ;;  %v8890_v30 = vmax.bf16 %v7882_v46, %v7874_v12  ;;  %v7341_v16 = vadd.bf16 %v12003_v40, %v6722_v53  ;;  %v4219_v31 = vpop.f32.mrb[105].mxu0  ;;  %5824 = vmatprep.mubr.bf16.mxu1 %v14442_v62  ;;  %v14585_v12 = vld [vmem:[#allocation32_spill] sm:$0xff] }
 0x4c5   : > { %v8786_v6 = vmax.f32 %v8784_v0, %v8785_v43  ;;  %v8907_v27 = vmax.bf16 %v7883_v19, %v7875_v14  ;;  %v7852_v33 = vmax.bf16 %v14442_v62, %v7340_v47  ;;  %v4221_v56 = vpop.f32.mrb[106].mxu0 }
 0x4c6   : > { %v8770_v4 = vpack.i.bf16 %v8769_v55, %v8769_v55  ;;  %v7853_v50 = vmax.bf16 %v14442_v62, %v7341_v16  ;;  %v6759_v1 = vpack.c.bf16 %v4221_v56, %v4217_v35  ;;  %v4223_v38 = vpop.f32.mrb[107].mxu0  ;;  %v4850_v20 = vpop.f32.mrb[88].mxu1 }
 0x4c7   : > { %v8787_v11 = vpack.i.bf16 %v8786_v6, %v8786_v6  ;;  %v8792_v54 = vmax.bf16 %v13107_v59, %v7852_v33  ;;  %v6760_v22 = vpack.c.bf16 %v4223_v38, %v4219_v31  ;;  %v4852_v8 = vpop.f32.mrb[89].mxu1 }
 0x4c8   : > { %v8809_v41 = vmax.bf16 %v13109_v15, %v7853_v50  ;;  %v7378_v32 = vadd.bf16 %v11863_v21, %v6759_v1  ;;  %v4854_v0 = vpop.f32.mrb[90].mxu1  ;;  %5192 = vmatmul.mubr.bf16.gmra.mrb[212].mxu0 %v14585_v12 }
 0x4c9   : > { %v9724_v46 = vcombine.low %v8770_v4, %v8787_v11  ;;  %v7379_v53 = vadd.bf16 %v11868_v7, %v6760_v22  ;;  %v6729_v43 = vpack.c.bf16 %v4854_v0, %v4850_v20  ;;  %v4856_v14 = vpop.f32.mrb[91].mxu1  ;;  %5201 = vmatprep.mubr.bf16.mxu0 %v14442_v62 }
 0x4ca   : > { %v7890_v19 = vmax.bf16 %v14442_v62, %v7378_v32  ;;  %v6730_v47 = vpack.c.bf16 %v4856_v14, %v4852_v8 }
 0x4cb   : > { %v7891_v59 = vmax.bf16 %v14442_v62, %v7379_v53  ;;  %v7348_v15 = vadd.bf16 %v11997_v26, %v6729_v43  ;;  %v4227_v35 = vpop.f32.mrb[108].mxu0  ;;  %5825 = vmatmul.mubr.bf16.gmra.mrb[196].mxu1 %v14581_v10  ;;  %v9238_v55 = vunpack.c.l.b16 %v9724_v46  ;;  %v9239_v16 = vunpack.c.h.b16 %v9724_v46  ;;  %v14586_v53 = vld [vmem:[#allocation36_spill] sm:$0xff] }
 0x4cc   : > { %v13135_v31 = vmax.bf16 %v8890_v30, %v7890_v19  ;;  %v7349_v6 = vadd.bf16 %v12003_v40, %v6730_v47  ;;  %v4229_v33 = vpop.f32.mrb[109].mxu0  ;;  %5834 = vmatprep.mubr.bf16.mxu1 %v14442_v62 }
 0x4cd   : > { %v13139_v56 = vmax.bf16 %v8907_v27, %v7891_v59  ;;  %v7860_v4 = vmax.bf16 %v14442_v62, %v7348_v15  ;;  %v4231_v50 = vpop.f32.mrb[110].mxu0  ;;  %v13144_v1 = vsel %vm9264_vm9, %v9238_v55, %v13008_v29  ;;  %v13148_v10 = vsel %vm9264_vm9, %v9239_v16, %v13012_v17 }
 0x4ce   : > { %v7861_v30 = vmax.bf16 %v14442_v62, %v7349_v6  ;;  %v6767_v38 = vpack.c.bf16 %v4231_v50, %v4227_v35  ;;  %v4233_v20 = vpop.f32.mrb[111].mxu0  ;;  %v4860_v11 = vpop.f32.mrb[92].mxu1 }
 0x4cf   : > { %v8793_v22 = vmax.bf16 %v8792_v54, %v7860_v4  ;;  %v6768_v8 = vpack.c.bf16 %v4233_v20, %v4229_v33  ;;  %v4862_v27 = vpop.f32.mrb[93].mxu1 }
 0x4d0   : > { %v8810_v32 = vmax.bf16 %v8809_v41, %v7861_v30  ;;  %v7386_v0 = vadd.bf16 %v11863_v21, %v6767_v38  ;;  %v4864_v46 = vpop.f32.mrb[94].mxu1  ;;  %5202 = vmatmul.mubr.bf16.gmra.mrb[216].mxu0 %v14586_v53 }
 0x4d1   : > { %v7387_v29 = vadd.bf16 %v11868_v7, %v6768_v8  ;;  %v6737_v43 = vpack.c.bf16 %v4864_v46, %v4860_v11  ;;  %v4866_v14 = vpop.f32.mrb[95].mxu1  ;;  %5211 = vmatprep.mubr.bf16.mxu0 %v14442_v62 }
 0x4d2   : > { %v7898_v17 = vmax.bf16 %v14442_v62, %v7386_v0  ;;  %v6738_v19 = vpack.c.bf16 %v4866_v14, %v4862_v27  ;;  %v14587_v27 = vld [vmem:[#allocation38_spill] sm:$0xff] }
 0x4d3   : > { %v7899_v47 = vmax.bf16 %v14442_v62, %v7387_v29  ;;  %v7356_v54 = vadd.bf16 %v11997_v26, %v6737_v43  ;;  %v4237_v59 = vpop.f32.mrb[112].mxu0  ;;  %5835 = vmatmul.mubr.bf16.gmra.mrb[200].mxu1 %v14582_v28 }
 0x4d4   : > { %v8892_v41 = vmax.bf16 %v13135_v31, %v7898_v17  ;;  %v7357_v15 = vadd.bf16 %v12003_v40, %v6738_v19  ;;  %v4239_v35 = vpop.f32.mrb[113].mxu0  ;;  %5844 = vmatprep.mubr.bf16.mxu1 %v14442_v62 }
 0x4d5   : > { %v8909_v55 = vmax.bf16 %v13139_v56, %v7899_v47  ;;  %v7868_v16 = vmax.bf16 %v14442_v62, %v7356_v54  ;;  %v4241_v6 = vpop.f32.mrb[114].mxu0 }
 0x4d6   : > { %v7869_v33 = vmax.bf16 %v14442_v62, %v7357_v15  ;;  %v6775_v4 = vpack.c.bf16 %v4241_v6, %v4237_v59  ;;  %v4243_v50 = vpop.f32.mrb[115].mxu0  ;;  %v4870_v30 = vpop.f32.mrb[96].mxu1 }
 0x4d7   : > { %v8794_v38 = vmax.bf16 %v8793_v22, %v7868_v16  ;;  %v6776_v20 = vpack.c.bf16 %v4243_v50, %v4239_v35  ;;  %v4872_v28 = vpop.f32.mrb[97].mxu1 }
 0x4d8   : > { %v8811_v11 = vmax.bf16 %v8810_v32, %v7869_v33  ;;  %v7394_v31 = vadd.bf16 %v11863_v21, %v6775_v4  ;;  %v4874_v8 = vpop.f32.mrb[98].mxu1  ;;  %5212 = vmatmul.mubr.bf16.gmra.mrb[220].mxu0 %v14587_v27 }
 0x4d9   : > { %v8795_v0 = vunpack.i.l.bf16 %v8794_v38  ;;  %v8796_v46 = vunpack.i.h.bf16 %v8794_v38  ;;  %v7395_v56 = vadd.bf16 %v11868_v7, %v6776_v20  ;;  %v6745_v29 = vpack.c.bf16 %v4874_v8, %v4870_v30  ;;  %v4876_v43 = vpop.f32.mrb[99].mxu1  ;;  %5221 = vmatprep.mubr.bf16.mxu0 %v14442_v62 }
 0x4da   : > { %v8812_v14 = vunpack.i.l.bf16 %v8811_v11  ;;  %v8813_v17 = vunpack.i.h.bf16 %v8811_v11  ;;  %v7906_v22 = vmax.bf16 %v14442_v62, %v7394_v31  ;;  %v6746_v19 = vpack.c.bf16 %v4876_v43, %v4872_v28 }
 0x4db   : > { %v8797_v47 = vmax.f32 %v8795_v0, %v8796_v46  ;;  %v7907_v32 = vmax.bf16 %v14442_v62, %v7395_v56  ;;  %v4247_v54 = vpop.f32.mrb[116].mxu0  ;;  %5845 = vmatmul.mubr.bf16.gmra.mrb[204].mxu1 %v14583_v48  ;;  %v7364_v46 = vadd.bf16 %v11997_v26, %v6745_v29 }
 0x4dc   : > { %v8814_v59 = vmax.f32 %v8812_v14, %v8813_v17  ;;  %v13172_v15 = vmax.bf16 %v8892_v41, %v7906_v22  ;;  %v4249_v35 = vpop.f32.mrb[117].mxu0  ;;  %5854 = vmatprep.mubr.bf16.mxu1 %v14442_v62  ;;  %v14588_v41 = vld [vmem:[#allocation42_spill] sm:$0xff]  ;;  %v7365_v17 = vadd.bf16 %v12003_v40, %v6746_v19  ;;  %v10298_v19 = vld [vmem:[%s14276_s6] sm:$0xff] }
 0x4dd   : > { %v8798_v16 = vrot.slane %v8797_v47, 4  ;;  %v13175_v6 = vmax.bf16 %v8909_v55, %v7907_v32  ;;  %v4251_v33 = vpop.f32.mrb[118].mxu0 }
 0x4de   : > { %v8815_v4 = vrot.slane %v8814_v59, 4  ;;  %v6783_v50 = vpack.c.bf16 %v4251_v33, %v4247_v54  ;;  %v4253_v30 = vpop.f32.mrb[119].mxu0  ;;  %v4880_v38 = vpop.f32.mrb[100].mxu1 }
 0x4df   : > { %v8799_v20 = vmax.f32 %v8797_v47, %v8798_v16  ;;  %v6784_v28 = vpack.c.bf16 %v4253_v30, %v4249_v35  ;;  %v4882_v11 = vpop.f32.mrb[101].mxu1 }
 0x4e0   : > { %v8816_v31 = vmax.f32 %v8814_v59, %v8815_v4  ;;  %v7402_v48 = vadd.bf16 %v11863_v21, %v6783_v50  ;;  %v4884_v8 = vpop.f32.mrb[102].mxu1  ;;  %5222 = vmatmul.mubr.bf16.gmra.mrb[224].mxu0 %v14588_v41  ;;  %v6809_v50 = vcombine.high %v10298_v19, %v10298_v19 }
 0x4e1   : > { %v8800_v0 = vrot.slane %v8799_v20, 2  ;;  %v7403_v55 = vadd.bf16 %v11868_v7, %v6784_v28  ;;  %v6753_v56 = vpack.c.bf16 %v4884_v8, %v4880_v38  ;;  %v4886_v43 = vpop.f32.mrb[103].mxu1  ;;  %5231 = vmatprep.mubr.bf16.mxu0 %v14442_v62  ;;  %v7876_v38 = vmax.bf16 %v14442_v62, %v7364_v46 }
 0x4e2   : > { %v8817_v14 = vrot.slane %v8816_v31, 2  ;;  %v7914_v22 = vmax.bf16 %v14442_v62, %v7402_v48  ;;  %v6754_v47 = vpack.c.bf16 %v4886_v43, %v4882_v11 }
 0x4e3   : > { %v8801_v32 = vmax.f32 %v8799_v20, %v8800_v0  ;;  %v7915_v54 = vmax.bf16 %v14442_v62, %v7403_v55  ;;  %v7372_v59 = vadd.bf16 %v11997_v26, %v6753_v56  ;;  %v4257_v35 = vpop.f32.mrb[120].mxu0  ;;  %5855 = vmatmul.mubr.bf16.gmra.mrb[208].mxu1 %v14584_v5 }
 0x4e4   : > { %v8818_v29 = vmax.f32 %v8816_v31, %v8817_v14  ;;  %v8894_v16 = vmax.bf16 %v13172_v15, %v7914_v22  ;;  %v7373_v33 = vadd.bf16 %v12003_v40, %v6754_v47  ;;  %v4259_v4 = vpop.f32.mrb[121].mxu0  ;;  %5864 = vmatprep.mubr.bf16.mxu1 %v14442_v62  ;;  %v7877_v15 = vmax.bf16 %v14442_v62, %v7365_v17 }
 0x4e5   : > { %v8802_v30 = vrot.slane %v8801_v32, 1  ;;  %v8911_v20 = vmax.bf16 %v13175_v6, %v7915_v54  ;;  %v7884_v5 = vmax.bf16 %v14442_v62, %v7372_v59  ;;  %v4261_v28 = vpop.f32.mrb[122].mxu0  ;;  %v14589_v54 = vld [vmem:[#allocation47_spill] sm:$0xff] }
 0x4e6   : > { %v8819_v11 = vrot.slane %v8818_v29, 1  ;;  %v7885_v31 = vmax.bf16 %v14442_v62, %v7373_v33  ;;  %v6791_v48 = vpack.c.bf16 %v4261_v28, %v4257_v35  ;;  %v4263_v8 = vpop.f32.mrb[123].mxu0  ;;  %v4890_v0 = vpop.f32.mrb[104].mxu1  ;;  %v14590_v35 = vld [vmem:[#allocation48_spill] sm:$0xff] }
 0x4e7   : > { %v8803_v55 = vmax.f32 %v8801_v32, %v8802_v30  ;;  %v8924_v56 = vmax.bf16 %v7884_v5, %v7876_v38  ;;  %v6792_v43 = vpack.c.bf16 %v4263_v8, %v4259_v4  ;;  %v4892_v14 = vpop.f32.mrb[105].mxu1  ;;  %v6823_v33 = vrot.slane %v6809_v50, %v14590_v35 }
 0x4e8   : > { %v8820_v22 = vmax.f32 %v8818_v29, %v8819_v11  ;;  %v8941_v47 = vmax.bf16 %v7885_v31, %v7877_v15  ;;  %v7410_v46 = vadd.bf16 %v11863_v21, %v6791_v48  ;;  %v4894_v6 = vpop.f32.mrb[106].mxu1  ;;  %5232 = vmatmul.mubr.bf16.gmra.mrb[228].mxu0 %v14589_v54 }
 0x4e9   : > { %v8804_v59 = vpack.i.bf16 %v8803_v55, %v8803_v55  ;;  %v7411_v19 = vadd.bf16 %v11868_v7, %v6792_v43  ;;  %v6761_v17 = vpack.c.bf16 %v4894_v6, %v4890_v0  ;;  %v4896_v9 = vpop.f32.mrb[107].mxu1  ;;  %5241 = vmatprep.mubr.bf16.mxu0 %v14442_v62  ;;  %v6825_v0 = vcombine.high %v6823_v33, %v6823_v33 }
 0x4ea   : > { %v8821_v32 = vpack.i.bf16 %v8820_v22, %v8820_v22  ;;  %v7922_v4 = vmax.bf16 %v14442_v62, %v7410_v46  ;;  %v6762_v30 = vpack.c.bf16 %v4896_v9, %v4892_v14 }
 0x4eb   : > { %v7923_v29 = vmax.bf16 %v14442_v62, %v7411_v19  ;;  %v7380_v38 = vadd.bf16 %v11997_v26, %v6761_v17  ;;  %v4267_v5 = vpop.f32.mrb[124].mxu0  ;;  %5865 = vmatmul.mubr.bf16.gmra.mrb[212].mxu1 %v14585_v12  ;;  %v14591_v17 = vld [vmem:[#allocation53_spill] sm:$0xff] }
 0x4ec   : > { %v9725_v28 = vcombine.low %v8804_v59, %v8821_v32  ;;  %v8895_v11 = vmax.bf16 %v8894_v16, %v7922_v4  ;;  %v7381_v15 = vadd.bf16 %v12003_v40, %v6762_v30  ;;  %v4269_v31 = vpop.f32.mrb[125].mxu0  ;;  %5874 = vmatprep.mubr.bf16.mxu1 %v14442_v62 }
 0x4ed   : > { %v8912_v48 = vmax.bf16 %v8911_v20, %v7923_v29  ;;  %v7892_v50 = vmax.bf16 %v14442_v62, %v7380_v38  ;;  %v4271_v8 = vpop.f32.mrb[126].mxu0 }
 0x4ee   : > { %v7893_v9 = vmax.bf16 %v14442_v62, %v7381_v15  ;;  %v6799_v55 = vpack.c.bf16 %v4271_v8, %v4267_v5  ;;  %v4273_v43 = vpop.f32.mrb[127].mxu0  ;;  %v4900_v14 = vpop.f32.mrb[108].mxu1  ;;  %v9240_v22 = vunpack.c.l.b16 %v9725_v28  ;;  %v9241_v46 = vunpack.c.h.b16 %v9725_v28 }
 0x4ef   : > { %v13211_v12 = vmax.bf16 %v8924_v56, %v7892_v50  ;;  %v6800_v16 = vpack.c.bf16 %v4273_v43, %v4269_v31  ;;  %v4902_v6 = vpop.f32.mrb[109].mxu1 }
 0x4f0   : > { %v13213_v59 = vmax.bf16 %v8941_v47, %v7893_v9  ;;  %v7418_v19 = vadd.bf16 %v11863_v21, %v6799_v55  ;;  %v4904_v20 = vpop.f32.mrb[110].mxu1  ;;  %5242 = vmatmul.mubr.bf16.gmra.mrb[232].mxu0 %v14591_v17  ;;  %v13219_v32 = vsel %vm9264_vm9, %v9240_v22, %v13079_v42  ;;  %v13223_v4 = vsel %vm9264_vm9, %v9241_v46, %v13083_v13 }
 0x4f1   : > { %v7419_v56 = vadd.bf16 %v11868_v7, %v6800_v16  ;;  %v6769_v30 = vpack.c.bf16 %v4904_v20, %v4900_v14  ;;  %v4906_v29 = vpop.f32.mrb[111].mxu1  ;;  %v13227_v47 = vrot.slane %v6823_v33, %v14590_v35  ;;  %v13230_v21 = vrot.slane %v6825_v0, %v14590_v35  ;;  %5251 = vmatprep.mubr.bf16.mxu0 %v14442_v62 }
 0x4f2   : > { %v7930_v38 = vmax.bf16 %v14442_v62, %v7418_v19  ;;  %v6770_v42 = vpack.c.bf16 %v4906_v29, %v4902_v6 }
 0x4f3   : > { %v7931_v5 = vmax.bf16 %v14442_v62, %v7419_v56  ;;  %v7388_v13 = vadd.bf16 %v11997_v26, %v6769_v30  ;;  %v4983_v28 = vpop.f32.mrb[128].mxu0  ;;  %5875 = vmatmul.mubr.bf16.gmra.mrb[216].mxu1 %v14586_v53  ;;  %v6887_v8 = vpack.i.b16 %v13227_v47, %v13227_v47  ;;  %v6894_v0 = vpack.i.b16 %v13230_v21, %v13230_v21  ;;  %v14592_v30 = vld [vmem:[#allocation58_spill] sm:$0xff] }
 0x4f4   : > { %v8896_v7 = vmax.bf16 %v8895_v11, %v7930_v38  ;;  %v7389_v15 = vadd.bf16 %v12003_v40, %v6770_v42  ;;  %v4985_v33 = vpop.f32.mrb[129].mxu0  ;;  %5884 = vmatprep.mubr.bf16.mxu1 %v14442_v62 }
 0x4f5   : > { %v8913_v35 = vmax.bf16 %v8912_v48, %v7931_v5  ;;  %v7900_v31 = vmax.bf16 %v14442_v62, %v7388_v13  ;;  %v4987_v50 = vpop.f32.mrb[130].mxu0  ;;  %v14593_v13 = vld [vmem:[#allocation9_spill] sm:$0xff] }
 0x4f6   : > { %v8897_v9 = vunpack.i.l.bf16 %v8896_v7  ;;  %v8898_v55 = vunpack.i.h.bf16 %v8896_v7  ;;  %v7901_v53 = vmax.bf16 %v14442_v62, %v7389_v15  ;;  %v6299_v11 = vpack.c.bf16 %v4987_v50, %v4983_v28  ;;  %v4910_v43 = vpop.f32.mrb[112].mxu1  ;;  %v4989_v14 = vpop.f32.mrb[131].mxu0 }
 0x4f7   : > { %v8914_v22 = vunpack.i.l.bf16 %v8913_v35  ;;  %v8915_v46 = vunpack.i.h.bf16 %v8913_v35  ;;  %v8926_v48 = vmax.bf16 %v13211_v12, %v7900_v31  ;;  %v6300_v16 = vpack.c.bf16 %v4989_v14, %v4985_v33  ;;  %v4912_v6 = vpop.f32.mrb[113].mxu1 }
 0x4f8   : > { %v8899_v19 = vmax.f32 %v8897_v9, %v8898_v55  ;;  %v8943_v20 = vmax.bf16 %v13213_v59, %v7901_v53  ;;  %v4914_v56 = vpop.f32.mrb[114].mxu1  ;;  %5252 = vmatmul.mubr.bf16.gmra.mrb[236].mxu0 %v14592_v30  ;;  %v13250_v28 = vrot.slane %v6887_v8, %v14593_v13  ;;  %v13253_v12 = vrot.slane %v6894_v0, %v14593_v13 }
 0x4f9   : > { %v8916_v29 = vmax.f32 %v8914_v22, %v8915_v46  ;;  %v6777_v38 = vpack.c.bf16 %v4914_v56, %v4910_v43  ;;  %v4916_v42 = vpop.f32.mrb[115].mxu1  ;;  %5261 = vmatprep.mubr.bf16.mxu0 %v14442_v62 }
 0x4fa   : > { %v8900_v5 = vrot.slane %v8899_v19, 4  ;;  %v6778_v7 = vpack.c.bf16 %v4916_v42, %v4912_v6  ;;  %v6918_v43 = vadd.bf16 %v13250_v28, %v6299_v11 }
 0x4fb   : > { %v8917_v15 = vrot.slane %v8916_v29, 4  ;;  %v7396_v33 = vadd.bf16 %v11997_v26, %v6777_v38  ;;  %v4993_v59 = vpop.f32.mrb[132].mxu0  ;;  %5885 = vmatmul.mubr.bf16.gmra.mrb[220].mxu1 %v14587_v27  ;;  %v6919_v27 = vadd.bf16 %v13253_v12, %v6300_v16 }
 0x4fc   : > { %v8901_v35 = vmax.f32 %v8899_v19, %v8900_v5  ;;  %v7397_v31 = vadd.bf16 %v12003_v40, %v6778_v7  ;;  %v4995_v50 = vpop.f32.mrb[133].mxu0  ;;  %5894 = vmatprep.mubr.bf16.mxu1 %v14442_v62 }
 0x4fd   : > { %v8918_v9 = vmax.f32 %v8916_v29, %v8917_v15  ;;  %v7908_v8 = vmax.bf16 %v14442_v62, %v7396_v33  ;;  %v4997_v55 = vpop.f32.mrb[134].mxu0  ;;  %v14594_v15 = vld [vmem:[#allocation63_spill] sm:$0xff] }
 0x4fe   : > { %v8902_v53 = vrot.slane %v8901_v35, 2  ;;  %v7909_v0 = vmax.bf16 %v14442_v62, %v7397_v31  ;;  %v6307_v14 = vpack.c.bf16 %v4997_v55, %v4993_v59  ;;  %v4920_v22 = vpop.f32.mrb[116].mxu1  ;;  %v4999_v46 = vpop.f32.mrb[135].mxu0 }
 0x4ff   : > { %v8919_v6 = vrot.slane %v8918_v9, 2  ;;  %v13263_v19 = vmax.bf16 %v8926_v48, %v7908_v8  ;;  %v6308_v56 = vpack.c.bf16 %v4999_v46, %v4995_v50  ;;  %v4922_v38 = vpop.f32.mrb[117].mxu1  ;;  %v7430_v48 = vmax.bf16 %v14442_v62, %v6918_v43 }
 0x500   : > { %v8903_v42 = vmax.f32 %v8901_v35, %v8902_v53  ;;  %v13265_v29 = vmax.bf16 %v8943_v20, %v7909_v0  ;;  %v6926_v5 = vadd.bf16 %v13250_v28, %v6307_v14  ;;  %v4924_v7 = vpop.f32.mrb[118].mxu1  ;;  %5262 = vmatmul.mubr.bf16.gmra.mrb[240].mxu0 %v14594_v15  ;;  %v7431_v8 = vmax.bf16 %v14442_v62, %v6919_v27 }
 0x501   : > { %v8920_v11 = vmax.f32 %v8918_v9, %v8919_v6  ;;  %v6927_v33 = vadd.bf16 %v13253_v12, %v6308_v56  ;;  %v6785_v59 = vpack.c.bf16 %v4924_v7, %v4920_v22  ;;  %v4926_v31 = vpop.f32.mrb[119].mxu1  ;;  %5271 = vmatprep.mubr.bf16.mxu0 %v14442_v62 }
 0x502   : > { %v8904_v16 = vrot.slane %v8903_v42, 1  ;;  %v7438_v50 = vmax.bf16 %v14442_v62, %v6926_v5  ;;  %v6786_v35 = vpack.c.bf16 %v4926_v31, %v4922_v38 }
 0x503   : > { %v8921_v20 = vrot.slane %v8920_v11, 1  ;;  %v7439_v55 = vmax.bf16 %v14442_v62, %v6927_v33  ;;  %v7404_v53 = vadd.bf16 %v11997_v26, %v6785_v59  ;;  %v5003_v9 = vpop.f32.mrb[136].mxu0  ;;  %5895 = vmatmul.mubr.bf16.gmra.mrb[224].mxu1 %v14588_v41 }
 0x504   : > { %v8905_v0 = vmax.f32 %v8903_v42, %v8904_v16  ;;  %v8006_v14 = vmax.bf16 %v7438_v50, %v7430_v48  ;;  %v7405_v22 = vadd.bf16 %v12003_v40, %v6786_v35  ;;  %v5005_v46 = vpop.f32.mrb[137].mxu0  ;;  %5904 = vmatprep.mubr.bf16.mxu1 %v14442_v62 }
 0x505   : > { %v8922_v43 = vmax.f32 %v8920_v11, %v8921_v20  ;;  %v8023_v6 = vmax.bf16 %v7439_v55, %v7431_v8  ;;  %v7916_v56 = vmax.bf16 %v14442_v62, %v7404_v53  ;;  %v5007_v38 = vpop.f32.mrb[138].mxu0 }
 0x506   : > { %v8906_v27 = vpack.i.bf16 %v8905_v0, %v8905_v0  ;;  %v7917_v5 = vmax.bf16 %v14442_v62, %v7405_v22  ;;  %v6315_v7 = vpack.c.bf16 %v5007_v38, %v5003_v9  ;;  %v4930_v33 = vpop.f32.mrb[120].mxu1  ;;  %v5009_v59 = vpop.f32.mrb[139].mxu0 }
 0x507   : > { %v8923_v31 = vpack.i.bf16 %v8922_v43, %v8922_v43  ;;  %v8928_v41 = vmax.bf16 %v13263_v19, %v7916_v56  ;;  %v6316_v42 = vpack.c.bf16 %v5009_v59, %v5005_v46  ;;  %v4932_v16 = vpop.f32.mrb[121].mxu1 }
 0x508   : > { %v8945_v48 = vmax.bf16 %v13265_v29, %v7917_v5  ;;  %v6934_v50 = vadd.bf16 %v13250_v28, %v6315_v7  ;;  %v4934_v11 = vpop.f32.mrb[122].mxu1  ;;  %5272 = vmatmul.mubr.bf16.gmra.mrb[244].mxu0 %v11906_v61 }
 0x509   : > { %v9728_v35 = vcombine.low %v8906_v27, %v8923_v31  ;;  %v6935_v20 = vadd.bf16 %v13253_v12, %v6316_v42  ;;  %v6793_v8 = vpack.c.bf16 %v4934_v11, %v4930_v33  ;;  %v4936_v55 = vpop.f32.mrb[123].mxu1  ;;  %5281 = vmatprep.mubr.bf16.mxu0 %v14442_v62  ;;  %v9026_v33 = vld [vmem:[%s10696_s20] sm:$0xff] }
 0x50a   : > { %v7446_v53 = vmax.bf16 %v14442_v62, %v6934_v50  ;;  %v6794_v19 = vpack.c.bf16 %v4936_v55, %v4932_v16 }
 0x50b   : > { %v7447_v9 = vmax.bf16 %v14442_v62, %v6935_v20  ;;  %v7412_v29 = vadd.bf16 %v11997_v26, %v6793_v8  ;;  %v5013_v0 = vpop.f32.mrb[140].mxu0  ;;  %5905 = vmatmul.mubr.bf16.gmra.mrb[228].mxu1 %v14589_v54  ;;  %v9246_v22 = vunpack.c.l.b16 %v9728_v35  ;;  %v9247_v46 = vunpack.c.h.b16 %v9728_v35 }
 0x50c   : > { %v13291_v43 = vmax.bf16 %v8006_v14, %v7446_v53  ;;  %v7413_v56 = vadd.bf16 %v12003_v40, %v6794_v19  ;;  %v5015_v38 = vpop.f32.mrb[141].mxu0  ;;  %5914 = vmatprep.mubr.bf16.mxu1 %v14442_v62 }
 0x50d   : > { %v13295_v27 = vmax.bf16 %v8023_v6, %v7447_v9  ;;  %v7924_v5 = vmax.bf16 %v14442_v62, %v7412_v29  ;;  %v5017_v7 = vpop.f32.mrb[142].mxu0  ;;  %v9267_v59 = vsel %vm9266_vm10, %v9246_v22, %v13144_v1  ;;  %v9274_v54 = vsel %vm9266_vm10, %v9247_v46, %v13148_v10 }
 0x50e   : > { %v7925_v14 = vmax.bf16 %v14442_v62, %v7413_v56  ;;  %v6323_v31 = vpack.c.bf16 %v5017_v7, %v5013_v0  ;;  %v4940_v42 = vpop.f32.mrb[124].mxu1  ;;  %v5019_v16 = vpop.f32.mrb[143].mxu0  ;;  %v9317_v50 = vpack.c.b16 %v9274_v54, %v9267_v59 }
 0x50f   : > { %v8929_v11 = vmax.bf16 %v8928_v41, %v7924_v5  ;;  %v6324_v6 = vpack.c.bf16 %v5019_v16, %v5015_v38  ;;  %v4942_v35 = vpop.f32.mrb[125].mxu1  ;;  %v6855_v38 = vcombine.high %v13227_v47, %v13227_v47  ;;  %v6857_v5 = vcombine.high %v13230_v21, %v13230_v21 }
 0x510   : > { %v8946_v20 = vmax.bf16 %v8945_v48, %v7925_v14  ;;  %v6942_v8 = vadd.bf16 %v13250_v28, %v6323_v31  ;;  %v4944_v55 = vpop.f32.mrb[126].mxu1  ;;  %5282 = vmatmul.mubr.bf16.gmra.mrb[248].mxu0 %v11946_v58  ;;  %v9325_v1 = vmax.bf16 %v9317_v50, %v9026_v33 }
 0x511   : > { %v6943_v53 = vadd.bf16 %v13253_v12, %v6324_v6  ;;  %v6801_v10 = vpack.c.bf16 %v4944_v55, %v4940_v42  ;;  %v4946_v19 = vpop.f32.mrb[127].mxu1  ;;  %5291 = vmatprep.mubr.bf16.mxu0 %v14442_v62  ;;  %v6901_v16 = vpack.i.b16 %v6855_v38, %v6855_v38  ;;  %v6908_v50 = vpack.i.b16 %v6857_v5, %v6857_v5 }
 0x512   : > { %v7454_v9 = vmax.bf16 %v14442_v62, %v6942_v8  ;;  %v6802_v29 = vpack.c.bf16 %v4946_v19, %v4942_v35  ;;  %9329 = vst [vmem:[%s10696_s20] sm:$0xff] %v9325_v1 }
 0x513   : > { %v7455_v41 = vmax.bf16 %v14442_v62, %v6943_v53  ;;  %v7420_v48 = vadd.bf16 %v11997_v26, %v6801_v10  ;;  %v5023_v0 = vpop.f32.mrb[144].mxu0  ;;  %5915 = vmatmul.mubr.bf16.gmra.mrb[232].mxu1 %v14591_v17 }
 0x514   : > { %v8008_v22 = vmax.bf16 %v13291_v43, %v7454_v9  ;;  %v7421_v46 = vadd.bf16 %v12003_v40, %v6802_v29  ;;  %v5025_v56 = vpop.f32.mrb[145].mxu0  ;;  %5924 = vmatprep.mubr.bf16.mxu1 %v14442_v62 }
 0x515   : > { %v8025_v7 = vmax.bf16 %v13295_v27, %v7455_v41  ;;  %v7932_v26 = vmax.bf16 %v14442_v62, %v7420_v48  ;;  %v5027_v33 = vpop.f32.mrb[146].mxu0 }
 0x516   : > { %v7933_v17 = vmax.bf16 %v14442_v62, %v7421_v46  ;;  %v6331_v59 = vpack.c.bf16 %v5027_v33, %v5023_v0  ;;  %v5029_v43 = vpop.f32.mrb[147].mxu0  ;;  %v5656_v54 = vpop.f32.mrb[128].mxu1 }
 0x517   : > { %v8930_v40 = vmax.bf16 %v8929_v11, %v7932_v26  ;;  %v6332_v14 = vpack.c.bf16 %v5029_v43, %v5025_v56  ;;  %v5658_v31 = vpop.f32.mrb[129].mxu1  ;;  %v13336_v56 = vrot.slane %v6901_v16, %v14593_v13  ;;  %v13339_v26 = vrot.slane %v6908_v50, %v14593_v13 }
 0x518   : > { %v8947_v42 = vmax.bf16 %v8946_v20, %v7933_v17  ;;  %v6950_v47 = vadd.bf16 %v13250_v28, %v6331_v59  ;;  %5292 = vmatmul.mubr.bf16.gmra.mrb[252].mxu0 %v11978_v44  ;;  %v5660_v21 = vpop.f32.mrb[130].mxu1 }
 0x519   : > { %v8931_v27 = vunpack.i.l.bf16 %v8930_v40  ;;  %v8932_v6 = vunpack.i.h.bf16 %v8930_v40  ;;  %v6951_v35 = vadd.bf16 %v13253_v12, %v6332_v14  ;;  %v6301_v8 = vpack.c.bf16 %v5660_v21, %v5656_v54  ;;  %v5662_v55 = vpop.f32.mrb[131].mxu1  ;;  %5301 = vmatprep.mubr.bf16.mxu0 %v14442_v62 }
 0x51a   : > { %v8948_v1 = vunpack.i.l.bf16 %v8947_v42  ;;  %v8949_v11 = vunpack.i.h.bf16 %v8947_v42  ;;  %v7462_v53 = vmax.bf16 %v14442_v62, %v6950_v47  ;;  %v6302_v20 = vpack.c.bf16 %v5662_v55, %v5658_v31 }
 0x51b   : > { %v8933_v10 = vmax.f32 %v8931_v27, %v8932_v6  ;;  %v7463_v19 = vmax.bf16 %v14442_v62, %v6951_v35  ;;  %v5033_v9 = vpop.f32.mrb[148].mxu0  ;;  %5925 = vmatmul.mubr.bf16.gmra.mrb[236].mxu1 %v14592_v30  ;;  %v6920_v31 = vadd.bf16 %v13336_v56, %v6301_v8 }
 0x51c   : > { %v8950_v29 = vmax.f32 %v8948_v1, %v8949_v11  ;;  %v13330_v41 = vmax.bf16 %v8008_v22, %v7462_v53  ;;  %v5035_v48 = vpop.f32.mrb[149].mxu0  ;;  %5934 = vmatprep.mubr.bf16.mxu1 %v14442_v62  ;;  %v6921_v16 = vadd.bf16 %v13339_v26, %v6302_v20 }
 0x51d   : > { %v8934_v0 = vrot.slane %v8933_v10, 4  ;;  %v13333_v46 = vmax.bf16 %v8025_v7, %v7463_v19  ;;  %v5037_v38 = vpop.f32.mrb[150].mxu0  ;;  %v7432_v19 = vmax.bf16 %v14442_v62, %v6920_v31 }
 0x51e   : > { %v8951_v5 = vrot.slane %v8950_v29, 4  ;;  %v6339_v33 = vpack.c.bf16 %v5037_v38, %v5033_v9  ;;  %v5039_v17 = vpop.f32.mrb[151].mxu0  ;;  %v5666_v30 = vpop.f32.mrb[132].mxu1  ;;  %v7433_v38 = vmax.bf16 %v14442_v62, %v6921_v16 }
 0x51f   : > { %v8935_v59 = vmax.f32 %v8933_v10, %v8934_v0  ;;  %v6340_v22 = vpack.c.bf16 %v5039_v17, %v5035_v48  ;;  %v5668_v43 = vpop.f32.mrb[133].mxu1 }
 0x520   : > { %v8952_v54 = vmax.f32 %v8950_v29, %v8951_v5  ;;  %v6958_v40 = vadd.bf16 %v13250_v28, %v6339_v33  ;;  %5302 = vmatmul.mubr.bf16.gmra.mrb[0].mxu0 %v12000_v23  ;;  %v5670_v7 = vpop.f32.mrb[134].mxu1 }
 0x521   : > { %v8936_v14 = vrot.slane %v8935_v59, 2  ;;  %v6959_v42 = vadd.bf16 %v13253_v12, %v6340_v22  ;;  %v6309_v47 = vpack.c.bf16 %v5670_v7, %v5666_v30  ;;  %v5672_v13 = vpop.f32.mrb[135].mxu1  ;;  %5311 = vmatprep.mubr.bf16.mxu0 %v14442_v62 }
 0x522   : > { %v8953_v21 = vrot.slane %v8952_v54, 2  ;;  %v7470_v50 = vmax.bf16 %v14442_v62, %v6958_v40  ;;  %v6310_v27 = vpack.c.bf16 %v5672_v13, %v5668_v43 }
 0x523   : > { %v8937_v6 = vmax.f32 %v8935_v59, %v8936_v14  ;;  %v7471_v35 = vmax.bf16 %v14442_v62, %v6959_v42  ;;  %v6928_v55 = vadd.bf16 %v13336_v56, %v6309_v47  ;;  %v5043_v1 = vpop.f32.mrb[152].mxu0  ;;  %5935 = vmatmul.mubr.bf16.gmra.mrb[240].mxu1 %v14594_v15 }
 0x524   : > { %v8954_v8 = vmax.f32 %v8952_v54, %v8953_v21  ;;  %v8010_v11 = vmax.bf16 %v13330_v41, %v7470_v50  ;;  %v6929_v53 = vadd.bf16 %v13339_v26, %v6310_v27  ;;  %v5045_v10 = vpop.f32.mrb[153].mxu0  ;;  %5944 = vmatprep.mubr.bf16.mxu1 %v14442_v62 }
 0x525   : > { %v8938_v20 = vrot.slane %v8937_v6, 1  ;;  %v8027_v9 = vmax.bf16 %v13333_v46, %v7471_v35  ;;  %v7440_v29 = vmax.bf16 %v14442_v62, %v6928_v55  ;;  %v5047_v48 = vpop.f32.mrb[154].mxu0 }
 0x526   : > { %v8955_v0 = vrot.slane %v8954_v8, 1  ;;  %v7441_v15 = vmax.bf16 %v14442_v62, %v6929_v53  ;;  %v6347_v5 = vpack.c.bf16 %v5047_v48, %v5043_v1  ;;  %v5049_v41 = vpop.f32.mrb[155].mxu0  ;;  %v5676_v33 = vpop.f32.mrb[136].mxu1 }
 0x527   : > { %v8939_v17 = vmax.f32 %v8937_v6, %v8938_v20  ;;  %v8040_v30 = vmax.bf16 %v7440_v29, %v7432_v19  ;;  %v6348_v59 = vpack.c.bf16 %v5049_v41, %v5045_v10  ;;  %v5678_v22 = vpop.f32.mrb[137].mxu1 }
 0x528   : > { %v8956_v43 = vmax.f32 %v8954_v8, %v8955_v0  ;;  %v8057_v54 = vmax.bf16 %v7441_v15, %v7433_v38  ;;  %v6966_v40 = vadd.bf16 %v13250_v28, %v6347_v5  ;;  %5312 = vmatmul.mubr.bf16.gmra.mrb[4].mxu0 %v12025_v36  ;;  %v5680_v46 = vpop.f32.mrb[138].mxu1 }
 0x529   : > { %v8940_v7 = vpack.i.bf16 %v8939_v17, %v8939_v17  ;;  %v6967_v14 = vadd.bf16 %v13253_v12, %v6348_v59  ;;  %v6317_v31 = vpack.c.bf16 %v5680_v46, %v5676_v33  ;;  %v5682_v42 = vpop.f32.mrb[139].mxu1  ;;  %5321 = vmatprep.mubr.bf16.mxu0 %v14442_v62  ;;  %v9027_v33 = vld [vmem:[%s10696_s20 + $0x8] sm:$0xff] }
 0x52a   : > { %v8957_v47 = vpack.i.bf16 %v8956_v43, %v8956_v43  ;;  %v7478_v13 = vmax.bf16 %v14442_v62, %v6966_v40  ;;  %v6318_v21 = vpack.c.bf16 %v5682_v42, %v5678_v22 }
 0x52b   : > { %v7479_v16 = vmax.bf16 %v14442_v62, %v6967_v14  ;;  %v6936_v50 = vadd.bf16 %v13336_v56, %v6317_v31  ;;  %v5053_v27 = vpop.f32.mrb[156].mxu0  ;;  %5945 = vmatmul.mubr.bf16.gmra.mrb[244].mxu1 %v11906_v61 }
 0x52c   : > { %v9729_v6 = vcombine.low %v8940_v7, %v8957_v47  ;;  %v8011_v35 = vmax.bf16 %v8010_v11, %v7478_v13  ;;  %v6937_v55 = vadd.bf16 %v13339_v26, %v6318_v21  ;;  %v5055_v1 = vpop.f32.mrb[157].mxu0  ;;  %5954 = vmatprep.mubr.bf16.mxu1 %v14442_v62 }
 0x52d   : > { %v8028_v8 = vmax.bf16 %v8027_v9, %v7479_v16  ;;  %v7448_v53 = vmax.bf16 %v14442_v62, %v6936_v50  ;;  %v5057_v10 = vpop.f32.mrb[158].mxu0 }
 0x52e   : > { %v7449_v20 = vmax.bf16 %v14442_v62, %v6937_v55  ;;  %v6355_v19 = vpack.c.bf16 %v5057_v10, %v5053_v27  ;;  %v5059_v29 = vpop.f32.mrb[159].mxu0  ;;  %v5686_v48 = vpop.f32.mrb[140].mxu1  ;;  %v9248_v0 = vunpack.c.l.b16 %v9729_v6  ;;  %v9249_v38 = vunpack.c.h.b16 %v9729_v6 }
 0x52f   : > { %v13371_v61 = vmax.bf16 %v8040_v30, %v7448_v53  ;;  %v6356_v11 = vpack.c.bf16 %v5059_v29, %v5055_v1  ;;  %v5688_v15 = vpop.f32.mrb[141].mxu1 }
 0x530   : > { %v13373_v5 = vmax.bf16 %v8057_v54, %v7449_v20  ;;  %v6974_v41 = vadd.bf16 %v13250_v28, %v6355_v19  ;;  %5322 = vmatmul.mubr.bf16.gmra.mrb[8].mxu0 %v12045_v34  ;;  %v5690_v9 = vpop.f32.mrb[142].mxu1  ;;  %v9281_v17 = vsel %vm9266_vm10, %v9248_v0, %v13219_v32  ;;  %v9288_v59 = vsel %vm9266_vm10, %v9249_v38, %v13223_v4 }
 0x531   : > { %v6975_v22 = vadd.bf16 %v13253_v12, %v6356_v11  ;;  %v6325_v30 = vpack.c.bf16 %v5690_v9, %v5686_v48  ;;  %v5692_v43 = vpop.f32.mrb[143].mxu1  ;;  %5331 = vmatprep.mubr.bf16.mxu0 %v14442_v62  ;;  %v9318_v54 = vpack.c.b16 %v9288_v59, %v9281_v17 }
 0x532   : > { %v7486_v40 = vmax.bf16 %v14442_v62, %v6974_v41  ;;  %v6326_v46 = vpack.c.bf16 %v5692_v43, %v5688_v15 }
 0x533   : > { %v7487_v7 = vmax.bf16 %v14442_v62, %v6975_v22  ;;  %v6944_v14 = vadd.bf16 %v13336_v56, %v6325_v30  ;;  %v5063_v31 = vpop.f32.mrb[160].mxu0  ;;  %5955 = vmatmul.mubr.bf16.gmra.mrb[248].mxu1 %v11946_v58  ;;  %v9326_v32 = vmax.bf16 %v9318_v54, %v9027_v33 }
 0x534   : > { %v8012_v4 = vmax.bf16 %v8011_v35, %v7486_v40  ;;  %v6945_v42 = vadd.bf16 %v13339_v26, %v6326_v46  ;;  %v5065_v47 = vpop.f32.mrb[161].mxu0  ;;  %5964 = vmatprep.mubr.bf16.mxu1 %v14442_v62 }
 0x535   : > { %v8029_v13 = vmax.bf16 %v8028_v8, %v7487_v7  ;;  %v7456_v21 = vmax.bf16 %v14442_v62, %v6944_v14  ;;  %v5067_v16 = vpop.f32.mrb[162].mxu0  ;;  %9330 = vst [vmem:[%s10696_s20 + $0x8] sm:$0xff] %v9326_v32 }
 0x536   : > { %v8013_v50 = vunpack.i.l.bf16 %v8012_v4  ;;  %v8014_v27 = vunpack.i.h.bf16 %v8012_v4  ;;  %v7457_v6 = vmax.bf16 %v14442_v62, %v6945_v42  ;;  %v6363_v55 = vpack.c.bf16 %v5067_v16, %v5063_v31  ;;  %v5069_v1 = vpop.f32.mrb[163].mxu0  ;;  %v5696_v53 = vpop.f32.mrb[144].mxu1 }
 0x537   : > { %v8030_v58 = vunpack.i.l.bf16 %v8029_v13  ;;  %v8031_v10 = vunpack.i.h.bf16 %v8029_v13  ;;  %v8042_v35 = vmax.bf16 %v13371_v61, %v7456_v21  ;;  %v6364_v20 = vpack.c.bf16 %v5069_v1, %v5065_v47  ;;  %v5698_v19 = vpop.f32.mrb[145].mxu1 }
 0x538   : > { %v8015_v29 = vmax.f32 %v8013_v50, %v8014_v27  ;;  %v8059_v8 = vmax.bf16 %v13373_v5, %v7457_v6  ;;  %5332 = vmatmul.mubr.bf16.gmra.mrb[12].mxu0 %v12067_v24  ;;  %v5700_v48 = vpop.f32.mrb[146].mxu1  ;;  %v6982_v40 = vadd.bf16 %v13250_v28, %v6363_v55 }
 0x539   : > { %v8032_v0 = vmax.f32 %v8030_v58, %v8031_v10  ;;  %v6333_v38 = vpack.c.bf16 %v5700_v48, %v5696_v53  ;;  %v5702_v11 = vpop.f32.mrb[147].mxu1  ;;  %5341 = vmatprep.mubr.bf16.mxu0 %v14442_v62 }
 0x53a   : > { %v8016_v15 = vrot.slane %v8015_v29, 4  ;;  %v6334_v41 = vpack.c.bf16 %v5702_v11, %v5698_v19  ;;  %v7494_v58 = vmax.bf16 %v14442_v62, %v6982_v40 }
 0x53b   : > { %v8033_v9 = vrot.slane %v8032_v0, 4  ;;  %v6952_v33 = vadd.bf16 %v13336_v56, %v6333_v38  ;;  %v5073_v17 = vpop.f32.mrb[164].mxu0  ;;  %5965 = vmatmul.mubr.bf16.gmra.mrb[252].mxu1 %v11978_v44  ;;  %v6983_v44 = vadd.bf16 %v13253_v12, %v6364_v20 }
 0x53c   : > { %v8017_v61 = vmax.f32 %v8015_v29, %v8016_v15  ;;  %v6953_v59 = vadd.bf16 %v13339_v26, %v6334_v41  ;;  %v5075_v5 = vpop.f32.mrb[165].mxu0  ;;  %5974 = vmatprep.mubr.bf16.mxu1 %v14442_v62 }
 0x53d   : > { %v8034_v22 = vmax.f32 %v8032_v0, %v8033_v9  ;;  %v7464_v30 = vmax.bf16 %v14442_v62, %v6952_v33  ;;  %v5077_v43 = vpop.f32.mrb[166].mxu0  ;;  %v7495_v19 = vmax.bf16 %v14442_v62, %v6983_v44 }
 0x53e   : > { %v8018_v54 = vrot.slane %v8017_v61, 2  ;;  %v7465_v46 = vmax.bf16 %v14442_v62, %v6953_v59  ;;  %v6371_v7 = vpack.c.bf16 %v5077_v43, %v5073_v17  ;;  %v5079_v14 = vpop.f32.mrb[167].mxu0  ;;  %v5706_v31 = vpop.f32.mrb[148].mxu1 }
 0x53f   : > { %v8035_v32 = vrot.slane %v8034_v22, 2  ;;  %v13405_v4 = vmax.bf16 %v8042_v35, %v7464_v30  ;;  %v6372_v42 = vpack.c.bf16 %v5079_v14, %v5075_v5  ;;  %v5708_v47 = vpop.f32.mrb[149].mxu1 }
 0x540   : > { %v8019_v13 = vmax.f32 %v8017_v61, %v8018_v54  ;;  %v13407_v21 = vmax.bf16 %v8059_v8, %v7465_v46  ;;  %v6990_v16 = vadd.bf16 %v13250_v28, %v6371_v7  ;;  %5342 = vmatmul.mubr.bf16.gmra.mrb[16].mxu0 %v12084_v2  ;;  %v5710_v50 = vpop.f32.mrb[150].mxu1 }
 0x541   : > { %v8036_v27 = vmax.f32 %v8034_v22, %v8035_v32  ;;  %v6991_v6 = vadd.bf16 %v13253_v12, %v6372_v42  ;;  %v6341_v55 = vpack.c.bf16 %v5710_v50, %v5706_v31  ;;  %v5712_v1 = vpop.f32.mrb[151].mxu1  ;;  %5351 = vmatprep.mubr.bf16.mxu0 %v14442_v62 }
 0x542   : > { %v8020_v53 = vrot.slane %v8019_v13, 1  ;;  %v7502_v10 = vmax.bf16 %v14442_v62, %v6990_v16  ;;  %v6342_v35 = vpack.c.bf16 %v5712_v1, %v5708_v47 }
 0x543   : > { %v8037_v20 = vrot.slane %v8036_v27, 1  ;;  %v7503_v29 = vmax.bf16 %v14442_v62, %v6991_v6  ;;  %v6960_v8 = vadd.bf16 %v13336_v56, %v6341_v55  ;;  %v5083_v48 = vpop.f32.mrb[168].mxu0  ;;  %5975 = vmatmul.mubr.bf16.gmra.mrb[0].mxu1 %v12000_v23 }
 0x544   : > { %v8021_v0 = vmax.f32 %v8019_v13, %v8020_v53  ;;  %v8142_v38 = vmax.bf16 %v7502_v10, %v7494_v58  ;;  %v6961_v11 = vadd.bf16 %v13339_v26, %v6342_v35  ;;  %v5085_v15 = vpop.f32.mrb[169].mxu0  ;;  %5984 = vmatprep.mubr.bf16.mxu1 %v14442_v62 }
 0x545   : > { %v8038_v41 = vmax.f32 %v8036_v27, %v8037_v20  ;;  %v8159_v9 = vmax.bf16 %v7503_v29, %v7495_v19  ;;  %v7472_v33 = vmax.bf16 %v14442_v62, %v6960_v8  ;;  %v5087_v17 = vpop.f32.mrb[170].mxu0 }
 0x546   : > { %v8022_v61 = vpack.i.bf16 %v8021_v0, %v8021_v0  ;;  %v7473_v59 = vmax.bf16 %v14442_v62, %v6961_v11  ;;  %v6379_v5 = vpack.c.bf16 %v5087_v17, %v5083_v48  ;;  %v5089_v22 = vpop.f32.mrb[171].mxu0  ;;  %v5716_v30 = vpop.f32.mrb[152].mxu1 }
 0x547   : > { %v8039_v43 = vpack.i.bf16 %v8038_v41, %v8038_v41  ;;  %v8044_v23 = vmax.bf16 %v13405_v4, %v7472_v33  ;;  %v6380_v54 = vpack.c.bf16 %v5089_v22, %v5085_v15  ;;  %v5718_v40 = vpop.f32.mrb[153].mxu1 }
 0x548   : > { %v8061_v46 = vmax.bf16 %v13407_v21, %v7473_v59  ;;  %v6998_v7 = vadd.bf16 %v13250_v28, %v6379_v5  ;;  %5352 = vmatmul.mubr.bf16.gmra.mrb[20].mxu0 %v12112_v63  ;;  %v5720_v14 = vpop.f32.mrb[154].mxu1 }
 0x549   : > { %v13427_v31 = vcombine.low %v8022_v61, %v8039_v43  ;;  %v6999_v32 = vadd.bf16 %v13253_v12, %v6380_v54  ;;  %v6349_v44 = vpack.c.bf16 %v5720_v14, %v5716_v30  ;;  %v5722_v42 = vpop.f32.mrb[155].mxu1  ;;  %5361 = vmatprep.mubr.bf16.mxu0 %v14442_v62 }
 0x54a   : > { %v7510_v47 = vmax.bf16 %v14442_v62, %v6998_v7  ;;  %v6350_v4 = vpack.c.bf16 %v5722_v42, %v5718_v40 }
 0x54b   : > { %v7511_v13 = vmax.bf16 %v14442_v62, %v6999_v32  ;;  %v6968_v21 = vadd.bf16 %v13336_v56, %v6349_v44  ;;  %v5093_v16 = vpop.f32.mrb[172].mxu0  ;;  %5985 = vmatmul.mubr.bf16.gmra.mrb[4].mxu1 %v12025_v36 }
 0x54c   : > { %v8143_v50 = vmax.bf16 %v8142_v38, %v7510_v47  ;;  %v6969_v27 = vadd.bf16 %v13339_v26, %v6350_v4  ;;  %v5095_v6 = vpop.f32.mrb[173].mxu0  ;;  %5994 = vmatprep.mubr.bf16.mxu1 %v14442_v62 }
 0x54d   : > { %v8160_v55 = vmax.bf16 %v8159_v9, %v7511_v13  ;;  %v7480_v1 = vmax.bf16 %v14442_v62, %v6968_v21  ;;  %v5097_v53 = vpop.f32.mrb[174].mxu0 }
 0x54e   : > { %v7481_v58 = vmax.bf16 %v14442_v62, %v6969_v27  ;;  %v6387_v10 = vpack.c.bf16 %v5097_v53, %v5093_v16  ;;  %v5099_v35 = vpop.f32.mrb[175].mxu0  ;;  %v5726_v20 = vpop.f32.mrb[156].mxu1 }
 0x54f   : > { %v8045_v19 = vmax.bf16 %v8044_v23, %v7480_v1  ;;  %v6388_v29 = vpack.c.bf16 %v5099_v35, %v5095_v6  ;;  %v5728_v8 = vpop.f32.mrb[157].mxu1 }
 0x550   : > { %v8062_v48 = vmax.bf16 %v8061_v46, %v7481_v58  ;;  %v7006_v36 = vadd.bf16 %v13250_v28, %v6387_v10  ;;  %5362 = vmatmul.mubr.bf16.gmra.mrb[24].mxu0 %v12151_v18  ;;  %v5730_v0 = vpop.f32.mrb[158].mxu1 }
 0x551   : > { %v7007_v38 = vadd.bf16 %v13253_v12, %v6388_v29  ;;  %v6357_v11 = vpack.c.bf16 %v5730_v0, %v5726_v20  ;;  %v5732_v15 = vpop.f32.mrb[159].mxu1  ;;  %5371 = vmatprep.mubr.bf16.mxu0 %v14442_v62 }
 0x552   : > { %v7518_v41 = vmax.bf16 %v14442_v62, %v7006_v36  ;;  %v6358_v9 = vpack.c.bf16 %v5732_v15, %v5728_v8 }
 0x553   : > { %v7519_v33 = vmax.bf16 %v14442_v62, %v7007_v38  ;;  %v6976_v17 = vadd.bf16 %v13336_v56, %v6357_v11  ;;  %v5103_v61 = vpop.f32.mrb[176].mxu0  ;;  %5995 = vmatmul.mubr.bf16.gmra.mrb[8].mxu1 %v12045_v34 }
 0x554   : > { %v8144_v59 = vmax.bf16 %v8143_v50, %v7518_v41  ;;  %v6977_v5 = vadd.bf16 %v13339_v26, %v6358_v9  ;;  %v5105_v22 = vpop.f32.mrb[177].mxu0  ;;  %6004 = vmatprep.mubr.bf16.mxu1 %v14442_v62 }
 0x555   : > { %v8161_v30 = vmax.bf16 %v8160_v55, %v7519_v33  ;;  %v7488_v43 = vmax.bf16 %v14442_v62, %v6976_v17  ;;  %v5107_v23 = vpop.f32.mrb[178].mxu0 }
 0x556   : > { %v7489_v54 = vmax.bf16 %v14442_v62, %v6977_v5  ;;  %v6395_v40 = vpack.c.bf16 %v5107_v23, %v5103_v61  ;;  %v5109_v46 = vpop.f32.mrb[179].mxu0  ;;  %v5736_v7 = vpop.f32.mrb[160].mxu1 }
 0x557   : > { %v8046_v14 = vmax.bf16 %v8045_v19, %v7488_v43  ;;  %v6396_v32 = vpack.c.bf16 %v5109_v46, %v5105_v22  ;;  %v5738_v44 = vpop.f32.mrb[161].mxu1 }
 0x558   : > { %v8063_v42 = vmax.bf16 %v8062_v48, %v7489_v54  ;;  %v7014_v34 = vadd.bf16 %v13250_v28, %v6395_v40  ;;  %5372 = vmatmul.mubr.bf16.gmra.mrb[28].mxu0 %v12172_v60  ;;  %v5740_v47 = vpop.f32.mrb[162].mxu1 }
 0x559   : > { %v8047_v4 = vunpack.i.l.bf16 %v8046_v14  ;;  %v8048_v13 = vunpack.i.h.bf16 %v8046_v14  ;;  %v7015_v21 = vadd.bf16 %v13253_v12, %v6396_v32  ;;  %v6365_v16 = vpack.c.bf16 %v5740_v47, %v5736_v7  ;;  %v5742_v50 = vpop.f32.mrb[163].mxu1  ;;  %5381 = vmatprep.mubr.bf16.mxu0 %v14442_v62 }
 0x55a   : > { %v8064_v27 = vunpack.i.l.bf16 %v8063_v42  ;;  %v8065_v6 = vunpack.i.h.bf16 %v8063_v42  ;;  %v7526_v55 = vmax.bf16 %v14442_v62, %v7014_v34  ;;  %v6366_v1 = vpack.c.bf16 %v5742_v50, %v5738_v44 }
 0x55b   : > { %v8049_v53 = vmax.f32 %v8047_v4, %v8048_v13  ;;  %v7527_v58 = vmax.bf16 %v14442_v62, %v7015_v21  ;;  %v5113_v10 = vpop.f32.mrb[180].mxu0  ;;  %6005 = vmatmul.mubr.bf16.gmra.mrb[12].mxu1 %v12067_v24 }
 0x55c   : > { %v8066_v35 = vmax.f32 %v8064_v27, %v8065_v6  ;;  %v13458_v20 = vmax.bf16 %v8144_v59, %v7526_v55  ;;  %v5115_v19 = vpop.f32.mrb[181].mxu0  ;;  %6014 = vmatprep.mubr.bf16.mxu1 %v14442_v62  ;;  %v6984_v59 = vadd.bf16 %v13336_v56, %v6365_v16  ;;  %v6985_v23 = vadd.bf16 %v13339_v26, %v6366_v1 }
 0x55d   : > { %v8050_v29 = vrot.slane %v8049_v53, 4  ;;  %v13461_v8 = vmax.bf16 %v8161_v30, %v7527_v58  ;;  %v5117_v48 = vpop.f32.mrb[182].mxu0 }
 0x55e   : > { %v8067_v36 = vrot.slane %v8066_v35, 4  ;;  %v6403_v0 = vpack.c.bf16 %v5117_v48, %v5113_v10  ;;  %v5119_v38 = vpop.f32.mrb[183].mxu0  ;;  %v5746_v11 = vpop.f32.mrb[164].mxu1  ;;  %v7496_v13 = vmax.bf16 %v14442_v62, %v6984_v59  ;;  %v7497_v6 = vmax.bf16 %v14442_v62, %v6985_v23 }
 0x55f   : > { %v8051_v15 = vmax.f32 %v8049_v53, %v8050_v29  ;;  %v6404_v41 = vpack.c.bf16 %v5119_v38, %v5115_v19  ;;  %v5748_v9 = vpop.f32.mrb[165].mxu1 }
 0x560   : > { %v8068_v33 = vmax.f32 %v8066_v35, %v8067_v36  ;;  %v7022_v24 = vadd.bf16 %v13250_v28, %v6403_v0  ;;  %5382 = vmatmul.mubr.bf16.gmra.mrb[32].mxu0 %v12192_v45  ;;  %v5750_v17 = vpop.f32.mrb[166].mxu1 }
 0x561   : > { %v8052_v61 = vrot.slane %v8051_v15, 2  ;;  %v7023_v5 = vadd.bf16 %v13253_v12, %v6404_v41  ;;  %v6373_v22 = vpack.c.bf16 %v5750_v17, %v5746_v11  ;;  %v5752_v30 = vpop.f32.mrb[167].mxu1  ;;  %5391 = vmatprep.mubr.bf16.mxu0 %v14442_v62 }
 0x562   : > { %v8069_v43 = vrot.slane %v8068_v33, 2  ;;  %v7534_v54 = vmax.bf16 %v14442_v62, %v7022_v24  ;;  %v6374_v40 = vpack.c.bf16 %v5752_v30, %v5748_v9 }
 0x563   : > { %v8053_v46 = vmax.f32 %v8051_v15, %v8052_v61  ;;  %v7535_v7 = vmax.bf16 %v14442_v62, %v7023_v5  ;;  %v6992_v14 = vadd.bf16 %v13336_v56, %v6373_v22  ;;  %v5123_v32 = vpop.f32.mrb[184].mxu0  ;;  %6015 = vmatmul.mubr.bf16.gmra.mrb[16].mxu1 %v12084_v2 }
 0x564   : > { %v8070_v44 = vmax.f32 %v8068_v33, %v8069_v43  ;;  %v8146_v42 = vmax.bf16 %v13458_v20, %v7534_v54  ;;  %v6993_v34 = vadd.bf16 %v13339_v26, %v6374_v40  ;;  %v5125_v47 = vpop.f32.mrb[185].mxu0  ;;  %6024 = vmatprep.mubr.bf16.mxu1 %v14442_v62 }
 0x565   : > { %v8054_v4 = vrot.slane %v8053_v46, 1  ;;  %v8163_v21 = vmax.bf16 %v13461_v8, %v7535_v7  ;;  %v7504_v16 = vmax.bf16 %v14442_v62, %v6992_v14  ;;  %v5127_v50 = vpop.f32.mrb[186].mxu0 }
 0x566   : > { %v8071_v27 = vrot.slane %v8070_v44, 1  ;;  %v7505_v2 = vmax.bf16 %v14442_v62, %v6993_v34  ;;  %v6411_v55 = vpack.c.bf16 %v5127_v50, %v5123_v32  ;;  %v5129_v1 = vpop.f32.mrb[187].mxu0  ;;  %v5756_v53 = vpop.f32.mrb[168].mxu1 }
 0x567   : > { %v8055_v58 = vmax.f32 %v8053_v46, %v8054_v4  ;;  %v8176_v10 = vmax.bf16 %v7504_v16, %v7496_v13  ;;  %v6412_v35 = vpack.c.bf16 %v5129_v1, %v5125_v47  ;;  %v5758_v20 = vpop.f32.mrb[169].mxu1 }
 0x568   : > { %v8072_v19 = vmax.f32 %v8070_v44, %v8071_v27  ;;  %v8193_v29 = vmax.bf16 %v7505_v2, %v7497_v6  ;;  %v7030_v48 = vadd.bf16 %v13250_v28, %v6411_v55  ;;  %5392 = vmatmul.mubr.bf16.gmra.mrb[36].mxu0 %v12209_v25  ;;  %v5760_v8 = vpop.f32.mrb[170].mxu1 }
 0x569   : > { %v8056_v36 = vpack.i.bf16 %v8055_v58, %v8055_v58  ;;  %v7031_v0 = vadd.bf16 %v13253_v12, %v6412_v35  ;;  %v6381_v38 = vpack.c.bf16 %v5760_v8, %v5756_v53  ;;  %v5762_v11 = vpop.f32.mrb[171].mxu1  ;;  %5401 = vmatprep.mubr.bf16.mxu0 %v14442_v62 }
 0x56a   : > { %v8073_v15 = vpack.i.bf16 %v8072_v19, %v8072_v19  ;;  %v7542_v41 = vmax.bf16 %v14442_v62, %v7030_v48  ;;  %v6382_v9 = vpack.c.bf16 %v5762_v11, %v5758_v20 }
 0x56b   : > { %v7543_v33 = vmax.bf16 %v14442_v62, %v7031_v0  ;;  %v7000_v24 = vadd.bf16 %v13336_v56, %v6381_v38  ;;  %v5133_v17 = vpop.f32.mrb[188].mxu0  ;;  %6025 = vmatmul.mubr.bf16.gmra.mrb[20].mxu1 %v12112_v63 }
 0x56c   : > { %v13489_v61 = vcombine.low %v8056_v36, %v8073_v15  ;;  %v8147_v59 = vmax.bf16 %v8146_v42, %v7542_v41  ;;  %v7001_v5 = vadd.bf16 %v13339_v26, %v6382_v9  ;;  %v5135_v22 = vpop.f32.mrb[189].mxu0  ;;  %6034 = vmatprep.mubr.bf16.mxu1 %v14442_v62 }
 0x56d   : > { %v8164_v30 = vmax.bf16 %v8163_v21, %v7543_v33  ;;  %v7512_v43 = vmax.bf16 %v14442_v62, %v7000_v24  ;;  %v5137_v23 = vpop.f32.mrb[190].mxu0 }
 0x56e   : > { %v7513_v54 = vmax.bf16 %v14442_v62, %v7001_v5  ;;  %v6419_v40 = vpack.c.bf16 %v5137_v23, %v5133_v17  ;;  %v5139_v46 = vpop.f32.mrb[191].mxu0  ;;  %v5766_v7 = vpop.f32.mrb[172].mxu1 }
 0x56f   : > { %v13495_v14 = vmax.bf16 %v8176_v10, %v7512_v43  ;;  %v6420_v63 = vpack.c.bf16 %v5139_v46, %v5135_v22  ;;  %v5768_v32 = vpop.f32.mrb[173].mxu1 }
 0x570   : > { %v13497_v44 = vmax.bf16 %v8193_v29, %v7513_v54  ;;  %v7038_v42 = vadd.bf16 %v13250_v28, %v6419_v40  ;;  %5402 = vmatmul.mubr.bf16.gmra.mrb[40].mxu0 %v12237_v51  ;;  %v5770_v34 = vpop.f32.mrb[174].mxu1 }
 0x571   : > { %v7039_v47 = vadd.bf16 %v13253_v12, %v6420_v63  ;;  %v6389_v4 = vpack.c.bf16 %v5770_v34, %v5766_v7  ;;  %v5772_v13 = vpop.f32.mrb[175].mxu1  ;;  %5411 = vmatprep.mubr.bf16.mxu0 %v14442_v62 }
 0x572   : > { %v7550_v21 = vmax.bf16 %v14442_v62, %v7038_v42  ;;  %v6390_v16 = vpack.c.bf16 %v5772_v13, %v5768_v32 }
 0x573   : > { %v7551_v50 = vmax.bf16 %v14442_v62, %v7039_v47  ;;  %v7008_v27 = vadd.bf16 %v13336_v56, %v6389_v4  ;;  %v5143_v6 = vpop.f32.mrb[192].mxu0  ;;  %6035 = vmatmul.mubr.bf16.gmra.mrb[24].mxu1 %v12151_v18 }
 0x574   : > { %v8148_v2 = vmax.bf16 %v8147_v59, %v7550_v21  ;;  %v7009_v55 = vadd.bf16 %v13339_v26, %v6390_v16  ;;  %v5145_v1 = vpop.f32.mrb[193].mxu0  ;;  %6044 = vmatprep.mubr.bf16.mxu1 %v14442_v62 }
 0x575   : > { %v8165_v53 = vmax.bf16 %v8164_v30, %v7551_v50  ;;  %v7520_v58 = vmax.bf16 %v14442_v62, %v7008_v27  ;;  %v5147_v10 = vpop.f32.mrb[194].mxu0 }
 0x576   : > { %v8149_v35 = vunpack.i.l.bf16 %v8148_v2  ;;  %v8150_v20 = vunpack.i.h.bf16 %v8148_v2  ;;  %v7521_v19 = vmax.bf16 %v14442_v62, %v7009_v55  ;;  %v6427_v29 = vpack.c.bf16 %v5147_v10, %v5143_v6  ;;  %v5149_v48 = vpop.f32.mrb[195].mxu0  ;;  %v5776_v8 = vpop.f32.mrb[176].mxu1 }
 0x577   : > { %v8166_v36 = vunpack.i.l.bf16 %v8165_v53  ;;  %v8167_v0 = vunpack.i.h.bf16 %v8165_v53  ;;  %v8178_v18 = vmax.bf16 %v13495_v14, %v7520_v58  ;;  %v6428_v38 = vpack.c.bf16 %v5149_v48, %v5145_v1  ;;  %v5778_v11 = vpop.f32.mrb[177].mxu1 }
 0x578   : > { %v8151_v15 = vmax.f32 %v8149_v35, %v8150_v20  ;;  %v8195_v41 = vmax.bf16 %v13497_v44, %v7521_v19  ;;  %5412 = vmatmul.mubr.bf16.gmra.mrb[44].mxu0 %v12259_v49  ;;  %v5780_v9 = vpop.f32.mrb[178].mxu1  ;;  %v7046_v32 = vadd.bf16 %v13250_v28, %v6427_v29 }
 0x579   : > { %v8168_v33 = vmax.f32 %v8166_v36, %v8167_v0  ;;  %v6397_v24 = vpack.c.bf16 %v5780_v9, %v5776_v8  ;;  %v5782_v17 = vpop.f32.mrb[179].mxu1  ;;  %5421 = vmatprep.mubr.bf16.mxu0 %v14442_v62 }
 0x57a   : > { %v8152_v59 = vrot.slane %v8151_v15, 4  ;;  %v6398_v5 = vpack.c.bf16 %v5782_v17, %v5778_v11  ;;  %v7558_v35 = vmax.bf16 %v14442_v62, %v7046_v32 }
 0x57b   : > { %v8169_v22 = vrot.slane %v8168_v33, 4  ;;  %v7016_v30 = vadd.bf16 %v13336_v56, %v6397_v24  ;;  %v5153_v43 = vpop.f32.mrb[196].mxu0  ;;  %6045 = vmatmul.mubr.bf16.gmra.mrb[28].mxu1 %v12172_v60  ;;  %v7047_v60 = vadd.bf16 %v13253_v12, %v6428_v38 }
 0x57c   : > { %v8153_v23 = vmax.f32 %v8151_v15, %v8152_v59  ;;  %v7017_v54 = vadd.bf16 %v13339_v26, %v6398_v5  ;;  %v5155_v40 = vpop.f32.mrb[197].mxu0  ;;  %6054 = vmatprep.mubr.bf16.mxu1 %v14442_v62 }
 0x57d   : > { %v8170_v46 = vmax.f32 %v8168_v33, %v8169_v22  ;;  %v7528_v7 = vmax.bf16 %v14442_v62, %v7016_v30  ;;  %v5157_v14 = vpop.f32.mrb[198].mxu0  ;;  %v7559_v48 = vmax.bf16 %v14442_v62, %v7047_v60 }
 0x57e   : > { %v8154_v63 = vrot.slane %v8153_v23, 2  ;;  %v7529_v44 = vmax.bf16 %v14442_v62, %v7017_v54  ;;  %v6435_v42 = vpack.c.bf16 %v5157_v14, %v5153_v43  ;;  %v5159_v34 = vpop.f32.mrb[199].mxu0  ;;  %v5786_v47 = vpop.f32.mrb[180].mxu1 }
 0x57f   : > { %v8171_v4 = vrot.slane %v8170_v46, 2  ;;  %v13523_v13 = vmax.bf16 %v8178_v18, %v7528_v7  ;;  %v6436_v21 = vpack.c.bf16 %v5159_v34, %v5155_v40  ;;  %v5788_v16 = vpop.f32.mrb[181].mxu1  ;;  %v14595_v7 = vld [vmem:[#allocation33_spill] sm:$0xff]  ;;  %v9194_v34 = vunpack.c.l.b16 %v13427_v31 }
 0x580   : > { %v8155_v50 = vmax.f32 %v8153_v23, %v8154_v63  ;;  %v13525_v27 = vmax.bf16 %v8195_v41, %v7529_v44  ;;  %v7054_v6 = vadd.bf16 %v13250_v28, %v6435_v42  ;;  %5422 = vmatmul.mubr.bf16.gmra.mrb[48].mxu0 %v12276_v39  ;;  %v5790_v2 = vpop.f32.mrb[182].mxu1 }
 0x581   : > { %v8172_v55 = vmax.f32 %v8170_v46, %v8171_v4  ;;  %v7055_v1 = vadd.bf16 %v13253_v12, %v6436_v21  ;;  %v6405_v53 = vpack.c.bf16 %v5790_v2, %v5786_v47  ;;  %v5792_v58 = vpop.f32.mrb[183].mxu1  ;;  %5431 = vmatprep.mubr.bf16.mxu0 %v14442_v62  ;;  %v9195_v47 = vunpack.c.h.b16 %v13427_v31 }
 0x582   : > { %v8156_v10 = vrot.slane %v8155_v50, 1  ;;  %v7566_v20 = vmax.bf16 %v14442_v62, %v7054_v6  ;;  %v6406_v19 = vpack.c.bf16 %v5792_v58, %v5788_v16 }
 0x583   : > { %v8173_v29 = vrot.slane %v8172_v55, 1  ;;  %v7567_v8 = vmax.bf16 %v14442_v62, %v7055_v1  ;;  %v7024_v36 = vadd.bf16 %v13336_v56, %v6405_v53  ;;  %v5163_v0 = vpop.f32.mrb[200].mxu0  ;;  %6055 = vmatmul.mubr.bf16.gmra.mrb[32].mxu1 %v12192_v45 }
 0x584   : > { %v8157_v18 = vmax.f32 %v8155_v50, %v8156_v10  ;;  %v8278_v38 = vmax.bf16 %v7566_v20, %v7558_v35  ;;  %v7025_v11 = vadd.bf16 %v13339_v26, %v6406_v19  ;;  %v5165_v15 = vpop.f32.mrb[201].mxu0  ;;  %6064 = vmatprep.mubr.bf16.mxu1 %v14442_v62 }
 0x585   : > { %v8174_v41 = vmax.f32 %v8172_v55, %v8173_v29  ;;  %v8295_v9 = vmax.bf16 %v7567_v8, %v7559_v48  ;;  %v7536_v33 = vmax.bf16 %v14442_v62, %v7024_v36  ;;  %v5167_v24 = vpop.f32.mrb[202].mxu0 }
 0x586   : > { %v8158_v17 = vpack.i.bf16 %v8157_v18, %v8157_v18  ;;  %v7537_v59 = vmax.bf16 %v14442_v62, %v7025_v11  ;;  %v6443_v5 = vpack.c.bf16 %v5167_v24, %v5163_v0  ;;  %v5169_v22 = vpop.f32.mrb[203].mxu0  ;;  %v5796_v30 = vpop.f32.mrb[184].mxu1  ;;  %v14596_v18 = vld [vmem:[#allocation34_spill] sm:$0xff] }
 0x587   : > { %v8175_v43 = vpack.i.bf16 %v8174_v41, %v8174_v41  ;;  %v8180_v45 = vmax.bf16 %v13523_v13, %v7536_v33  ;;  %v6444_v23 = vpack.c.bf16 %v5169_v22, %v5165_v15  ;;  %v5798_v54 = vpop.f32.mrb[185].mxu1 }
 0x588   : > { %v8197_v40 = vmax.bf16 %v13525_v27, %v7537_v59  ;;  %v7062_v46 = vadd.bf16 %v13250_v28, %v6443_v5  ;;  %5432 = vmatmul.mubr.bf16.gmra.mrb[52].mxu0 %v14595_v7  ;;  %v5800_v14 = vpop.f32.mrb[186].mxu1 }
 0x589   : > { %v9706_v63 = vcombine.low %v8158_v17, %v8175_v43  ;;  %v7063_v32 = vadd.bf16 %v13253_v12, %v6444_v23  ;;  %v6413_v44 = vpack.c.bf16 %v5800_v14, %v5796_v30  ;;  %v5802_v42 = vpop.f32.mrb[187].mxu1  ;;  %5441 = vmatprep.mubr.bf16.mxu0 %v14442_v62 }
 0x58a   : > { %v7574_v4 = vmax.bf16 %v14442_v62, %v7062_v46  ;;  %v6414_v60 = vpack.c.bf16 %v5802_v42, %v5798_v54 }
 0x58b   : > { %v9202_v13 = vunpack.c.l.b16 %v9706_v63  ;;  %v9203_v21 = vunpack.c.h.b16 %v9706_v63  ;;  %v7575_v16 = vmax.bf16 %v14442_v62, %v7063_v32  ;;  %v7032_v50 = vadd.bf16 %v13336_v56, %v6413_v44  ;;  %v5173_v27 = vpop.f32.mrb[204].mxu0  ;;  %6065 = vmatmul.mubr.bf16.gmra.mrb[36].mxu1 %v12209_v25 }
 0x58c   : > { %v13553_v6 = vmax.bf16 %v8278_v38, %v7574_v4  ;;  %v7033_v2 = vadd.bf16 %v13339_v26, %v6414_v60  ;;  %v5175_v55 = vpop.f32.mrb[205].mxu0  ;;  %6074 = vmatprep.mubr.bf16.mxu1 %v14442_v62 }
 0x58d   : > { %v13558_v31 = vsel %vm9254_vm4, %v9202_v13, %v9194_v34  ;;  %v13561_v1 = vsel %vm9254_vm4, %v9203_v21, %v9195_v47  ;;  %v8296_v53 = vmax.bf16 %v8295_v9, %v7575_v16  ;;  %v7544_v58 = vmax.bf16 %v14442_v62, %v7032_v50  ;;  %v5177_v10 = vpop.f32.mrb[206].mxu0  ;;  %v14597_v34 = vld [vmem:[#allocation31_spill] sm:$0xff] }
 0x58e   : > { %v7545_v35 = vmax.bf16 %v14442_v62, %v7033_v2  ;;  %v6451_v25 = vpack.c.bf16 %v5177_v10, %v5173_v27  ;;  %v5179_v20 = vpop.f32.mrb[207].mxu0  ;;  %v5806_v19 = vpop.f32.mrb[188].mxu1 }
 0x58f   : > { %v8181_v29 = vmax.bf16 %v8180_v45, %v7544_v58  ;;  %v6452_v48 = vpack.c.bf16 %v5179_v20, %v5175_v55  ;;  %v5808_v8 = vpop.f32.mrb[189].mxu1 }
 0x590   : > { %v8198_v36 = vmax.bf16 %v8197_v40, %v7545_v35  ;;  %v7070_v0 = vadd.bf16 %v13250_v28, %v6451_v25  ;;  %5442 = vmatmul.mubr.bf16.gmra.mrb[56].mxu0 %v14596_v18  ;;  %v5810_v38 = vpop.f32.mrb[190].mxu1 }
 0x591   : > { %v7071_v11 = vadd.bf16 %v13253_v12, %v6452_v48  ;;  %v6421_v15 = vpack.c.bf16 %v5810_v38, %v5806_v19  ;;  %v5812_v41 = vpop.f32.mrb[191].mxu1  ;;  %5451 = vmatprep.mubr.bf16.mxu0 %v14442_v62 }
 0x592   : > { %v7582_v9 = vmax.bf16 %v14442_v62, %v7070_v0  ;;  %v6422_v33 = vpack.c.bf16 %v5812_v41, %v5808_v8 }
 0x593   : > { %v7583_v24 = vmax.bf16 %v14442_v62, %v7071_v11  ;;  %v7040_v17 = vadd.bf16 %v13336_v56, %v6421_v15  ;;  %v5183_v59 = vpop.f32.mrb[208].mxu0  ;;  %6075 = vmatmul.mubr.bf16.gmra.mrb[40].mxu1 %v12237_v51 }
 0x594   : > { %v8280_v5 = vmax.bf16 %v13553_v6, %v7582_v9  ;;  %v7041_v22 = vadd.bf16 %v13339_v26, %v6422_v33  ;;  %v5185_v30 = vpop.f32.mrb[209].mxu0  ;;  %6084 = vmatprep.mubr.bf16.mxu1 %v14442_v62  ;;  %v14598_v9 = vld [vmem:[#allocation35_spill] sm:$0xff] }
 0x595   : > { %v8297_v43 = vmax.bf16 %v8296_v53, %v7583_v24  ;;  %v7552_v45 = vmax.bf16 %v14442_v62, %v7040_v17  ;;  %v5187_v23 = vpop.f32.mrb[210].mxu0 }
 0x596   : > { %v7553_v54 = vmax.bf16 %v14442_v62, %v7041_v22  ;;  %v6459_v40 = vpack.c.bf16 %v5187_v23, %v5183_v59  ;;  %v5189_v46 = vpop.f32.mrb[211].mxu0  ;;  %v5816_v14 = vpop.f32.mrb[192].mxu1 }
 0x597   : > { %v8182_v63 = vmax.bf16 %v8181_v29, %v7552_v45  ;;  %v6460_v32 = vpack.c.bf16 %v5189_v46, %v5185_v30  ;;  %v5818_v44 = vpop.f32.mrb[193].mxu1 }
 0x598   : > { %v8199_v51 = vmax.bf16 %v8198_v36, %v7553_v54  ;;  %v7078_v42 = vadd.bf16 %v13250_v28, %v6459_v40  ;;  %5452 = vmatmul.mubr.bf16.gmra.mrb[60].mxu0 %v14597_v34  ;;  %v5820_v47 = vpop.f32.mrb[194].mxu1 }
 0x599   : > { %v8183_v4 = vunpack.i.l.bf16 %v8182_v63  ;;  %v8184_v60 = vunpack.i.h.bf16 %v8182_v63  ;;  %v7079_v13 = vadd.bf16 %v13253_v12, %v6460_v32  ;;  %v6429_v21 = vpack.c.bf16 %v5820_v47, %v5816_v14  ;;  %v5822_v16 = vpop.f32.mrb[195].mxu1  ;;  %5461 = vmatprep.mubr.bf16.mxu0 %v14442_v62 }
 0x59a   : > { %v8200_v50 = vunpack.i.l.bf16 %v8199_v51  ;;  %v8201_v27 = vunpack.i.h.bf16 %v8199_v51  ;;  %v7590_v6 = vmax.bf16 %v14442_v62, %v7078_v42  ;;  %v6430_v2 = vpack.c.bf16 %v5822_v16, %v5818_v44 }
 0x59b   : > { %v8185_v55 = vmax.f32 %v8183_v4, %v8184_v60  ;;  %v7591_v53 = vmax.bf16 %v14442_v62, %v7079_v13  ;;  %v5193_v58 = vpop.f32.mrb[212].mxu0  ;;  %6085 = vmatmul.mubr.bf16.gmra.mrb[44].mxu1 %v12259_v49  ;;  %v7048_v17 = vadd.bf16 %v13336_v56, %v6429_v21 }
 0x59c   : > { %v8202_v10 = vmax.f32 %v8200_v50, %v8201_v27  ;;  %v13585_v35 = vmax.bf16 %v8280_v5, %v7590_v6  ;;  %v5195_v25 = vpop.f32.mrb[213].mxu0  ;;  %6094 = vmatprep.mubr.bf16.mxu1 %v14442_v62 }
 0x59d   : > { %v8186_v20 = vrot.slane %v8185_v55, 4  ;;  %v13588_v19 = vmax.bf16 %v8297_v43, %v7591_v53  ;;  %v5197_v29 = vpop.f32.mrb[214].mxu0  ;;  %v7049_v43 = vadd.bf16 %v13339_v26, %v6430_v2  ;;  %v7560_v47 = vmax.bf16 %v14442_v62, %v7048_v17 }
 0x59e   : > { %v8203_v48 = vrot.slane %v8202_v10, 4  ;;  %v6467_v8 = vpack.c.bf16 %v5197_v29, %v5193_v58  ;;  %v5199_v36 = vpop.f32.mrb[215].mxu0  ;;  %v5826_v0 = vpop.f32.mrb[196].mxu1 }
 0x59f   : > { %v8187_v38 = vmax.f32 %v8185_v55, %v8186_v20  ;;  %v6468_v11 = vpack.c.bf16 %v5199_v36, %v5195_v25  ;;  %v5828_v15 = vpop.f32.mrb[197].mxu1  ;;  %v7561_v16 = vmax.bf16 %v14442_v62, %v7049_v43  ;;  %v14599_v20 = vld [vmem:[#allocation39_spill] sm:$0xff] }
 0x5a0   : > { %v8204_v41 = vmax.f32 %v8202_v10, %v8203_v48  ;;  %v7086_v49 = vadd.bf16 %v13250_v28, %v6467_v8  ;;  %5462 = vmatmul.mubr.bf16.gmra.mrb[64].mxu0 %v14598_v9  ;;  %v5830_v33 = vpop.f32.mrb[198].mxu1 }
 0x5a1   : > { %v8188_v24 = vrot.slane %v8187_v38, 2  ;;  %v7087_v59 = vadd.bf16 %v13253_v12, %v6468_v11  ;;  %v6437_v5 = vpack.c.bf16 %v5830_v33, %v5826_v0  ;;  %v5832_v22 = vpop.f32.mrb[199].mxu1  ;;  %5471 = vmatprep.mubr.bf16.mxu0 %v14442_v62 }
 0x5a2   : > { %v8205_v30 = vrot.slane %v8204_v41, 2  ;;  %v7598_v45 = vmax.bf16 %v14442_v62, %v7086_v49  ;;  %v6438_v23 = vpack.c.bf16 %v5832_v22, %v5828_v15  ;;  %v9197_v22 = vunpack.c.h.b16 %v13489_v61 }
 0x5a3   : > { %v8189_v54 = vmax.f32 %v8187_v38, %v8188_v24  ;;  %v7599_v40 = vmax.bf16 %v14442_v62, %v7087_v59  ;;  %v7056_v46 = vadd.bf16 %v13336_v56, %v6437_v5  ;;  %v5203_v14 = vpop.f32.mrb[216].mxu0  ;;  %6095 = vmatmul.mubr.bf16.gmra.mrb[48].mxu1 %v12276_v39  ;;  %v9196_v5 = vunpack.c.l.b16 %v13489_v61 }
 0x5a4   : > { %v8206_v63 = vmax.f32 %v8204_v41, %v8205_v30  ;;  %v8282_v32 = vmax.bf16 %v13585_v35, %v7598_v45  ;;  %v7057_v44 = vadd.bf16 %v13339_v26, %v6438_v23  ;;  %v5205_v51 = vpop.f32.mrb[217].mxu0  ;;  %6104 = vmatprep.mubr.bf16.mxu1 %v14442_v62 }
 0x5a5   : > { %v8190_v42 = vrot.slane %v8189_v54, 1  ;;  %v8299_v4 = vmax.bf16 %v13588_v19, %v7599_v40  ;;  %v7568_v60 = vmax.bf16 %v14442_v62, %v7056_v46  ;;  %v5207_v13 = vpop.f32.mrb[218].mxu0 }
 0x5a6   : > { %v8207_v21 = vrot.slane %v8206_v63, 1  ;;  %v7569_v39 = vmax.bf16 %v14442_v62, %v7057_v44  ;;  %v6475_v50 = vpack.c.bf16 %v5207_v13, %v5203_v14  ;;  %v5209_v27 = vpop.f32.mrb[219].mxu0  ;;  %v5836_v6 = vpop.f32.mrb[200].mxu1 }
 0x5a7   : > { %v8191_v2 = vmax.f32 %v8189_v54, %v8190_v42  ;;  %v8312_v55 = vmax.bf16 %v7568_v60, %v7560_v47  ;;  %v6476_v53 = vpack.c.bf16 %v5209_v27, %v5205_v51  ;;  %v5838_v58 = vpop.f32.mrb[201].mxu1 }
 0x5a8   : > { %v8208_v10 = vmax.f32 %v8206_v63, %v8207_v21  ;;  %v8329_v35 = vmax.bf16 %v7569_v39, %v7561_v16  ;;  %v7094_v25 = vadd.bf16 %v13250_v28, %v6475_v50  ;;  %5472 = vmatmul.mubr.bf16.gmra.mrb[68].mxu0 %v14599_v20  ;;  %v5840_v19 = vpop.f32.mrb[202].mxu1 }
 0x5a9   : > { %v8192_v29 = vpack.i.bf16 %v8191_v2, %v8191_v2  ;;  %v7095_v48 = vadd.bf16 %v13253_v12, %v6476_v53  ;;  %v6445_v8 = vpack.c.bf16 %v5840_v19, %v5836_v6  ;;  %v5842_v36 = vpop.f32.mrb[203].mxu1  ;;  %5481 = vmatprep.mubr.bf16.mxu0 %v14442_v62 }
 0x5aa   : > { %v8209_v0 = vpack.i.bf16 %v8208_v10, %v8208_v10  ;;  %v7606_v38 = vmax.bf16 %v14442_v62, %v7094_v25  ;;  %v6446_v11 = vpack.c.bf16 %v5842_v36, %v5838_v58 }
 0x5ab   : > { %v7607_v15 = vmax.bf16 %v14442_v62, %v7095_v48  ;;  %v7064_v41 = vadd.bf16 %v13336_v56, %v6445_v8  ;;  %v5213_v49 = vpop.f32.mrb[220].mxu0  ;;  %6105 = vmatmul.mubr.bf16.gmra.mrb[52].mxu1 %v14595_v7 }
 0x5ac   : > { %v9707_v33 = vcombine.low %v8192_v29, %v8209_v0  ;;  %v8283_v24 = vmax.bf16 %v8282_v32, %v7606_v38  ;;  %v7065_v17 = vadd.bf16 %v13339_v26, %v6446_v11  ;;  %v5215_v59 = vpop.f32.mrb[221].mxu0  ;;  %6114 = vmatprep.mubr.bf16.mxu1 %v14442_v62 }
 0x5ad   : > { %v8300_v30 = vmax.bf16 %v8299_v4, %v7607_v15  ;;  %v7576_v43 = vmax.bf16 %v14442_v62, %v7064_v41  ;;  %v5217_v45 = vpop.f32.mrb[222].mxu0  ;;  %v14600_v4 = vld [vmem:[#allocation40_spill] sm:$0xff] }
 0x5ae   : > { %v9204_v23 = vunpack.c.l.b16 %v9707_v33  ;;  %v9205_v54 = vunpack.c.h.b16 %v9707_v33  ;;  %v7577_v40 = vmax.bf16 %v14442_v62, %v7065_v17  ;;  %v6483_v7 = vpack.c.bf16 %v5217_v45, %v5213_v49  ;;  %v5219_v46 = vpop.f32.mrb[223].mxu0  ;;  %v5846_v14 = vpop.f32.mrb[204].mxu1 }
 0x5af   : > { %v13622_v63 = vmax.bf16 %v8312_v55, %v7576_v43  ;;  %v6484_v32 = vpack.c.bf16 %v5219_v46, %v5215_v59  ;;  %v5848_v44 = vpop.f32.mrb[205].mxu1 }
 0x5b0   : > { %v13625_v51 = vsel %vm9254_vm4, %v9204_v23, %v9196_v5  ;;  %v13628_v61 = vsel %vm9254_vm4, %v9205_v54, %v9197_v22  ;;  %v13630_v42 = vmax.bf16 %v8329_v35, %v7577_v40  ;;  %v7102_v47 = vadd.bf16 %v13250_v28, %v6483_v7  ;;  %5482 = vmatmul.mubr.bf16.gmra.mrb[72].mxu0 %v14600_v4  ;;  %v5850_v60 = vpop.f32.mrb[206].mxu1 }
 0x5b1   : > { %v7103_v13 = vadd.bf16 %v13253_v12, %v6484_v32  ;;  %v6453_v21 = vpack.c.bf16 %v5850_v60, %v5846_v14  ;;  %v5852_v16 = vpop.f32.mrb[207].mxu1  ;;  %5491 = vmatprep.mubr.bf16.mxu0 %v14442_v62 }
 0x5b2   : > { %v7614_v39 = vmax.bf16 %v14442_v62, %v7102_v47  ;;  %v6454_v50 = vpack.c.bf16 %v5852_v16, %v5848_v44 }
 0x5b3   : > { %v7615_v27 = vmax.bf16 %v14442_v62, %v7103_v13  ;;  %v7072_v6 = vadd.bf16 %v13336_v56, %v6453_v21  ;;  %v5223_v2 = vpop.f32.mrb[224].mxu0  ;;  %6115 = vmatmul.mubr.bf16.gmra.mrb[56].mxu1 %v14596_v18 }
 0x5b4   : > { %v8284_v55 = vmax.bf16 %v8283_v24, %v7614_v39  ;;  %v7073_v53 = vadd.bf16 %v13339_v26, %v6454_v50  ;;  %v5225_v58 = vpop.f32.mrb[225].mxu0  ;;  %6124 = vmatprep.mubr.bf16.mxu1 %v14442_v62  ;;  %v14601_v24 = vld [vmem:[#allocation37_spill] sm:$0xff] }
 0x5b5   : > { %v8301_v10 = vmax.bf16 %v8300_v30, %v7615_v27  ;;  %v7584_v35 = vmax.bf16 %v14442_v62, %v7072_v6  ;;  %v5227_v25 = vpop.f32.mrb[226].mxu0 }
 0x5b6   : > { %v8285_v19 = vunpack.i.l.bf16 %v8284_v55  ;;  %v8286_v29 = vunpack.i.h.bf16 %v8284_v55  ;;  %v7585_v48 = vmax.bf16 %v14442_v62, %v7073_v53  ;;  %v6491_v8 = vpack.c.bf16 %v5227_v25, %v5223_v2  ;;  %v5229_v36 = vpop.f32.mrb[227].mxu0  ;;  %v5856_v0 = vpop.f32.mrb[208].mxu1  ;;  %v14602_v53 = vld [vmem:[#allocation45_spill] sm:$0xff] }
 0x5b7   : > { %v8302_v38 = vunpack.i.l.bf16 %v8301_v10  ;;  %v8303_v11 = vunpack.i.h.bf16 %v8301_v10  ;;  %v8314_v18 = vmax.bf16 %v13622_v63, %v7584_v35  ;;  %v6492_v15 = vpack.c.bf16 %v5229_v36, %v5225_v58  ;;  %v5858_v41 = vpop.f32.mrb[209].mxu1 }
 0x5b8   : > { %v8287_v49 = vmax.f32 %v8285_v19, %v8286_v29  ;;  %v8331_v33 = vmax.bf16 %v13630_v42, %v7585_v48  ;;  %5492 = vmatmul.mubr.bf16.gmra.mrb[76].mxu0 %v14601_v24  ;;  %v5860_v17 = vpop.f32.mrb[210].mxu1  ;;  %v7110_v42 = vadd.bf16 %v13250_v28, %v6491_v8 }
 0x5b9   : > { %v8304_v59 = vmax.f32 %v8302_v38, %v8303_v11  ;;  %v6461_v5 = vpack.c.bf16 %v5860_v17, %v5856_v0  ;;  %v5862_v22 = vpop.f32.mrb[211].mxu1  ;;  %5501 = vmatprep.mubr.bf16.mxu0 %v14442_v62 }
 0x5ba   : > { %v8288_v30 = vrot.slane %v8287_v49, 4  ;;  %v6462_v43 = vpack.c.bf16 %v5862_v22, %v5858_v41  ;;  %v7622_v48 = vmax.bf16 %v14442_v62, %v7110_v42 }
 0x5bb   : > { %v8305_v45 = vrot.slane %v8304_v59, 4  ;;  %v7080_v23 = vadd.bf16 %v13336_v56, %v6461_v5  ;;  %v5233_v54 = vpop.f32.mrb[228].mxu0  ;;  %6125 = vmatmul.mubr.bf16.gmra.mrb[60].mxu1 %v14597_v34  ;;  %v7111_v34 = vadd.bf16 %v13253_v12, %v6492_v15 }
 0x5bc   : > { %v8289_v40 = vmax.f32 %v8287_v49, %v8288_v30  ;;  %v7081_v7 = vadd.bf16 %v13339_v26, %v6462_v43  ;;  %v5235_v46 = vpop.f32.mrb[229].mxu0  ;;  %6134 = vmatprep.mubr.bf16.mxu1 %v14442_v62 }
 0x5bd   : > { %v8306_v14 = vmax.f32 %v8304_v59, %v8305_v45  ;;  %v7592_v63 = vmax.bf16 %v14442_v62, %v7080_v23  ;;  %v5237_v32 = vpop.f32.mrb[230].mxu0  ;;  %v7623_v38 = vmax.bf16 %v14442_v62, %v7111_v34 }
 0x5be   : > { %v8290_v44 = vrot.slane %v8289_v40, 2  ;;  %v7593_v47 = vmax.bf16 %v14442_v62, %v7081_v7  ;;  %v6499_v60 = vpack.c.bf16 %v5237_v32, %v5233_v54  ;;  %v5239_v13 = vpop.f32.mrb[231].mxu0  ;;  %v5866_v21 = vpop.f32.mrb[212].mxu1 }
 0x5bf   : > { %v8307_v16 = vrot.slane %v8306_v14, 2  ;;  %v13656_v39 = vmax.bf16 %v8314_v18, %v7592_v63  ;;  %v6500_v50 = vpack.c.bf16 %v5239_v13, %v5235_v46  ;;  %v5868_v27 = vpop.f32.mrb[213].mxu1 }
 0x5c0   : > { %v8291_v6 = vmax.f32 %v8289_v40, %v8290_v44  ;;  %v13658_v2 = vmax.bf16 %v8331_v33, %v7593_v47  ;;  %v7118_v55 = vadd.bf16 %v13250_v28, %v6499_v60  ;;  %5502 = vmatmul.mubr.bf16.gmra.mrb[80].mxu0 %v14602_v53  ;;  %v5870_v58 = vpop.f32.mrb[214].mxu1 }
 0x5c1   : > { %v8308_v10 = vmax.f32 %v8306_v14, %v8307_v16  ;;  %v7119_v35 = vadd.bf16 %v13253_v12, %v6500_v50  ;;  %v6469_v25 = vpack.c.bf16 %v5870_v58, %v5866_v21  ;;  %v5872_v19 = vpop.f32.mrb[215].mxu1  ;;  %5511 = vmatprep.mubr.bf16.mxu0 %v14442_v62 }
 0x5c2   : > { %v8292_v29 = vrot.slane %v8291_v6, 1  ;;  %v7630_v8 = vmax.bf16 %v14442_v62, %v7118_v55  ;;  %v6470_v36 = vpack.c.bf16 %v5872_v19, %v5868_v27 }
 0x5c3   : > { %v8309_v0 = vrot.slane %v8308_v10, 1  ;;  %v7631_v11 = vmax.bf16 %v14442_v62, %v7119_v35  ;;  %v7088_v18 = vadd.bf16 %v13336_v56, %v6469_v25  ;;  %v5243_v15 = vpop.f32.mrb[232].mxu0  ;;  %6135 = vmatmul.mubr.bf16.gmra.mrb[64].mxu1 %v14598_v9 }
 0x5c4   : > { %v8293_v41 = vmax.f32 %v8291_v6, %v8292_v29  ;;  %v8414_v49 = vmax.bf16 %v7630_v8, %v7622_v48  ;;  %v7089_v33 = vadd.bf16 %v13339_v26, %v6470_v36  ;;  %v5245_v17 = vpop.f32.mrb[233].mxu0  ;;  %6144 = vmatprep.mubr.bf16.mxu1 %v14442_v62 }
 0x5c5   : > { %v8310_v59 = vmax.f32 %v8308_v10, %v8309_v0  ;;  %v8431_v5 = vmax.bf16 %v7631_v11, %v7623_v38  ;;  %v7600_v22 = vmax.bf16 %v14442_v62, %v7088_v18  ;;  %v5247_v30 = vpop.f32.mrb[234].mxu0 }
 0x5c6   : > { %v8294_v43 = vpack.i.bf16 %v8293_v41, %v8293_v41  ;;  %v7601_v45 = vmax.bf16 %v14442_v62, %v7089_v33  ;;  %v6507_v23 = vpack.c.bf16 %v5247_v30, %v5243_v15  ;;  %v5249_v54 = vpop.f32.mrb[235].mxu0  ;;  %v5876_v40 = vpop.f32.mrb[216].mxu1 }
 0x5c7   : > { %v8311_v7 = vpack.i.bf16 %v8310_v59, %v8310_v59  ;;  %v8316_v9 = vmax.bf16 %v13656_v39, %v7600_v22  ;;  %v6508_v46 = vpack.c.bf16 %v5249_v54, %v5245_v17  ;;  %v5878_v14 = vpop.f32.mrb[217].mxu1 }
 0x5c8   : > { %v8333_v63 = vmax.bf16 %v13658_v2, %v7601_v45  ;;  %v7126_v32 = vadd.bf16 %v13250_v28, %v6507_v23  ;;  %5512 = vmatmul.mubr.bf16.gmra.mrb[84].mxu0 %v12508_v37  ;;  %v5880_v44 = vpop.f32.mrb[218].mxu1 }
 0x5c9   : > { %v9710_v42 = vcombine.low %v8294_v43, %v8311_v7  ;;  %v7127_v47 = vadd.bf16 %v13253_v12, %v6508_v46  ;;  %v6477_v60 = vpack.c.bf16 %v5880_v44, %v5876_v40  ;;  %v5882_v13 = vpop.f32.mrb[219].mxu1  ;;  %5521 = vmatprep.mubr.bf16.mxu0 %v14442_v62 }
 0x5ca   : > { %v7638_v21 = vmax.bf16 %v14442_v62, %v7126_v32  ;;  %v6478_v16 = vpack.c.bf16 %v5882_v13, %v5878_v14 }
 0x5cb   : > { %v9210_v34 = vunpack.c.l.b16 %v9710_v42  ;;  %v9211_v39 = vunpack.c.h.b16 %v9710_v42  ;;  %v7639_v50 = vmax.bf16 %v14442_v62, %v7127_v47  ;;  %v7096_v27 = vadd.bf16 %v13336_v56, %v6477_v60  ;;  %v5253_v6 = vpop.f32.mrb[236].mxu0  ;;  %6145 = vmatmul.mubr.bf16.gmra.mrb[68].mxu1 %v14599_v20  ;;  %v14603_v47 = vld [vmem:[#allocation43_spill] sm:$0xff] }
 0x5cc   : > { %v13684_v2 = vmax.bf16 %v8414_v49, %v7638_v21  ;;  %v7097_v55 = vadd.bf16 %v13339_v26, %v6478_v16  ;;  %v5255_v58 = vpop.f32.mrb[237].mxu0  ;;  %6154 = vmatprep.mubr.bf16.mxu1 %v14442_v62 }
 0x5cd   : > { %v13690_v10 = vsel %vm9256_vm5, %v9210_v34, %v13558_v31  ;;  %v13694_v35 = vsel %vm9256_vm5, %v9211_v39, %v13561_v1  ;;  %v8432_v25 = vmax.bf16 %v8431_v5, %v7639_v50  ;;  %v7608_v19 = vmax.bf16 %v14442_v62, %v7096_v27  ;;  %v5257_v29 = vpop.f32.mrb[238].mxu0 }
 0x5ce   : > { %v7609_v20 = vmax.bf16 %v14442_v62, %v7097_v55  ;;  %v6515_v48 = vpack.c.bf16 %v5257_v29, %v5253_v6  ;;  %v5259_v8 = vpop.f32.mrb[239].mxu0  ;;  %v5886_v36 = vpop.f32.mrb[220].mxu1 }
 0x5cf   : > { %v8317_v0 = vmax.bf16 %v8316_v9, %v7608_v19  ;;  %v6516_v38 = vpack.c.bf16 %v5259_v8, %v5255_v58  ;;  %v5888_v11 = vpop.f32.mrb[221].mxu1 }
 0x5d0   : > { %v8334_v18 = vmax.bf16 %v8333_v63, %v7609_v20  ;;  %v7134_v31 = vadd.bf16 %v13250_v28, %v6515_v48  ;;  %5522 = vmatmul.mubr.bf16.gmra.mrb[88].mxu0 %v12541_v52  ;;  %v5890_v15 = vpop.f32.mrb[222].mxu1 }
 0x5d1   : > { %v7135_v1 = vadd.bf16 %v13253_v12, %v6516_v38  ;;  %v6485_v41 = vpack.c.bf16 %v5890_v15, %v5886_v36  ;;  %v5892_v49 = vpop.f32.mrb[223].mxu1  ;;  %5531 = vmatprep.mubr.bf16.mxu0 %v14442_v62 }
 0x5d2   : > { %v7646_v33 = vmax.bf16 %v14442_v62, %v7134_v31  ;;  %v6486_v17 = vpack.c.bf16 %v5892_v49, %v5888_v11 }
 0x5d3   : > { %v7647_v59 = vmax.bf16 %v14442_v62, %v7135_v1  ;;  %v7104_v5 = vadd.bf16 %v13336_v56, %v6485_v41  ;;  %v5263_v22 = vpop.f32.mrb[240].mxu0  ;;  %6155 = vmatmul.mubr.bf16.gmra.mrb[72].mxu1 %v14600_v4 }
 0x5d4   : > { %v8416_v30 = vmax.bf16 %v13684_v2, %v7646_v33  ;;  %v7105_v43 = vadd.bf16 %v13339_v26, %v6486_v17  ;;  %v5265_v45 = vpop.f32.mrb[241].mxu0  ;;  %6164 = vmatprep.mubr.bf16.mxu1 %v14442_v62 }
 0x5d5   : > { %v8433_v23 = vmax.bf16 %v8432_v25, %v7647_v59  ;;  %v7616_v54 = vmax.bf16 %v14442_v62, %v7104_v5  ;;  %v5267_v40 = vpop.f32.mrb[242].mxu0 }
 0x5d6   : > { %v7617_v7 = vmax.bf16 %v14442_v62, %v7105_v43  ;;  %v6523_v9 = vpack.c.bf16 %v5267_v40, %v5263_v22  ;;  %v5269_v46 = vpop.f32.mrb[243].mxu0  ;;  %v5896_v14 = vpop.f32.mrb[224].mxu1 }
 0x5d7   : > { %v8318_v63 = vmax.bf16 %v8317_v0, %v7616_v54  ;;  %v6524_v32 = vpack.c.bf16 %v5269_v46, %v5265_v45  ;;  %v5898_v44 = vpop.f32.mrb[225].mxu1 }
 0x5d8   : > { %v8335_v4 = vmax.bf16 %v8334_v18, %v7617_v7  ;;  %v7142_v42 = vadd.bf16 %v13250_v28, %v6523_v9  ;;  %5532 = vmatmul.mubr.bf16.gmra.mrb[92].mxu0 %v14603_v47  ;;  %v5900_v60 = vpop.f32.mrb[226].mxu1 }
 0x5d9   : > { %v8319_v13 = vunpack.i.l.bf16 %v8318_v63  ;;  %v8320_v21 = vunpack.i.h.bf16 %v8318_v63  ;;  %v7143_v16 = vadd.bf16 %v13253_v12, %v6524_v32  ;;  %v6493_v34 = vpack.c.bf16 %v5900_v60, %v5896_v14  ;;  %v5902_v39 = vpop.f32.mrb[227].mxu1  ;;  %5541 = vmatprep.mubr.bf16.mxu0 %v14442_v62 }
 0x5da   : > { %v8336_v50 = vunpack.i.l.bf16 %v8335_v4  ;;  %v8337_v27 = vunpack.i.h.bf16 %v8335_v4  ;;  %v7654_v6 = vmax.bf16 %v14442_v62, %v7142_v42  ;;  %v6494_v2 = vpack.c.bf16 %v5902_v39, %v5898_v44 }
 0x5db   : > { %v8321_v55 = vmax.f32 %v8319_v13, %v8320_v21  ;;  %v7655_v58 = vmax.bf16 %v14442_v62, %v7143_v16  ;;  %v5273_v25 = vpop.f32.mrb[244].mxu0  ;;  %6165 = vmatmul.mubr.bf16.gmra.mrb[76].mxu1 %v14601_v24  ;;  %v7112_v17 = vadd.bf16 %v13336_v56, %v6493_v34 }
 0x5dc   : > { %v8338_v19 = vmax.f32 %v8336_v50, %v8337_v27  ;;  %v13718_v29 = vmax.bf16 %v8416_v30, %v7654_v6  ;;  %v5275_v20 = vpop.f32.mrb[245].mxu0  ;;  %6174 = vmatprep.mubr.bf16.mxu1 %v14442_v62  ;;  %v7113_v43 = vadd.bf16 %v13339_v26, %v6494_v2 }
 0x5dd   : > { %v8322_v48 = vrot.slane %v8321_v55, 4  ;;  %v13721_v8 = vmax.bf16 %v8433_v23, %v7655_v58  ;;  %v5277_v36 = vpop.f32.mrb[246].mxu0  ;;  %v7624_v4 = vmax.bf16 %v14442_v62, %v7112_v17 }
 0x5de   : > { %v8339_v0 = vrot.slane %v8338_v19, 4  ;;  %v6531_v38 = vpack.c.bf16 %v5277_v36, %v5273_v25  ;;  %v5279_v11 = vpop.f32.mrb[247].mxu0  ;;  %v5906_v18 = vpop.f32.mrb[228].mxu1  ;;  %v7625_v16 = vmax.bf16 %v14442_v62, %v7113_v43 }
 0x5df   : > { %v8323_v31 = vmax.f32 %v8321_v55, %v8322_v48  ;;  %v6532_v15 = vpack.c.bf16 %v5279_v11, %v5275_v20  ;;  %v5908_v1 = vpop.f32.mrb[229].mxu1 }
 0x5e0   : > { %v8340_v41 = vmax.f32 %v8338_v19, %v8339_v0  ;;  %v7150_v24 = vadd.bf16 %v13250_v28, %v6531_v38  ;;  %5542 = vmatmul.mubr.bf16.gmra.mrb[96].mxu0 %v12582_v3  ;;  %v5910_v49 = vpop.f32.mrb[230].mxu1 }
 0x5e1   : > { %v8324_v33 = vrot.slane %v8323_v31, 2  ;;  %v7151_v59 = vadd.bf16 %v13253_v12, %v6532_v15  ;;  %v6501_v5 = vpack.c.bf16 %v5910_v49, %v5906_v18  ;;  %v5912_v22 = vpop.f32.mrb[231].mxu1  ;;  %5551 = vmatprep.mubr.bf16.mxu0 %v14442_v62 }
 0x5e2   : > { %v8341_v30 = vrot.slane %v8340_v41, 2  ;;  %v7662_v45 = vmax.bf16 %v14442_v62, %v7150_v24  ;;  %v6502_v23 = vpack.c.bf16 %v5912_v22, %v5908_v1 }
 0x5e3   : > { %v8325_v54 = vmax.f32 %v8323_v31, %v8324_v33  ;;  %v7663_v40 = vmax.bf16 %v14442_v62, %v7151_v59  ;;  %v7120_v7 = vadd.bf16 %v13336_v56, %v6501_v5  ;;  %v5283_v9 = vpop.f32.mrb[248].mxu0  ;;  %6175 = vmatmul.mubr.bf16.gmra.mrb[80].mxu1 %v14602_v53 }
 0x5e4   : > { %v8342_v46 = vmax.f32 %v8340_v41, %v8341_v30  ;;  %v8418_v14 = vmax.bf16 %v13718_v29, %v7662_v45  ;;  %v7121_v63 = vadd.bf16 %v13339_v26, %v6502_v23  ;;  %v5285_v32 = vpop.f32.mrb[249].mxu0  ;;  %6184 = vmatprep.mubr.bf16.mxu1 %v14442_v62 }
 0x5e5   : > { %v8326_v44 = vrot.slane %v8325_v54, 1  ;;  %v8435_v42 = vmax.bf16 %v13721_v8, %v7663_v40  ;;  %v7632_v60 = vmax.bf16 %v14442_v62, %v7120_v7  ;;  %v5287_v13 = vpop.f32.mrb[250].mxu0 }
 0x5e6   : > { %v8343_v21 = vrot.slane %v8342_v46, 1  ;;  %v7633_v53 = vmax.bf16 %v14442_v62, %v7121_v63  ;;  %v6539_v34 = vpack.c.bf16 %v5287_v13, %v5283_v9  ;;  %v5289_v39 = vpop.f32.mrb[251].mxu0  ;;  %v5916_v50 = vpop.f32.mrb[232].mxu1  ;;  %v14604_v63 = vld [vmem:[#allocation44_spill] sm:$0xff] }
 0x5e7   : > { %v8327_v27 = vmax.f32 %v8325_v54, %v8326_v44  ;;  %v8448_v6 = vmax.bf16 %v7632_v60, %v7624_v4  ;;  %v6540_v2 = vpack.c.bf16 %v5289_v39, %v5285_v32  ;;  %v5918_v55 = vpop.f32.mrb[233].mxu1 }
 0x5e8   : > { %v8344_v58 = vmax.f32 %v8342_v46, %v8343_v21  ;;  %v8465_v25 = vmax.bf16 %v7633_v53, %v7625_v16  ;;  %v7158_v19 = vadd.bf16 %v13250_v28, %v6539_v34  ;;  %5552 = vmatmul.mubr.bf16.gmra.mrb[100].mxu0 %v12599_v57  ;;  %v5920_v29 = vpop.f32.mrb[234].mxu1 }
 0x5e9   : > { %v8328_v20 = vpack.i.bf16 %v8327_v27, %v8327_v27  ;;  %v7159_v48 = vadd.bf16 %v13253_v12, %v6540_v2  ;;  %v6509_v8 = vpack.c.bf16 %v5920_v29, %v5916_v50  ;;  %v5922_v36 = vpop.f32.mrb[235].mxu1  ;;  %5561 = vmatprep.mubr.bf16.mxu0 %v14442_v62 }
 0x5ea   : > { %v8345_v0 = vpack.i.bf16 %v8344_v58, %v8344_v58  ;;  %v7670_v38 = vmax.bf16 %v14442_v62, %v7158_v19  ;;  %v6510_v11 = vpack.c.bf16 %v5922_v36, %v5918_v55 }
 0x5eb   : > { %v7671_v18 = vmax.bf16 %v14442_v62, %v7159_v48  ;;  %v7128_v31 = vadd.bf16 %v13336_v56, %v6509_v8  ;;  %v5293_v15 = vpop.f32.mrb[252].mxu0  ;;  %6185 = vmatmul.mubr.bf16.gmra.mrb[84].mxu1 %v12508_v37 }
 0x5ec   : > { %v9711_v1 = vcombine.low %v8328_v20, %v8345_v0  ;;  %v8419_v41 = vmax.bf16 %v8418_v14, %v7670_v38  ;;  %v7129_v24 = vadd.bf16 %v13339_v26, %v6510_v11  ;;  %v5295_v49 = vpop.f32.mrb[253].mxu0  ;;  %6194 = vmatprep.mubr.bf16.mxu1 %v14442_v62  ;;  %v14605_v38 = vld [vmem:[#allocation41_spill] sm:$0xff] }
 0x5ed   : > { %v8436_v33 = vmax.bf16 %v8435_v42, %v7671_v18  ;;  %v7640_v17 = vmax.bf16 %v14442_v62, %v7128_v31  ;;  %v5297_v59 = vpop.f32.mrb[254].mxu0 }
 0x5ee   : > { %v9212_v5 = vunpack.c.l.b16 %v9711_v1  ;;  %v9213_v22 = vunpack.c.h.b16 %v9711_v1  ;;  %v7641_v30 = vmax.bf16 %v14442_v62, %v7129_v24  ;;  %v6547_v43 = vpack.c.bf16 %v5297_v59, %v5293_v15  ;;  %v5299_v45 = vpop.f32.mrb[255].mxu0  ;;  %v5926_v23 = vpop.f32.mrb[236].mxu1 }
 0x5ef   : > { %v13753_v54 = vmax.bf16 %v8448_v6, %v7640_v17  ;;  %v6548_v37 = vpack.c.bf16 %v5299_v45, %v5295_v49  ;;  %v5928_v40 = vpop.f32.mrb[237].mxu1 }
 0x5f0   : > { %v13757_v7 = vsel %vm9256_vm5, %v9212_v5, %v13625_v51  ;;  %v13761_v9 = vsel %vm9256_vm5, %v9213_v22, %v13628_v61  ;;  %v13763_v46 = vmax.bf16 %v8465_v25, %v7641_v30  ;;  %v7166_v14 = vadd.bf16 %v13250_v28, %v6547_v43  ;;  %5562 = vmatmul.mubr.bf16.gmra.mrb[104].mxu0 %v14604_v63  ;;  %v5930_v32 = vpop.f32.mrb[238].mxu1 }
 0x5f1   : > { %v7167_v44 = vadd.bf16 %v13253_v12, %v6548_v37  ;;  %v6517_v4 = vpack.c.bf16 %v5930_v32, %v5926_v23  ;;  %v5932_v42 = vpop.f32.mrb[239].mxu1  ;;  %5571 = vmatprep.mubr.bf16.mxu0 %v14442_v62 }
 0x5f2   : > { %v7678_v51 = vmax.bf16 %v14442_v62, %v7166_v14  ;;  %v6518_v60 = vpack.c.bf16 %v5932_v42, %v5928_v40 }
 0x5f3   : > { %v7679_v13 = vmax.bf16 %v14442_v62, %v7167_v44  ;;  %v7136_v61 = vadd.bf16 %v13336_v56, %v6517_v4  ;;  %v5303_v21 = vpop.f32.mrb[0].mxu0  ;;  %6195 = vmatmul.mubr.bf16.gmra.mrb[88].mxu1 %v12541_v52 }
 0x5f4   : > { %v8420_v16 = vmax.bf16 %v8419_v41, %v7678_v51  ;;  %v7137_v53 = vadd.bf16 %v13339_v26, %v6518_v60  ;;  %v5305_v34 = vpop.f32.mrb[1].mxu0  ;;  %6204 = vmatprep.mubr.bf16.mxu1 %v14442_v62 }
 0x5f5   : > { %v8437_v39 = vmax.bf16 %v8436_v33, %v7679_v13  ;;  %v7648_v50 = vmax.bf16 %v14442_v62, %v7136_v61  ;;  %v5307_v27 = vpop.f32.mrb[2].mxu0  ;;  %v14606_v13 = vld [vmem:[#allocation51_spill] sm:$0xff] }
 0x5f6   : > { %v8421_v6 = vunpack.i.l.bf16 %v8420_v16  ;;  %v8422_v2 = vunpack.i.h.bf16 %v8420_v16  ;;  %v7649_v55 = vmax.bf16 %v14442_v62, %v7137_v53  ;;  %v6555_v58 = vpack.c.bf16 %v5307_v27, %v5303_v21  ;;  %v5309_v25 = vpop.f32.mrb[3].mxu0  ;;  %v5936_v19 = vpop.f32.mrb[240].mxu1 }
 0x5f7   : > { %v8438_v29 = vunpack.i.l.bf16 %v8437_v39  ;;  %v8439_v20 = vunpack.i.h.bf16 %v8437_v39  ;;  %v8450_v52 = vmax.bf16 %v13753_v54, %v7648_v50  ;;  %v6556_v48 = vpack.c.bf16 %v5309_v25, %v5305_v34  ;;  %v5938_v8 = vpop.f32.mrb[241].mxu1 }
 0x5f8   : > { %v8423_v36 = vmax.f32 %v8421_v6, %v8422_v2  ;;  %v8467_v0 = vmax.bf16 %v13763_v46, %v7649_v55  ;;  %5572 = vmatmul.mubr.bf16.gmra.mrb[108].mxu0 %v14605_v38  ;;  %v5940_v11 = vpop.f32.mrb[242].mxu1  ;;  %v7174_v23 = vadd.bf16 %v13250_v28, %v6555_v58 }
 0x5f9   : > { %v8440_v18 = vmax.f32 %v8438_v29, %v8439_v20  ;;  %v6525_v31 = vpack.c.bf16 %v5940_v11, %v5936_v19  ;;  %v5942_v15 = vpop.f32.mrb[243].mxu1  ;;  %5581 = vmatprep.mubr.bf16.mxu0 %v14442_v62 }
 0x5fa   : > { %v8424_v1 = vrot.slane %v8423_v36, 4  ;;  %v6526_v41 = vpack.c.bf16 %v5942_v15, %v5938_v8  ;;  %v7686_v50 = vmax.bf16 %v14442_v62, %v7174_v23 }
 0x5fb   : > { %v8441_v24 = vrot.slane %v8440_v18, 4  ;;  %v7144_v49 = vadd.bf16 %v13336_v56, %v6525_v31  ;;  %v5313_v33 = vpop.f32.mrb[4].mxu0  ;;  %6205 = vmatmul.mubr.bf16.gmra.mrb[92].mxu1 %v14603_v47  ;;  %v7175_v47 = vadd.bf16 %v13253_v12, %v6556_v48 }
 0x5fc   : > { %v8425_v17 = vmax.f32 %v8423_v36, %v8424_v1  ;;  %v7145_v59 = vadd.bf16 %v13339_v26, %v6526_v41  ;;  %v5315_v5 = vpop.f32.mrb[5].mxu0  ;;  %6214 = vmatprep.mubr.bf16.mxu1 %v14442_v62 }
 0x5fd   : > { %v8442_v22 = vmax.f32 %v8440_v18, %v8441_v24  ;;  %v7656_v30 = vmax.bf16 %v14442_v62, %v7144_v49  ;;  %v5317_v43 = vpop.f32.mrb[6].mxu0  ;;  %v7687_v55 = vmax.bf16 %v14442_v62, %v7175_v47 }
 0x5fe   : > { %v8426_v45 = vrot.slane %v8425_v17, 2  ;;  %v7657_v54 = vmax.bf16 %v14442_v62, %v7145_v59  ;;  %v6563_v37 = vpack.c.bf16 %v5317_v43, %v5313_v33  ;;  %v5319_v40 = vpop.f32.mrb[7].mxu0  ;;  %v5946_v46 = vpop.f32.mrb[244].mxu1 }
 0x5ff   : > { %v8443_v14 = vrot.slane %v8442_v22, 2  ;;  %v13789_v32 = vmax.bf16 %v8450_v52, %v7656_v30  ;;  %v6564_v44 = vpack.c.bf16 %v5319_v40, %v5315_v5  ;;  %v5948_v4 = vpop.f32.mrb[245].mxu1  ;;  %v14607_v5 = vld [vmem:[#allocation49_spill] sm:$0xff] }
 0x600   : > { %v8427_v42 = vmax.f32 %v8425_v17, %v8426_v45  ;;  %v13791_v51 = vmax.bf16 %v8467_v0, %v7657_v54  ;;  %v7182_v60 = vadd.bf16 %v13250_v28, %v6563_v37  ;;  %5582 = vmatmul.mubr.bf16.gmra.mrb[112].mxu0 %v14606_v13  ;;  %v5950_v61 = vpop.f32.mrb[246].mxu1 }
 0x601   : > { %v8444_v21 = vmax.f32 %v8442_v22, %v8443_v14  ;;  %v7183_v16 = vadd.bf16 %v13253_v12, %v6564_v44  ;;  %v6533_v53 = vpack.c.bf16 %v5950_v61, %v5946_v46  ;;  %v5952_v34 = vpop.f32.mrb[247].mxu1  ;;  %5591 = vmatprep.mubr.bf16.mxu0 %v14442_v62 }
 0x602   : > { %v8428_v39 = vrot.slane %v8427_v42, 1  ;;  %v7694_v27 = vmax.bf16 %v14442_v62, %v7182_v60  ;;  %v6534_v6 = vpack.c.bf16 %v5952_v34, %v5948_v4 }
 0x603   : > { %v8445_v2 = vrot.slane %v8444_v21, 1  ;;  %v7695_v58 = vmax.bf16 %v14442_v62, %v7183_v16  ;;  %v7152_v25 = vadd.bf16 %v13336_v56, %v6533_v53  ;;  %v5323_v19 = vpop.f32.mrb[8].mxu0  ;;  %6215 = vmatmul.mubr.bf16.gmra.mrb[96].mxu1 %v12582_v3 }
 0x604   : > { %v8429_v29 = vmax.f32 %v8427_v42, %v8428_v39  ;;  %v8550_v20 = vmax.bf16 %v7694_v27, %v7686_v50  ;;  %v7153_v52 = vadd.bf16 %v13339_v26, %v6534_v6  ;;  %v5325_v48 = vpop.f32.mrb[9].mxu0  ;;  %6224 = vmatprep.mubr.bf16.mxu1 %v14442_v62 }
 0x605   : > { %v8446_v8 = vmax.f32 %v8444_v21, %v8445_v2  ;;  %v8567_v36 = vmax.bf16 %v7695_v58, %v7687_v55  ;;  %v7664_v0 = vmax.bf16 %v14442_v62, %v7152_v25  ;;  %v5327_v11 = vpop.f32.mrb[10].mxu0  ;;  %v14608_v55 = vld [vmem:[#allocation50_spill] sm:$0xff] }
 0x606   : > { %v8430_v18 = vpack.i.bf16 %v8429_v29, %v8429_v29  ;;  %v7665_v31 = vmax.bf16 %v14442_v62, %v7153_v52  ;;  %v6571_v15 = vpack.c.bf16 %v5327_v11, %v5323_v19  ;;  %v5329_v1 = vpop.f32.mrb[11].mxu0  ;;  %v5956_v41 = vpop.f32.mrb[248].mxu1 }
 0x607   : > { %v8447_v24 = vpack.i.bf16 %v8446_v8, %v8446_v8  ;;  %v8452_v3 = vmax.bf16 %v13789_v32, %v7664_v0  ;;  %v6572_v49 = vpack.c.bf16 %v5329_v1, %v5325_v48  ;;  %v5958_v33 = vpop.f32.mrb[249].mxu1 }
 0x608   : > { %v8469_v17 = vmax.bf16 %v13791_v51, %v7665_v31  ;;  %v7190_v59 = vadd.bf16 %v13250_v28, %v6571_v15  ;;  %5592 = vmatmul.mubr.bf16.gmra.mrb[116].mxu0 %v14607_v5  ;;  %v5960_v22 = vpop.f32.mrb[250].mxu1 }
 0x609   : > { %v9714_v30 = vcombine.low %v8430_v18, %v8447_v24  ;;  %v7191_v43 = vadd.bf16 %v13253_v12, %v6572_v49  ;;  %v6541_v45 = vpack.c.bf16 %v5960_v22, %v5956_v41  ;;  %v5962_v23 = vpop.f32.mrb[251].mxu1  ;;  %5601 = vmatprep.mubr.bf16.mxu0 %v14442_v62  ;;  %v14609_v22 = vld [vmem:[#allocation46_spill] sm:$0xff] }
 0x60a   : > { %v7702_v54 = vmax.bf16 %v14442_v62, %v7190_v59  ;;  %v6542_v37 = vpack.c.bf16 %v5962_v23, %v5958_v33 }
 0x60b   : > { %v9218_v40 = vunpack.c.l.b16 %v9714_v30  ;;  %v9219_v46 = vunpack.c.h.b16 %v9714_v30  ;;  %v7703_v14 = vmax.bf16 %v14442_v62, %v7191_v43  ;;  %v7160_v47 = vadd.bf16 %v13336_v56, %v6541_v45  ;;  %v5333_v32 = vpop.f32.mrb[12].mxu0  ;;  %6225 = vmatmul.mubr.bf16.gmra.mrb[100].mxu1 %v12599_v57 }
 0x60c   : > { %v13817_v44 = vmax.bf16 %v8550_v20, %v7702_v54  ;;  %v7161_v4 = vadd.bf16 %v13339_v26, %v6542_v37  ;;  %v5335_v42 = vpop.f32.mrb[13].mxu0  ;;  %6234 = vmatprep.mubr.bf16.mxu1 %v14442_v62 }
 0x60d   : > { %v13823_v51 = vsel %vm9258_vm6, %v9218_v40, %v13690_v10  ;;  %v13827_v60 = vsel %vm9258_vm6, %v9219_v46, %v13694_v35  ;;  %v8568_v61 = vmax.bf16 %v8567_v36, %v7703_v14  ;;  %v7672_v21 = vmax.bf16 %v14442_v62, %v7160_v47  ;;  %v5337_v16 = vpop.f32.mrb[14].mxu0 }
 0x60e   : > { %v7673_v57 = vmax.bf16 %v14442_v62, %v7161_v4  ;;  %v6579_v53 = vpack.c.bf16 %v5337_v16, %v5333_v32  ;;  %v5339_v34 = vpop.f32.mrb[15].mxu0  ;;  %v5966_v39 = vpop.f32.mrb[252].mxu1 }
 0x60f   : > { %v8453_v50 = vmax.bf16 %v8452_v3, %v7672_v21  ;;  %v6580_v27 = vpack.c.bf16 %v5339_v34, %v5335_v42  ;;  %v5968_v6 = vpop.f32.mrb[253].mxu1 }
 0x610   : > { %v8470_v2 = vmax.bf16 %v8469_v17, %v7673_v57  ;;  %v7198_v10 = vadd.bf16 %v13250_v28, %v6579_v53  ;;  %5602 = vmatmul.mubr.bf16.gmra.mrb[120].mxu0 %v14608_v55  ;;  %v5970_v58 = vpop.f32.mrb[254].mxu1 }
 0x611   : > { %v7199_v35 = vadd.bf16 %v13253_v12, %v6580_v27  ;;  %v6549_v25 = vpack.c.bf16 %v5970_v58, %v5966_v39  ;;  %v5972_v19 = vpop.f32.mrb[255].mxu1  ;;  %5611 = vmatprep.mubr.bf16.mxu0 %v14442_v62 }
 0x612   : > { %v7710_v29 = vmax.bf16 %v14442_v62, %v7198_v10  ;;  %v6550_v20 = vpack.c.bf16 %v5972_v19, %v5968_v6 }
 0x613   : > { %v7711_v52 = vmax.bf16 %v14442_v62, %v7199_v35  ;;  %v7168_v48 = vadd.bf16 %v13336_v56, %v6549_v25  ;;  %v5343_v8 = vpop.f32.mrb[16].mxu0  ;;  %6235 = vmatmul.mubr.bf16.gmra.mrb[104].mxu1 %v14604_v63 }
 0x614   : > { %v8552_v36 = vmax.bf16 %v13817_v44, %v7710_v29  ;;  %v7169_v0 = vadd.bf16 %v13339_v26, %v6550_v20  ;;  %v5345_v11 = vpop.f32.mrb[17].mxu0  ;;  %6244 = vmatprep.mubr.bf16.mxu1 %v14442_v62 }
 0x615   : > { %v8569_v18 = vmax.bf16 %v8568_v61, %v7711_v52  ;;  %v7680_v31 = vmax.bf16 %v14442_v62, %v7168_v48  ;;  %v5347_v15 = vpop.f32.mrb[18].mxu0 }
 0x616   : > { %v7681_v1 = vmax.bf16 %v14442_v62, %v7169_v0  ;;  %v6587_v41 = vpack.c.bf16 %v5347_v15, %v5343_v8  ;;  %v5349_v24 = vpop.f32.mrb[19].mxu0  ;;  %v5976_v3 = vpop.f32.mrb[0].mxu1 }
 0x617   : > { %v8454_v49 = vmax.bf16 %v8453_v50, %v7680_v31  ;;  %v6588_v33 = vpack.c.bf16 %v5349_v24, %v5345_v11  ;;  %v5978_v17 = vpop.f32.mrb[1].mxu1 }
 0x618   : > { %v8471_v63 = vmax.bf16 %v8470_v2, %v7681_v1  ;;  %v7206_v59 = vadd.bf16 %v13250_v28, %v6587_v41  ;;  %5612 = vmatmul.mubr.bf16.gmra.mrb[124].mxu0 %v14609_v22  ;;  %v5980_v30 = vpop.f32.mrb[2].mxu1 }
 0x619   : > { %v8455_v43 = vunpack.i.l.bf16 %v8454_v49  ;;  %v8456_v45 = vunpack.i.h.bf16 %v8454_v49  ;;  %v7207_v23 = vadd.bf16 %v13253_v12, %v6588_v33  ;;  %v6557_v54 = vpack.c.bf16 %v5980_v30, %v5976_v3  ;;  %v5982_v37 = vpop.f32.mrb[3].mxu1 }
 0x61a   : > { %v8472_v40 = vunpack.i.l.bf16 %v8471_v63  ;;  %v8473_v46 = vunpack.i.h.bf16 %v8471_v63  ;;  %v7718_v14 = vmax.bf16 %v14442_v62, %v7206_v59  ;;  %v6558_v47 = vpack.c.bf16 %v5982_v37, %v5978_v17 }
 0x61b   : > { %v8457_v32 = vmax.f32 %v8455_v43, %v8456_v45  ;;  %v7719_v44 = vmax.bf16 %v14442_v62, %v7207_v23  ;;  %v5353_v4 = vpop.f32.mrb[20].mxu0  ;;  %6245 = vmatmul.mubr.bf16.gmra.mrb[108].mxu1 %v14605_v38  ;;  %v7176_v19 = vadd.bf16 %v13336_v56, %v6557_v54 }
 0x61c   : > { %v8474_v42 = vmax.f32 %v8472_v40, %v8473_v46  ;;  %v13850_v61 = vmax.bf16 %v8552_v36, %v7718_v14  ;;  %v5355_v21 = vpop.f32.mrb[21].mxu0  ;;  %6254 = vmatprep.mubr.bf16.mxu1 %v14442_v62  ;;  %v7177_v8 = vadd.bf16 %v13339_v26, %v6558_v47 }
 0x61d   : > { %v8458_v16 = vrot.slane %v8457_v32, 4  ;;  %v13853_v57 = vmax.bf16 %v8569_v18, %v7719_v44  ;;  %v5357_v53 = vpop.f32.mrb[22].mxu0  ;;  %v7688_v33 = vmax.bf16 %v14442_v62, %v7176_v19 }
 0x61e   : > { %v8475_v34 = vrot.slane %v8474_v42, 4  ;;  %v6595_v39 = vpack.c.bf16 %v5357_v53, %v5353_v4  ;;  %v5359_v50 = vpop.f32.mrb[23].mxu0  ;;  %v5986_v27 = vpop.f32.mrb[4].mxu1  ;;  %v7689_v43 = vmax.bf16 %v14442_v62, %v7177_v8 }
 0x61f   : > { %v8459_v6 = vmax.f32 %v8457_v32, %v8458_v16  ;;  %v6596_v2 = vpack.c.bf16 %v5359_v50, %v5355_v21  ;;  %v5988_v10 = vpop.f32.mrb[5].mxu1 }
 0x620   : > { %v8476_v58 = vmax.f32 %v8474_v42, %v8475_v34  ;;  %v7214_v38 = vadd.bf16 %v13250_v28, %v6595_v39  ;;  %v5990_v35 = vpop.f32.mrb[6].mxu1 }
 0x621   : > { %v8460_v25 = vrot.slane %v8459_v6, 2  ;;  %v7215_v29 = vadd.bf16 %v13253_v12, %v6596_v2  ;;  %v6565_v20 = vpack.c.bf16 %v5990_v35, %v5986_v27  ;;  %v5992_v52 = vpop.f32.mrb[7].mxu1 }
 0x622   : > { %v8477_v48 = vrot.slane %v8476_v58, 2  ;;  %v7726_v36 = vmax.bf16 %v14442_v62, %v7214_v38  ;;  %v6566_v0 = vpack.c.bf16 %v5992_v52, %v5988_v10 }
 0x623   : > { %v8461_v11 = vmax.f32 %v8459_v6, %v8460_v25  ;;  %v7727_v18 = vmax.bf16 %v14442_v62, %v7215_v29  ;;  %v7184_v31 = vadd.bf16 %v13336_v56, %v6565_v20  ;;  %v5363_v15 = vpop.f32.mrb[24].mxu0  ;;  %6255 = vmatmul.mubr.bf16.gmra.mrb[112].mxu1 %v14606_v13 }
 0x624   : > { %v8478_v1 = vmax.f32 %v8476_v58, %v8477_v48  ;;  %v8554_v41 = vmax.bf16 %v13850_v61, %v7726_v36  ;;  %v7185_v24 = vadd.bf16 %v13339_v26, %v6566_v0  ;;  %v5365_v3 = vpop.f32.mrb[25].mxu0  ;;  %6264 = vmatprep.mubr.bf16.mxu1 %v14442_v62 }
 0x625   : > { %v8462_v49 = vrot.slane %v8461_v11, 1  ;;  %v8571_v17 = vmax.bf16 %v13853_v57, %v7727_v18  ;;  %v7696_v63 = vmax.bf16 %v14442_v62, %v7184_v31  ;;  %v5367_v59 = vpop.f32.mrb[26].mxu0 }
 0x626   : > { %v8479_v30 = vrot.slane %v8478_v1, 1  ;;  %v7697_v13 = vmax.bf16 %v14442_v62, %v7185_v24  ;;  %v6603_v45 = vpack.c.bf16 %v5367_v59, %v5363_v15  ;;  %v5369_v23 = vpop.f32.mrb[27].mxu0  ;;  %v5996_v54 = vpop.f32.mrb[8].mxu1 }
 0x627   : > { %v8463_v37 = vmax.f32 %v8461_v11, %v8462_v49  ;;  %v8584_v40 = vmax.bf16 %v7696_v63, %v7688_v33  ;;  %v6604_v46 = vpack.c.bf16 %v5369_v23, %v5365_v3  ;;  %v5998_v14 = vpop.f32.mrb[9].mxu1 }
 0x628   : > { %v8480_v47 = vmax.f32 %v8478_v1, %v8479_v30  ;;  %v8601_v32 = vmax.bf16 %v7697_v13, %v7689_v43  ;;  %v7222_v44 = vadd.bf16 %v13250_v28, %v6603_v45  ;;  %v6000_v4 = vpop.f32.mrb[10].mxu1 }
 0x629   : > { %v8464_v42 = vpack.i.bf16 %v8463_v37, %v8463_v37  ;;  %v7223_v61 = vadd.bf16 %v13253_v12, %v6604_v46  ;;  %v6573_v21 = vpack.c.bf16 %v6000_v4, %v5996_v54  ;;  %v6002_v16 = vpop.f32.mrb[11].mxu1 }
 0x62a   : > { %v8481_v57 = vpack.i.bf16 %v8480_v47, %v8480_v47  ;;  %v7734_v53 = vmax.bf16 %v14442_v62, %v7222_v44  ;;  %v6574_v34 = vpack.c.bf16 %v6002_v16, %v5998_v14 }
 0x62b   : > { %v7735_v39 = vmax.bf16 %v14442_v62, %v7223_v61  ;;  %v7192_v50 = vadd.bf16 %v13336_v56, %v6573_v21  ;;  %v5373_v27 = vpop.f32.mrb[28].mxu0  ;;  %6265 = vmatmul.mubr.bf16.gmra.mrb[116].mxu1 %v14607_v5 }
 0x62c   : > { %v9715_v6 = vcombine.low %v8464_v42, %v8481_v57  ;;  %v8555_v2 = vmax.bf16 %v8554_v41, %v7734_v53  ;;  %v7193_v10 = vadd.bf16 %v13339_v26, %v6574_v34  ;;  %v5375_v58 = vpop.f32.mrb[29].mxu0  ;;  %6274 = vmatprep.mubr.bf16.mxu1 %v14442_v62 }
 0x62d   : > { %v8572_v38 = vmax.bf16 %v8571_v17, %v7735_v39  ;;  %v7704_v35 = vmax.bf16 %v14442_v62, %v7192_v50  ;;  %v5377_v25 = vpop.f32.mrb[30].mxu0 }
 0x62e   : > { %v9220_v19 = vunpack.c.l.b16 %v9715_v6  ;;  %v9221_v29 = vunpack.c.h.b16 %v9715_v6  ;;  %v7705_v20 = vmax.bf16 %v14442_v62, %v7193_v10  ;;  %v6611_v52 = vpack.c.bf16 %v5377_v25, %v5373_v27  ;;  %v5379_v48 = vpop.f32.mrb[31].mxu0  ;;  %v6006_v8 = vpop.f32.mrb[12].mxu1 }
 0x62f   : > { %v8585_v36 = vmax.bf16 %v8584_v40, %v7704_v35  ;;  %v6612_v5 = vpack.c.bf16 %v5379_v48, %v5375_v58  ;;  %v6008_v0 = vpop.f32.mrb[13].mxu1 }
 0x630   : > { %v13883_v11 = vsel %vm9258_vm6, %v9220_v19, %v13757_v7  ;;  %v13887_v18 = vsel %vm9258_vm6, %v9221_v29, %v13761_v9  ;;  %v8602_v31 = vmax.bf16 %v8601_v32, %v7705_v20  ;;  %v7230_v15 = vadd.bf16 %v13250_v28, %v6611_v52  ;;  %v6010_v1 = vpop.f32.mrb[14].mxu1 }
 0x631   : > { %v7231_v41 = vadd.bf16 %v13253_v12, %v6612_v5  ;;  %v6581_v24 = vpack.c.bf16 %v6010_v1, %v6006_v8  ;;  %v6012_v3 = vpop.f32.mrb[15].mxu1 }
 0x632   : > { %v7742_v49 = vmax.bf16 %v14442_v62, %v7230_v15  ;;  %v6582_v33 = vpack.c.bf16 %v6012_v3, %v6008_v0 }
 0x633   : > { %v7743_v17 = vmax.bf16 %v14442_v62, %v7231_v41  ;;  %v7200_v7 = vadd.bf16 %v13336_v56, %v6581_v24  ;;  %v5383_v63 = vpop.f32.mrb[32].mxu0  ;;  %6275 = vmatmul.mubr.bf16.gmra.mrb[120].mxu1 %v14608_v55 }
 0x634   : > { %v8556_v9 = vmax.bf16 %v8555_v2, %v7742_v49  ;;  %v7201_v59 = vadd.bf16 %v13339_v26, %v6582_v33  ;;  %v5385_v30 = vpop.f32.mrb[33].mxu0  ;;  %6284 = vmatprep.mubr.bf16.mxu1 %v14442_v62 }
 0x635   : > { %v8573_v43 = vmax.bf16 %v8572_v38, %v7743_v17  ;;  %v7712_v13 = vmax.bf16 %v14442_v62, %v7200_v7  ;;  %v5387_v45 = vpop.f32.mrb[34].mxu0 }
 0x636   : > { %v8557_v23 = vunpack.i.l.bf16 %v8556_v9  ;;  %v8558_v54 = vunpack.i.h.bf16 %v8556_v9  ;;  %v7713_v37 = vmax.bf16 %v14442_v62, %v7201_v59  ;;  %v6619_v40 = vpack.c.bf16 %v5387_v45, %v5383_v63  ;;  %v5389_v46 = vpop.f32.mrb[35].mxu0  ;;  %v6016_v14 = vpop.f32.mrb[16].mxu1 }
 0x637   : > { %v8574_v47 = vunpack.i.l.bf16 %v8573_v43  ;;  %v8575_v32 = vunpack.i.h.bf16 %v8573_v43  ;;  %v8586_v55 = vmax.bf16 %v8585_v36, %v7712_v13  ;;  %v6620_v44 = vpack.c.bf16 %v5389_v46, %v5385_v30  ;;  %v6018_v4 = vpop.f32.mrb[17].mxu1 }
 0x638   : > { %v8559_v42 = vmax.f32 %v8557_v23, %v8558_v54  ;;  %v8603_v61 = vmax.bf16 %v8602_v31, %v7713_v37  ;;  %v6020_v21 = vpop.f32.mrb[18].mxu1  ;;  %v7238_v29 = vadd.bf16 %v13250_v28, %v6619_v40 }
 0x639   : > { %v8576_v16 = vmax.f32 %v8574_v47, %v8575_v32  ;;  %v6589_v57 = vpack.c.bf16 %v6020_v21, %v6016_v14  ;;  %v6022_v53 = vpop.f32.mrb[19].mxu1  ;;  %v7239_v5 = vadd.bf16 %v13253_v12, %v6620_v44 }
 0x63a   : > { %v8560_v34 = vrot.slane %v8559_v42, 4  ;;  %v6590_v39 = vpack.c.bf16 %v6022_v53, %v6018_v4  ;;  %v7750_v63 = vmax.bf16 %v14442_v62, %v7238_v29 }
 0x63b   : > { %v8577_v50 = vrot.slane %v8576_v16, 4  ;;  %v7208_v27 = vadd.bf16 %v13336_v56, %v6589_v57  ;;  %v5393_v6 = vpop.f32.mrb[36].mxu0  ;;  %6285 = vmatmul.mubr.bf16.gmra.mrb[124].mxu1 %v14609_v22  ;;  %v7751_v43 = vmax.bf16 %v14442_v62, %v7239_v5 }
 0x63c   : > { %v8561_v2 = vmax.f32 %v8559_v42, %v8560_v34  ;;  %v7209_v10 = vadd.bf16 %v13339_v26, %v6590_v39  ;;  %v5395_v58 = vpop.f32.mrb[37].mxu0 }
 0x63d   : > { %v8578_v38 = vmax.f32 %v8576_v16, %v8577_v50  ;;  %v7720_v35 = vmax.bf16 %v14442_v62, %v7208_v27  ;;  %v5397_v25 = vpop.f32.mrb[38].mxu0 }
 0x63e   : > { %v8562_v19 = vrot.slane %v8561_v2, 2  ;;  %v7721_v20 = vmax.bf16 %v14442_v62, %v7209_v10  ;;  %v6627_v52 = vpack.c.bf16 %v5397_v25, %v5393_v6  ;;  %v5399_v48 = vpop.f32.mrb[39].mxu0  ;;  %v6026_v8 = vpop.f32.mrb[20].mxu1 }
 0x63f   : > { %v8579_v36 = vrot.slane %v8578_v38, 2  ;;  %v13906_v22 = vmax.bf16 %v8586_v55, %v7720_v35  ;;  %v6628_v0 = vpack.c.bf16 %v5399_v48, %v5395_v58  ;;  %v6028_v31 = vpop.f32.mrb[21].mxu1 }
 0x640   : > { %v8563_v15 = vmax.f32 %v8561_v2, %v8562_v19  ;;  %v13908_v1 = vmax.bf16 %v8603_v61, %v7721_v20  ;;  %v7246_v41 = vadd.bf16 %v13250_v28, %v6627_v52  ;;  %v6030_v24 = vpop.f32.mrb[22].mxu1 }
 0x641   : > { %v8580_v3 = vmax.f32 %v8578_v38, %v8579_v36  ;;  %v7247_v49 = vadd.bf16 %v13253_v12, %v6628_v0  ;;  %v6597_v33 = vpack.c.bf16 %v6030_v24, %v6026_v8  ;;  %v6032_v17 = vpop.f32.mrb[23].mxu1 }
 0x642   : > { %v8564_v7 = vrot.slane %v8563_v15, 1  ;;  %v7758_v9 = vmax.bf16 %v14442_v62, %v7246_v41  ;;  %v6598_v59 = vpack.c.bf16 %v6032_v17, %v6028_v31 }
 0x643   : > { %v8581_v30 = vrot.slane %v8580_v3, 1  ;;  %v7759_v13 = vmax.bf16 %v14442_v62, %v7247_v49  ;;  %v7216_v45 = vadd.bf16 %v13336_v56, %v6597_v33  ;;  %v5403_v23 = vpop.f32.mrb[40].mxu0 }
 0x644   : > { %v8565_v54 = vmax.f32 %v8563_v15, %v8564_v7  ;;  %v8686_v37 = vmax.bf16 %v7758_v9, %v7750_v63  ;;  %v7217_v40 = vadd.bf16 %v13339_v26, %v6598_v59  ;;  %v5405_v46 = vpop.f32.mrb[41].mxu0 }
 0x645   : > { %v8582_v14 = vmax.f32 %v8580_v3, %v8581_v30  ;;  %v8703_v47 = vmax.bf16 %v7759_v13, %v7751_v43  ;;  %v7728_v32 = vmax.bf16 %v14442_v62, %v7216_v45  ;;  %v5407_v55 = vpop.f32.mrb[42].mxu0 }
 0x646   : > { %v8566_v44 = vpack.i.bf16 %v8565_v54, %v8565_v54  ;;  %v7729_v4 = vmax.bf16 %v14442_v62, %v7217_v40  ;;  %v6635_v42 = vpack.c.bf16 %v5407_v55, %v5403_v23  ;;  %v5409_v61 = vpop.f32.mrb[43].mxu0  ;;  %v6036_v21 = vpop.f32.mrb[24].mxu1 }
 0x647   : > { %v8583_v16 = vpack.i.bf16 %v8582_v14, %v8582_v14  ;;  %v8588_v57 = vmax.bf16 %v13906_v22, %v7728_v32  ;;  %v6636_v53 = vpack.c.bf16 %v5409_v61, %v5405_v46  ;;  %v6038_v34 = vpop.f32.mrb[25].mxu1 }
 0x648   : > { %v8605_v39 = vmax.bf16 %v13908_v1, %v7729_v4  ;;  %v7254_v50 = vadd.bf16 %v13250_v28, %v6635_v42  ;;  %v6040_v27 = vpop.f32.mrb[26].mxu1 }
 0x649   : > { %v9718_v6 = vcombine.low %v8566_v44, %v8583_v16  ;;  %v7255_v2 = vadd.bf16 %v13253_v12, %v6636_v53  ;;  %v6605_v10 = vpack.c.bf16 %v6040_v27, %v6036_v21  ;;  %v6042_v58 = vpop.f32.mrb[27].mxu1 }
 0x64a   : > { %v7766_v38 = vmax.bf16 %v14442_v62, %v7254_v50  ;;  %v6606_v35 = vpack.c.bf16 %v6042_v58, %v6038_v34 }
 0x64b   : > { %v9226_v25 = vunpack.c.l.b16 %v9718_v6  ;;  %v9227_v19 = vunpack.c.h.b16 %v9718_v6  ;;  %v7767_v29 = vmax.bf16 %v14442_v62, %v7255_v2  ;;  %v7224_v20 = vadd.bf16 %v13336_v56, %v6605_v10  ;;  %v5413_v52 = vpop.f32.mrb[44].mxu0 }
 0x64c   : > { %v8687_v48 = vmax.bf16 %v8686_v37, %v7766_v38  ;;  %v7225_v8 = vadd.bf16 %v13339_v26, %v6606_v35  ;;  %v5415_v36 = vpop.f32.mrb[45].mxu0 }
 0x64d   : > { %v8704_v5 = vmax.bf16 %v8703_v47, %v7767_v29  ;;  %v7736_v22 = vmax.bf16 %v14442_v62, %v7224_v20  ;;  %v5417_v0 = vpop.f32.mrb[46].mxu0  ;;  %v13931_v31 = vsel %vm9260_vm7, %v9226_v25, %v13823_v51  ;;  %v13935_v15 = vsel %vm9260_vm7, %v9227_v19, %v13827_v60 }
 0x64e   : > { %v7737_v1 = vmax.bf16 %v14442_v62, %v7225_v8  ;;  %v6643_v41 = vpack.c.bf16 %v5417_v0, %v5413_v52  ;;  %v5419_v24 = vpop.f32.mrb[47].mxu0  ;;  %v6046_v3 = vpop.f32.mrb[28].mxu1 }
 0x64f   : > { %v8589_v49 = vmax.bf16 %v8588_v57, %v7736_v22  ;;  %v6644_v33 = vpack.c.bf16 %v5419_v24, %v5415_v36  ;;  %v6048_v17 = vpop.f32.mrb[29].mxu1 }
 0x650   : > { %v8606_v7 = vmax.bf16 %v8605_v39, %v7737_v1  ;;  %v7262_v63 = vadd.bf16 %v13250_v28, %v6643_v41  ;;  %v6050_v9 = vpop.f32.mrb[30].mxu1 }
 0x651   : > { %v7263_v59 = vadd.bf16 %v13253_v12, %v6644_v33  ;;  %v6613_v51 = vpack.c.bf16 %v6050_v9, %v6046_v3  ;;  %v6052_v30 = vpop.f32.mrb[31].mxu1 }
 0x652   : > { %v7774_v43 = vmax.bf16 %v14442_v62, %v7262_v63  ;;  %v6614_v60 = vpack.c.bf16 %v6052_v30, %v6048_v17 }
 0x653   : > { %v7775_v13 = vmax.bf16 %v14442_v62, %v7263_v59  ;;  %v7232_v45 = vadd.bf16 %v13336_v56, %v6613_v51  ;;  %v5423_v23 = vpop.f32.mrb[48].mxu0 }
 0x654   : > { %v8688_v54 = vmax.bf16 %v8687_v48, %v7774_v43  ;;  %v7233_v37 = vadd.bf16 %v13339_v26, %v6614_v60  ;;  %v5425_v40 = vpop.f32.mrb[49].mxu0 }
 0x655   : > { %v8705_v46 = vmax.bf16 %v8704_v5, %v7775_v13  ;;  %v7744_v14 = vmax.bf16 %v14442_v62, %v7232_v45  ;;  %v5427_v47 = vpop.f32.mrb[50].mxu0 }
 0x656   : > { %v7745_v32 = vmax.bf16 %v14442_v62, %v7233_v37  ;;  %v6651_v55 = vpack.c.bf16 %v5427_v47, %v5423_v23  ;;  %v5429_v44 = vpop.f32.mrb[51].mxu0  ;;  %v6056_v4 = vpop.f32.mrb[32].mxu1 }
 0x657   : > { %v8590_v42 = vmax.bf16 %v8589_v49, %v7744_v14  ;;  %v6652_v61 = vpack.c.bf16 %v5429_v44, %v5425_v40  ;;  %v6058_v21 = vpop.f32.mrb[33].mxu1 }
 0x658   : > { %v8607_v16 = vmax.bf16 %v8606_v7, %v7745_v32  ;;  %v7270_v57 = vadd.bf16 %v13250_v28, %v6651_v55  ;;  %v6060_v53 = vpop.f32.mrb[34].mxu1 }
 0x659   : > { %v8591_v34 = vunpack.i.l.bf16 %v8590_v42  ;;  %v8592_v39 = vunpack.i.h.bf16 %v8590_v42  ;;  %v7271_v50 = vadd.bf16 %v13253_v12, %v6652_v61  ;;  %v6621_v27 = vpack.c.bf16 %v6060_v53, %v6056_v4  ;;  %v6062_v6 = vpop.f32.mrb[35].mxu1 }
 0x65a   : > { %v8608_v2 = vunpack.i.l.bf16 %v8607_v16  ;;  %v8609_v10 = vunpack.i.h.bf16 %v8607_v16  ;;  %v7782_v58 = vmax.bf16 %v14442_v62, %v7270_v57  ;;  %v6622_v38 = vpack.c.bf16 %v6062_v6, %v6058_v21 }
 0x65b   : > { %v8593_v35 = vmax.f32 %v8591_v34, %v8592_v39  ;;  %v7783_v25 = vmax.bf16 %v14442_v62, %v7271_v50  ;;  %v5433_v19 = vpop.f32.mrb[52].mxu0  ;;  %v7240_v63 = vadd.bf16 %v13336_v56, %v6621_v27 }
 0x65c   : > { %v8610_v29 = vmax.f32 %v8608_v2, %v8609_v10  ;;  %v13950_v20 = vmax.bf16 %v8688_v54, %v7782_v58  ;;  %v5435_v52 = vpop.f32.mrb[53].mxu0  ;;  %v7241_v43 = vadd.bf16 %v13339_v26, %v6622_v38 }
 0x65d   : > { %v8594_v48 = vrot.slane %v8593_v35, 4  ;;  %v13952_v8 = vmax.bf16 %v8705_v46, %v7783_v25  ;;  %v5437_v36 = vpop.f32.mrb[54].mxu0  ;;  %v7752_v55 = vmax.bf16 %v14442_v62, %v7240_v63 }
 0x65e   : > { %v8611_v5 = vrot.slane %v8610_v29, 4  ;;  %v6659_v22 = vpack.c.bf16 %v5437_v36, %v5433_v19  ;;  %v5439_v0 = vpop.f32.mrb[55].mxu0  ;;  %v6066_v1 = vpop.f32.mrb[36].mxu1  ;;  %v7753_v21 = vmax.bf16 %v14442_v62, %v7241_v43 }
 0x65f   : > { %v8595_v41 = vmax.f32 %v8593_v35, %v8594_v48  ;;  %v6660_v24 = vpack.c.bf16 %v5439_v0, %v5435_v52  ;;  %v6068_v3 = vpop.f32.mrb[37].mxu1 }
 0x660   : > { %v8612_v49 = vmax.f32 %v8610_v29, %v8611_v5  ;;  %v7278_v33 = vadd.bf16 %v13250_v28, %v6659_v22  ;;  %v6070_v17 = vpop.f32.mrb[38].mxu1 }
 0x661   : > { %v8596_v7 = vrot.slane %v8595_v41, 2  ;;  %v7279_v9 = vadd.bf16 %v13253_v12, %v6660_v24  ;;  %v6629_v59 = vpack.c.bf16 %v6070_v17, %v6066_v1  ;;  %v6072_v51 = vpop.f32.mrb[39].mxu1 }
 0x662   : > { %v8613_v30 = vrot.slane %v8612_v49, 2  ;;  %v7790_v60 = vmax.bf16 %v14442_v62, %v7278_v33  ;;  %v6630_v13 = vpack.c.bf16 %v6072_v51, %v6068_v3 }
 0x663   : > { %v8597_v45 = vmax.f32 %v8595_v41, %v8596_v7  ;;  %v7791_v23 = vmax.bf16 %v14442_v62, %v7279_v9  ;;  %v7248_v54 = vadd.bf16 %v13336_v56, %v6629_v59  ;;  %v5443_v37 = vpop.f32.mrb[56].mxu0 }
 0x664   : > { %v8614_v40 = vmax.f32 %v8612_v49, %v8613_v30  ;;  %v8690_v46 = vmax.bf16 %v13950_v20, %v7790_v60  ;;  %v7249_v14 = vadd.bf16 %v13339_v26, %v6630_v13  ;;  %v5445_v47 = vpop.f32.mrb[57].mxu0 }
 0x665   : > { %v8598_v32 = vrot.slane %v8597_v45, 1  ;;  %v8707_v44 = vmax.bf16 %v13952_v8, %v7791_v23  ;;  %v7760_v4 = vmax.bf16 %v14442_v62, %v7248_v54  ;;  %v5447_v42 = vpop.f32.mrb[58].mxu0 }
 0x666   : > { %v8615_v61 = vrot.slane %v8614_v40, 1  ;;  %v7761_v16 = vmax.bf16 %v14442_v62, %v7249_v14  ;;  %v6667_v57 = vpack.c.bf16 %v5447_v42, %v5443_v37  ;;  %v5449_v53 = vpop.f32.mrb[59].mxu0  ;;  %v6076_v34 = vpop.f32.mrb[40].mxu1 }
 0x667   : > { %v8599_v39 = vmax.f32 %v8597_v45, %v8598_v32  ;;  %v8720_v50 = vmax.bf16 %v7760_v4, %v7752_v55  ;;  %v6668_v27 = vpack.c.bf16 %v5449_v53, %v5445_v47  ;;  %v6078_v6 = vpop.f32.mrb[41].mxu1 }
 0x668   : > { %v8616_v2 = vmax.f32 %v8614_v40, %v8615_v61  ;;  %v8737_v10 = vmax.bf16 %v7761_v16, %v7753_v21  ;;  %v7286_v58 = vadd.bf16 %v13250_v28, %v6667_v57  ;;  %v6080_v38 = vpop.f32.mrb[42].mxu1 }
 0x669   : > { %v8600_v35 = vpack.i.bf16 %v8599_v39, %v8599_v39  ;;  %v7287_v25 = vadd.bf16 %v13253_v12, %v6668_v27  ;;  %v6637_v19 = vpack.c.bf16 %v6080_v38, %v6076_v34  ;;  %v6082_v29 = vpop.f32.mrb[43].mxu1 }
 0x66a   : > { %v8617_v20 = vpack.i.bf16 %v8616_v2, %v8616_v2  ;;  %v7798_v52 = vmax.bf16 %v14442_v62, %v7286_v58  ;;  %v6638_v48 = vpack.c.bf16 %v6082_v29, %v6078_v6 }
 0x66b   : > { %v7799_v8 = vmax.bf16 %v14442_v62, %v7287_v25  ;;  %v7256_v36 = vadd.bf16 %v13336_v56, %v6637_v19  ;;  %v5453_v5 = vpop.f32.mrb[60].mxu0 }
 0x66c   : > { %v9719_v22 = vcombine.low %v8600_v35, %v8617_v20  ;;  %v8691_v0 = vmax.bf16 %v8690_v46, %v7798_v52  ;;  %v7257_v1 = vadd.bf16 %v13339_v26, %v6638_v48  ;;  %v5455_v41 = vpop.f32.mrb[61].mxu0 }
 0x66d   : > { %v8708_v24 = vmax.bf16 %v8707_v44, %v7799_v8  ;;  %v7768_v3 = vmax.bf16 %v14442_v62, %v7256_v36  ;;  %v5457_v49 = vpop.f32.mrb[62].mxu0 }
 0x66e   : > { %v9228_v33 = vunpack.c.l.b16 %v9719_v22  ;;  %v9229_v17 = vunpack.c.h.b16 %v9719_v22  ;;  %v7769_v7 = vmax.bf16 %v14442_v62, %v7257_v1  ;;  %v6675_v63 = vpack.c.bf16 %v5457_v49, %v5453_v5  ;;  %v5459_v9 = vpop.f32.mrb[63].mxu0  ;;  %v6086_v59 = vpop.f32.mrb[44].mxu1 }
 0x66f   : > { %v8721_v51 = vmax.bf16 %v8720_v50, %v7768_v3  ;;  %v6676_v30 = vpack.c.bf16 %v5459_v9, %v5455_v41  ;;  %v6088_v43 = vpop.f32.mrb[45].mxu1 }
 0x670   : > { %v8738_v60 = vmax.bf16 %v8737_v10, %v7769_v7  ;;  %v7294_v13 = vadd.bf16 %v13250_v28, %v6675_v63  ;;  %v6090_v45 = vpop.f32.mrb[46].mxu1  ;;  %v13979_v23 = vsel %vm9260_vm7, %v9228_v33, %v13883_v11  ;;  %v13983_v54 = vsel %vm9260_vm7, %v9229_v17, %v13887_v18 }
 0x671   : > { %v7295_v37 = vadd.bf16 %v13253_v12, %v6676_v30  ;;  %v6645_v40 = vpack.c.bf16 %v6090_v45, %v6086_v59  ;;  %v6092_v46 = vpop.f32.mrb[47].mxu1 }
 0x672   : > { %v7806_v14 = vmax.bf16 %v14442_v62, %v7294_v13  ;;  %v6646_v47 = vpack.c.bf16 %v6092_v46, %v6088_v43 }
 0x673   : > { %v7807_v32 = vmax.bf16 %v14442_v62, %v7295_v37  ;;  %v7264_v55 = vadd.bf16 %v13336_v56, %v6645_v40  ;;  %v5463_v44 = vpop.f32.mrb[64].mxu0 }
 0x674   : > { %v8692_v4 = vmax.bf16 %v8691_v0, %v7806_v14  ;;  %v7265_v11 = vadd.bf16 %v13339_v26, %v6646_v47  ;;  %v5465_v42 = vpop.f32.mrb[65].mxu0 }
 0x675   : > { %v8709_v61 = vmax.bf16 %v8708_v24, %v7807_v32  ;;  %v7776_v18 = vmax.bf16 %v14442_v62, %v7264_v55  ;;  %v5467_v21 = vpop.f32.mrb[66].mxu0 }
 0x676   : > { %v8693_v16 = vunpack.i.l.bf16 %v8692_v4  ;;  %v8694_v57 = vunpack.i.h.bf16 %v8692_v4  ;;  %v7777_v53 = vmax.bf16 %v14442_v62, %v7265_v11  ;;  %v6683_v34 = vpack.c.bf16 %v5467_v21, %v5463_v44  ;;  %v5469_v39 = vpop.f32.mrb[67].mxu0  ;;  %v6096_v50 = vpop.f32.mrb[48].mxu1 }
 0x677   : > { %v8710_v27 = vunpack.i.l.bf16 %v8709_v61  ;;  %v8711_v6 = vunpack.i.h.bf16 %v8709_v61  ;;  %v8722_v2 = vmax.bf16 %v8721_v51, %v7776_v18  ;;  %v6684_v10 = vpack.c.bf16 %v5469_v39, %v5465_v42  ;;  %v6098_v58 = vpop.f32.mrb[49].mxu1 }
 0x678   : > { %v8695_v38 = vmax.f32 %v8693_v16, %v8694_v57  ;;  %v8739_v35 = vmax.bf16 %v8738_v60, %v7777_v53  ;;  %v6100_v25 = vpop.f32.mrb[50].mxu1  ;;  %v7302_v33 = vadd.bf16 %v13250_v28, %v6683_v34 }
 0x679   : > { %v8712_v19 = vmax.f32 %v8710_v27, %v8711_v6  ;;  %v6653_v29 = vpack.c.bf16 %v6100_v25, %v6096_v50  ;;  %v6102_v20 = vpop.f32.mrb[51].mxu1  ;;  %v7303_v51 = vadd.bf16 %v13253_v12, %v6684_v10 }
 0x67a   : > { %v8696_v52 = vrot.slane %v8695_v38, 4  ;;  %v6654_v48 = vpack.c.bf16 %v6102_v20, %v6098_v58  ;;  %v7814_v44 = vmax.bf16 %v14442_v62, %v7302_v33 }
 0x67b   : > { %v8713_v8 = vrot.slane %v8712_v19, 4  ;;  %v7272_v36 = vadd.bf16 %v13336_v56, %v6653_v29  ;;  %v5473_v5 = vpop.f32.mrb[68].mxu0  ;;  %v7815_v61 = vmax.bf16 %v14442_v62, %v7303_v51 }
 0x67c   : > { %v8697_v22 = vmax.f32 %v8695_v38, %v8696_v52  ;;  %v7273_v0 = vadd.bf16 %v13339_v26, %v6654_v48  ;;  %v5475_v1 = vpop.f32.mrb[69].mxu0 }
 0x67d   : > { %v8714_v41 = vmax.f32 %v8712_v19, %v8713_v8  ;;  %v7784_v24 = vmax.bf16 %v14442_v62, %v7272_v36  ;;  %v5477_v3 = vpop.f32.mrb[70].mxu0 }
 0x67e   : > { %v8698_v49 = vrot.slane %v8697_v22, 2  ;;  %v7785_v17 = vmax.bf16 %v14442_v62, %v7273_v0  ;;  %v6691_v7 = vpack.c.bf16 %v5477_v3, %v5473_v5  ;;  %v5479_v63 = vpop.f32.mrb[71].mxu0  ;;  %v6106_v9 = vpop.f32.mrb[52].mxu1 }
 0x67f   : > { %v8715_v59 = vrot.slane %v8714_v41, 2  ;;  %v13998_v30 = vmax.bf16 %v8722_v2, %v7784_v24  ;;  %v6692_v43 = vpack.c.bf16 %v5479_v63, %v5475_v1  ;;  %v6108_v60 = vpop.f32.mrb[53].mxu1 }
 0x680   : > { %v8699_v13 = vmax.f32 %v8697_v22, %v8698_v49  ;;  %v14000_v45 = vmax.bf16 %v8739_v35, %v7785_v17  ;;  %v7310_v37 = vadd.bf16 %v13250_v28, %v6691_v7  ;;  %v6110_v40 = vpop.f32.mrb[54].mxu1 }
 0x681   : > { %v8716_v46 = vmax.f32 %v8714_v41, %v8715_v59  ;;  %v7311_v14 = vadd.bf16 %v13253_v12, %v6692_v43  ;;  %v6661_v47 = vpack.c.bf16 %v6110_v40, %v6106_v9  ;;  %v6112_v32 = vpop.f32.mrb[55].mxu1 }
 0x682   : > { %v8700_v55 = vrot.slane %v8699_v13, 1  ;;  %v7822_v4 = vmax.bf16 %v14442_v62, %v7310_v37  ;;  %v6662_v11 = vpack.c.bf16 %v6112_v32, %v6108_v60 }
 0x683   : > { %v8717_v42 = vrot.slane %v8716_v46, 1  ;;  %v7823_v18 = vmax.bf16 %v14442_v62, %v7311_v14  ;;  %v7280_v21 = vadd.bf16 %v13336_v56, %v6661_v47  ;;  %v5483_v16 = vpop.f32.mrb[72].mxu0 }
 0x684   : > { %v8701_v57 = vmax.f32 %v8699_v13, %v8700_v55  ;;  %v8822_v53 = vmax.bf16 %v7822_v4, %v7814_v44  ;;  %v7281_v34 = vadd.bf16 %v13339_v26, %v6662_v11  ;;  %v5485_v39 = vpop.f32.mrb[73].mxu0 }
 0x685   : > { %v8718_v50 = vmax.f32 %v8716_v46, %v8717_v42  ;;  %v8839_v27 = vmax.bf16 %v7823_v18, %v7815_v61  ;;  %v7792_v6 = vmax.bf16 %v14442_v62, %v7280_v21  ;;  %v5487_v2 = vpop.f32.mrb[74].mxu0 }
 0x686   : > { %v8702_v10 = vpack.i.bf16 %v8701_v57, %v8701_v57  ;;  %v7793_v58 = vmax.bf16 %v14442_v62, %v7281_v34  ;;  %v6699_v38 = vpack.c.bf16 %v5487_v2, %v5483_v16  ;;  %v5489_v35 = vpop.f32.mrb[75].mxu0  ;;  %v6116_v25 = vpop.f32.mrb[56].mxu1 }
 0x687   : > { %v8719_v19 = vpack.i.bf16 %v8718_v50, %v8718_v50  ;;  %v8724_v29 = vmax.bf16 %v13998_v30, %v7792_v6  ;;  %v6700_v20 = vpack.c.bf16 %v5489_v35, %v5485_v39  ;;  %v6118_v52 = vpop.f32.mrb[57].mxu1 }
 0x688   : > { %v8741_v48 = vmax.bf16 %v14000_v45, %v7793_v58  ;;  %v7318_v8 = vadd.bf16 %v13250_v28, %v6699_v38  ;;  %v6120_v36 = vpop.f32.mrb[58].mxu1 }
 0x689   : > { %v9722_v5 = vcombine.low %v8702_v10, %v8719_v19  ;;  %v7319_v22 = vadd.bf16 %v13253_v12, %v6700_v20  ;;  %v6669_v0 = vpack.c.bf16 %v6120_v36, %v6116_v25  ;;  %v6122_v1 = vpop.f32.mrb[59].mxu1 }
 0x68a   : > { %v7830_v41 = vmax.bf16 %v14442_v62, %v7318_v8  ;;  %v6670_v24 = vpack.c.bf16 %v6122_v1, %v6118_v52 }
 0x68b   : > { %v9234_v3 = vunpack.c.l.b16 %v9722_v5  ;;  %v9235_v49 = vunpack.c.h.b16 %v9722_v5  ;;  %v7831_v33 = vmax.bf16 %v14442_v62, %v7319_v22  ;;  %v7288_v17 = vadd.bf16 %v13336_v56, %v6669_v0  ;;  %v5493_v7 = vpop.f32.mrb[76].mxu0 }
 0x68c   : > { %v8823_v63 = vmax.bf16 %v8822_v53, %v7830_v41  ;;  %v7289_v9 = vadd.bf16 %v13339_v26, %v6670_v24  ;;  %v5495_v59 = vpop.f32.mrb[77].mxu0 }
 0x68d   : > { %v8840_v51 = vmax.bf16 %v8839_v27, %v7831_v33  ;;  %v7800_v30 = vmax.bf16 %v14442_v62, %v7288_v17  ;;  %v5497_v43 = vpop.f32.mrb[78].mxu0  ;;  %v14023_v60 = vsel %vm9262_vm8, %v9234_v3, %v13931_v31  ;;  %v14027_v13 = vsel %vm9262_vm8, %v9235_v49, %v13935_v15 }
 0x68e   : > { %v7801_v45 = vmax.bf16 %v14442_v62, %v7289_v9  ;;  %v6707_v37 = vpack.c.bf16 %v5497_v43, %v5493_v7  ;;  %v5499_v40 = vpop.f32.mrb[79].mxu0  ;;  %v6126_v46 = vpop.f32.mrb[60].mxu1 }
 0x68f   : > { %v8725_v14 = vmax.bf16 %v8724_v29, %v7800_v30  ;;  %v6708_v47 = vpack.c.bf16 %v5499_v40, %v5495_v59  ;;  %v6128_v32 = vpop.f32.mrb[61].mxu1 }
 0x690   : > { %v8742_v55 = vmax.bf16 %v8741_v48, %v7801_v45  ;;  %v7326_v44 = vadd.bf16 %v13250_v28, %v6707_v37  ;;  %v6130_v4 = vpop.f32.mrb[62].mxu1 }
 0x691   : > { %v7327_v11 = vadd.bf16 %v13253_v12, %v6708_v47  ;;  %v6677_v31 = vpack.c.bf16 %v6130_v4, %v6126_v46  ;;  %v6132_v42 = vpop.f32.mrb[63].mxu1 }
 0x692   : > { %v7838_v61 = vmax.bf16 %v14442_v62, %v7326_v44  ;;  %v6678_v15 = vpack.c.bf16 %v6132_v42, %v6128_v32 }
 0x693   : > { %v7839_v18 = vmax.bf16 %v14442_v62, %v7327_v11  ;;  %v7296_v21 = vadd.bf16 %v13336_v56, %v6677_v31  ;;  %v5503_v16 = vpop.f32.mrb[80].mxu0 }
 0x694   : > { %v8824_v57 = vmax.bf16 %v8823_v63, %v7838_v61  ;;  %v7297_v53 = vadd.bf16 %v13339_v26, %v6678_v15  ;;  %v5505_v34 = vpop.f32.mrb[81].mxu0 }
 0x695   : > { %v8841_v39 = vmax.bf16 %v8840_v51, %v7839_v18  ;;  %v7808_v50 = vmax.bf16 %v14442_v62, %v7296_v21  ;;  %v5507_v27 = vpop.f32.mrb[82].mxu0 }
 0x696   : > { %v7809_v6 = vmax.bf16 %v14442_v62, %v7297_v53  ;;  %v6715_v2 = vpack.c.bf16 %v5507_v27, %v5503_v16  ;;  %v5509_v10 = vpop.f32.mrb[83].mxu0  ;;  %v6136_v58 = vpop.f32.mrb[64].mxu1 }
 0x697   : > { %v8726_v38 = vmax.bf16 %v8725_v14, %v7808_v50  ;;  %v6716_v35 = vpack.c.bf16 %v5509_v10, %v5505_v34  ;;  %v6138_v25 = vpop.f32.mrb[65].mxu1 }
 0x698   : > { %v8743_v19 = vmax.bf16 %v8742_v55, %v7809_v6  ;;  %v7334_v29 = vadd.bf16 %v13250_v28, %v6715_v2  ;;  %v6140_v20 = vpop.f32.mrb[66].mxu1 }
 0x699   : > { %v8727_v52 = vunpack.i.l.bf16 %v8726_v38  ;;  %v8728_v48 = vunpack.i.h.bf16 %v8726_v38  ;;  %v7335_v8 = vadd.bf16 %v13253_v12, %v6716_v35  ;;  %v6685_v36 = vpack.c.bf16 %v6140_v20, %v6136_v58  ;;  %v6142_v5 = vpop.f32.mrb[67].mxu1 }
 0x69a   : > { %v8744_v22 = vunpack.i.l.bf16 %v8743_v19  ;;  %v8745_v0 = vunpack.i.h.bf16 %v8743_v19  ;;  %v7846_v1 = vmax.bf16 %v14442_v62, %v7334_v29  ;;  %v6686_v41 = vpack.c.bf16 %v6142_v5, %v6138_v25 }
 0x69b   : > { %v8729_v24 = vmax.f32 %v8727_v52, %v8728_v48  ;;  %v7847_v3 = vmax.bf16 %v14442_v62, %v7335_v8  ;;  %v5513_v49 = vpop.f32.mrb[84].mxu0  ;;  %v7304_v44 = vadd.bf16 %v13336_v56, %v6685_v36 }
 0x69c   : > { %v8746_v33 = vmax.f32 %v8744_v22, %v8745_v0  ;;  %v14042_v17 = vmax.bf16 %v8824_v57, %v7846_v1  ;;  %v5515_v7 = vpop.f32.mrb[85].mxu0  ;;  %v7305_v61 = vadd.bf16 %v13339_v26, %v6686_v41 }
 0x69d   : > { %v8730_v63 = vrot.slane %v8729_v24, 4  ;;  %v14044_v9 = vmax.bf16 %v8841_v39, %v7847_v3  ;;  %v5517_v59 = vpop.f32.mrb[86].mxu0  ;;  %v7816_v2 = vmax.bf16 %v14442_v62, %v7304_v44 }
 0x69e   : > { %v8747_v51 = vrot.slane %v8746_v33, 4  ;;  %v6723_v30 = vpack.c.bf16 %v5517_v59, %v5513_v49  ;;  %v5519_v43 = vpop.f32.mrb[87].mxu0  ;;  %v6146_v45 = vpop.f32.mrb[68].mxu1  ;;  %v7817_v25 = vmax.bf16 %v14442_v62, %v7305_v61 }
 0x69f   : > { %v8731_v37 = vmax.f32 %v8729_v24, %v8730_v63  ;;  %v6724_v40 = vpack.c.bf16 %v5519_v43, %v5515_v7  ;;  %v6148_v46 = vpop.f32.mrb[69].mxu1 }
 0x6a0   : > { %v8748_v14 = vmax.f32 %v8746_v33, %v8747_v51  ;;  %v7342_v47 = vadd.bf16 %v13250_v28, %v6723_v30  ;;  %v6150_v32 = vpop.f32.mrb[70].mxu1 }
 0x6a1   : > { %v8732_v55 = vrot.slane %v8731_v37, 2  ;;  %v7343_v4 = vadd.bf16 %v13253_v12, %v6724_v40  ;;  %v6693_v11 = vpack.c.bf16 %v6150_v32, %v6146_v45  ;;  %v6152_v31 = vpop.f32.mrb[71].mxu1 }
 0x6a2   : > { %v8749_v42 = vrot.slane %v8748_v14, 2  ;;  %v7854_v15 = vmax.bf16 %v14442_v62, %v7342_v47  ;;  %v6694_v18 = vpack.c.bf16 %v6152_v31, %v6148_v46 }
 0x6a3   : > { %v8733_v21 = vmax.f32 %v8731_v37, %v8732_v55  ;;  %v7855_v16 = vmax.bf16 %v14442_v62, %v7343_v4  ;;  %v7312_v57 = vadd.bf16 %v13336_v56, %v6693_v11  ;;  %v5523_v53 = vpop.f32.mrb[88].mxu0 }
 0x6a4   : > { %v8750_v34 = vmax.f32 %v8748_v14, %v8749_v42  ;;  %v8826_v39 = vmax.bf16 %v14042_v17, %v7854_v15  ;;  %v7313_v50 = vadd.bf16 %v13339_v26, %v6694_v18  ;;  %v5525_v27 = vpop.f32.mrb[89].mxu0 }
 0x6a5   : > { %v8734_v6 = vrot.slane %v8733_v21, 1  ;;  %v8843_v10 = vmax.bf16 %v14044_v9, %v7855_v16  ;;  %v7824_v58 = vmax.bf16 %v14442_v62, %v7312_v57  ;;  %v5527_v38 = vpop.f32.mrb[90].mxu0 }
 0x6a6   : > { %v8751_v35 = vrot.slane %v8750_v34, 1  ;;  %v7825_v19 = vmax.bf16 %v14442_v62, %v7313_v50  ;;  %v6731_v29 = vpack.c.bf16 %v5527_v38, %v5523_v53  ;;  %v5529_v20 = vpop.f32.mrb[91].mxu0  ;;  %v6156_v52 = vpop.f32.mrb[72].mxu1 }
 0x6a7   : > { %v8735_v48 = vmax.f32 %v8733_v21, %v8734_v6  ;;  %v8856_v8 = vmax.bf16 %v7824_v58, %v7816_v2  ;;  %v6732_v36 = vpack.c.bf16 %v5529_v20, %v5525_v27  ;;  %v6158_v5 = vpop.f32.mrb[73].mxu1 }
 0x6a8   : > { %v8752_v22 = vmax.f32 %v8750_v34, %v8751_v35  ;;  %v8873_v0 = vmax.bf16 %v7825_v19, %v7817_v25  ;;  %v7350_v1 = vadd.bf16 %v13250_v28, %v6731_v29  ;;  %v6160_v41 = vpop.f32.mrb[74].mxu1 }
 0x6a9   : > { %v8736_v24 = vpack.i.bf16 %v8735_v48, %v8735_v48  ;;  %v7351_v3 = vadd.bf16 %v13253_v12, %v6732_v36  ;;  %v6701_v49 = vpack.c.bf16 %v6160_v41, %v6156_v52  ;;  %v6162_v33 = vpop.f32.mrb[75].mxu1 }
 0x6aa   : > { %v8753_v17 = vpack.i.bf16 %v8752_v22, %v8752_v22  ;;  %v7862_v7 = vmax.bf16 %v14442_v62, %v7350_v1  ;;  %v6702_v63 = vpack.c.bf16 %v6162_v33, %v6158_v5 }
 0x6ab   : > { %v7863_v9 = vmax.bf16 %v14442_v62, %v7351_v3  ;;  %v7320_v59 = vadd.bf16 %v13336_v56, %v6701_v49  ;;  %v5533_v51 = vpop.f32.mrb[92].mxu0 }
 0x6ac   : > { %v9723_v30 = vcombine.low %v8736_v24, %v8753_v17  ;;  %v8827_v43 = vmax.bf16 %v8826_v39, %v7862_v7  ;;  %v7321_v45 = vadd.bf16 %v13339_v26, %v6702_v63  ;;  %v5535_v37 = vpop.f32.mrb[93].mxu0 }
 0x6ad   : > { %v8844_v40 = vmax.bf16 %v8843_v10, %v7863_v9  ;;  %v7832_v46 = vmax.bf16 %v14442_v62, %v7320_v59  ;;  %v5537_v14 = vpop.f32.mrb[94].mxu0 }
 0x6ae   : > { %v9236_v47 = vunpack.c.l.b16 %v9723_v30  ;;  %v9237_v32 = vunpack.c.h.b16 %v9723_v30  ;;  %v7833_v55 = vmax.bf16 %v14442_v62, %v7321_v45  ;;  %v6739_v44 = vpack.c.bf16 %v5537_v14, %v5533_v51  ;;  %v5539_v4 = vpop.f32.mrb[95].mxu0  ;;  %v6166_v11 = vpop.f32.mrb[76].mxu1 }
 0x6af   : > { %v8857_v31 = vmax.bf16 %v8856_v8, %v7832_v46  ;;  %v6740_v42 = vpack.c.bf16 %v5539_v4, %v5535_v37  ;;  %v6168_v61 = vpop.f32.mrb[77].mxu1 }
 0x6b0   : > { %v8874_v15 = vmax.bf16 %v8873_v0, %v7833_v55  ;;  %v7358_v18 = vadd.bf16 %v13250_v28, %v6739_v44  ;;  %v6170_v21 = vpop.f32.mrb[78].mxu1  ;;  %v14071_v16 = vsel %vm9262_vm8, %v9236_v47, %v13979_v23  ;;  %v14075_v57 = vsel %vm9262_vm8, %v9237_v32, %v13983_v54 }
 0x6b1   : > { %v7359_v53 = vadd.bf16 %v13253_v12, %v6740_v42  ;;  %v6709_v34 = vpack.c.bf16 %v6170_v21, %v6166_v11  ;;  %v6172_v39 = vpop.f32.mrb[79].mxu1 }
 0x6b2   : > { %v7870_v50 = vmax.bf16 %v14442_v62, %v7358_v18  ;;  %v6710_v27 = vpack.c.bf16 %v6172_v39, %v6168_v61 }
 0x6b3   : > { %v7871_v6 = vmax.bf16 %v14442_v62, %v7359_v53  ;;  %v7328_v2 = vadd.bf16 %v13336_v56, %v6709_v34  ;;  %v5543_v10 = vpop.f32.mrb[96].mxu0 }
 0x6b4   : > { %v8828_v58 = vmax.bf16 %v8827_v43, %v7870_v50  ;;  %v7329_v23 = vadd.bf16 %v13339_v26, %v6710_v27  ;;  %v5545_v38 = vpop.f32.mrb[97].mxu0 }
 0x6b5   : > { %v8845_v35 = vmax.bf16 %v8844_v40, %v7871_v6  ;;  %v7840_v54 = vmax.bf16 %v14442_v62, %v7328_v2  ;;  %v5547_v25 = vpop.f32.mrb[98].mxu0 }
 0x6b6   : > { %v8829_v19 = vunpack.i.l.bf16 %v8828_v58  ;;  %v8830_v29 = vunpack.i.h.bf16 %v8828_v58  ;;  %v7841_v20 = vmax.bf16 %v14442_v62, %v7329_v23  ;;  %v6747_v52 = vpack.c.bf16 %v5547_v25, %v5543_v10  ;;  %v5549_v48 = vpop.f32.mrb[99].mxu0  ;;  %v6176_v8 = vpop.f32.mrb[80].mxu1 }
 0x6b7   : > { %v8846_v36 = vunpack.i.l.bf16 %v8845_v35  ;;  %v8847_v5 = vunpack.i.h.bf16 %v8845_v35  ;;  %v8858_v22 = vmax.bf16 %v8857_v31, %v7840_v54  ;;  %v6748_v0 = vpack.c.bf16 %v5549_v48, %v5545_v38  ;;  %v6178_v1 = vpop.f32.mrb[81].mxu1 }
 0x6b8   : > { %v8831_v41 = vmax.f32 %v8829_v19, %v8830_v29  ;;  %v8875_v24 = vmax.bf16 %v8874_v15, %v7841_v20  ;;  %v6180_v3 = vpop.f32.mrb[82].mxu1  ;;  %v7366_v47 = vadd.bf16 %v13250_v28, %v6747_v52 }
 0x6b9   : > { %v8848_v49 = vmax.f32 %v8846_v36, %v8847_v5  ;;  %v6717_v33 = vpack.c.bf16 %v6180_v3, %v6176_v8  ;;  %v6182_v17 = vpop.f32.mrb[83].mxu1  ;;  %v7367_v31 = vadd.bf16 %v13253_v12, %v6748_v0 }
 0x6ba   : > { %v8832_v7 = vrot.slane %v8831_v41, 4  ;;  %v6718_v63 = vpack.c.bf16 %v6182_v17, %v6178_v1  ;;  %v7878_v10 = vmax.bf16 %v14442_v62, %v7366_v47 }
 0x6bb   : > { %v8849_v9 = vrot.slane %v8848_v49, 4  ;;  %v7336_v59 = vadd.bf16 %v13336_v56, %v6717_v33  ;;  %v5553_v51 = vpop.f32.mrb[100].mxu0  ;;  %v7879_v35 = vmax.bf16 %v14442_v62, %v7367_v31 }
 0x6bc   : > { %v8833_v30 = vmax.f32 %v8831_v41, %v8832_v7  ;;  %v7337_v43 = vadd.bf16 %v13339_v26, %v6718_v63  ;;  %v5555_v45 = vpop.f32.mrb[101].mxu0 }
 0x6bd   : > { %v8850_v37 = vmax.f32 %v8848_v49, %v8849_v9  ;;  %v7848_v40 = vmax.bf16 %v14442_v62, %v7336_v59  ;;  %v5557_v46 = vpop.f32.mrb[102].mxu0 }
 0x6be   : > { %v8834_v14 = vrot.slane %v8833_v30, 2  ;;  %v7849_v32 = vmax.bf16 %v14442_v62, %v7337_v43  ;;  %v6755_v55 = vpack.c.bf16 %v5557_v46, %v5553_v51  ;;  %v5559_v44 = vpop.f32.mrb[103].mxu0  ;;  %v6186_v4 = vpop.f32.mrb[84].mxu1 }
 0x6bf   : > { %v8851_v11 = vrot.slane %v8850_v37, 2  ;;  %v14090_v42 = vmax.bf16 %v8858_v22, %v7848_v40  ;;  %v6756_v61 = vpack.c.bf16 %v5559_v44, %v5555_v45  ;;  %v6188_v15 = vpop.f32.mrb[85].mxu1 }
 0x6c0   : > { %v8835_v18 = vmax.f32 %v8833_v30, %v8834_v14  ;;  %v14092_v21 = vmax.bf16 %v8875_v24, %v7849_v32  ;;  %v7374_v53 = vadd.bf16 %v13250_v28, %v6755_v55  ;;  %v6190_v34 = vpop.f32.mrb[86].mxu1 }
 0x6c1   : > { %v8852_v39 = vmax.f32 %v8850_v37, %v8851_v11  ;;  %v7375_v50 = vadd.bf16 %v13253_v12, %v6756_v61  ;;  %v6725_v27 = vpack.c.bf16 %v6190_v34, %v6186_v4  ;;  %v6192_v6 = vpop.f32.mrb[87].mxu1 }
 0x6c2   : > { %v8836_v2 = vrot.slane %v8835_v18, 1  ;;  %v7886_v58 = vmax.bf16 %v14442_v62, %v7374_v53  ;;  %v6726_v23 = vpack.c.bf16 %v6192_v6, %v6188_v15 }
 0x6c3   : > { %v8853_v38 = vrot.slane %v8852_v39, 1  ;;  %v7887_v54 = vmax.bf16 %v14442_v62, %v7375_v50  ;;  %v7344_v25 = vadd.bf16 %v13336_v56, %v6725_v27  ;;  %v5563_v19 = vpop.f32.mrb[104].mxu0 }
 0x6c4   : > { %v8837_v29 = vmax.f32 %v8835_v18, %v8836_v2  ;;  %v8958_v20 = vmax.bf16 %v7886_v58, %v7878_v10  ;;  %v7345_v52 = vadd.bf16 %v13339_v26, %v6726_v23  ;;  %v5565_v48 = vpop.f32.mrb[105].mxu0 }
 0x6c5   : > { %v8854_v8 = vmax.f32 %v8852_v39, %v8853_v38  ;;  %v8975_v36 = vmax.bf16 %v7887_v54, %v7879_v35  ;;  %v7856_v5 = vmax.bf16 %v14442_v62, %v7344_v25  ;;  %v5567_v22 = vpop.f32.mrb[106].mxu0 }
 0x6c6   : > { %v8838_v0 = vpack.i.bf16 %v8837_v29, %v8837_v29  ;;  %v7857_v1 = vmax.bf16 %v14442_v62, %v7345_v52  ;;  %v6763_v41 = vpack.c.bf16 %v5567_v22, %v5563_v19  ;;  %v5569_v24 = vpop.f32.mrb[107].mxu0  ;;  %v6196_v3 = vpop.f32.mrb[88].mxu1 }
 0x6c7   : > { %v8855_v49 = vpack.i.bf16 %v8854_v8, %v8854_v8  ;;  %v8860_v33 = vmax.bf16 %v14090_v42, %v7856_v5  ;;  %v6764_v17 = vpack.c.bf16 %v5569_v24, %v5565_v48  ;;  %v6198_v7 = vpop.f32.mrb[89].mxu1 }
 0x6c8   : > { %v8877_v63 = vmax.bf16 %v14092_v21, %v7857_v1  ;;  %v7382_v9 = vadd.bf16 %v13250_v28, %v6763_v41  ;;  %v6200_v59 = vpop.f32.mrb[90].mxu1 }
 0x6c9   : > { %v9726_v51 = vcombine.low %v8838_v0, %v8855_v49  ;;  %v7383_v30 = vadd.bf16 %v13253_v12, %v6764_v17  ;;  %v6733_v43 = vpack.c.bf16 %v6200_v59, %v6196_v3  ;;  %v6202_v45 = vpop.f32.mrb[91].mxu1 }
 0x6ca   : > { %v7894_v37 = vmax.bf16 %v14442_v62, %v7382_v9  ;;  %v6734_v40 = vpack.c.bf16 %v6202_v45, %v6198_v7 }
 0x6cb   : > { %v9242_v46 = vunpack.c.l.b16 %v9726_v51  ;;  %v9243_v14 = vunpack.c.h.b16 %v9726_v51  ;;  %v7895_v47 = vmax.bf16 %v14442_v62, %v7383_v30  ;;  %v7352_v32 = vadd.bf16 %v13336_v56, %v6733_v43  ;;  %v5573_v55 = vpop.f32.mrb[108].mxu0 }
 0x6cc   : > { %v8959_v44 = vmax.bf16 %v8958_v20, %v7894_v37  ;;  %v7353_v4 = vadd.bf16 %v13339_v26, %v6734_v40  ;;  %v5575_v11 = vpop.f32.mrb[109].mxu0 }
 0x6cd   : > { %v8976_v31 = vmax.bf16 %v8975_v36, %v7895_v47  ;;  %v7864_v42 = vmax.bf16 %v14442_v62, %v7352_v32  ;;  %v5577_v61 = vpop.f32.mrb[110].mxu0  ;;  %v14115_v15 = vsel %vm9264_vm9, %v9242_v46, %v14023_v60  ;;  %v14119_v18 = vsel %vm9264_vm9, %v9243_v14, %v14027_v13 }
 0x6ce   : > { %v7865_v21 = vmax.bf16 %v14442_v62, %v7353_v4  ;;  %v6771_v53 = vpack.c.bf16 %v5577_v61, %v5573_v55  ;;  %v5579_v34 = vpop.f32.mrb[111].mxu0  ;;  %v6206_v39 = vpop.f32.mrb[92].mxu1 }
 0x6cf   : > { %v8861_v50 = vmax.bf16 %v8860_v33, %v7864_v42  ;;  %v6772_v27 = vpack.c.bf16 %v5579_v34, %v5575_v11  ;;  %v6208_v6 = vpop.f32.mrb[93].mxu1 }
 0x6d0   : > { %v8878_v2 = vmax.bf16 %v8877_v63, %v7865_v21  ;;  %v7390_v10 = vadd.bf16 %v13250_v28, %v6771_v53  ;;  %v6210_v58 = vpop.f32.mrb[94].mxu1 }
 0x6d1   : > { %v7391_v23 = vadd.bf16 %v13253_v12, %v6772_v27  ;;  %v6741_v60 = vpack.c.bf16 %v6210_v58, %v6206_v39  ;;  %v6212_v38 = vpop.f32.mrb[95].mxu1 }
 0x6d2   : > { %v7902_v35 = vmax.bf16 %v14442_v62, %v7390_v10  ;;  %v6742_v13 = vpack.c.bf16 %v6212_v38, %v6208_v6 }
 0x6d3   : > { %v7903_v54 = vmax.bf16 %v14442_v62, %v7391_v23  ;;  %v7360_v25 = vadd.bf16 %v13336_v56, %v6741_v60  ;;  %v5583_v19 = vpop.f32.mrb[112].mxu0 }
 0x6d4   : > { %v8960_v29 = vmax.bf16 %v8959_v44, %v7902_v35  ;;  %v7361_v20 = vadd.bf16 %v13339_v26, %v6742_v13  ;;  %v5585_v52 = vpop.f32.mrb[113].mxu0 }
 0x6d5   : > { %v8977_v48 = vmax.bf16 %v8976_v31, %v7903_v54  ;;  %v7872_v8 = vmax.bf16 %v14442_v62, %v7360_v25  ;;  %v5587_v36 = vpop.f32.mrb[114].mxu0 }
 0x6d6   : > { %v7873_v5 = vmax.bf16 %v14442_v62, %v7361_v20  ;;  %v6779_v22 = vpack.c.bf16 %v5587_v36, %v5583_v19  ;;  %v5589_v0 = vpop.f32.mrb[115].mxu0  ;;  %v6216_v1 = vpop.f32.mrb[96].mxu1 }
 0x6d7   : > { %v8862_v41 = vmax.bf16 %v8861_v50, %v7872_v8  ;;  %v6780_v24 = vpack.c.bf16 %v5589_v0, %v5585_v52  ;;  %v6218_v3 = vpop.f32.mrb[97].mxu1 }
 0x6d8   : > { %v8879_v49 = vmax.bf16 %v8878_v2, %v7873_v5  ;;  %v7398_v33 = vadd.bf16 %v13250_v28, %v6779_v22  ;;  %v6220_v17 = vpop.f32.mrb[98].mxu1 }
 0x6d9   : > { %v8863_v7 = vunpack.i.l.bf16 %v8862_v41  ;;  %v8864_v63 = vunpack.i.h.bf16 %v8862_v41  ;;  %v7399_v9 = vadd.bf16 %v13253_v12, %v6780_v24  ;;  %v6749_v59 = vpack.c.bf16 %v6220_v17, %v6216_v1  ;;  %v6222_v51 = vpop.f32.mrb[99].mxu1 }
 0x6da   : > { %v8880_v30 = vunpack.i.l.bf16 %v8879_v49  ;;  %v8881_v43 = vunpack.i.h.bf16 %v8879_v49  ;;  %v7910_v45 = vmax.bf16 %v14442_v62, %v7398_v33  ;;  %v6750_v37 = vpack.c.bf16 %v6222_v51, %v6218_v3 }
 0x6db   : > { %v8865_v40 = vmax.f32 %v8863_v7, %v8864_v63  ;;  %v7911_v46 = vmax.bf16 %v14442_v62, %v7399_v9  ;;  %v5593_v14 = vpop.f32.mrb[116].mxu0  ;;  %v7368_v10 = vadd.bf16 %v13336_v56, %v6749_v59 }
 0x6dc   : > { %v8882_v47 = vmax.f32 %v8880_v30, %v8881_v43  ;;  %v14134_v32 = vmax.bf16 %v8960_v29, %v7910_v45  ;;  %v5595_v55 = vpop.f32.mrb[117].mxu0  ;;  %v7369_v35 = vadd.bf16 %v13339_v26, %v6750_v37 }
 0x6dd   : > { %v8866_v44 = vrot.slane %v8865_v40, 4  ;;  %v14136_v4 = vmax.bf16 %v8977_v48, %v7911_v46  ;;  %v5597_v11 = vpop.f32.mrb[118].mxu0  ;;  %v7880_v22 = vmax.bf16 %v14442_v62, %v7368_v10 }
 0x6de   : > { %v8883_v31 = vrot.slane %v8882_v47, 4  ;;  %v6787_v42 = vpack.c.bf16 %v5597_v11, %v5593_v14  ;;  %v5599_v61 = vpop.f32.mrb[119].mxu0  ;;  %v6226_v21 = vpop.f32.mrb[100].mxu1  ;;  %v7881_v3 = vmax.bf16 %v14442_v62, %v7369_v35 }
 0x6df   : > { %v8867_v53 = vmax.f32 %v8865_v40, %v8866_v44  ;;  %v6788_v34 = vpack.c.bf16 %v5599_v61, %v5595_v55  ;;  %v6228_v39 = vpop.f32.mrb[101].mxu1 }
 0x6e0   : > { %v8884_v50 = vmax.f32 %v8882_v47, %v8883_v31  ;;  %v7406_v27 = vadd.bf16 %v13250_v28, %v6787_v42  ;;  %v6230_v6 = vpop.f32.mrb[102].mxu1 }
 0x6e1   : > { %v8868_v2 = vrot.slane %v8867_v53, 2  ;;  %v7407_v58 = vadd.bf16 %v13253_v12, %v6788_v34  ;;  %v6757_v23 = vpack.c.bf16 %v6230_v6, %v6226_v21  ;;  %v6232_v60 = vpop.f32.mrb[103].mxu1 }
 0x6e2   : > { %v8885_v38 = vrot.slane %v8884_v50, 2  ;;  %v7918_v13 = vmax.bf16 %v14442_v62, %v7406_v27  ;;  %v6758_v54 = vpack.c.bf16 %v6232_v60, %v6228_v39 }
 0x6e3   : > { %v8869_v25 = vmax.f32 %v8867_v53, %v8868_v2  ;;  %v7919_v19 = vmax.bf16 %v14442_v62, %v7407_v58  ;;  %v7376_v29 = vadd.bf16 %v13336_v56, %v6757_v23  ;;  %v5603_v20 = vpop.f32.mrb[120].mxu0 }
 0x6e4   : > { %v8886_v52 = vmax.f32 %v8884_v50, %v8885_v38  ;;  %v8962_v48 = vmax.bf16 %v14134_v32, %v7918_v13  ;;  %v7377_v8 = vadd.bf16 %v13339_v26, %v6758_v54  ;;  %v5605_v36 = vpop.f32.mrb[121].mxu0 }
 0x6e5   : > { %v8870_v5 = vrot.slane %v8869_v25, 1  ;;  %v8979_v0 = vmax.bf16 %v14136_v4, %v7919_v19  ;;  %v7888_v1 = vmax.bf16 %v14442_v62, %v7376_v29  ;;  %v5607_v41 = vpop.f32.mrb[122].mxu0 }
 0x6e6   : > { %v8887_v24 = vrot.slane %v8886_v52, 1  ;;  %v7889_v49 = vmax.bf16 %v14442_v62, %v7377_v8  ;;  %v6795_v33 = vpack.c.bf16 %v5607_v41, %v5603_v20  ;;  %v5609_v17 = vpop.f32.mrb[123].mxu0  ;;  %v6236_v7 = vpop.f32.mrb[104].mxu1 }
 0x6e7   : > { %v8871_v63 = vmax.f32 %v8869_v25, %v8870_v5  ;;  %v8992_v9 = vmax.bf16 %v7888_v1, %v7880_v22  ;;  %v6796_v59 = vpack.c.bf16 %v5609_v17, %v5605_v36  ;;  %v6238_v51 = vpop.f32.mrb[105].mxu1 }
 0x6e8   : > { %v8888_v30 = vmax.f32 %v8886_v52, %v8887_v24  ;;  %v9009_v43 = vmax.bf16 %v7889_v49, %v7881_v3  ;;  %v7414_v45 = vadd.bf16 %v13250_v28, %v6795_v33  ;;  %v6240_v37 = vpop.f32.mrb[106].mxu1 }
 0x6e9   : > { %v8872_v40 = vpack.i.bf16 %v8871_v63, %v8871_v63  ;;  %v7415_v46 = vadd.bf16 %v13253_v12, %v6796_v59  ;;  %v6765_v14 = vpack.c.bf16 %v6240_v37, %v6236_v7  ;;  %v6242_v47 = vpop.f32.mrb[107].mxu1 }
 0x6ea   : > { %v8889_v32 = vpack.i.bf16 %v8888_v30, %v8888_v30  ;;  %v7926_v55 = vmax.bf16 %v14442_v62, %v7414_v45  ;;  %v6766_v44 = vpack.c.bf16 %v6242_v47, %v6238_v51 }
 0x6eb   : > { %v7927_v4 = vmax.bf16 %v14442_v62, %v7415_v46  ;;  %v7384_v11 = vadd.bf16 %v13336_v56, %v6765_v14  ;;  %v5613_v31 = vpop.f32.mrb[124].mxu0 }
 0x6ec   : > { %v9727_v42 = vcombine.low %v8872_v40, %v8889_v32  ;;  %v8963_v61 = vmax.bf16 %v8962_v48, %v7926_v55  ;;  %v7385_v21 = vadd.bf16 %v13339_v26, %v6766_v44  ;;  %v5615_v53 = vpop.f32.mrb[125].mxu0 }
 0x6ed   : > { %v8980_v34 = vmax.bf16 %v8979_v0, %v7927_v4  ;;  %v7896_v39 = vmax.bf16 %v14442_v62, %v7384_v11  ;;  %v5617_v50 = vpop.f32.mrb[126].mxu0 }
 0x6ee   : > { %v9244_v27 = vunpack.c.l.b16 %v9727_v42  ;;  %v9245_v6 = vunpack.c.h.b16 %v9727_v42  ;;  %v7897_v2 = vmax.bf16 %v14442_v62, %v7385_v21  ;;  %v6803_v10 = vpack.c.bf16 %v5617_v50, %v5613_v31  ;;  %v5619_v58 = vpop.f32.mrb[127].mxu0  ;;  %v6246_v23 = vpop.f32.mrb[108].mxu1 }
 0x6ef   : > { %v8993_v60 = vmax.bf16 %v8992_v9, %v7896_v39  ;;  %v6804_v38 = vpack.c.bf16 %v5619_v58, %v5615_v53  ;;  %v6248_v35 = vpop.f32.mrb[109].mxu1 }
 0x6f0   : > { %v9010_v13 = vmax.bf16 %v9009_v43, %v7897_v2  ;;  %v7422_v54 = vadd.bf16 %v13250_v28, %v6803_v10  ;;  %v6250_v25 = vpop.f32.mrb[110].mxu1  ;;  %v14163_v19 = vsel %vm9264_vm9, %v9244_v27, %v14071_v16  ;;  %v14167_v29 = vsel %vm9264_vm9, %v9245_v6, %v14075_v57 }
 0x6f1   : > { %v7423_v20 = vadd.bf16 %v13253_v12, %v6804_v38  ;;  %v6773_v52 = vpack.c.bf16 %v6250_v25, %v6246_v23  ;;  %v6252_v48 = vpop.f32.mrb[111].mxu1 }
 0x6f2   : > { %v7934_v8 = vmax.bf16 %v14442_v62, %v7422_v54  ;;  %v6774_v36 = vpack.c.bf16 %v6252_v48, %v6248_v35 }
 0x6f3   : > { %v7935_v5 = vmax.bf16 %v14442_v62, %v7423_v20  ;;  %v7392_v28 = vadd.bf16 %v13336_v56, %v6773_v52 }
 0x6f4   : > { %v8964_v22 = vmax.bf16 %v8963_v61, %v7934_v8  ;;  %v7393_v0 = vadd.bf16 %v13339_v26, %v6774_v36 }
 0x6f5   : > { %v8981_v16 = vmax.bf16 %v8980_v34, %v7935_v5  ;;  %v7904_v1 = vmax.bf16 %v14442_v62, %v7392_v28 }
 0x6f6   : > { %v8965_v41 = vunpack.i.l.bf16 %v8964_v22  ;;  %v8966_v57 = vunpack.i.h.bf16 %v8964_v22  ;;  %v7905_v24 = vmax.bf16 %v14442_v62, %v7393_v0  ;;  %v6256_v12 = vpop.f32.mrb[112].mxu1 }
 0x6f7   : > { %v8982_v3 = vunpack.i.l.bf16 %v8981_v16  ;;  %v8983_v49 = vunpack.i.h.bf16 %v8981_v16  ;;  %v8994_v33 = vmax.bf16 %v8993_v60, %v7904_v1  ;;  %v6258_v17 = vpop.f32.mrb[113].mxu1 }
 0x6f8   : > { %v8967_v7 = vmax.f32 %v8965_v41, %v8966_v57  ;;  %v9011_v63 = vmax.bf16 %v9010_v13, %v7905_v24  ;;  %v6260_v9 = vpop.f32.mrb[114].mxu1  ;;  %v9028_v24 = vld [vmem:[%s10696_s20 + $0x10] sm:$0xff] }
 0x6f9   : > { %v8984_v59 = vmax.f32 %v8982_v3, %v8983_v49  ;;  %v6781_v51 = vpack.c.bf16 %v6260_v9, %v6256_v12  ;;  %v6262_v30 = vpop.f32.mrb[115].mxu1 }
 0x6fa   : > { %v8968_v43 = vrot.slane %v8967_v7, 4  ;;  %v6782_v45 = vpack.c.bf16 %v6262_v30, %v6258_v17 }
 0x6fb   : > { %v8985_v37 = vrot.slane %v8984_v59, 4  ;;  %v7400_v40 = vadd.bf16 %v13336_v56, %v6781_v51 }
 0x6fc   : > { %v8969_v46 = vmax.f32 %v8967_v7, %v8968_v43  ;;  %v7401_v14 = vadd.bf16 %v13339_v26, %v6782_v45 }
 0x6fd   : > { %v8986_v47 = vmax.f32 %v8984_v59, %v8985_v37  ;;  %v7912_v32 = vmax.bf16 %v14442_v62, %v7400_v40 }
 0x6fe   : > { %v8970_v55 = vrot.slane %v8969_v46, 2  ;;  %v7913_v44 = vmax.bf16 %v14442_v62, %v7401_v14  ;;  %v6266_v4 = vpop.f32.mrb[116].mxu1 }
 0x6ff   : > { %v8987_v11 = vrot.slane %v8986_v47, 2  ;;  %v8995_v31 = vmax.bf16 %v8994_v33, %v7912_v32  ;;  %v6268_v42 = vpop.f32.mrb[117].mxu1 }
 0x700   : > { %v8971_v61 = vmax.f32 %v8969_v46, %v8970_v55  ;;  %v9012_v21 = vmax.bf16 %v9011_v63, %v7913_v44  ;;  %v6270_v53 = vpop.f32.mrb[118].mxu1 }
 0x701   : > { %v8988_v34 = vmax.f32 %v8986_v47, %v8987_v11  ;;  %v6789_v39 = vpack.c.bf16 %v6270_v53, %v6266_v4  ;;  %v6272_v50 = vpop.f32.mrb[119].mxu1 }
 0x702   : > { %v8972_v27 = vrot.slane %v8971_v61, 1  ;;  %v6790_v6 = vpack.c.bf16 %v6272_v50, %v6268_v42 }
 0x703   : > { %v8989_v2 = vrot.slane %v8988_v34, 1  ;;  %v7408_v10 = vadd.bf16 %v13336_v56, %v6789_v39 }
 0x704   : > { %v8973_v58 = vmax.f32 %v8971_v61, %v8972_v27  ;;  %v7409_v23 = vadd.bf16 %v13339_v26, %v6790_v6 }
 0x705   : > { %v8990_v60 = vmax.f32 %v8988_v34, %v8989_v2  ;;  %v7920_v38 = vmax.bf16 %v14442_v62, %v7408_v10 }
 0x706   : > { %v8974_v35 = vpack.i.bf16 %v8973_v58, %v8973_v58  ;;  %v7921_v13 = vmax.bf16 %v14442_v62, %v7409_v23  ;;  %v6276_v54 = vpop.f32.mrb[120].mxu1 }
 0x707   : > { %v8991_v25 = vpack.i.bf16 %v8990_v60, %v8990_v60  ;;  %v8996_v20 = vmax.bf16 %v8995_v31, %v7920_v38  ;;  %v6278_v52 = vpop.f32.mrb[121].mxu1  ;;  %v9029_v60 = vld [vmem:[%s10696_s20 + $0x18] sm:$0xff] }
 0x708   : > { %v9013_v48 = vmax.bf16 %v9012_v21, %v7921_v13  ;;  %v6280_v8 = vpop.f32.mrb[122].mxu1 }
 0x709   : > { %v9730_v36 = vcombine.low %v8974_v35, %v8991_v25  ;;  %v6797_v5 = vpack.c.bf16 %v6280_v8, %v6276_v54  ;;  %v6282_v28 = vpop.f32.mrb[123].mxu1 }
 0x70a   : > { %v6798_v22 = vpack.c.bf16 %v6282_v28, %v6278_v52 }
 0x70b   : > { %v9250_v0 = vunpack.c.l.b16 %v9730_v36  ;;  %v9251_v16 = vunpack.c.h.b16 %v9730_v36  ;;  %v7416_v1 = vadd.bf16 %v13336_v56, %v6797_v5 }
 0x70c   : > { %v7417_v41 = vadd.bf16 %v13339_v26, %v6798_v22 }
 0x70d   : > { %v7928_v57 = vmax.bf16 %v14442_v62, %v7416_v1  ;;  %v9295_v12 = vsel %vm9266_vm10, %v9250_v0, %v14115_v15  ;;  %v9302_v3 = vsel %vm9266_vm10, %v9251_v16, %v14119_v18 }
 0x70e   : > { %v7929_v49 = vmax.bf16 %v14442_v62, %v7417_v41  ;;  %v6286_v33 = vpop.f32.mrb[124].mxu1  ;;  %v9319_v17 = vpack.c.b16 %v9302_v3, %v9295_v12 }
 0x70f   : > { %v8997_v7 = vmax.bf16 %v8996_v20, %v7928_v57  ;;  %v6288_v63 = vpop.f32.mrb[125].mxu1 }
 0x710   : > { %v9014_v9 = vmax.bf16 %v9013_v48, %v7929_v49  ;;  %v6290_v59 = vpop.f32.mrb[126].mxu1  ;;  %v9327_v51 = vmax.bf16 %v9319_v17, %v9028_v24 }
 0x711   : > { %v6805_v30 = vpack.c.bf16 %v6290_v59, %v6286_v33  ;;  %v6292_v43 = vpop.f32.mrb[127].mxu1 }
 0x712   : > { %v6806_v45 = vpack.c.bf16 %v6292_v43, %v6288_v63  ;;  %9331 = vst [vmem:[%s10696_s20 + $0x10] sm:$0xff] %v9327_v51 }
 0x713   : > { %v7424_v37 = vadd.bf16 %v13336_v56, %v6805_v30 }
 0x714   : > { %v7425_v15 = vadd.bf16 %v13339_v26, %v6806_v45 }
 0x715   : > { %v7936_v40 = vmax.bf16 %v14442_v62, %v7424_v37 }
 0x716   : > { %v7937_v18 = vmax.bf16 %v14442_v62, %v7425_v15 }
 0x717   : > { %v8998_v46 = vmax.bf16 %v8997_v7, %v7936_v40 }
 0x718   : > { %v9015_v14 = vmax.bf16 %v9014_v9, %v7937_v18 }
 0x719   : > { %v8999_v47 = vunpack.i.l.bf16 %v8998_v46  ;;  %v9000_v32 = vunpack.i.h.bf16 %v8998_v46 }
 0x71a   : > { %v9016_v55 = vunpack.i.l.bf16 %v9015_v14  ;;  %v9017_v44 = vunpack.i.h.bf16 %v9015_v14 }
 0x71b   : > { %v9001_v4 = vmax.f32 %v8999_v47, %v9000_v32 }
 0x71c   : > { %v9018_v11 = vmax.f32 %v9016_v55, %v9017_v44 }
 0x71d   : > { %v9002_v31 = vrot.slane %v9001_v4, 4 }
 0x71e   : > { %v9019_v42 = vrot.slane %v9018_v11, 4 }
 0x71f   : > { %v9003_v61 = vmax.f32 %v9001_v4, %v9002_v31 }
 0x720   : > { %v9020_v21 = vmax.f32 %v9018_v11, %v9019_v42 }
 0x721   : > { %v9004_v56 = vrot.slane %v9003_v61, 2 }
 0x722   : > { %v9021_v26 = vrot.slane %v9020_v21, 2 }
 0x723   : > { %v9005_v53 = vmax.f32 %v9003_v61, %v9004_v56 }
 0x724   : > { %v9022_v34 = vmax.f32 %v9020_v21, %v9021_v26 }
 0x725   : > { %v9006_v62 = vrot.slane %v9005_v53, 1 }
 0x726   : > { %v9023_v39 = vrot.slane %v9022_v34, 1 }
 0x727   : > { %v9007_v50 = vmax.f32 %v9005_v53, %v9006_v62 }
 0x728   : > { %v9024_v27 = vmax.f32 %v9022_v34, %v9023_v39 }
 0x729   : > { %v9008_v6 = vpack.i.bf16 %v9007_v50, %v9007_v50 }
 0x72a   : > { %v9025_v2 = vpack.i.bf16 %v9024_v27, %v9024_v27 }
 0x72c   : > { %v9731_v10 = vcombine.low %v9008_v6, %v9025_v2 }
 0x72e   : > { %v9252_v58 = vunpack.c.l.b16 %v9731_v10  ;;  %v9253_v23 = vunpack.c.h.b16 %v9731_v10 }
 0x730   : > { %v9309_v38 = vsel %vm9266_vm10, %v9252_v58, %v14163_v19  ;;  %v9316_v35 = vsel %vm9266_vm10, %v9253_v23, %v14167_v29 }
 0x731   : > { %v9320_v13 = vpack.c.b16 %v9316_v35, %v9309_v38 }
 0x733   : > { %v9328_v54 = vmax.bf16 %v9320_v13, %v9029_v60 }
 0x735   : > { %9332 = vst [vmem:[%s10696_s20 + $0x18] sm:$0xff] %v9328_v54 }
 0x736   : > { %10313 = shalt.err (!%p10310_p11)
}
 0x737   : > { %s10314_s14 = scalar_lea.hbm %s14208_s17, 512  ;;  %s10318_s21 = scalar_lea.hbm %s14277_s7, 1024 }
 0x738   : > { %p10315_p13 = scmp.ne.s32.totalorder %s14208_s17, %s10314_s14  ;;  %p10319_p2 = scmp.lt.u32.totalorder %s14208_s17, %s14277_s7 }
 0x739   : > { %p10320_p3 = scmp.lt.u32.totalorder %s10318_s21, %s10314_s14  ;;  %p10322_p5 = scmp.lt.u32.totalorder %s10314_s14, %s14208_s17 }
 0x73a   : > { %p10316_p0 = pnand %p10315_p13, %p10529_p7 }
 0x73b   : > { %p10321_p4 = por %p10320_p3, %p10319_p2 }
 0x73c   : > { %p10317_p1 = pneg %p10316_p0 }
 0x73d   : > { %p10323_p6 = por %p10322_p5, %p10321_p4 }
 0x73f   : > { %p10324_p8 = pnand %p10323_p6, %p10317_p1 }
 0x741   : > { %10327 = shalt.err (!%p10324_p8)
}
 0x742   : > { %10138 = dma.vmem_to_hbm [thread:$0]  (%p10529_p7), %s14210_s29, 512, %s14208_s17, %s9334_s13  }
 0x743 PF: > { %p10144_p9 = scmp.ge.s32.totalorder %s10410_s10, 2  ;;  %s9360_s30 = sand.u32 1, %s10374_s24  }
 0x744   : > { %s9361_s22 = scalar_lea.sflag [#allocation4], %s9360_s30 }
 0x745   : > { %p10141_p10 = pnand %p10144_p9, %p10537_p12 }
 0x747   : > { %10369 = dma.done.wait (!%p10141_p10), %s9361_s22, 512  }
 0x748   : > { %10371 = vsyncadd (!%p10141_p10), %s9361_s22, 4294966784  ;;  %s20_s10 = sadd.s32 1, %s10410_s10   ;;  %s14611_s19 = sld [smem:[#allocation6_spill]] }
 0x749   : > { %p17_p11 = scmp.ge.s32.totalorder %s20_s10, 6   ;;  %s14612_s17 = sld [smem:[#allocation7_spill]] }
 0x74a   : > { %s14613_s24 = smov %s10378_s25  ;;  %s14614_s25 = smov %s10382_s26 }
 0x74b   : > { %s14615_s26 = smov %s10542_s23  ;;  %s14616_s27 = smov %s10390_s28 }
 0x74c   : > { %s14617_s28 = smov %s10545_s11  ;;  %s14618_s29 = smov %s10402_s8 }
 0x74d   : > { %s14619_s30 = smov %s10406_s9  ;;  %19 = sbr.rel (!%p17_p11) target bundleno = 6 (0x6), region = 133 }
 0x74e   : > { %s14620_s8 = smov %s14611_s19 }
 0x74f   : > { %s14621_s9 = smov %s14612_s17 }
 0x754   :  { %9366 = vsyncpa [#allocation4], 1 }
 0x755   :  { %9368 = vsyncpa [#allocation4 + $0x1], 1 }

</bundles_post_ra>
